<compile_context>
chip_gen: v6e
topology: v6e:2x2x1
jax: 0.10.0
libtpu: 0.0.40
codegen_flags: <defaults>
</compile_context>

<pallas_src>
import jax
import jax.numpy as jnp
import numpy as np
from jax.experimental import pallas as pl
from jax.experimental.pallas import tpu as pltpu


# ----------------------------------------------------------------------------
# Fused Pallas kernel: conv3x3 -> BN -> PReLU -> conv3x3 -> BN -> + residual
# ----------------------------------------------------------------------------
def _residual_block_kernel(x_ref, w1_ref, s1_ref, w2_ref, s2_ref, a_ref,
                           out_ref, pad_sc, patch_sc):
    # x_ref:    (1, H, W, C)  f32   one batch element
    # w*_ref:   (9*C, C)      bf16  conv weights with BN scale folded in
    # s*_ref:   (1, C)        f32   folded BN shift
    # a_ref:    (1,)          f32   PReLU slope (SMEM)
    # out_ref:  (1, H, W, C)  f32
    # pad_sc:   (H+2, W+2, C) f32   shared 'same'-padding scratch (both convs)
    # patch_sc: (H*W, 9*C)    bf16  im2col patch matrix (K unpadded = 576)
    _, H, W, C = x_ref.shape
    HW = H * W

    def conv3x3(w_ref):
        # Write each tap's (H*W, C) contribution straight into its K-slice of the
        # patch scratch (no concatenate / second materialization), cast to bf16.
        for kh in range(3):
            for kw in range(3):
                t = kh * 3 + kw
                patch_sc[:, t * C:(t + 1) * C] = (
                    pad_sc[kh:kh + H, kw:kw + W, :]
                    .reshape(HW, C).astype(patch_sc.dtype))
        # Single MXU matmul: (H*W, 9*C) bf16 @ (9*C, C) bf16 -> f32 accumulate.
        return jnp.dot(patch_sc[...], w_ref[...],
                       preferred_element_type=jnp.float32)        # (HW, C) f32

    x = x_ref[0]                                                  # (H, W, C) f32

    # Zero the shared padding scratch once per grid step (megacore-safe; the halo
    # ring stays zero for both convs because the interior fills never touch it).
    pad_sc[...] = jnp.zeros(pad_sc.shape, pad_sc.dtype)

    # ---- conv1 + BN1 + PReLU -------------------------------------------------
    pad_sc[1:H + 1, 1:W + 1, :] = x
    y = conv3x3(w1_ref) + s1_ref[...]                             # BN1 scale in w1
    a = a_ref[0]                                                  # PReLU slope (SMEM)
    y = jnp.where(y >= 0.0, y, a * y)

    # ---- conv2 + BN2 (intermediate never leaves VMEM; scratch reused) --------
    pad_sc[1:H + 1, 1:W + 1, :] = y.reshape(H, W, C)
    z = conv3x3(w2_ref) + s2_ref[...]                             # BN2 scale in w2

    # ---- residual add ----------------------------------------------------------
    z = z + x.reshape(HW, C)
    out_ref[...] = z.reshape(1, H, W, C)


# ----------------------------------------------------------------------------
# Wrapper
# ----------------------------------------------------------------------------
def residual_block_forward(x_nchw, params):
    """ResidualBlock forward. Input/output are NCHW float32, like PyTorch."""
    x = jnp.transpose(x_nchw, (0, 2, 3, 1)).astype(jnp.float32)   # -> NHWC
    N, H, W, C = x.shape
    eps = 1e-5
    K = 9 * C                                                     # contraction dim

    # Fold conv bias + BN (eval mode): scale into the weights, shift stays additive.
    #   y = conv(x; w*scale) + (bias - mean)*scale + beta
    def fold(w, bias, gamma, beta, mean, var):
        scale = gamma / jnp.sqrt(var + eps)                       # (C,)
        shift = (bias - mean) * scale + beta                      # (C,)
        w_s = (w * scale[None, None, None, :]).reshape(K, C)      # (9*C, C), no K pad
        return w_s.astype(jnp.bfloat16), shift.reshape(1, C).astype(jnp.float32)

    w1, s1 = fold(params["w1"], params["b1"], params["g1"], params["beta1"],
                  params["m1"], params["v1"])
    w2, s2 = fold(params["w2"], params["b2"], params["g2"], params["beta2"],
                  params["m2"], params["v2"])
    a = params["prelu_a"].reshape(1).astype(jnp.float32)

    cost = pl.CostEstimate(
        flops=2 * (2 * N * H * W * K * C),                        # two convs
        transcendentals=0,
        bytes_accessed=2 * (N * H * W * C * 4)                    # x + out
                       + 2 * (K * C * 2) + 2 * (C * 4) + 4)       # weights + shifts + a

    out = pl.pallas_call(
        _residual_block_kernel,
        out_shape=jax.ShapeDtypeStruct((N, H, W, C), jnp.float32),
        grid_spec=pltpu.PrefetchScalarGridSpec(
            num_scalar_prefetch=0,
            grid=(N,),
            in_specs=[
                pl.BlockSpec((1, H, W, C), lambda n: (n, 0, 0, 0)),   # x
                pl.BlockSpec((K, C), lambda n: (0, 0)),               # w1 (folded, bf16)
                pl.BlockSpec((1, C), lambda n: (0, 0)),               # shift1
                pl.BlockSpec((K, C), lambda n: (0, 0)),               # w2 (folded, bf16)
                pl.BlockSpec((1, C), lambda n: (0, 0)),               # shift2
                pl.BlockSpec(memory_space=pltpu.MemorySpace.SMEM),    # PReLU slope
            ],
            out_specs=pl.BlockSpec((1, H, W, C), lambda n: (n, 0, 0, 0)),
            scratch_shapes=[
                pltpu.VMEM((H + 2, W + 2, C), jnp.float32),   # shared padding scratch
                pltpu.VMEM((H * W, K), jnp.bfloat16),         # im2col patch matrix
            ],
        ),
        compiler_params=pltpu.CompilerParams(
            dimension_semantics=("parallel",)),               # v7x: both TensorCores
        cost_estimate=cost,
    )(x, w1, s1, w2, s2, a)

    return jnp.transpose(out, (0, 3, 1, 2))                   # -> NCHW


# ----------------------------------------------------------------------------
# Pure-JAX f32 reference (correctness check of the Pallas path)
# ----------------------------------------------------------------------------
def _reference_forward(x_nchw, params):
    x = jnp.transpose(x_nchw, (0, 2, 3, 1)).astype(jnp.float32)
    eps = 1e-5

    def conv(x_nhwc, w_khkwio, b):
        out = jax.lax.conv_general_dilated(
            x_nhwc, w_khkwio, window_strides=(1, 1), padding="SAME",
            dimension_numbers=("NHWC", "HWIO", "NHWC"))
        return out + b

    def bn(x_nhwc, g, beta, m, v):
        return (x_nhwc - m) / jnp.sqrt(v + eps) * g + beta

    y = conv(x, params["w1"], params["b1"])
    y = bn(y, params["g1"], params["beta1"], params["m1"], params["v1"])
    y = jnp.where(y >= 0.0, y, params["prelu_a"] * y)
    y = conv(y, params["w2"], params["b2"])
    y = bn(y, params["g2"], params["beta2"], params["m2"], params["v2"])
    y = y + x
    return jnp.transpose(y, (0, 3, 1, 2))


# ----------------------------------------------------------------------------
# Main
# ----------------------------------------------------------------------------
if __name__ == "__main__":
    N, C, H, W = 2, 64, 16, 16          # n_channels=64 (module default), kernel_size=3
    key = jax.random.PRNGKey(0)
    keys = jax.random.split(key, 12)

    params = {
        # conv weights stored as (kh, kw, Cin, Cout)
        "w1": 0.05 * jax.random.normal(keys[0], (3, 3, C, C), jnp.float32),
        "b1": 0.01 * jax.random.normal(keys[1], (C,), jnp.float32),
        "w2": 0.05 * jax.random.normal(keys[2], (3, 3, C, C), jnp.float32),
        "b2": 0.01 * jax.random.normal(keys[3], (C,), jnp.float32),
        # BatchNorm1 (eval mode) params
        "g1": 1.0 + 0.1 * jax.random.normal(keys[4], (C,), jnp.float32),
        "beta1": 0.1 * jax.random.normal(keys[5], (C,), jnp.float32),
        "m1": 0.1 * jax.random.normal(keys[6], (C,), jnp.float32),
        "v1": jax.random.uniform(keys[7], (C,), jnp.float32, 0.5, 1.5),
        # BatchNorm2 (eval mode) params
        "g2": 1.0 + 0.1 * jax.random.normal(keys[8], (C,), jnp.float32),
        "beta2": 0.1 * jax.random.normal(keys[9], (C,), jnp.float32),
        "m2": 0.1 * jax.random.normal(keys[10], (C,), jnp.float32),
        "v2": jax.random.uniform(keys[11], (C,), jnp.float32, 0.5, 1.5),
        # PReLU (single shared parameter, PyTorch default init)
        "prelu_a": jnp.array(0.25, jnp.float32),
    }

    x = jax.random.normal(jax.random.PRNGKey(42), (N, C, H, W), jnp.float32)

    out = jax.block_until_ready(residual_block_forward(x, params))
    ref = jax.block_until_ready(_reference_forward(x, params))

    assert out.shape == (N, C, H, W)
    # bf16 MXU operands with f32 accumulation -> loosened tolerance (review item).
    np.testing.assert_allclose(np.asarray(out), np.asarray(ref),
                               rtol=3e-2, atol=3e-2)
    print("KERNEL_OK")
</pallas_src>

<mosaic_0001>
module attributes {stable_mosaic.version = 11 : i64} {
  func.func @_residual_block_kernel(%arg0: i32, %arg1: memref<1x16x16x64xf32, #tpu.memory_space<vmem>>, %arg2: memref<576x64xbf16, #tpu.memory_space<vmem>>, %arg3: memref<1x64xf32, #tpu.memory_space<vmem>>, %arg4: memref<576x64xbf16, #tpu.memory_space<vmem>>, %arg5: memref<1x64xf32, #tpu.memory_space<vmem>>, %arg6: memref<1xf32, #tpu.memory_space<smem>>, %arg7: memref<1x16x16x64xf32, #tpu.memory_space<vmem>>, %arg8: memref<18x18x64xf32, #tpu.memory_space<vmem>>, %arg9: memref<256x576xbf16, #tpu.memory_space<vmem>>) attributes {dimension_semantics = [#tpu.dimension_semantics<parallel>], iteration_bounds = array<i64: 2>, scalar_prefetch = 0 : i64, scratch_operands = 2 : i64, tpu.core_type = #tpu.core_type<tc>, window_params = [{transform_indices = @transform_0, window_bounds = array<i64: 1, 16, 16, 64>}, {pipeline_mode = #tpu.pipeline_mode<synchronous>, transform_indices = @transform_1, window_bounds = array<i64: 576, 64>}, {pipeline_mode = #tpu.pipeline_mode<synchronous>, transform_indices = @transform_2, window_bounds = array<i64: 1, 64>}, {pipeline_mode = #tpu.pipeline_mode<synchronous>, transform_indices = @transform_3, window_bounds = array<i64: 576, 64>}, {pipeline_mode = #tpu.pipeline_mode<synchronous>, transform_indices = @transform_4, window_bounds = array<i64: 1, 64>}, {transform_indices = @transform_5, window_bounds = array<i64: 1>}, {transform_indices = @transform_6, window_bounds = array<i64: 1, 16, 16, 64>}]} {
    %c0 = arith.constant 0 : index
    %c0_0 = arith.constant 0 : index
    %c0_1 = arith.constant 0 : index
    %c0_2 = arith.constant 0 : index
    %0 = vector.load %arg1[%c0, %c0_0, %c0_1, %c0_2] : memref<1x16x16x64xf32, #tpu.memory_space<vmem>>, vector<1x16x16x64xf32>
    %1 = vector.shape_cast %0 : vector<1x16x16x64xf32> to vector<16x16x64xf32>
    %cst = arith.constant 0.000000e+00 : f32
    %2 = vector.broadcast %cst : f32 to vector<18x18x64xf32>
    %c0_3 = arith.constant 0 : index
    %c0_4 = arith.constant 0 : index
    %c0_5 = arith.constant 0 : index
    %3 = vector.load %arg8[%c0_3, %c0_4, %c0_5] : memref<18x18x64xf32, #tpu.memory_space<vmem>>, vector<18x18x64xf32>
    tpu.vector_store %arg8[%c0_3, %c0_4, %c0_5], %2 {strides = array<i32>} : memref<18x18x64xf32, #tpu.memory_space<vmem>>, vector<18x18x64xf32>,
    %c1 = arith.constant 1 : index
    %c1_6 = arith.constant 1 : index
    %c0_7 = arith.constant 0 : index
    %4 = vector.load %arg8[%c1, %c1_6, %c0_7] : memref<18x18x64xf32, #tpu.memory_space<vmem>>, vector<16x16x64xf32>
    tpu.vector_store %arg8[%c1, %c1_6, %c0_7], %1 {strides = array<i32>} : memref<18x18x64xf32, #tpu.memory_space<vmem>>, vector<16x16x64xf32>,
    %c0_8 = arith.constant 0 : index
    %c0_9 = arith.constant 0 : index
    %c0_10 = arith.constant 0 : index
    %5 = vector.load %arg8[%c0_8, %c0_9, %c0_10] : memref<18x18x64xf32, #tpu.memory_space<vmem>>, vector<16x16x64xf32>
    %6 = vector.shape_cast %5 : vector<16x16x64xf32> to vector<256x64xf32>
    %7 = arith.truncf %6 : vector<256x64xf32> to vector<256x64xbf16>
    %c0_11 = arith.constant 0 : index
    %c0_12 = arith.constant 0 : index
    %8 = vector.load %arg9[%c0_11, %c0_12] : memref<256x576xbf16, #tpu.memory_space<vmem>>, vector<256x64xbf16>
    tpu.vector_store %arg9[%c0_11, %c0_12], %7 {strides = array<i32>} : memref<256x576xbf16, #tpu.memory_space<vmem>>, vector<256x64xbf16>,
    %c0_13 = arith.constant 0 : index
    %c1_14 = arith.constant 1 : index
    %c0_15 = arith.constant 0 : index
    %9 = vector.load %arg8[%c0_13, %c1_14, %c0_15] : memref<18x18x64xf32, #tpu.memory_space<vmem>>, vector<16x16x64xf32>
    %10 = vector.shape_cast %9 : vector<16x16x64xf32> to vector<256x64xf32>
    %11 = arith.truncf %10 : vector<256x64xf32> to vector<256x64xbf16>
    %c0_16 = arith.constant 0 : index
    %c64 = arith.constant 64 : index
    %12 = vector.load %arg9[%c0_16, %c64] : memref<256x576xbf16, #tpu.memory_space<vmem>>, vector<256x64xbf16>
    tpu.vector_store %arg9[%c0_16, %c64], %11 {strides = array<i32>} : memref<256x576xbf16, #tpu.memory_space<vmem>>, vector<256x64xbf16>,
    %c0_17 = arith.constant 0 : index
    %c2 = arith.constant 2 : index
    %c0_18 = arith.constant 0 : index
    %13 = vector.load %arg8[%c0_17, %c2, %c0_18] : memref<18x18x64xf32, #tpu.memory_space<vmem>>, vector<16x16x64xf32>
    %14 = vector.shape_cast %13 : vector<16x16x64xf32> to vector<256x64xf32>
    %15 = arith.truncf %14 : vector<256x64xf32> to vector<256x64xbf16>
    %c0_19 = arith.constant 0 : index
    %c128 = arith.constant 128 : index
    %16 = vector.load %arg9[%c0_19, %c128] : memref<256x576xbf16, #tpu.memory_space<vmem>>, vector<256x64xbf16>
    tpu.vector_store %arg9[%c0_19, %c128], %15 {strides = array<i32>} : memref<256x576xbf16, #tpu.memory_space<vmem>>, vector<256x64xbf16>,
    %c1_20 = arith.constant 1 : index
    %c0_21 = arith.constant 0 : index
    %c0_22 = arith.constant 0 : index
    %17 = vector.load %arg8[%c1_20, %c0_21, %c0_22] : memref<18x18x64xf32, #tpu.memory_space<vmem>>, vector<16x16x64xf32>
    %18 = vector.shape_cast %17 : vector<16x16x64xf32> to vector<256x64xf32>
    %19 = arith.truncf %18 : vector<256x64xf32> to vector<256x64xbf16>
    %c0_23 = arith.constant 0 : index
    %c192 = arith.constant 192 : index
    %20 = vector.load %arg9[%c0_23, %c192] : memref<256x576xbf16, #tpu.memory_space<vmem>>, vector<256x64xbf16>
    tpu.vector_store %arg9[%c0_23, %c192], %19 {strides = array<i32>} : memref<256x576xbf16, #tpu.memory_space<vmem>>, vector<256x64xbf16>,
    %c1_24 = arith.constant 1 : index
    %c1_25 = arith.constant 1 : index
    %c0_26 = arith.constant 0 : index
    %21 = vector.load %arg8[%c1_24, %c1_25, %c0_26] : memref<18x18x64xf32, #tpu.memory_space<vmem>>, vector<16x16x64xf32>
    %22 = vector.shape_cast %21 : vector<16x16x64xf32> to vector<256x64xf32>
    %23 = arith.truncf %22 : vector<256x64xf32> to vector<256x64xbf16>
    %c0_27 = arith.constant 0 : index
    %c256 = arith.constant 256 : index
    %24 = vector.load %arg9[%c0_27, %c256] : memref<256x576xbf16, #tpu.memory_space<vmem>>, vector<256x64xbf16>
    tpu.vector_store %arg9[%c0_27, %c256], %23 {strides = array<i32>} : memref<256x576xbf16, #tpu.memory_space<vmem>>, vector<256x64xbf16>,
    %c1_28 = arith.constant 1 : index
    %c2_29 = arith.constant 2 : index
    %c0_30 = arith.constant 0 : index
    %25 = vector.load %arg8[%c1_28, %c2_29, %c0_30] : memref<18x18x64xf32, #tpu.memory_space<vmem>>, vector<16x16x64xf32>
    %26 = vector.shape_cast %25 : vector<16x16x64xf32> to vector<256x64xf32>
    %27 = arith.truncf %26 : vector<256x64xf32> to vector<256x64xbf16>
    %c0_31 = arith.constant 0 : index
    %c320 = arith.constant 320 : index
    %28 = vector.load %arg9[%c0_31, %c320] : memref<256x576xbf16, #tpu.memory_space<vmem>>, vector<256x64xbf16>
    tpu.vector_store %arg9[%c0_31, %c320], %27 {strides = array<i32>} : memref<256x576xbf16, #tpu.memory_space<vmem>>, vector<256x64xbf16>,
    %c2_32 = arith.constant 2 : index
    %c0_33 = arith.constant 0 : index
    %c0_34 = arith.constant 0 : index
    %29 = vector.load %arg8[%c2_32, %c0_33, %c0_34] : memref<18x18x64xf32, #tpu.memory_space<vmem>>, vector<16x16x64xf32>
    %30 = vector.shape_cast %29 : vector<16x16x64xf32> to vector<256x64xf32>
    %31 = arith.truncf %30 : vector<256x64xf32> to vector<256x64xbf16>
    %c0_35 = arith.constant 0 : index
    %c384 = arith.constant 384 : index
    %32 = vector.load %arg9[%c0_35, %c384] : memref<256x576xbf16, #tpu.memory_space<vmem>>, vector<256x64xbf16>
    tpu.vector_store %arg9[%c0_35, %c384], %31 {strides = array<i32>} : memref<256x576xbf16, #tpu.memory_space<vmem>>, vector<256x64xbf16>,
    %c2_36 = arith.constant 2 : index
    %c1_37 = arith.constant 1 : index
    %c0_38 = arith.constant 0 : index
    %33 = vector.load %arg8[%c2_36, %c1_37, %c0_38] : memref<18x18x64xf32, #tpu.memory_space<vmem>>, vector<16x16x64xf32>
    %34 = vector.shape_cast %33 : vector<16x16x64xf32> to vector<256x64xf32>
    %35 = arith.truncf %34 : vector<256x64xf32> to vector<256x64xbf16>
    %c0_39 = arith.constant 0 : index
    %c448 = arith.constant 448 : index
    %36 = vector.load %arg9[%c0_39, %c448] : memref<256x576xbf16, #tpu.memory_space<vmem>>, vector<256x64xbf16>
    tpu.vector_store %arg9[%c0_39, %c448], %35 {strides = array<i32>} : memref<256x576xbf16, #tpu.memory_space<vmem>>, vector<256x64xbf16>,
    %c2_40 = arith.constant 2 : index
    %c2_41 = arith.constant 2 : index
    %c0_42 = arith.constant 0 : index
    %37 = vector.load %arg8[%c2_40, %c2_41, %c0_42] : memref<18x18x64xf32, #tpu.memory_space<vmem>>, vector<16x16x64xf32>
    %38 = vector.shape_cast %37 : vector<16x16x64xf32> to vector<256x64xf32>
    %39 = arith.truncf %38 : vector<256x64xf32> to vector<256x64xbf16>
    %c0_43 = arith.constant 0 : index
    %c512 = arith.constant 512 : index
    %40 = vector.load %arg9[%c0_43, %c512] : memref<256x576xbf16, #tpu.memory_space<vmem>>, vector<256x64xbf16>
    tpu.vector_store %arg9[%c0_43, %c512], %39 {strides = array<i32>} : memref<256x576xbf16, #tpu.memory_space<vmem>>, vector<256x64xbf16>,
    %c0_44 = arith.constant 0 : index
    %c0_45 = arith.constant 0 : index
    %41 = vector.load %arg9[%c0_44, %c0_45] : memref<256x576xbf16, #tpu.memory_space<vmem>>, vector<256x576xbf16>
    %c0_46 = arith.constant 0 : index
    %c0_47 = arith.constant 0 : index
    %42 = vector.load %arg2[%c0_46, %c0_47] : memref<576x64xbf16, #tpu.memory_space<vmem>>, vector<576x64xbf16>
    %cst_48 = arith.constant dense<0.000000e+00> : vector<256x64xf32>
    %43 = tpu.matmul %41, %42, %cst_48 {dimension_numbers = #tpu.dot_dimension_numbers<[1], [0], [0], [1], [0, 0, 1, 1], [], []>} : vector<256x576xbf16>, vector<576x64xbf16>, vector<256x64xf32> -> vector<256x64xf32>
    %c0_49 = arith.constant 0 : index
    %c0_50 = arith.constant 0 : index
    %44 = vector.load %arg3[%c0_49, %c0_50] : memref<1x64xf32, #tpu.memory_space<vmem>>, vector<1x64xf32>
    %45 = vector.broadcast %44 : vector<1x64xf32> to vector<256x64xf32>
    %46 = arith.addf %43, %45 : vector<256x64xf32>
    %c0_51 = arith.constant 0 : index
    %47 = memref.load %arg6[%c0_51] : memref<1xf32, #tpu.memory_space<smem>>
    %cst_52 = arith.constant 0.000000e+00 : f32
    %48 = vector.broadcast %cst_52 : f32 to vector<256x64xf32>
    %49 = arith.cmpf oge, %46, %48 : vector<256x64xf32>
    %50 = vector.broadcast %47 : f32 to vector<256x64xf32>
    %51 = arith.mulf %50, %46 : vector<256x64xf32>
    %52 = arith.select %49, %46, %51 : vector<256x64xi1>, vector<256x64xf32>
    %53 = vector.shape_cast %52 : vector<256x64xf32> to vector<16x16x64xf32>
    %c1_53 = arith.constant 1 : index
    %c1_54 = arith.constant 1 : index
    %c0_55 = arith.constant 0 : index
    %54 = vector.load %arg8[%c1_53, %c1_54, %c0_55] : memref<18x18x64xf32, #tpu.memory_space<vmem>>, vector<16x16x64xf32>
    tpu.vector_store %arg8[%c1_53, %c1_54, %c0_55], %53 {strides = array<i32>} : memref<18x18x64xf32, #tpu.memory_space<vmem>>, vector<16x16x64xf32>,
    %c0_56 = arith.constant 0 : index
    %c0_57 = arith.constant 0 : index
    %c0_58 = arith.constant 0 : index
    %55 = vector.load %arg8[%c0_56, %c0_57, %c0_58] : memref<18x18x64xf32, #tpu.memory_space<vmem>>, vector<16x16x64xf32>
    %56 = vector.shape_cast %55 : vector<16x16x64xf32> to vector<256x64xf32>
    %57 = arith.truncf %56 : vector<256x64xf32> to vector<256x64xbf16>
    %c0_59 = arith.constant 0 : index
    %c0_60 = arith.constant 0 : index
    %58 = vector.load %arg9[%c0_59, %c0_60] : memref<256x576xbf16, #tpu.memory_space<vmem>>, vector<256x64xbf16>
    tpu.vector_store %arg9[%c0_59, %c0_60], %57 {strides = array<i32>} : memref<256x576xbf16, #tpu.memory_space<vmem>>, vector<256x64xbf16>,
    %c0_61 = arith.constant 0 : index
    %c1_62 = arith.constant 1 : index
    %c0_63 = arith.constant 0 : index
    %59 = vector.load %arg8[%c0_61, %c1_62, %c0_63] : memref<18x18x64xf32, #tpu.memory_space<vmem>>, vector<16x16x64xf32>
    %60 = vector.shape_cast %59 : vector<16x16x64xf32> to vector<256x64xf32>
    %61 = arith.truncf %60 : vector<256x64xf32> to vector<256x64xbf16>
    %c0_64 = arith.constant 0 : index
    %c64_65 = arith.constant 64 : index
    %62 = vector.load %arg9[%c0_64, %c64_65] : memref<256x576xbf16, #tpu.memory_space<vmem>>, vector<256x64xbf16>
    tpu.vector_store %arg9[%c0_64, %c64_65], %61 {strides = array<i32>} : memref<256x576xbf16, #tpu.memory_space<vmem>>, vector<256x64xbf16>,
    %c0_66 = arith.constant 0 : index
    %c2_67 = arith.constant 2 : index
    %c0_68 = arith.constant 0 : index
    %63 = vector.load %arg8[%c0_66, %c2_67, %c0_68] : memref<18x18x64xf32, #tpu.memory_space<vmem>>, vector<16x16x64xf32>
    %64 = vector.shape_cast %63 : vector<16x16x64xf32> to vector<256x64xf32>
    %65 = arith.truncf %64 : vector<256x64xf32> to vector<256x64xbf16>
    %c0_69 = arith.constant 0 : index
    %c128_70 = arith.constant 128 : index
    %66 = vector.load %arg9[%c0_69, %c128_70] : memref<256x576xbf16, #tpu.memory_space<vmem>>, vector<256x64xbf16>
    tpu.vector_store %arg9[%c0_69, %c128_70], %65 {strides = array<i32>} : memref<256x576xbf16, #tpu.memory_space<vmem>>, vector<256x64xbf16>,
    %c1_71 = arith.constant 1 : index
    %c0_72 = arith.constant 0 : index
    %c0_73 = arith.constant 0 : index
    %67 = vector.load %arg8[%c1_71, %c0_72, %c0_73] : memref<18x18x64xf32, #tpu.memory_space<vmem>>, vector<16x16x64xf32>
    %68 = vector.shape_cast %67 : vector<16x16x64xf32> to vector<256x64xf32>
    %69 = arith.truncf %68 : vector<256x64xf32> to vector<256x64xbf16>
    %c0_74 = arith.constant 0 : index
    %c192_75 = arith.constant 192 : index
    %70 = vector.load %arg9[%c0_74, %c192_75] : memref<256x576xbf16, #tpu.memory_space<vmem>>, vector<256x64xbf16>
    tpu.vector_store %arg9[%c0_74, %c192_75], %69 {strides = array<i32>} : memref<256x576xbf16, #tpu.memory_space<vmem>>, vector<256x64xbf16>,
    %c1_76 = arith.constant 1 : index
    %c1_77 = arith.constant 1 : index
    %c0_78 = arith.constant 0 : index
    %71 = vector.load %arg8[%c1_76, %c1_77, %c0_78] : memref<18x18x64xf32, #tpu.memory_space<vmem>>, vector<16x16x64xf32>
    %72 = vector.shape_cast %71 : vector<16x16x64xf32> to vector<256x64xf32>
    %73 = arith.truncf %72 : vector<256x64xf32> to vector<256x64xbf16>
    %c0_79 = arith.constant 0 : index
    %c256_80 = arith.constant 256 : index
    %74 = vector.load %arg9[%c0_79, %c256_80] : memref<256x576xbf16, #tpu.memory_space<vmem>>, vector<256x64xbf16>
    tpu.vector_store %arg9[%c0_79, %c256_80], %73 {strides = array<i32>} : memref<256x576xbf16, #tpu.memory_space<vmem>>, vector<256x64xbf16>,
    %c1_81 = arith.constant 1 : index
    %c2_82 = arith.constant 2 : index
    %c0_83 = arith.constant 0 : index
    %75 = vector.load %arg8[%c1_81, %c2_82, %c0_83] : memref<18x18x64xf32, #tpu.memory_space<vmem>>, vector<16x16x64xf32>
    %76 = vector.shape_cast %75 : vector<16x16x64xf32> to vector<256x64xf32>
    %77 = arith.truncf %76 : vector<256x64xf32> to vector<256x64xbf16>
    %c0_84 = arith.constant 0 : index
    %c320_85 = arith.constant 320 : index
    %78 = vector.load %arg9[%c0_84, %c320_85] : memref<256x576xbf16, #tpu.memory_space<vmem>>, vector<256x64xbf16>
    tpu.vector_store %arg9[%c0_84, %c320_85], %77 {strides = array<i32>} : memref<256x576xbf16, #tpu.memory_space<vmem>>, vector<256x64xbf16>,
    %c2_86 = arith.constant 2 : index
    %c0_87 = arith.constant 0 : index
    %c0_88 = arith.constant 0 : index
    %79 = vector.load %arg8[%c2_86, %c0_87, %c0_88] : memref<18x18x64xf32, #tpu.memory_space<vmem>>, vector<16x16x64xf32>
    %80 = vector.shape_cast %79 : vector<16x16x64xf32> to vector<256x64xf32>
    %81 = arith.truncf %80 : vector<256x64xf32> to vector<256x64xbf16>
    %c0_89 = arith.constant 0 : index
    %c384_90 = arith.constant 384 : index
    %82 = vector.load %arg9[%c0_89, %c384_90] : memref<256x576xbf16, #tpu.memory_space<vmem>>, vector<256x64xbf16>
    tpu.vector_store %arg9[%c0_89, %c384_90], %81 {strides = array<i32>} : memref<256x576xbf16, #tpu.memory_space<vmem>>, vector<256x64xbf16>,
    %c2_91 = arith.constant 2 : index
    %c1_92 = arith.constant 1 : index
    %c0_93 = arith.constant 0 : index
    %83 = vector.load %arg8[%c2_91, %c1_92, %c0_93] : memref<18x18x64xf32, #tpu.memory_space<vmem>>, vector<16x16x64xf32>
    %84 = vector.shape_cast %83 : vector<16x16x64xf32> to vector<256x64xf32>
    %85 = arith.truncf %84 : vector<256x64xf32> to vector<256x64xbf16>
    %c0_94 = arith.constant 0 : index
    %c448_95 = arith.constant 448 : index
    %86 = vector.load %arg9[%c0_94, %c448_95] : memref<256x576xbf16, #tpu.memory_space<vmem>>, vector<256x64xbf16>
    tpu.vector_store %arg9[%c0_94, %c448_95], %85 {strides = array<i32>} : memref<256x576xbf16, #tpu.memory_space<vmem>>, vector<256x64xbf16>,
    %c2_96 = arith.constant 2 : index
    %c2_97 = arith.constant 2 : index
    %c0_98 = arith.constant 0 : index
    %87 = vector.load %arg8[%c2_96, %c2_97, %c0_98] : memref<18x18x64xf32, #tpu.memory_space<vmem>>, vector<16x16x64xf32>
    %88 = vector.shape_cast %87 : vector<16x16x64xf32> to vector<256x64xf32>
    %89 = arith.truncf %88 : vector<256x64xf32> to vector<256x64xbf16>
    %c0_99 = arith.constant 0 : index
    %c512_100 = arith.constant 512 : index
    %90 = vector.load %arg9[%c0_99, %c512_100] : memref<256x576xbf16, #tpu.memory_space<vmem>>, vector<256x64xbf16>
    tpu.vector_store %arg9[%c0_99, %c512_100], %89 {strides = array<i32>} : memref<256x576xbf16, #tpu.memory_space<vmem>>, vector<256x64xbf16>,
    %c0_101 = arith.constant 0 : index
    %c0_102 = arith.constant 0 : index
    %91 = vector.load %arg9[%c0_101, %c0_102] : memref<256x576xbf16, #tpu.memory_space<vmem>>, vector<256x576xbf16>
    %c0_103 = arith.constant 0 : index
    %c0_104 = arith.constant 0 : index
    %92 = vector.load %arg4[%c0_103, %c0_104] : memref<576x64xbf16, #tpu.memory_space<vmem>>, vector<576x64xbf16>
    %cst_105 = arith.constant dense<0.000000e+00> : vector<256x64xf32>
    %93 = tpu.matmul %91, %92, %cst_105 {dimension_numbers = #tpu.dot_dimension_numbers<[1], [0], [0], [1], [0, 0, 1, 1], [], []>} : vector<256x576xbf16>, vector<576x64xbf16>, vector<256x64xf32> -> vector<256x64xf32>
    %c0_106 = arith.constant 0 : index
    %c0_107 = arith.constant 0 : index
    %94 = vector.load %arg5[%c0_106, %c0_107] : memref<1x64xf32, #tpu.memory_space<vmem>>, vector<1x64xf32>
    %95 = vector.broadcast %94 : vector<1x64xf32> to vector<256x64xf32>
    %96 = arith.addf %93, %95 : vector<256x64xf32>
    %97 = vector.shape_cast %1 : vector<16x16x64xf32> to vector<256x64xf32>
    %98 = arith.addf %96, %97 : vector<256x64xf32>
    %99 = vector.shape_cast %98 : vector<256x64xf32> to vector<1x16x16x64xf32>
    %c0_108 = arith.constant 0 : index
    %c0_109 = arith.constant 0 : index
    %c0_110 = arith.constant 0 : index
    %c0_111 = arith.constant 0 : index
    %100 = vector.load %arg7[%c0_108, %c0_109, %c0_110, %c0_111] : memref<1x16x16x64xf32, #tpu.memory_space<vmem>>, vector<1x16x16x64xf32>
    tpu.vector_store %arg7[%c0_108, %c0_109, %c0_110, %c0_111], %99 {strides = array<i32>} : memref<1x16x16x64xf32, #tpu.memory_space<vmem>>, vector<1x16x16x64xf32>,
    return
  }
  func.func @transform_0(%arg0: i32) -> (i32, i32, i32, i32) {
    %c0_i32 = arith.constant 0 : i32
    %c0_i32_0 = arith.constant 0 : i32
    %c0_i32_1 = arith.constant 0 : i32
    %c0_i32_2 = arith.constant 0 : i32
    return %arg0, %c0_i32, %c0_i32_0, %c0_i32_1 : i32, i32, i32, i32
  }
  func.func @transform_1(%arg0: i32) -> (i32, i32) {
    %c0_i32 = arith.constant 0 : i32
    %c0_i32_0 = arith.constant 0 : i32
    %c0_i32_1 = arith.constant 0 : i32
    return %c0_i32, %c0_i32_0 : i32, i32
  }
  func.func @transform_2(%arg0: i32) -> (i32, i32) {
    %c0_i32 = arith.constant 0 : i32
    %c0_i32_0 = arith.constant 0 : i32
    %c0_i32_1 = arith.constant 0 : i32
    return %c0_i32, %c0_i32_0 : i32, i32
  }
  func.func @transform_3(%arg0: i32) -> (i32, i32) {
    %c0_i32 = arith.constant 0 : i32
    %c0_i32_0 = arith.constant 0 : i32
    %c0_i32_1 = arith.constant 0 : i32
    return %c0_i32, %c0_i32_0 : i32, i32
  }
  func.func @transform_4(%arg0: i32) -> (i32, i32) {
    %c0_i32 = arith.constant 0 : i32
    %c0_i32_0 = arith.constant 0 : i32
    %c0_i32_1 = arith.constant 0 : i32
    return %c0_i32, %c0_i32_0 : i32, i32
  }
  func.func @transform_5(%arg0: i32) -> i32 {
    %c0_i32 = arith.constant 0 : i32
    %c0_i32_0 = arith.constant 0 : i32
    return %c0_i32 : i32
  }
  func.func @transform_6(%arg0: i32) -> (i32, i32, i32, i32) {
    %c0_i32 = arith.constant 0 : i32
    %c0_i32_0 = arith.constant 0 : i32
    %c0_i32_1 = arith.constant 0 : i32
    %c0_i32_2 = arith.constant 0 : i32
    return %arg0, %c0_i32, %c0_i32_0, %c0_i32_1 : i32, i32, i32, i32
  }
}

</mosaic_0001>

<bundles_post_ra>
// kernel: tpu_custom_call.1
= control target key start
LH: loop header
LB: loop body
LE: loop exit
PB: predicated region body
PF: predicated region fallthrough
CT: control target
= control target key end

     0   :  { %s12122_s0 = inlined_call_operand.vmem [shape: f32[2,16,16,64], index: 0, kind: input, shape index: {}]   ;;  %s12123_s1 = inlined_call_operand.vmem [shape: bf16[576,64], index: 1, kind: input, shape index: {}]   ;;  %s12124_s2 = inlined_call_operand.vmem [shape: f32[1,64], index: 2, kind: input, shape index: {}]   ;;  %s12125_s3 = inlined_call_operand.vmem [shape: bf16[576,64], index: 3, kind: input, shape index: {}]   ;;  %s12126_s4 = inlined_call_operand.vmem [shape: f32[1,64], index: 4, kind: input, shape index: {}]   ;;  %s12127_s5 = inlined_call_operand.<no memory space> [shape: f32[1], index: 5, kind: input, shape index: {}]   ;;  %s12128_s6 = inlined_call_operand.hbm [shape: f32[2,16,16,64], index: 6, kind: output, shape index: {}]  }
   0x1   :  { %11 = sst [smem:[#allocation4]] %s12127_s5 }
   0x2   :  { %12 = vsyncpa [#allocation6], 0 }
   0x3   :  { %14 = vsyncpa [#allocation6 + $0x1], 0  ;;  %s9654_s23 = smov 0   ;;  %s9656_s24 = smov 0  }
   0x4   :  { %s9658_s25 = smov 0   ;;  %s9660_s26 = smov 0  }
   0x5 LB: > { %s9675_s5 = sadd.s32 4294967295, %s9609_s26   ;;  %s7258_s27 = sadd.s32 4294967294, %s9609_s26   ;;  %s9609_s26 = sphi %s9660_s26, %s12254_s26   ;;  %s9605_s25 = sphi %s9658_s25, %s12253_s25   ;;  %s9601_s24 = sphi %s9656_s24, %s12252_s24   ;;  %s9597_s23 = sphi %s9654_s23, %s12251_s23  }
   0x6   : > { %s9679_s28 = sadd.s32 1, %s9609_s26   ;;  %s158_s29 = sadd.s32 1, %s9605_s25 }
   0x7   : > { %s155_s30 = ssub.s32 %s9609_s26, %s9679_s28  ;;  %p168_p0 = scmp.ne.s32.totalorder %s9605_s25, %s9601_s24 }
   0x8   : > { %p156_p1 = scmp.eq.s32.totalorder %s155_s30, 0  ;;  %p169_p2 = scmp.eq.s32.totalorder %s9675_s5, 1 }
   0x9   : > { %p174_p3 = scmp.ne.s32.totalorder %s9601_s24, %s9597_s23  ;;  %p175_p4 = scmp.eq.s32.totalorder %s7258_s27, 1 }
   0xa   : > { %s9690_s7 = scalar_select %p156_p1, %s9605_s25, %s158_s29  }
   0xb   : > { %p9692_p5 = por %p169_p2, %p168_p0  ;;  %p9696_p6 = por %p175_p4, %p174_p3 }
   0xc   : > { %p7261_p7 = scmp.ge.s32.totalorder %s9609_s26, 1  ;;  %p216_p8 = scmp.lt.s32.totalorder %s9609_s26, 3 }
   0xe   : > { %p217_p9 = pnand %p7261_p7, %p216_p8 }
  0x10   : > { %220 = sbr.rel (%p217_p9) target bundleno = 1137 (0x471), region = 44 }
  0x15   : > { %vm284_vm0 = vcmask 523264   ;;  %vm287_vm1 = vcmask 517120   ;;  %p246_p10 = scmp.lt.s32.totalorder %s9675_s5, 1  ;;  %v9301_v0 = vld [vmem:[%s12123_s1 + $0x78] sm:$0xff]   ;;  %v9611_v1 = vmov 0.0   ;;  %v9303_v3 = vld [vmem:[%s12123_s1 + $0x70] sm:$0xff]  }
  0x16   : > { %285 = vst.msk [vmem:[#allocation2] sm:$0xff] %vm284_vm0, %v9611_v1  ;;  %286 = vst.msk [vmem:[#allocation2 + $0x8] sm:$0xff] %vm284_vm0, %v9611_v1  ;;  %8690 = vmatprep.subr.bf16.mxu0 %v9301_v0  ;;  %v9302_v2 = vld [vmem:[%s12123_s1 + $0x38] sm:$0xff]   ;;  %v9304_v4 = vld [vmem:[%s12123_s1 + $0x30] sm:$0xff]   ;;  %s9612_s30 = smov 64   ;;  %vm533_vm2 = vcmask 519168  }
  0x17   : > { %289 = vst.msk [vmem:[#allocation2 + $0x18] sm:$0xff] %vm284_vm0, %v9611_v1  ;;  %290 = vst.msk [vmem:[#allocation2 + $0x20] sm:$0xff] %vm284_vm0, %v9611_v1  ;;  %s247_s12 = scalar_select %p246_p10, %s9675_s5, 1  ;;  %8691 = vmatpush3.bf16.msra.mxu0 %v9302_v2  ;;  %v9305_v5 = vld [vmem:[%s12123_s1 + $0x68] sm:$0xff]   ;;  %vm790_vm3 = vcmask 1043968  }
  0x18   : > { %292 = vst.msk [vmem:[#allocation2 + $0x30] sm:$0xff] %vm284_vm0, %v9611_v1  ;;  %293 = vst.msk [vmem:[#allocation2 + $0x38] sm:$0xff] %vm284_vm0, %v9611_v1  ;;  %8692 = vmatprep.subr.bf16.mxu0 %v9303_v3  ;;  %s3682_s20 = sld [smem:[#allocation4]]  ;;  %s8689_s18 = sshll.u32 %s9675_s5, 12 }
  0x19   : > { %295 = vst.msk [vmem:[#allocation2 + $0x48] sm:$0xff] %vm284_vm0, %v9611_v1  ;;  %296 = vst.msk [vmem:[#allocation2 + $0x50] sm:$0xff] %vm284_vm0, %v9611_v1  ;;  %s8112_s17 = sshll.u32 %s247_s12, 8  ;;  %s12070_s27 = scalar_lea.hbm %s12128_s6, %s8689_s18 }
  0x1a   : > { %298 = vst.msk [vmem:[#allocation2 + $0x60] sm:$0xff] %vm284_vm0, %v9611_v1  ;;  %299 = vst.msk [vmem:[#allocation2 + $0x68] sm:$0xff] %vm284_vm0, %v9611_v1  ;;  %s9775_s22 = scalar_lea.vmem %s12122_s0, %s8112_s17  ;;  %s9613_s10 = smov [#allocation5]  }
  0x1b   : > { %301 = vst.msk [vmem:[#allocation2 + $0x78] sm:$0xff] %vm284_vm0, %v9611_v1  ;;  %302 = vst.msk [vmem:[#allocation2 + $0x80] sm:$0xff] %vm284_vm0, %v9611_v1  ;;  %v9781_v6 = vld [vmem:[%s9775_s22] sm:$0xff]  ;;  %v9784_v7 = vld [vmem:[%s9775_s22 + $0x8] sm:$0xff]  ;;  %8693 = vmatpush3.bf16.msra.mxu0 %v9304_v4  ;;  %s9553_s11 = sshll.u32 %s9613_s10, 4  ;;  %s9554_s11 = int_to_ptr.vmem [resolvable:$false] %s9553_s11 }
  0x1c   : > { %304 = vst.msk [vmem:[#allocation2 + $0x90] sm:$0xff] %vm284_vm0, %v9611_v1  ;;  %305 = vst.msk [vmem:[#allocation2 + $0x98] sm:$0xff] %vm284_vm0, %v9611_v1  ;;  %v9787_v8 = vld [vmem:[%s9775_s22 + $0x10] sm:$0xff]  ;;  %v9796_v9 = vld [vmem:[%s9775_s22 + $0x18] sm:$0xff]  ;;  %8694 = vmatprep.subr.bf16.mxu0 %v9305_v5  ;;  %s9555_s12 = scalar_lea.vmem %s9554_s11, 8192 }
  0x1d   : > { %307 = vst.msk [vmem:[#allocation2 + $0xa8] sm:$0xff] %vm284_vm0, %v9611_v1  ;;  %308 = vst.msk [vmem:[#allocation2 + $0xb0] sm:$0xff] %vm284_vm0, %v9611_v1  ;;  %v9799_v10 = vld [vmem:[%s9775_s22 + $0x20] sm:$0xff]  ;;  %v9802_v11 = vld [vmem:[%s9775_s22 + $0x28] sm:$0xff] }
  0x1e   : > { %310 = vst.msk [vmem:[#allocation2 + $0xc0] sm:$0xff] %vm284_vm0, %v9611_v1  ;;  %311 = vst.msk [vmem:[#allocation2 + $0xc8] sm:$0xff] %vm284_vm0, %v9611_v1  ;;  %v566_v12 = vld [vmem:[#allocation2 + $0x1] sm:$0xff]  ;;  %v9811_v14 = vld [vmem:[%s9775_s22 + $0x30] sm:$0xff] }
  0x1f   : > { %313 = vst.msk [vmem:[#allocation2 + $0xd8] sm:$0xff] %vm284_vm0, %v9611_v1  ;;  %314 = vst.msk [vmem:[#allocation2 + $0xe0] sm:$0xff] %vm284_vm0, %v9611_v1  ;;  %v8145_v15 = vpack.c.bf16 %v566_v12, %v566_v12  ;;  %v9816_v16 = vld [vmem:[%s9775_s22 + $0x38] sm:$0xff]  ;;  %v9819_v17 = vld [vmem:[%s9775_s22 + $0x40] sm:$0xff] }
  0x20   : > { %316 = vst.msk [vmem:[#allocation2 + $0xf0] sm:$0xff] %vm284_vm0, %v9611_v1  ;;  %317 = vst.msk [vmem:[#allocation2 + $0xf8] sm:$0xff] %vm284_vm0, %v9611_v1  ;;  %v9822_v18 = vld [vmem:[%s9775_s22 + $0x48] sm:$0xff]  ;;  %v9831_v19 = vld [vmem:[%s9775_s22 + $0x50] sm:$0xff] }
  0x21   : > { %319 = vst.msk [vmem:[#allocation2 + $0x108] sm:$0xff] %vm284_vm0, %v9611_v1  ;;  %320 = vst.msk [vmem:[#allocation2 + $0x110] sm:$0xff] %vm284_vm0, %v9611_v1  ;;  %v9834_v20 = vld [vmem:[%s9775_s22 + $0x58] sm:$0xff]  ;;  %v9837_v21 = vld [vmem:[%s9775_s22 + $0x60] sm:$0xff]  ;;  %694 = vrot.lane.b32.xlu0 %v8145_v15, %s9612_s30 }
  0x22   : > { %322 = vst.msk [vmem:[#allocation2 + $0x120] sm:$0xff] %vm284_vm0, %v9611_v1  ;;  %323 = vst.msk [vmem:[#allocation2 + $0x128] sm:$0xff] %vm284_vm0, %v9611_v1  ;;  %v9847_v23 = vld [vmem:[%s9775_s22 + $0x68] sm:$0xff]  ;;  %v9850_v24 = vld [vmem:[%s9775_s22 + $0x70] sm:$0xff] }
  0x23   : > { %325 = vst.msk [vmem:[#allocation2 + $0x138] sm:$0xff] %vm284_vm0, %v9611_v1  ;;  %326 = vst.msk [vmem:[#allocation2 + $0x140] sm:$0xff] %vm284_vm0, %v9611_v1  ;;  %v9853_v25 = vld [vmem:[%s9775_s22 + $0x78] sm:$0xff]  ;;  %v9862_v26 = vld [vmem:[%s9775_s22 + $0x80] sm:$0xff] }
  0x24   : > { %328 = vst.msk [vmem:[#allocation2 + $0x150] sm:$0xff] %vm284_vm0, %v9611_v1  ;;  %329 = vst.msk [vmem:[#allocation2 + $0x158] sm:$0xff] %vm284_vm0, %v9611_v1  ;;  %v9865_v27 = vld [vmem:[%s9775_s22 + $0x88] sm:$0xff]  ;;  %v9868_v28 = vld [vmem:[%s9775_s22 + $0x90] sm:$0xff] }
  0x25   : > { %331 = vst.msk [vmem:[#allocation2 + $0x168] sm:$0xff] %vm284_vm0, %v9611_v1  ;;  %332 = vst.msk [vmem:[#allocation2 + $0x170] sm:$0xff] %vm284_vm0, %v9611_v1  ;;  %v9877_v29 = vld [vmem:[%s9775_s22 + $0x98] sm:$0xff]  ;;  %v9880_v30 = vld [vmem:[%s9775_s22 + $0xa0] sm:$0xff] }
  0x26   : > { %334 = vst.msk [vmem:[#allocation2 + $0x180] sm:$0xff] %vm284_vm0, %v9611_v1  ;;  %335 = vst.msk [vmem:[#allocation2 + $0x188] sm:$0xff] %vm284_vm0, %v9611_v1  ;;  %v9883_v31 = vld [vmem:[%s9775_s22 + $0xa8] sm:$0xff] }
  0x27   : > { %337 = vst.msk [vmem:[#allocation2 + $0x198] sm:$0xff] %vm284_vm0, %v9611_v1  ;;  %338 = vst.msk [vmem:[#allocation2 + $0x1a0] sm:$0xff] %vm284_vm0, %v9611_v1 }
  0x28   : > { %288 = vst.msk [vmem:[#allocation2 + $0x10] sm:$0x3] %vm287_vm1, %v9611_v1  ;;  %291 = vst.msk [vmem:[#allocation2 + $0x28] sm:$0x3] %vm287_vm1, %v9611_v1 }
  0x29   : > { %294 = vst.msk [vmem:[#allocation2 + $0x40] sm:$0x3] %vm287_vm1, %v9611_v1  ;;  %297 = vst.msk [vmem:[#allocation2 + $0x58] sm:$0x3] %vm287_vm1, %v9611_v1 }
  0x2a   : > { %300 = vst.msk [vmem:[#allocation2 + $0x70] sm:$0x3] %vm287_vm1, %v9611_v1  ;;  %303 = vst.msk [vmem:[#allocation2 + $0x88] sm:$0x3] %vm287_vm1, %v9611_v1 }
  0x2b   : > { %306 = vst.msk [vmem:[#allocation2 + $0xa0] sm:$0x3] %vm287_vm1, %v9611_v1  ;;  %309 = vst.msk [vmem:[#allocation2 + $0xb8] sm:$0x3] %vm287_vm1, %v9611_v1 }
  0x2c   : > { %312 = vst.msk [vmem:[#allocation2 + $0xd0] sm:$0x3] %vm287_vm1, %v9611_v1  ;;  %315 = vst.msk [vmem:[#allocation2 + $0xe8] sm:$0x3] %vm287_vm1, %v9611_v1 }
  0x2d   : > { %318 = vst.msk [vmem:[#allocation2 + $0x100] sm:$0x3] %vm287_vm1, %v9611_v1  ;;  %321 = vst.msk [vmem:[#allocation2 + $0x118] sm:$0x3] %vm287_vm1, %v9611_v1 }
  0x2e   : > { %324 = vst.msk [vmem:[#allocation2 + $0x130] sm:$0x3] %vm287_vm1, %v9611_v1  ;;  %327 = vst.msk [vmem:[#allocation2 + $0x148] sm:$0x3] %vm287_vm1, %v9611_v1 }
  0x2f   : > { %330 = vst.msk [vmem:[#allocation2 + $0x160] sm:$0x3] %vm287_vm1, %v9611_v1  ;;  %333 = vst.msk [vmem:[#allocation2 + $0x178] sm:$0x3] %vm287_vm1, %v9611_v1  ;;  %v567_v13 = vld [vmem:[#allocation2 + $0x9] sm:$0xff] }
  0x30   : > { %336 = vst.msk [vmem:[#allocation2 + $0x190] sm:$0x3] %vm287_vm1, %v9611_v1  ;;  %339 = vst.msk [vmem:[#allocation2 + $0x1a8] sm:$0x3] %vm287_vm1, %v9611_v1  ;;  %v8146_v22 = vpack.c.bf16 %v567_v13, %v567_v13 }
  0x31   : > { %12163 = vst [vmem:[#allocation8_spill] sm:$0xff] %v9781_v6  ;;  %12164 = vst [vmem:[#allocation9_spill] sm:$0xff] %v9784_v7 }
  0x32   : > { %12165 = vst [vmem:[#allocation10_spill] sm:$0xff] %v9787_v8  ;;  %341 = vst.msk [vmem:[#allocation2 + $0x19] sm:$0xff] %vm284_vm0, %v9781_v6  ;;  %696 = vrot.lane.b32.xlu0 %v8146_v22, %s9612_s30 }
  0x33   : > { %342 = vst.msk [vmem:[#allocation2 + $0x21] sm:$0xff] %vm284_vm0, %v9784_v7  ;;  %343 = vst.msk [vmem:[#allocation2 + $0x31] sm:$0xff] %vm284_vm0, %v9787_v8 }
  0x34   : > { %12166 = vst [vmem:[#allocation11_spill] sm:$0xff] %v9796_v9  ;;  %12167 = vst [vmem:[#allocation12_spill] sm:$0xff] %v9799_v10 }
  0x35   : > { %12168 = vst [vmem:[#allocation13_spill] sm:$0xff] %v9802_v11  ;;  %344 = vst.msk [vmem:[#allocation2 + $0x39] sm:$0xff] %vm284_vm0, %v9796_v9 }
  0x36   : > { %345 = vst.msk [vmem:[#allocation2 + $0x49] sm:$0xff] %vm284_vm0, %v9799_v10  ;;  %346 = vst.msk [vmem:[#allocation2 + $0x51] sm:$0xff] %vm284_vm0, %v9802_v11 }
  0x37   : > { %12169 = vst [vmem:[#allocation14_spill] sm:$0xff] %v9811_v14  ;;  %347 = vst.msk [vmem:[#allocation2 + $0x61] sm:$0xff] %vm284_vm0, %v9811_v14 }
  0x38   : > { %12170 = vst [vmem:[#allocation15_spill] sm:$0xff] %v9816_v16  ;;  %12171 = vst [vmem:[#allocation16_spill] sm:$0xff] %v9819_v17 }
  0x39   : > { %12172 = vst [vmem:[#allocation17_spill] sm:$0xff] %v9822_v18  ;;  %348 = vst.msk [vmem:[#allocation2 + $0x69] sm:$0xff] %vm284_vm0, %v9816_v16  ;;  %v1015_v32 = vld [vmem:[#allocation2 + $0x18] sm:$0xff] }
  0x3a   : > { %349 = vst.msk [vmem:[#allocation2 + $0x79] sm:$0xff] %vm284_vm0, %v9819_v17  ;;  %350 = vst.msk [vmem:[#allocation2 + $0x81] sm:$0xff] %vm284_vm0, %v9822_v18  ;;  %v1016_v33 = vld [vmem:[#allocation2 + $0x20] sm:$0xff]  ;;  %v8209_v35 = vpack.c.bf16 %v1015_v32, %v1015_v32  ;;  %v1017_v38 = vld [vmem:[#allocation2 + $0x30] sm:$0xff] }
  0x3b   : > { %12173 = vst [vmem:[#allocation18_spill] sm:$0xff] %v9831_v19  ;;  %12174 = vst [vmem:[#allocation19_spill] sm:$0xff] %v9834_v20  ;;  %v568_v34 = vld [vmem:[#allocation2 + $0x19] sm:$0xff]  ;;  %v8210_v36 = vpack.c.bf16 %v1016_v33, %v1016_v33  ;;  %v8211_v40 = vpack.c.bf16 %v1017_v38, %v1017_v38  ;;  %v569_v45 = vld [vmem:[#allocation2 + $0x21] sm:$0xff] }
  0x3c   : > { %12175 = vst [vmem:[#allocation20_spill] sm:$0xff] %v9837_v21  ;;  %351 = vst.msk [vmem:[#allocation2 + $0x91] sm:$0xff] %vm284_vm0, %v9831_v19  ;;  %v8147_v37 = vpack.c.bf16 %v568_v34, %v568_v34  ;;  %v1018_v39 = vld [vmem:[#allocation2 + $0x38] sm:$0xff]  ;;  %1143 = vrot.lane.b32.xlu1 %v8209_v35, %s9612_s30  ;;  %v8148_v57 = vpack.c.bf16 %v569_v45, %v569_v45  ;;  %v9958_v32 = vld [vmem:[%s9775_s22 + $0xb0] sm:$0xff] }
  0x3d   : > { %352 = vst.msk [vmem:[#allocation2 + $0x99] sm:$0xff] %vm284_vm0, %v9834_v20  ;;  %353 = vst.msk [vmem:[#allocation2 + $0xa9] sm:$0xff] %vm284_vm0, %v9837_v21  ;;  %v8212_v41 = vpack.c.bf16 %v1018_v39, %v1018_v39  ;;  %v1019_v42 = vld [vmem:[#allocation2 + $0x48] sm:$0xff]  ;;  %v1020_v44 = vld [vmem:[#allocation2 + $0x50] sm:$0xff] }
  0x3e   : > { %12176 = vst [vmem:[#allocation21_spill] sm:$0xff] %v9847_v23  ;;  %12177 = vst [vmem:[#allocation22_spill] sm:$0xff] %v9850_v24  ;;  %v9893_v43 = vpack.c.bf16 %v1019_v42, %v1019_v42  ;;  %v9897_v46 = vpack.c.bf16 %v1020_v44, %v1020_v44  ;;  %v1021_v47 = vld [vmem:[#allocation2 + $0x60] sm:$0xff]  ;;  %698 = vrot.lane.b32.xlu0 %v8147_v37, %s9612_s30  ;;  %v570_v53 = vld [vmem:[#allocation2 + $0x31] sm:$0xff] }
  0x3f   : > { %12178 = vst [vmem:[#allocation23_spill] sm:$0xff] %v9853_v25  ;;  %354 = vst.msk [vmem:[#allocation2 + $0xb1] sm:$0xff] %vm284_vm0, %v9847_v23  ;;  %v9902_v49 = vpack.c.bf16 %v1021_v47, %v1021_v47  ;;  %v9928_v63 = vpack.c.bf16 %v570_v53, %v570_v53  ;;  %v571_v15 = vld [vmem:[#allocation2 + $0x39] sm:$0xff]  ;;  %v572_v22 = vld [vmem:[#allocation2 + $0x49] sm:$0xff] }
  0x40   : > { %355 = vst.msk [vmem:[#allocation2 + $0xc1] sm:$0xff] %vm284_vm0, %v9850_v24  ;;  %356 = vst.msk [vmem:[#allocation2 + $0xc9] sm:$0xff] %vm284_vm0, %v9853_v25  ;;  %v1022_v48 = vld [vmem:[#allocation2 + $0x68] sm:$0xff]  ;;  %1145 = vrot.lane.b32.xlu1 %v8210_v36, %s9612_s30  ;;  %v9961_v33 = vpack.c.bf16 %v571_v15, %v571_v15  ;;  %v9966_v34 = vld [vmem:[%s9775_s22 + $0xb8] sm:$0xff]  ;;  %v9988_v39 = vpack.c.bf16 %v572_v22, %v572_v22 }
  0x41   : > { %12179 = vst [vmem:[#allocation24_spill] sm:$0xff] %v9862_v26  ;;  %12180 = vst [vmem:[#allocation25_spill] sm:$0xff] %v9865_v27  ;;  %v9904_v50 = vpack.c.bf16 %v1022_v48, %v1022_v48  ;;  %v1023_v51 = vld [vmem:[#allocation2 + $0x78] sm:$0xff]  ;;  %v1024_v52 = vld [vmem:[#allocation2 + $0x80] sm:$0xff] }
  0x42   : > { %12181 = vst [vmem:[#allocation26_spill] sm:$0xff] %v9868_v28  ;;  %357 = vst.msk [vmem:[#allocation2 + $0xd9] sm:$0xff] %vm284_vm0, %v9862_v26  ;;  %v9908_v54 = vpack.c.bf16 %v1023_v51, %v1023_v51  ;;  %v9910_v55 = vpack.c.bf16 %v1024_v52, %v1024_v52  ;;  %1147 = vrot.lane.b32.xlu0 %v8211_v40, %s9612_s30  ;;  %v9981_v37 = vld [vmem:[%s9775_s22 + $0xd0] sm:$0xff]  ;;  %v9306_v38 = vld [vmem:[%s12123_s1 + $0x28] sm:$0xff]  }
  0x43   : > { %358 = vst.msk [vmem:[#allocation2 + $0xe1] sm:$0xff] %vm284_vm0, %v9865_v27  ;;  %359 = vst.msk [vmem:[#allocation2 + $0xf1] sm:$0xff] %vm284_vm0, %v9868_v28  ;;  %v1025_v56 = vld [vmem:[#allocation2 + $0x90] sm:$0xff]  ;;  %8695 = vmatpush3.bf16.msra.mxu0 %v9306_v38  ;;  %v9307_v42 = vld [vmem:[%s12123_s1 + $0x60] sm:$0xff]  }
  0x44   : > { %12182 = vst [vmem:[#allocation27_spill] sm:$0xff] %v9877_v29  ;;  %12183 = vst [vmem:[#allocation28_spill] sm:$0xff] %v9880_v30  ;;  %v9915_v58 = vpack.c.bf16 %v1025_v56, %v1025_v56  ;;  %v1026_v59 = vld [vmem:[#allocation2 + $0x98] sm:$0xff]  ;;  %v1027_v61 = vld [vmem:[#allocation2 + $0xa8] sm:$0xff]  ;;  %700 = vrot.lane.b32.xlu1 %v8148_v57, %s9612_s30  ;;  %8696 = vmatprep.subr.bf16.mxu0 %v9307_v42 }
  0x45   : > { %12184 = vst [vmem:[#allocation29_spill] sm:$0xff] %v9883_v31  ;;  %360 = vst.msk [vmem:[#allocation2 + $0xf9] sm:$0xff] %vm284_vm0, %v9877_v29  ;;  %v9921_v60 = vpack.c.bf16 %v1026_v59, %v1026_v59  ;;  %v9930_v0 = vpack.c.bf16 %v1027_v61, %v1027_v61  ;;  %v373_v44 = vld [vmem:[#allocation2] sm:$0xff]  ;;  %v9309_v48 = vld [vmem:[%s12123_s1 + $0x58] sm:$0xff]  }
  0x46   : > { %361 = vst.msk [vmem:[#allocation2 + $0x109] sm:$0xff] %vm284_vm0, %v9880_v30  ;;  %362 = vst.msk [vmem:[#allocation2 + $0x111] sm:$0xff] %vm284_vm0, %v9883_v31  ;;  %v1028_v62 = vld [vmem:[#allocation2 + $0xb0] sm:$0xff]  ;;  %702 = vrot.lane.b32.xlu0 %v9928_v63, %s9612_s30  ;;  %v9308_v45 = vld [vmem:[%s12123_s1 + $0x20] sm:$0xff]  }
  0x47   : > { %536 = vst.msk [vmem:[#allocation3 + $0x28] sm:$0xf] %vm533_vm2, %v8209_v35  ;;  %537 = vst.msk [vmem:[#allocation3 + $0x3c] sm:$0xf] %vm533_vm2, %v8210_v36  ;;  %v9932_v1 = vpack.c.bf16 %v1028_v62, %v1028_v62  ;;  %v1029_v2 = vld [vmem:[#allocation2 + $0xc0] sm:$0xff]  ;;  %v1030_v3 = vld [vmem:[#allocation2 + $0xc8] sm:$0xff]  ;;  %8697 = vmatpush3.bf16.msra.mxu0 %v9308_v45 }
  0x48   : > { %538 = vst.msk [vmem:[#allocation3 + $0x50] sm:$0xf] %vm533_vm2, %v8211_v40  ;;  %539 = vst.msk [vmem:[#allocation3 + $0x64] sm:$0xf] %vm533_vm2, %v8212_v41  ;;  %v9936_v4 = vpack.c.bf16 %v1029_v2, %v1029_v2  ;;  %v9938_v5 = vpack.c.bf16 %v1030_v3, %v1030_v3  ;;  %1149 = vrot.lane.b32.xlu1 %v8212_v41, %s9612_s30  ;;  %v9969_v35 = vld [vmem:[%s9775_s22 + $0xc0] sm:$0xff]  ;;  %v9972_v36 = vld [vmem:[%s9775_s22 + $0xc8] sm:$0xff]  ;;  %8698 = vmatprep.subr.bf16.mxu0 %v9309_v48 }
  0x49   : > { %540 = vst.msk [vmem:[#allocation3 + $0x78] sm:$0xf] %vm533_vm2, %v9893_v43  ;;  %541 = vst.msk [vmem:[#allocation3 + $0x8c] sm:$0xf] %vm533_vm2, %v9897_v46  ;;  %v1031_v12 = vld [vmem:[#allocation2 + $0xd8] sm:$0xff]  ;;  %v10006_v47 = vld [vmem:[%s9775_s22 + $0xe0] sm:$0xff] }
  0x4a   : > { %542 = vst.msk [vmem:[#allocation3 + $0xa0] sm:$0xf] %vm533_vm2, %v9902_v49  ;;  %543 = vst.msk [vmem:[#allocation3 + $0xb4] sm:$0xf] %vm533_vm2, %v9904_v50  ;;  %v9943_v13 = vpack.c.bf16 %v1031_v12, %v1031_v12  ;;  %1151 = vrot.lane.b32.xlu0 %v9893_v43, %s9612_s30  ;;  %v9993_v40 = vld [vmem:[%s9775_s22 + $0xd8] sm:$0xff]  ;;  %v8113_v43 = vpack.c.bf16 %v373_v44, %v373_v44  ;;  %v374_v51 = vld [vmem:[#allocation2 + $0x8] sm:$0xff] }
  0x4b   : > { %544 = vst.msk [vmem:[#allocation3 + $0xc8] sm:$0xf] %vm533_vm2, %v9908_v54  ;;  %545 = vst.msk [vmem:[#allocation3 + $0xdc] sm:$0xf] %vm533_vm2, %v9910_v55  ;;  %v573_v41 = vld [vmem:[#allocation2 + $0x51] sm:$0xff]  ;;  %v823_v52 = vld [vmem:[#allocation2 + $0x2] sm:$0xff]  ;;  %v8114_v56 = vpack.c.bf16 %v374_v51, %v374_v51 }
  0x4c   : > { %546 = vst.msk [vmem:[#allocation3 + $0xf0] sm:$0xf] %vm533_vm2, %v9915_v58  ;;  %547 = vst.msk [vmem:[#allocation3 + $0x104] sm:$0xf] %vm533_vm2, %v9921_v60  ;;  %704 = vrot.lane.b32.xlu1 %v9961_v33, %s9612_s30  ;;  %v574_v53 = vld [vmem:[#allocation2 + $0x61] sm:$0xff]  ;;  %v10016_v57 = vpack.c.bf16 %v823_v52, %v823_v52  ;;  %v10020_v59 = vpack.c.bf16 %v573_v41, %v573_v41  ;;  %v9310_v62 = vld [vmem:[%s12123_s1 + $0x18] sm:$0xff]  }
  0x4d   : > { %548 = vst.msk [vmem:[#allocation3 + $0x118] sm:$0xf] %vm533_vm2, %v9930_v0  ;;  %549 = vst.msk [vmem:[#allocation3 + $0x12c] sm:$0xf] %vm533_vm2, %v9932_v1  ;;  %v10027_v61 = vpack.c.bf16 %v574_v53, %v574_v53  ;;  %v10033_v2 = vld [vmem:[%s9775_s22 + $0xe8] sm:$0xff]  ;;  %v576_v3 = vld [vmem:[#allocation2 + $0x79] sm:$0xff]  ;;  %8699 = vmatpush3.bf16.msra.mxu0 %v9310_v62 }
  0x4e   : > { %550 = vst.msk [vmem:[#allocation3 + $0x140] sm:$0xf] %vm533_vm2, %v9936_v4  ;;  %551 = vst.msk [vmem:[#allocation3 + $0x154] sm:$0xf] %vm533_vm2, %v9938_v5  ;;  %706 = vrot.lane.b32.xlu0 %v9988_v39, %s9612_s30  ;;  %v824_v12 = vld [vmem:[#allocation2 + $0xa] sm:$0xff]  ;;  %v825_v44 = vld [vmem:[#allocation2 + $0x1a] sm:$0xff]  ;;  %v10073_v48 = vpack.c.bf16 %v576_v3, %v576_v3 }
  0x4f   : > { %552 = vst.msk [vmem:[#allocation3 + $0x168] sm:$0xf] %vm533_vm2, %v9943_v13  ;;  %12185 = vst [vmem:[#allocation30_spill] sm:$0xff] %v9958_v32  ;;  %v10044_v15 = vpack.c.bf16 %v824_v12, %v824_v12  ;;  %v9312_v22 = vld [vmem:[%s12123_s1 + $0x10] sm:$0xff]   ;;  %v9313_v42 = vld [vmem:[%s12123_s1 + $0x48] sm:$0xff]  }
  0x50   : > { %363 = vst.msk [vmem:[#allocation2 + $0x121] sm:$0xff] %vm284_vm0, %v9958_v32  ;;  %12186 = vst [vmem:[#allocation31_spill] sm:$0xff] %v9966_v34  ;;  %1153 = vrot.lane.b32.xlu1 %v9897_v46, %s9612_s30  ;;  %v575_v46 = vld [vmem:[#allocation2 + $0x69] sm:$0xff]  ;;  %v10069_v45 = vld [vmem:[%s9775_s22 + $0xf8] sm:$0xff] }
  0x51   : > { %12187 = vst [vmem:[#allocation32_spill] sm:$0xff] %v9969_v35  ;;  %12188 = vst [vmem:[#allocation33_spill] sm:$0xff] %v9972_v36  ;;  %v10050_v38 = vld [vmem:[%s9775_s22 + $0xf0] sm:$0xff]  ;;  %v10054_v41 = vpack.c.bf16 %v575_v46, %v575_v46  ;;  %v9315_v51 = vld [vmem:[%s12123_s1 + $0x40] sm:$0xff]   ;;  %s243_s22 = sand.u32 1, %s9601_s24  }
  0x52   : > { %364 = vst.msk [vmem:[#allocation2 + $0x129] sm:$0xff] %vm284_vm0, %v9966_v34  ;;  %365 = vst.msk [vmem:[#allocation2 + $0x139] sm:$0xff] %vm284_vm0, %v9969_v35  ;;  %1155 = vrot.lane.b32.xlu0 %v9902_v49, %s9612_s30  ;;  %v9311_v49 = vld [vmem:[%s12123_s1 + $0x50] sm:$0xff]   ;;  %v577_v52 = vld [vmem:[#allocation2 + $0x81] sm:$0xff]  ;;  %s7262_s16 = sshll.u32 %s243_s22, 8  ;;  %s12082_s5 = scalar_lea.sflag [#allocation6], %s243_s22 }
  0x53   : > { %366 = vst.msk [vmem:[#allocation2 + $0x141] sm:$0xff] %vm284_vm0, %v9972_v36  ;;  %12189 = vst [vmem:[#allocation34_spill] sm:$0xff] %v9981_v37  ;;  %8700 = vmatprep.subr.bf16.mxu0 %v9311_v49  ;;  %v826_v53 = vld [vmem:[#allocation2 + $0x22] sm:$0xff]  ;;  %v827_v62 = vld [vmem:[#allocation2 + $0x32] sm:$0xff]  ;;  %s11865_s17 = scalar_lea.vmem [#allocation5], %s7262_s16 }
  0x54   : > { %367 = vst.msk [vmem:[#allocation2 + $0x151] sm:$0xff] %vm284_vm0, %v9981_v37  ;;  %12190 = vst [vmem:[#allocation35_spill] sm:$0xff] %v9993_v40  ;;  %708 = vrot.lane.b32.xlu1 %v10020_v59, %s9612_s30  ;;  %8701 = vmatpush3.bf16.msra.mxu0 %v9312_v22  ;;  %v828_v46 = vld [vmem:[#allocation2 + $0x3a] sm:$0xff]  ;;  %v829_v3 = vld [vmem:[#allocation2 + $0x4a] sm:$0xff]  ;;  %v10093_v49 = vpack.c.bf16 %v827_v62, %v827_v62  ;;  %s7196_s19 = sshll.u32 %s11865_s17, 4  ;;  %s12072_s19 = int_to_ptr.vmem [resolvable:$true] %s7196_s19 }
  0x55   : > { %368 = vst.msk [vmem:[#allocation2 + $0x159] sm:$0xff] %vm284_vm0, %v9993_v40  ;;  %12191 = vst [vmem:[#allocation36_spill] sm:$0xff] %v10006_v47  ;;  %8702 = vmatprep.subr.bf16.mxu0 %v9313_v42  ;;  %v10095_v12 = vpack.c.bf16 %v828_v46, %v828_v46  ;;  %v10097_v22 = vpack.c.bf16 %v829_v3, %v829_v3  ;;  %v830_v42 = vld [vmem:[#allocation2 + $0x52] sm:$0xff]  ;;  %v832_v46 = vld [vmem:[#allocation2 + $0x6a] sm:$0xff]  ;;  %s9549_s29 = scalar_lea.vmem %s12072_s19, 4096  ;;  %p9556_p0 = scmp.lt.s32.totalorder %s12072_s19, %s9554_s11 }
  0x56   : > { %369 = vst.msk [vmem:[#allocation2 + $0x169] sm:$0xff] %vm284_vm0, %v10006_v47  ;;  %12192 = vst [vmem:[#allocation37_spill] sm:$0xff] %v10033_v2  ;;  %710 = vrot.lane.b32.xlu0 %v10027_v61, %s9612_s30  ;;  %v833_v3 = vld [vmem:[#allocation2 + $0x7a] sm:$0xff]  ;;  %v835_v47 = vld [vmem:[#allocation2 + $0x92] sm:$0xff]  ;;  %p9550_p11 = scmp.ne.s32.totalorder %s12072_s19, %s9549_s29  ;;  %p9557_p1 = scmp.lt.s32.totalorder %s9555_s12, %s9549_s29 }
  0x57   : > { %534 = vst.msk [vmem:[#allocation3] sm:$0xf] %vm533_vm2, %v8113_v43  ;;  %535 = vst.msk [vmem:[#allocation3 + $0x14] sm:$0xf] %vm533_vm2, %v8114_v56  ;;  %v10063_v43 = vpack.c.bf16 %v825_v44, %v825_v44  ;;  %v10084_v56 = vpack.c.bf16 %v826_v53, %v826_v53  ;;  %v578_v44 = vld [vmem:[#allocation2 + $0x91] sm:$0xff]  ;;  %v10099_v53 = vpack.c.bf16 %v830_v42, %v830_v42  ;;  %v834_v42 = vld [vmem:[#allocation2 + $0x82] sm:$0xff] }
  0x58   : > { %983 = vst.msk [vmem:[#allocation3 + $0x4] sm:$0xf] %vm533_vm2, %v10016_v57  ;;  %12193 = vst [vmem:[#allocation38_spill] sm:$0xff] %v10050_v38  ;;  %1157 = vrot.lane.b32.xlu1 %v9904_v50, %s9612_s30  ;;  %v9314_v50 = vld [vmem:[%s12123_s1 + $0x8] sm:$0xff]   ;;  %v581_v40 = vld [vmem:[#allocation2 + $0xb1] sm:$0xff]  ;;  %p9551_p12 = pnand %p9550_p11, %p9692_p5  ;;  %p9558_p2 = por %p9557_p1, %p9556_p0 }
  0x59   : > { %370 = vst.msk [vmem:[#allocation2 + $0x171] sm:$0xff] %vm284_vm0, %v10033_v2  ;;  %371 = vst.msk [vmem:[#allocation2 + $0x181] sm:$0xff] %vm284_vm0, %v10050_v38  ;;  %8703 = vmatpush3.bf16.msra.mxu0 %v9314_v50  ;;  %v10104_v50 = vld [vmem:[%s12123_s1 + $0x118] sm:$0xff]   ;;  %v831_v2 = vld [vmem:[#allocation2 + $0x62] sm:$0xff] }
  0x5a   : > { %984 = vst.msk [vmem:[#allocation3 + $0x18] sm:$0xf] %vm533_vm2, %v10044_v15  ;;  %12194 = vst [vmem:[#allocation39_spill] sm:$0xff] %v10069_v45  ;;  %1159 = vrot.lane.b32.xlu0 %v9908_v54, %s9612_s30  ;;  %v9316_v54 = vld [vmem:[%s12123_s1] sm:$0xff]   ;;  %8704 = vmatprep.subr.bf16.mxu0 %v9315_v51  ;;  %v10108_v51 = vpack.c.bf16 %v577_v52, %v577_v52  ;;  %v10116_v62 = vpack.c.bf16 %v831_v2, %v831_v2  ;;  %v394_v27 = vld [vmem:[#allocation2 + $0xf8] sm:$0xff]  ;;  %p9552_p13 = pneg %p9551_p12 }
  0x5b   : > { %372 = vst.msk [vmem:[#allocation2 + $0x189] sm:$0xff] %vm284_vm0, %v10069_v45  ;;  %v10122_v52 = vpack.c.bf16 %v833_v3, %v833_v3  ;;  %v10124_v45 = vpack.c.bf16 %v834_v42, %v834_v42  ;;  %v836_v38 = vld [vmem:[#allocation2 + $0x9a] sm:$0xff]  ;;  %v10128_v2 = vpack.c.bf16 %v578_v44, %v578_v44  ;;  %v838_v44 = vld [vmem:[#allocation2 + $0xb2] sm:$0xff]  ;;  %v839_v35 = vld [vmem:[#allocation2 + $0xc2] sm:$0xff] }
  0x5c   : > { %985 = vst.msk [vmem:[#allocation3 + $0x2c] sm:$0xf] %vm533_vm2, %v10063_v43  ;;  %712 = vrot.lane.b32.xlu1 %v10054_v41, %s9612_s30  ;;  %986 = vst.msk [vmem:[#allocation3 + $0x40] sm:$0xf] %vm533_vm2, %v10084_v56  ;;  %v579_v3 = vld [vmem:[#allocation2 + $0x99] sm:$0xff]  ;;  %v10159_v36 = vpack.c.bf16 %v838_v44, %v838_v44  ;;  %v10169_v37 = vpack.c.bf16 %v839_v35, %v839_v35  ;;  %v586_v23 = vld [vmem:[#allocation2 + $0xf1] sm:$0xff]  ;;  %p9559_p3 = pnand %p9558_p2, %p9552_p13 }
  0x5d   : > { %987 = vst.msk [vmem:[#allocation3 + $0x54] sm:$0xf] %vm533_vm2, %v10093_v49  ;;  %988 = vst.msk [vmem:[#allocation3 + $0x68] sm:$0xf] %vm533_vm2, %v10095_v12  ;;  %8705 = vmatpush3.bf16.msra.mxu0 %v9316_v54  ;;  %v10133_v54 = vpack.c.bf16 %v835_v47, %v835_v47  ;;  %v10157_v42 = vpack.c.bf16 %v579_v3, %v579_v3  ;;  %v10177_v3 = vpack.c.bf16 %v581_v40, %v581_v40  ;;  %v392_v44 = vld [vmem:[#allocation2 + $0xe0] sm:$0xff]  ;;  %v843_v29 = vld [vmem:[#allocation2 + $0xf2] sm:$0xff] }
  0x5e   : > { %714 = vrot.lane.b32.xlu0 %v10073_v48, %s9612_s30  ;;  %989 = vst.msk [vmem:[#allocation3 + $0x7c] sm:$0xf] %vm533_vm2, %v10097_v22  ;;  %990 = vst.msk [vmem:[#allocation3 + $0x90] sm:$0xf] %vm533_vm2, %v10099_v53  ;;  %9178 = vmatprep.subr.bf16.mxu0 %v10104_v50  ;;  %v841_v31 = vld [vmem:[#allocation2 + $0xda] sm:$0xff]  ;;  %v8132_v34 = vpack.c.bf16 %v392_v44, %v392_v44  ;;  %v10208_v28 = vpack.c.bf16 %v843_v29, %v843_v29  ;;  %v1035_v29 = vld [vmem:[#allocation2 + $0x108] sm:$0xff] }
  0x5f   : > { %991 = vst.msk [vmem:[#allocation3 + $0xa4] sm:$0xf] %vm533_vm2, %v10116_v62  ;;  %993 = vst.msk [vmem:[#allocation3 + $0xcc] sm:$0xf] %vm533_vm2, %v10122_v52  ;;  %v10189_v30 = vpack.c.bf16 %v841_v31, %v841_v31  ;;  %v584_v40 = vld [vmem:[#allocation2 + $0xd9] sm:$0xff]  ;;  %v1033_v31 = vld [vmem:[#allocation2 + $0xf0] sm:$0xff] }
  0x60   : > { %1161 = vrot.lane.b32.xlu1 %v9910_v55, %s9612_s30  ;;  %v10120_v55 = vpack.c.bf16 %v832_v46, %v832_v46  ;;  %v10135_v46 = vpack.c.bf16 %v836_v38, %v836_v38  ;;  %994 = vst.msk [vmem:[#allocation3 + $0xe0] sm:$0xf] %vm533_vm2, %v10124_v45  ;;  %995 = vst.msk [vmem:[#allocation3 + $0xf4] sm:$0xf] %vm533_vm2, %v10133_v54  ;;  %v580_v38 = vld [vmem:[#allocation2 + $0xa9] sm:$0xff]  ;;  %v8163_v32 = vpack.c.bf16 %v584_v40, %v584_v40  ;;  %v1034_v40 = vld [vmem:[#allocation2 + $0xf8] sm:$0xff] }
  0x61   : > { %998 = vst.msk [vmem:[#allocation3 + $0x130] sm:$0xf] %vm533_vm2, %v10159_v36  ;;  %999 = vst.msk [vmem:[#allocation3 + $0x144] sm:$0xf] %vm533_vm2, %v10169_v37  ;;  %v844_v25 = vld [vmem:[#allocation2 + $0xfa] sm:$0xff]  ;;  %v847_v20 = vld [vmem:[#allocation2 + $0x122] sm:$0xff] }
  0x62   : > { %1163 = vrot.lane.b32.xlu0 %v9915_v58, %s9612_s30  ;;  %992 = vst.msk [vmem:[#allocation3 + $0xb8] sm:$0xf] %vm533_vm2, %v10120_v55  ;;  %v837_v58 = vld [vmem:[#allocation2 + $0xaa] sm:$0xff]  ;;  %996 = vst.msk [vmem:[#allocation3 + $0x108] sm:$0xf] %vm533_vm2, %v10135_v46  ;;  %v1272_v7 = vld [vmem:[#allocation2 + $0x21] sm:$0xff] }
  0x63   : > { %v10149_v47 = vpack.c.bf16 %v837_v58, %v837_v58  ;;  %v10163_v58 = vpack.c.bf16 %v580_v38, %v580_v38  ;;  %553 = vst.msk [vmem:[#allocation3 + $0x17c] sm:$0xf] %vm533_vm2, %v8132_v34  ;;  %1001 = vst.msk [vmem:[#allocation3 + $0x16c] sm:$0xf] %vm533_vm2, %v10189_v30  ;;  %v393_v34 = vld [vmem:[#allocation2 + $0xf0] sm:$0xff] }
  0x64   : > { %716 = vrot.lane.b32.xlu1 %v10108_v51, %s9612_s30  ;;  %1003 = vst.msk [vmem:[#allocation3 + $0x194] sm:$0xf] %vm533_vm2, %v10208_v28  ;;  %v589_v17 = vld [vmem:[#allocation2 + $0x111] sm:$0xff] }
  0x65   : > { %997 = vst.msk [vmem:[#allocation3 + $0x11c] sm:$0xf] %vm533_vm2, %v10149_v47 }
  0x66   : > { %718 = vrot.lane.b32.xlu0 %v10128_v2, %s9612_s30 }
  0x68   : > { %1165 = vrot.lane.b32.xlu1 %v9921_v60, %s9612_s30  ;;  %v582_v60 = vld [vmem:[#allocation2 + $0xc1] sm:$0xff] }
  0x69   : > { %v10183_v35 = vpack.c.bf16 %v582_v60, %v582_v60  ;;  %v842_v60 = vld [vmem:[#allocation2 + $0xe2] sm:$0xff] }
  0x6a   : > { %1167 = vrot.lane.b32.xlu0 %v9930_v0, %s9612_s30  ;;  %v840_v0 = vld [vmem:[#allocation2 + $0xca] sm:$0xff]  ;;  %v10200_v44 = vpack.c.bf16 %v842_v60, %v842_v60  ;;  %v585_v60 = vld [vmem:[#allocation2 + $0xe1] sm:$0xff] }
  0x6b   : > { %v10179_v38 = vpack.c.bf16 %v840_v0, %v840_v0 }
  0x6c   : > { %720 = vrot.lane.b32.xlu1 %v10157_v42, %s9612_s30  ;;  %1002 = vst.msk [vmem:[#allocation3 + $0x180] sm:$0xf] %vm533_vm2, %v10200_v44 }
  0x6d   : > { %1000 = vst.msk [vmem:[#allocation3 + $0x158] sm:$0xf] %vm533_vm2, %v10179_v38 }
  0x6e   : > { %722 = vrot.lane.b32.xlu0 %v10163_v58, %s9612_s30 }
  0x70   : > { %1169 = vrot.lane.b32.xlu1 %v9932_v1, %s9612_s30  ;;  %v583_v1 = vld [vmem:[#allocation2 + $0xc9] sm:$0xff] }
  0x71   : > { %v10198_v0 = vpack.c.bf16 %v583_v1, %v583_v1  ;;  %v8134_v1 = vpack.c.bf16 %v394_v27, %v394_v27  ;;  %v10216_v27 = vpack.c.bf16 %v844_v25, %v844_v25  ;;  %v588_v25 = vld [vmem:[#allocation2 + $0x109] sm:$0xff] }
  0x72   : > { %1171 = vrot.lane.b32.xlu0 %v9936_v4, %s9612_s30  ;;  %v1032_v4 = vld [vmem:[#allocation2 + $0xe0] sm:$0xff] }
  0x73   : > { %v8226_v26 = vpack.c.bf16 %v1032_v4, %v1032_v4  ;;  %555 = vst.msk [vmem:[#allocation3 + $0x1a4] sm:$0xf] %vm533_vm2, %v8134_v1  ;;  %v8164_v4 = vpack.c.bf16 %v585_v60, %v585_v60  ;;  %1004 = vst.msk [vmem:[#allocation3 + $0x1a8] sm:$0xf] %vm533_vm2, %v10216_v27  ;;  %v8228_v1 = vpack.c.bf16 %v1034_v40, %v1034_v40 }
  0x74   : > { %724 = vrot.lane.b32.xlu1 %v10177_v3, %s9612_s30  ;;  %v8229_v60 = vpack.c.bf16 %v1035_v29, %v1035_v29  ;;  %v1037_v29 = vld [vmem:[#allocation2 + $0x120] sm:$0xff] }
  0x76   : > { %726 = vrot.lane.b32.xlu0 %v10183_v35, %s9612_s30 }
  0x78   : > { %1173 = vrot.lane.b32.xlu1 %v9938_v5, %s9612_s30  ;;  %v8133_v5 = vpack.c.bf16 %v393_v34, %v393_v34  ;;  %v8165_v34 = vpack.c.bf16 %v586_v23, %v586_v23  ;;  %v1036_v23 = vld [vmem:[#allocation2 + $0x110] sm:$0xff] }
  0x7a   : > { %1175 = vrot.lane.b32.xlu0 %v9943_v13, %s9612_s30  ;;  %v8227_v13 = vpack.c.bf16 %v1033_v31, %v1033_v31  ;;  %554 = vst.msk [vmem:[#allocation3 + $0x190] sm:$0xf] %vm533_vm2, %v8133_v5  ;;  %v396_v31 = vld [vmem:[#allocation2 + $0x110] sm:$0xff] }
  0x7b   : > { %v845_v5 = vld [vmem:[#allocation2 + $0x10a] sm:$0xff]  ;;  %v8136_v24 = vpack.c.bf16 %v396_v31, %v396_v31 }
  0x7c   : > { %728 = vrot.lane.b32.xlu1 %v10198_v0, %s9612_s30  ;;  %v10222_v18 = vpack.c.bf16 %v845_v5, %v845_v5 }
  0x7d   : > { %557 = vst.msk [vmem:[#allocation3 + $0x1cc] sm:$0xf] %vm533_vm2, %v8136_v24  ;;  %v8230_v24 = vpack.c.bf16 %v1036_v23, %v1036_v23  ;;  %v8168_v23 = vpack.c.bf16 %v589_v17, %v589_v17  ;;  %v591_v17 = vld [vmem:[#allocation2 + $0x129] sm:$0xff] }
  0x7e   : > { %730 = vrot.lane.b32.xlu0 %v8163_v32, %s9612_s30  ;;  %v395_v32 = vld [vmem:[#allocation2 + $0x108] sm:$0xff]  ;;  %1005 = vst.msk [vmem:[#allocation3 + $0x1bc] sm:$0xf] %vm533_vm2, %v10222_v18 }
  0x7f   : > { %v8135_v21 = vpack.c.bf16 %v395_v32, %v395_v32  ;;  %v8167_v32 = vpack.c.bf16 %v588_v25, %v588_v25  ;;  %v848_v25 = vld [vmem:[#allocation2 + $0x12a] sm:$0xff] }
  0x80   : > { %1177 = vrot.lane.b32.xlu1 %v8226_v26, %s9612_s30  ;;  %v587_v26 = vld [vmem:[#allocation2 + $0xf9] sm:$0xff] }
  0x81   : > { %556 = vst.msk [vmem:[#allocation3 + $0x1b8] sm:$0xf] %vm533_vm2, %v8135_v21  ;;  %v8166_v40 = vpack.c.bf16 %v587_v26, %v587_v26  ;;  %v397_v21 = vld [vmem:[#allocation2 + $0x120] sm:$0xff]  ;;  %v10236_v26 = vpack.c.bf16 %v847_v20, %v847_v20 }
  0x82   : > { %1179 = vrot.lane.b32.xlu0 %v8227_v13, %s9612_s30  ;;  %v846_v13 = vld [vmem:[#allocation2 + $0x112] sm:$0xff]  ;;  %v8137_v31 = vpack.c.bf16 %v397_v21, %v397_v21 }
  0x83   : > { %1007 = vst.msk [vmem:[#allocation3 + $0x1e4] sm:$0xf] %vm533_vm2, %v10236_v26  ;;  %v1039_v21 = vld [vmem:[#allocation2 + $0x138] sm:$0xff] }
  0x84   : > { %732 = vrot.lane.b32.xlu1 %v8164_v4, %s9612_s30  ;;  %v10230_v4 = vpack.c.bf16 %v846_v13, %v846_v13  ;;  %558 = vst.msk [vmem:[#allocation3 + $0x1e0] sm:$0xf] %vm533_vm2, %v8137_v31  ;;  %v10244_v13 = vpack.c.bf16 %v848_v25, %v848_v25  ;;  %v8233_v25 = vpack.c.bf16 %v1039_v21, %v1039_v21  ;;  %v401_v21 = vld [vmem:[#allocation2 + $0x150] sm:$0xff] }
  0x86   : > { %734 = vrot.lane.b32.xlu0 %v8165_v34, %s9612_s30  ;;  %1006 = vst.msk [vmem:[#allocation3 + $0x1d0] sm:$0xf] %vm533_vm2, %v10230_v4  ;;  %v398_v34 = vld [vmem:[#allocation2 + $0x128] sm:$0xff]  ;;  %1008 = vst.msk [vmem:[#allocation3 + $0x1f8] sm:$0xf] %vm533_vm2, %v10244_v13 }
  0x87   : > { %v8138_v5 = vpack.c.bf16 %v398_v34, %v398_v34  ;;  %v849_v34 = vld [vmem:[#allocation2 + $0x13a] sm:$0xff] }
  0x88   : > { %1181 = vrot.lane.b32.xlu1 %v8228_v1, %s9612_s30  ;;  %v590_v1 = vld [vmem:[#allocation2 + $0x121] sm:$0xff] }
  0x89   : > { %559 = vst.msk [vmem:[#allocation3 + $0x1f4] sm:$0xf] %vm533_vm2, %v8138_v5  ;;  %v8169_v20 = vpack.c.bf16 %v590_v1, %v590_v1  ;;  %v592_v1 = vld [vmem:[#allocation2 + $0x139] sm:$0xff] }
  0x8a   : > { %1183 = vrot.lane.b32.xlu0 %v8229_v60, %s9612_s30  ;;  %v8231_v60 = vpack.c.bf16 %v1037_v29, %v1037_v29  ;;  %v400_v29 = vld [vmem:[#allocation2 + $0x140] sm:$0xff] }
  0x8b   : > { %v8140_v19 = vpack.c.bf16 %v400_v29, %v400_v29  ;;  %v8171_v29 = vpack.c.bf16 %v592_v1, %v592_v1  ;;  %v593_v1 = vld [vmem:[#allocation2 + $0x141] sm:$0xff] }
  0x8c   : > { %736 = vrot.lane.b32.xlu1 %v8166_v40, %s9612_s30  ;;  %v1038_v40 = vld [vmem:[#allocation2 + $0x128] sm:$0xff] }
  0x8d   : > { %v8232_v31 = vpack.c.bf16 %v1038_v40, %v1038_v40  ;;  %561 = vst.msk [vmem:[#allocation3 + $0x21c] sm:$0xf] %vm533_vm2, %v8140_v19  ;;  %v9344_v19 = vld [vmem:[%s12123_s1 + $0xf8] sm:$0xff]  }
  0x8e   : > { %738 = vrot.lane.b32.xlu0 %v8167_v32, %s9612_s30  ;;  %v399_v32 = vld [vmem:[#allocation2 + $0x138] sm:$0xff]  ;;  %8802 = vmatprep.subr.bf16.mxu1 %v9344_v19  ;;  %v8172_v19 = vpack.c.bf16 %v593_v1, %v593_v1 }
  0x8f   : > { %v8139_v5 = vpack.c.bf16 %v399_v32, %v399_v32  ;;  %v1040_v32 = vld [vmem:[#allocation2 + $0x140] sm:$0xff] }
  0x90   : > { %1185 = vrot.lane.b32.xlu1 %v8230_v24, %s9612_s30  ;;  %v10250_v24 = vpack.c.bf16 %v849_v34, %v849_v34  ;;  %v402_v34 = vld [vmem:[#allocation2 + $0x158] sm:$0xff] }
  0x91   : > { %560 = vst.msk [vmem:[#allocation3 + $0x208] sm:$0xf] %vm533_vm2, %v8139_v5  ;;  %v8141_v5 = vpack.c.bf16 %v401_v21, %v401_v21  ;;  %v852_v21 = vld [vmem:[#allocation2 + $0x15a] sm:$0xff] }
  0x92   : > { %1187 = vrot.lane.b32.xlu0 %v8231_v60, %s9612_s30  ;;  %1009 = vst.msk [vmem:[#allocation3 + $0x20c] sm:$0xf] %vm533_vm2, %v10250_v24  ;;  %v850_v60 = vld [vmem:[#allocation2 + $0x142] sm:$0xff] }
  0x93   : > { %v10258_v40 = vpack.c.bf16 %v850_v60, %v850_v60  ;;  %v851_v60 = vld [vmem:[#allocation2 + $0x152] sm:$0xff]  ;;  %562 = vst.msk [vmem:[#allocation3 + $0x230] sm:$0xf] %vm533_vm2, %v8141_v5 }
  0x94   : > { %740 = vrot.lane.b32.xlu1 %v8168_v23, %s9612_s30  ;;  %v8170_v23 = vpack.c.bf16 %v591_v17, %v591_v17  ;;  %v8142_v17 = vpack.c.bf16 %v402_v34, %v402_v34  ;;  %v10270_v11 = vpack.c.bf16 %v851_v60, %v851_v60  ;;  %v10281_v34 = vpack.c.bf16 %v852_v21, %v852_v21  ;;  %v403_v60 = vld [vmem:[#allocation2 + $0x168] sm:$0xff] }
  0x95   : > { %1010 = vst.msk [vmem:[#allocation3 + $0x220] sm:$0xf] %vm533_vm2, %v10258_v40  ;;  %v8143_v21 = vpack.c.bf16 %v403_v60, %v403_v60  ;;  %v854_v60 = vld [vmem:[#allocation2 + $0x172] sm:$0xff] }
  0x96   : > { %742 = vrot.lane.b32.xlu0 %v8169_v20, %s9612_s30  ;;  %v1041_v20 = vld [vmem:[#allocation2 + $0x150] sm:$0xff]  ;;  %563 = vst.msk [vmem:[#allocation3 + $0x244] sm:$0xf] %vm533_vm2, %v8142_v17  ;;  %1011 = vst.msk [vmem:[#allocation3 + $0x234] sm:$0xf] %vm533_vm2, %v10270_v11  ;;  %v1043_v17 = vld [vmem:[#allocation2 + $0x168] sm:$0xff] }
  0x97   : > { %v8235_v16 = vpack.c.bf16 %v1041_v20, %v1041_v20  ;;  %v1042_v20 = vld [vmem:[#allocation2 + $0x158] sm:$0xff]  ;;  %1012 = vst.msk [vmem:[#allocation3 + $0x248] sm:$0xf] %vm533_vm2, %v10281_v34  ;;  %564 = vst.msk [vmem:[#allocation3 + $0x258] sm:$0xf] %vm533_vm2, %v8143_v21 }
  0x98   : > { %1189 = vrot.lane.b32.xlu1 %v8232_v31, %s9612_s30  ;;  %v8234_v31 = vpack.c.bf16 %v1040_v32, %v1040_v32  ;;  %v9346_v32 = vld [vmem:[%s12123_s1 + $0xf0] sm:$0xff]   ;;  %v8236_v1 = vpack.c.bf16 %v1042_v20, %v1042_v20  ;;  %v9352_v20 = vld [vmem:[%s12123_s1 + $0xe0] sm:$0xff]  }
  0x9a   : > { %1191 = vrot.lane.b32.xlu0 %v8233_v25, %s9612_s30  ;;  %v9345_v25 = vld [vmem:[%s12123_s1 + $0xb8] sm:$0xff]  }
  0x9b   : > { %8803 = vmatpush3.bf16.msra.mxu1 %v9345_v25  ;;  %v404_v25 = vld [vmem:[#allocation2 + $0x170] sm:$0xff] }
  0x9c   : > { %744 = vrot.lane.b32.xlu1 %v8170_v23, %s9612_s30  ;;  %v594_v23 = vld [vmem:[#allocation2 + $0x151] sm:$0xff]  ;;  %8804 = vmatprep.subr.bf16.mxu1 %v9346_v32  ;;  %v8144_v10 = vpack.c.bf16 %v404_v25, %v404_v25  ;;  %v10307_v25 = vpack.c.bf16 %v854_v60, %v854_v60 }
  0x9d   : > { %v8173_v5 = vpack.c.bf16 %v594_v23, %v594_v23  ;;  %v853_v32 = vld [vmem:[#allocation2 + $0x16a] sm:$0xff]  ;;  %v595_v23 = vld [vmem:[#allocation2 + $0x159] sm:$0xff] }
  0x9e   : > { %746 = vrot.lane.b32.xlu0 %v8171_v29, %s9612_s30  ;;  %v9347_v29 = vld [vmem:[%s12123_s1 + $0xb0] sm:$0xff]   ;;  %v10296_v14 = vpack.c.bf16 %v853_v32, %v853_v32  ;;  %565 = vst.msk [vmem:[#allocation3 + $0x26c] sm:$0xf] %vm533_vm2, %v8144_v10  ;;  %v9353_v10 = vld [vmem:[%s12123_s1 + $0xa0] sm:$0xff]   ;;  %1014 = vst.msk [vmem:[#allocation3 + $0x270] sm:$0xf] %vm533_vm2, %v10307_v25 }
  0x9f   : > { %8805 = vmatpush3.bf16.msra.mxu1 %v9347_v29  ;;  %v8237_v29 = vpack.c.bf16 %v1043_v17, %v1043_v17  ;;  %v1044_v17 = vld [vmem:[#allocation2 + $0x170] sm:$0xff]  ;;  %v1271_v32 = vld [vmem:[#allocation2 + $0x19] sm:$0xff] }
  0xa0   : > { %1193 = vrot.lane.b32.xlu1 %v8234_v31, %s9612_s30  ;;  %v9350_v31 = vld [vmem:[%s12123_s1 + $0xe8] sm:$0xff]   ;;  %1013 = vst.msk [vmem:[#allocation3 + $0x25c] sm:$0xf] %vm533_vm2, %v10296_v14  ;;  %v8238_v60 = vpack.c.bf16 %v1044_v17, %v1044_v17  ;;  %v1721_v17 = vld [vmem:[#allocation2 + $0x38] sm:$0xff] }
  0xa1   : > { %8806 = vmatprep.subr.bf16.mxu1 %v9350_v31  ;;  %v695_v31 = vpop.permute.xlu0 %694 }
  0xa2   : > { %1195 = vrot.lane.b32.xlu0 %v8235_v16, %s9612_s30  ;;  %v9351_v16 = vld [vmem:[%s12123_s1 + $0xa8] sm:$0xff]   ;;  %791 = vst.msk [vmem:[#allocation3] sm:$0xf] %vm790_vm3, %v695_v31  ;;  %v8241_v31 = vpack.c.bf16 %v1271_v32, %v1271_v32 }
  0xa3   : > { %8807 = vmatpush3.bf16.msra.mxu1 %v9351_v16  ;;  %v9357_v16 = vld [vmem:[%s12123_s1 + $0xd8] sm:$0xff]  }
  0xa4   : > { %748 = vrot.lane.b32.xlu1 %v8172_v19, %s9612_s30  ;;  %v596_v19 = vld [vmem:[#allocation2 + $0x169] sm:$0xff]  ;;  %8808 = vmatprep.subr.bf16.mxu1 %v9352_v20  ;;  %1431 = vst.msk [vmem:[#allocation3 + $0x8] sm:$0xf] %vm533_vm2, %v8241_v31 }
  0xa5   : > { %v8175_v21 = vpack.c.bf16 %v596_v19, %v596_v19  ;;  %v1720_v20 = vld [vmem:[#allocation2 + $0x30] sm:$0xff] }
  0xa6   : > { %750 = vrot.lane.b32.xlu0 %v8173_v5, %s9612_s30  ;;  %v8174_v5 = vpack.c.bf16 %v595_v23, %v595_v23  ;;  %v697_v23 = vpop.permute.xlu0 %696  ;;  %v597_v19 = vld [vmem:[#allocation2 + $0x171] sm:$0xff]  ;;  %v8305_v9 = vpack.c.bf16 %v1720_v20, %v1720_v20 }
  0xa7   : > { %8809 = vmatpush3.bf16.msra.mxu1 %v9353_v10  ;;  %792 = vst.msk [vmem:[#allocation3 + $0x14] sm:$0xf] %vm790_vm3, %v697_v23  ;;  %v8242_v10 = vpack.c.bf16 %v1272_v7, %v1272_v7  ;;  %v8176_v32 = vpack.c.bf16 %v597_v19, %v597_v19  ;;  %v9363_v23 = vld [vmem:[%s12123_s1 + $0xc8] sm:$0xff]  }
  0xa8   : > { %1197 = vrot.lane.b32.xlu1 %v8236_v1, %s9612_s30  ;;  %v1045_v1 = vld [vmem:[#allocation2 + $0x180] sm:$0xff]  ;;  %8810 = vmatprep.subr.bf16.mxu1 %v9357_v16  ;;  %1880 = vst.msk [vmem:[#allocation3 + $0xc] sm:$0xf] %vm533_vm2, %v8305_v9  ;;  %v1273_v9 = vld [vmem:[#allocation2 + $0x31] sm:$0xff] }
  0xa9   : > { %v8239_v8 = vpack.c.bf16 %v1045_v1, %v1045_v1  ;;  %1432 = vst.msk [vmem:[#allocation3 + $0x1c] sm:$0xf] %vm533_vm2, %v8242_v10  ;;  %v9360_v1 = vld [vmem:[%s12123_s1 + $0x90] sm:$0xff]   ;;  %v1722_v10 = vld [vmem:[#allocation2 + $0x48] sm:$0xff] }
  0xaa   : > { %1199 = vrot.lane.b32.xlu0 %v8237_v29, %s9612_s30  ;;  %v9358_v29 = vld [vmem:[%s12123_s1 + $0x98] sm:$0xff]  }
  0xab   : > { %8811 = vmatpush3.bf16.msra.mxu1 %v9358_v29  ;;  %v8243_v29 = vpack.c.bf16 %v1273_v9, %v1273_v9  ;;  %v2171_v9 = vld [vmem:[#allocation2 + $0x52] sm:$0xff] }
  0xac   : > { %752 = vrot.lane.b32.xlu1 %v8174_v5, %s9612_s30  ;;  %v9359_v5 = vld [vmem:[%s12123_s1 + $0xd0] sm:$0xff]  }
  0xad   : > { %8812 = vmatprep.subr.bf16.mxu1 %v9359_v5  ;;  %v2168_v5 = vld [vmem:[#allocation2 + $0x32] sm:$0xff]  ;;  %1433 = vst.msk [vmem:[#allocation3 + $0x30] sm:$0xf] %vm533_vm2, %v8243_v29 }
  0xae   : > { %v1144_v6 = vpop.permute.xlu1 %1143  ;;  %754 = vrot.lane.b32.xlu0 %v8175_v21, %s9612_s30  ;;  %v8306_v21 = vpack.c.bf16 %v1721_v17, %v1721_v17  ;;  %v8307_v17 = vpack.c.bf16 %v1722_v10, %v1722_v10 }
  0xaf   : > { %1239 = vst.msk [vmem:[#allocation3 + $0x4] sm:$0xf] %vm790_vm3, %v1144_v6  ;;  %v1046_v6 = vld [vmem:[#allocation2 + $0x188] sm:$0xff]  ;;  %8813 = vmatpush3.bf16.msra.mxu1 %v9360_v1 }
  0xb0   : > { %1201 = vrot.lane.b32.xlu1 %v8238_v60, %s9612_s30  ;;  %v699_v7 = vpop.permute.xlu0 %698  ;;  %1881 = vst.msk [vmem:[#allocation3 + $0x20] sm:$0xf] %vm533_vm2, %v8306_v21  ;;  %v1274_v60 = vld [vmem:[#allocation2 + $0x39] sm:$0xff]  ;;  %v8240_v20 = vpack.c.bf16 %v1046_v6, %v1046_v6  ;;  %8814 = vmatprep.subr.bf16.mxu1 %v9363_v23  ;;  %v8369_v21 = vpack.c.bf16 %v2168_v5, %v2168_v5  ;;  %v2170_v6 = vld [vmem:[#allocation2 + $0x4a] sm:$0xff]  ;;  %1882 = vst.msk [vmem:[#allocation3 + $0x34] sm:$0xf] %vm533_vm2, %v8307_v17 }
  0xb1   : > { %793 = vst.msk [vmem:[#allocation3 + $0x28] sm:$0xf] %vm790_vm3, %v699_v7  ;;  %v8244_v19 = vpack.c.bf16 %v1274_v60, %v1274_v60  ;;  %v2169_v7 = vld [vmem:[#allocation2 + $0x3a] sm:$0xff]  ;;  %v8371_v60 = vpack.c.bf16 %v2170_v6, %v2170_v6 }
  0xb2   : > { %v1146_v16 = vpop.permute.xlu1 %1145  ;;  %1203 = vrot.lane.b32.xlu0 %v8239_v8, %s9612_s30  ;;  %v9364_v8 = vld [vmem:[%s12123_s1 + $0x88] sm:$0xff]   ;;  %v9365_v23 = vld [vmem:[%s12123_s1 + $0xc0] sm:$0xff]   ;;  %2328 = vst.msk [vmem:[#allocation3 + $0x10] sm:$0xf] %vm533_vm2, %v8369_v21  ;;  %v1276_v21 = vld [vmem:[#allocation2 + $0x51] sm:$0xff] }
  0xb3   : > { %1240 = vst.msk [vmem:[#allocation3 + $0x18] sm:$0xf] %vm790_vm3, %v1146_v16  ;;  %8815 = vmatpush3.bf16.msra.mxu1 %v9364_v8  ;;  %v1724_v6 = vld [vmem:[#allocation2 + $0x60] sm:$0xff] }
  0xb4   : > { %756 = vrot.lane.b32.xlu1 %v8176_v32, %s9612_s30  ;;  %v1148_v31 = vpop.permute.xlu0 %1147  ;;  %1434 = vst.msk [vmem:[#allocation3 + $0x44] sm:$0xf] %vm533_vm2, %v8244_v19  ;;  %v8370_v32 = vpack.c.bf16 %v2169_v7, %v2169_v7  ;;  %8816 = vmatprep.subr.bf16.mxu1 %v9365_v23  ;;  %2330 = vst.msk [vmem:[#allocation3 + $0x38] sm:$0xf] %vm533_vm2, %v8371_v60  ;;  %v9328_v7 = vld [vmem:[%s12123_s1 + $0x110] sm:$0xff]   ;;  %v8309_v23 = vpack.c.bf16 %v1724_v6, %v1724_v6 }
  0xb5   : > { %1241 = vst.msk [vmem:[#allocation3 + $0x2c] sm:$0xf] %vm790_vm3, %v1148_v31  ;;  %v8372_v31 = vpack.c.bf16 %v2171_v9, %v2171_v9 }
  0xb6   : > { %v2360_v1 = vld [vmem:[#allocation3] sm:$0xff]  ;;  %v701_v16 = vpop.permute.xlu1 %700  ;;  %1591 = vrot.lane.b32.xlu0 %v10063_v43, %s9612_s30  ;;  %2329 = vst.msk [vmem:[#allocation3 + $0x24] sm:$0xf] %vm533_vm2, %v8370_v32  ;;  %v1725_v32 = vld [vmem:[#allocation2 + $0x68] sm:$0xff]  ;;  %1884 = vst.msk [vmem:[#allocation3 + $0x5c] sm:$0xf] %vm533_vm2, %v8309_v23 }
  0xb7   : > { %4420 = vst.msk [vmem:[#allocation3 + $0x4] sm:$0xf] %vm533_vm2, %v10016_v57  ;;  %v1723_v43 = vld [vmem:[#allocation2 + $0x50] sm:$0xff]  ;;  %v9366_v57 = vld [vmem:[%s12123_s1 + $0x80] sm:$0xff]   ;;  %2331 = vst.msk [vmem:[#allocation3 + $0x4c] sm:$0xf] %vm533_vm2, %v8372_v31  ;;  %v8310_v9 = vpack.c.bf16 %v1725_v32, %v1725_v32 }
  0xb8   : > { %794 = vst.msk [vmem:[#allocation3 + $0x3c] sm:$0xf] %vm790_vm3, %v701_v16  ;;  %1205 = vrot.lane.b32.xlu1 %v8240_v20, %s9612_s30  ;;  %v703_v29 = vpop.permute.xlu0 %702  ;;  %v8308_v19 = vpack.c.bf16 %v1723_v43, %v1723_v43  ;;  %8817 = vmatpush3.bf16.msra.mxu1 %v9366_v57  ;;  %v2172_v57 = vld [vmem:[#allocation2 + $0x62] sm:$0xff] }
  0xb9   : > { %795 = vst.msk [vmem:[#allocation3 + $0x50] sm:$0xf] %vm790_vm3, %v703_v29 }
  0xba   : > { %v2363_v10 = vld [vmem:[#allocation3 + $0x14] sm:$0xff]  ;;  %v1150_v8 = vpop.permute.xlu1 %1149  ;;  %2040 = vrot.lane.b32.xlu0 %v9928_v63, %s9612_s30  ;;  %1883 = vst.msk [vmem:[#allocation3 + $0x48] sm:$0xf] %vm533_vm2, %v8308_v19  ;;  %v8246_v63 = vpack.c.bf16 %v1276_v21, %v1276_v21  ;;  %1885 = vst.msk [vmem:[#allocation3 + $0x70] sm:$0xf] %vm533_vm2, %v8310_v9 }
  0xbb   : > { %4421 = vst.msk [vmem:[#allocation3 + $0x18] sm:$0xf] %vm533_vm2, %v10044_v15  ;;  %v7555_v20 = vcombine.high %v2360_v1, %v2363_v10  ;;  %v7554_v5 = vcombine.low %v2360_v1, %v2363_v10  ;;  %v1275_v15 = vld [vmem:[#allocation2 + $0x49] sm:$0xff] }
  0xbc   : > { %1242 = vst.msk [vmem:[#allocation3 + $0x40] sm:$0xf] %vm790_vm3, %v1150_v8  ;;  %1593 = vrot.lane.b32.xlu1 %v10084_v56, %s9612_s30  ;;  %v1152_v17 = vpop.permute.xlu0 %1151  ;;  %v8245_v1 = vpack.c.bf16 %v1275_v15, %v1275_v15  ;;  %v2366_v43 = vld [vmem:[#allocation3 + $0x28] sm:$0xff]  ;;  %v1278_v19 = vld [vmem:[#allocation2 + $0x69] sm:$0xff]  ;;  %v1727_v15 = vld [vmem:[#allocation2 + $0x80] sm:$0xff] }
  0xbd   : > { %3231 = vmatprep.mubr.bf16.mxu0 %v7555_v20  ;;  %1243 = vst.msk [vmem:[#allocation3 + $0x54] sm:$0xf] %vm790_vm3, %v1152_v17  ;;  %v8248_v10 = vpack.c.bf16 %v1278_v19, %v1278_v19  ;;  %v2173_v8 = vld [vmem:[#allocation2 + $0x6a] sm:$0xff]  ;;  %v8373_v20 = vpack.c.bf16 %v2172_v57, %v2172_v57  ;;  %v2175_v17 = vld [vmem:[#allocation2 + $0x82] sm:$0xff] }
  0xbe   : > { %3232 = vmatmul.mubr.bf16.vlgmr.msra.gmra.mxu0 %v7554_v5  ;;  %v705_v16 = vpop.permute.xlu1 %704  ;;  %1595 = vrot.lane.b32.xlu0 %v10093_v49, %s9612_s30  ;;  %1436 = vst.msk [vmem:[#allocation3 + $0x6c] sm:$0xf] %vm533_vm2, %v8246_v63  ;;  %v9337_v49 = vld [vmem:[%s12123_s1 + $0x108] sm:$0xff]   ;;  %1435 = vst.msk [vmem:[#allocation3 + $0x58] sm:$0xf] %vm533_vm2, %v8245_v1  ;;  %v2174_v5 = vld [vmem:[#allocation2 + $0x7a] sm:$0xff]  ;;  %v8376_v63 = vpack.c.bf16 %v2175_v17, %v2175_v17 }
  0xbf   : > { %796 = vst.msk [vmem:[#allocation3 + $0x64] sm:$0xf] %vm790_vm3, %v705_v16  ;;  %9179 = vmatpush3.bf16.msra.mxu0 %v10104_v50  ;;  %v8375_v21 = vpack.c.bf16 %v2174_v5, %v2174_v5  ;;  %v1277_v16 = vld [vmem:[#allocation2 + $0x61] sm:$0xff]  ;;  %v1728_v19 = vld [vmem:[#allocation2 + $0x90] sm:$0xff] }
  0xc0   : > { %2042 = vrot.lane.b32.xlu1 %v9961_v33, %s9612_s30  ;;  %v707_v56 = vpop.permute.xlu0 %706  ;;  %9180 = vmatprep.subr.bf16.mxu0 %v9328_v7  ;;  %1438 = vst.msk [vmem:[#allocation3 + $0x94] sm:$0xf] %vm533_vm2, %v8248_v10  ;;  %2332 = vst.msk [vmem:[#allocation3 + $0x60] sm:$0xf] %vm533_vm2, %v8373_v20  ;;  %v8247_v32 = vpack.c.bf16 %v1277_v16, %v1277_v16  ;;  %v8313_v10 = vpack.c.bf16 %v1728_v19, %v1728_v19  ;;  %v2178_v16 = vld [vmem:[#allocation2 + $0xaa] sm:$0xff] }
  0xc1   : > { %797 = vst.msk [vmem:[#allocation3 + $0x78] sm:$0xf] %vm790_vm3, %v707_v56  ;;  %v1726_v56 = vld [vmem:[#allocation2 + $0x78] sm:$0xff]  ;;  %v1733_v19 = vld [vmem:[#allocation2 + $0xc8] sm:$0xff] }
  0xc2   : > { %v1154_v50 = vpop.permute.xlu1 %1153  ;;  %2044 = vrot.lane.b32.xlu0 %v9988_v39, %s9612_s30  ;;  %v9354_v39 = vld [vmem:[%s12123_s1 + $0x100] sm:$0xff]   ;;  %v8311_v6 = vpack.c.bf16 %v1726_v56, %v1726_v56  ;;  %2334 = vst.msk [vmem:[#allocation3 + $0x88] sm:$0xf] %vm533_vm2, %v8375_v21  ;;  %2335 = vst.msk [vmem:[#allocation3 + $0x9c] sm:$0xf] %vm533_vm2, %v8376_v63 }
  0xc3   : > { %v2369_v60 = vld [vmem:[#allocation3 + $0x3c] sm:$0xff]  ;;  %1244 = vst.msk [vmem:[#allocation3 + $0x68] sm:$0xf] %vm790_vm3, %v1154_v50  ;;  %9181 = vmatpush3.bf16.msra.mxu0 %v9328_v7 }
  0xc4   : > { %v9317_v33 = vld [vmem:[#allocation3 + $0x2c] ss:$20 sps:$4 sm:$0xff]   ;;  %v7559_v31 = vcombine.low %v2366_v43, %v2369_v60  ;;  %1597 = vrot.lane.b32.xlu1 %v10095_v12, %s9612_s30  ;;  %v1156_v29 = vpop.permute.xlu0 %1155  ;;  %9182 = vmatprep.subr.bf16.mxu0 %v9337_v49  ;;  %v8374_v12 = vpack.c.bf16 %v2173_v8, %v2173_v8  ;;  %v2372_v9 = vld [vmem:[#allocation3 + $0x50] sm:$0xff]  ;;  %1437 = vst.msk [vmem:[#allocation3 + $0x80] sm:$0xf] %vm533_vm2, %v8247_v32 }
  0xc5   : > { %3239 = vmatprep.mubr.bf16.mxu0 %v9317_v33  ;;  %1245 = vst.msk [vmem:[#allocation3 + $0x7c] sm:$0xf] %vm790_vm3, %v1156_v29  ;;  %v1280_v60 = vld [vmem:[#allocation2 + $0x81] sm:$0xff]  ;;  %v8379_v32 = vpack.c.bf16 %v2178_v16, %v2178_v16 }
  0xc6   : > { %v709_v7 = vpop.permute.xlu1 %708  ;;  %3240 = vmatmul.mubr.bf16.gmra.mxu0 %v7559_v31  ;;  %1599 = vrot.lane.b32.xlu0 %v10097_v22, %s9612_s30  ;;  %v8312_v22 = vpack.c.bf16 %v1727_v15, %v1727_v15  ;;  %2333 = vst.msk [vmem:[#allocation3 + $0x74] sm:$0xf] %vm533_vm2, %v8374_v12  ;;  %1886 = vst.msk [vmem:[#allocation3 + $0x84] sm:$0xf] %vm533_vm2, %v8311_v6  ;;  %v8250_v33 = vpack.c.bf16 %v1280_v60, %v1280_v60  ;;  %v1279_v31 = vld [vmem:[#allocation2 + $0x79] sm:$0xff]  ;;  %v1731_v6 = vld [vmem:[#allocation2 + $0xb0] sm:$0xff] }
  0xc7   : > { %798 = vst.msk [vmem:[#allocation3 + $0x8c] sm:$0xf] %vm790_vm3, %v709_v7  ;;  %9183 = vmatpush3.bf16.msra.mxu0 %v9337_v49  ;;  %v8249_v29 = vpack.c.bf16 %v1279_v31, %v1279_v31  ;;  %v1282_v7 = vld [vmem:[#allocation2 + $0x99] sm:$0xff]  ;;  %v1284_v31 = vld [vmem:[#allocation2 + $0xb1] sm:$0xff] }
  0xc8   : > { %2046 = vrot.lane.b32.xlu1 %v10020_v59, %s9612_s30  ;;  %v711_v1 = vpop.permute.xlu0 %710  ;;  %9184 = vmatprep.subr.bf16.mxu0 %v9354_v39  ;;  %1887 = vst.msk [vmem:[#allocation3 + $0x98] sm:$0xf] %vm533_vm2, %v8312_v22  ;;  %1440 = vst.msk [vmem:[#allocation3 + $0xbc] sm:$0xf] %vm533_vm2, %v8250_v33  ;;  %v2176_v12 = vld [vmem:[#allocation2 + $0x92] sm:$0xff]  ;;  %v8252_v21 = vpack.c.bf16 %v1282_v7, %v1282_v7  ;;  %v2180_v7 = vld [vmem:[#allocation2 + $0xc2] sm:$0xff] }
  0xc9   : > { %799 = vst.msk [vmem:[#allocation3 + $0xa0] sm:$0xf] %vm790_vm3, %v711_v1  ;;  %v8377_v63 = vpack.c.bf16 %v2176_v12, %v2176_v12  ;;  %v2179_v15 = vld [vmem:[#allocation2 + $0xb2] sm:$0xff] }
  0xca   : > { %v1158_v49 = vpop.permute.xlu1 %1157  ;;  %v2375_v23 = vld [vmem:[#allocation3 + $0x64] sm:$0xff]  ;;  %2048 = vrot.lane.b32.xlu0 %v10027_v61, %s9612_s30  ;;  %1439 = vst.msk [vmem:[#allocation3 + $0xa8] sm:$0xf] %vm533_vm2, %v8249_v29  ;;  %1888 = vst.msk [vmem:[#allocation3 + $0xac] sm:$0xf] %vm533_vm2, %v8313_v10  ;;  %v8380_v22 = vpack.c.bf16 %v2179_v15, %v2179_v15  ;;  %v8318_v10 = vpack.c.bf16 %v1733_v19, %v1733_v19 }
  0xcb   : > { %v9320_v50 = vld [vmem:[#allocation3 + $0x54] ss:$20 sps:$4 sm:$0xff]   ;;  %1246 = vst.msk [vmem:[#allocation3 + $0x90] sm:$0xf] %vm790_vm3, %v1158_v49  ;;  %v7564_v59 = vcombine.low %v2372_v9, %v2375_v23  ;;  %9185 = vmatpush3.bf16.msra.mxu0 %v9354_v39  ;;  %v1730_v49 = vld [vmem:[#allocation2 + $0xa8] sm:$0xff] }
  0xcc   : > { %1601 = vrot.lane.b32.xlu1 %v10099_v53, %s9612_s30  ;;  %3247 = vmatprep.mubr.bf16.mxu0 %v9320_v50  ;;  %v1160_v43 = vpop.permute.xlu0 %1159  ;;  %v1729_v39 = vld [vmem:[#allocation2 + $0x98] sm:$0xff]  ;;  %v2378_v20 = vld [vmem:[#allocation3 + $0x78] sm:$0xff]  ;;  %1442 = vst.msk [vmem:[#allocation3 + $0xe4] sm:$0xf] %vm533_vm2, %v8252_v21  ;;  %2336 = vst.msk [vmem:[#allocation3 + $0xb0] sm:$0xf] %vm533_vm2, %v8377_v63  ;;  %v8316_v50 = vpack.c.bf16 %v1731_v6, %v1731_v6  ;;  %v8381_v21 = vpack.c.bf16 %v2180_v7, %v2180_v7 }
  0xcd   : > { %1247 = vst.msk [vmem:[#allocation3 + $0xa4] sm:$0xf] %vm790_vm3, %v1160_v43  ;;  %v8314_v57 = vpack.c.bf16 %v1729_v39, %v1729_v39  ;;  %v2183_v63 = vld [vmem:[#allocation2 + $0xe2] sm:$0xff] }
  0xce   : > { %v713_v61 = vpop.permute.xlu1 %712  ;;  %3248 = vmatmul.mubr.bf16.gmra.mxu0 %v7564_v59  ;;  %1603 = vrot.lane.b32.xlu0 %v10116_v62, %s9612_s30  ;;  %v8315_v59 = vpack.c.bf16 %v1730_v49, %v1730_v49  ;;  %2338 = vst.msk [vmem:[#allocation3 + $0xd8] sm:$0xf] %vm533_vm2, %v8379_v32  ;;  %2339 = vst.msk [vmem:[#allocation3 + $0xec] sm:$0xf] %vm533_vm2, %v8380_v22  ;;  %v1735_v32 = vld [vmem:[#allocation2 + $0xe0] sm:$0xff]  ;;  %v1734_v22 = vld [vmem:[#allocation2 + $0xd8] sm:$0xff] }
  0xcf   : > { %800 = vst.msk [vmem:[#allocation3 + $0xb4] sm:$0xf] %vm790_vm3, %v713_v61  ;;  %v8320_v49 = vpack.c.bf16 %v1735_v32, %v1735_v32 }
  0xd0   : > { %2050 = vrot.lane.b32.xlu1 %v10054_v41, %s9612_s30  ;;  %v715_v53 = vpop.permute.xlu0 %714  ;;  %1889 = vst.msk [vmem:[#allocation3 + $0xc0] sm:$0xf] %vm533_vm2, %v8314_v57  ;;  %1891 = vst.msk [vmem:[#allocation3 + $0xe8] sm:$0xf] %vm533_vm2, %v8316_v50  ;;  %v1732_v57 = vld [vmem:[#allocation2 + $0xc0] sm:$0xff] }
  0xd1   : > { %801 = vst.msk [vmem:[#allocation3 + $0xc8] sm:$0xf] %vm790_vm3, %v715_v53  ;;  %v8254_v53 = vpack.c.bf16 %v1284_v31, %v1284_v31 }
  0xd2   : > { %v1162_v8 = vpop.permute.xlu1 %1161  ;;  %v2381_v5 = vld [vmem:[#allocation3 + $0x8c] sm:$0xff]  ;;  %2052 = vrot.lane.b32.xlu0 %v10073_v48, %s9612_s30  ;;  %1890 = vst.msk [vmem:[#allocation3 + $0xd4] sm:$0xf] %vm533_vm2, %v8315_v59  ;;  %1893 = vst.msk [vmem:[#allocation3 + $0x110] sm:$0xf] %vm533_vm2, %v8318_v10 }
  0xd3   : > { %v9322_v62 = vld [vmem:[#allocation3 + $0x7c] ss:$20 sps:$4 sm:$0xff]   ;;  %1248 = vst.msk [vmem:[#allocation3 + $0xb8] sm:$0xf] %vm790_vm3, %v1162_v8  ;;  %v7569_v41 = vcombine.low %v2378_v20, %v2381_v5  ;;  %v8317_v8 = vpack.c.bf16 %v1732_v57, %v1732_v57 }
  0xd4   : > { %1605 = vrot.lane.b32.xlu1 %v10120_v55, %s9612_s30  ;;  %3255 = vmatprep.mubr.bf16.mxu0 %v9322_v62  ;;  %v1164_v17 = vpop.permute.xlu0 %1163  ;;  %v2177_v48 = vld [vmem:[#allocation2 + $0x9a] sm:$0xff]  ;;  %v1281_v55 = vld [vmem:[#allocation2 + $0x91] sm:$0xff]  ;;  %1444 = vst.msk [vmem:[#allocation3 + $0x10c] sm:$0xf] %vm533_vm2, %v8254_v53  ;;  %2340 = vst.msk [vmem:[#allocation3 + $0x100] sm:$0xf] %vm533_vm2, %v8381_v21 }
  0xd5   : > { %1249 = vst.msk [vmem:[#allocation3 + $0xcc] sm:$0xf] %vm790_vm3, %v1164_v17  ;;  %v8378_v1 = vpack.c.bf16 %v2177_v48, %v2177_v48  ;;  %v8251_v23 = vpack.c.bf16 %v1281_v55, %v1281_v55  ;;  %v2384_v43 = vld [vmem:[#allocation3 + $0xa0] sm:$0xff]  ;;  %v2182_v48 = vld [vmem:[#allocation2 + $0xda] sm:$0xff] }
  0xd6   : > { %v717_v56 = vpop.permute.xlu1 %716  ;;  %3256 = vmatmul.mubr.bf16.gmra.mxu0 %v7569_v41  ;;  %1607 = vrot.lane.b32.xlu0 %v10122_v52, %s9612_s30  ;;  %1892 = vst.msk [vmem:[#allocation3 + $0xfc] sm:$0xf] %vm533_vm2, %v8317_v8  ;;  %v1286_v17 = vld [vmem:[#allocation2 + $0xc9] sm:$0xff]  ;;  %1895 = vst.msk [vmem:[#allocation3 + $0x138] sm:$0xf] %vm533_vm2, %v8320_v49  ;;  %v1737_v53 = vld [vmem:[#allocation2 + $0xf8] sm:$0xff] }
  0xd7   : > { %802 = vst.msk [vmem:[#allocation3 + $0xdc] sm:$0xf] %vm790_vm3, %v717_v56  ;;  %v8256_v12 = vpack.c.bf16 %v1286_v17, %v1286_v17  ;;  %v8383_v56 = vpack.c.bf16 %v2182_v48, %v2182_v48  ;;  %v2185_v17 = vld [vmem:[#allocation2 + $0xfa] sm:$0xff] }
  0xd8   : > { %2054 = vrot.lane.b32.xlu1 %v10108_v51, %s9612_s30  ;;  %v719_v9 = vpop.permute.xlu0 %718  ;;  %2337 = vst.msk [vmem:[#allocation3 + $0xc4] sm:$0xf] %vm533_vm2, %v8378_v1  ;;  %1441 = vst.msk [vmem:[#allocation3 + $0xd0] sm:$0xf] %vm533_vm2, %v8251_v23  ;;  %v8384_v1 = vpack.c.bf16 %v2183_v63, %v2183_v63  ;;  %v8386_v48 = vpack.c.bf16 %v2185_v17, %v2185_v17 }
  0xd9   : > { %803 = vst.msk [vmem:[#allocation3 + $0xf0] sm:$0xf] %vm790_vm3, %v719_v9  ;;  %v8319_v9 = vpack.c.bf16 %v1734_v22, %v1734_v22 }
  0xda   : > { %v1166_v52 = vpop.permute.xlu1 %1165  ;;  %v2387_v60 = vld [vmem:[#allocation3 + $0xb4] sm:$0xff]  ;;  %2056 = vrot.lane.b32.xlu0 %v10128_v2, %s9612_s30  ;;  %1446 = vst.msk [vmem:[#allocation3 + $0x134] sm:$0xf] %vm533_vm2, %v8256_v12  ;;  %2342 = vst.msk [vmem:[#allocation3 + $0x128] sm:$0xf] %vm533_vm2, %v8383_v56 }
  0xdb   : > { %v9324_v33 = vld [vmem:[#allocation3 + $0xa4] ss:$20 sps:$4 sm:$0xff]   ;;  %1250 = vst.msk [vmem:[#allocation3 + $0xe0] sm:$0xf] %vm790_vm3, %v1166_v52  ;;  %v7574_v51 = vcombine.low %v2384_v43, %v2387_v60  ;;  %v1926_v52 = vld [vmem:[#allocation2 + $0xd9] sm:$0xff] }
  0xdc   : > { %1609 = vrot.lane.b32.xlu1 %v10124_v45, %s9612_s30  ;;  %3263 = vmatprep.mubr.bf16.mxu0 %v9324_v33  ;;  %v1168_v61 = vpop.permute.xlu0 %1167  ;;  %v1283_v2 = vld [vmem:[#allocation2 + $0xa9] sm:$0xff]  ;;  %v2390_v5 = vld [vmem:[#allocation3 + $0xc8] sm:$0xff]  ;;  %2343 = vst.msk [vmem:[#allocation3 + $0x13c] sm:$0xf] %vm533_vm2, %v8384_v1  ;;  %1894 = vst.msk [vmem:[#allocation3 + $0x124] sm:$0xf] %vm533_vm2, %v8319_v9 }
  0xdd   : > { %1251 = vst.msk [vmem:[#allocation3 + $0xf4] sm:$0xf] %vm790_vm3, %v1168_v61  ;;  %v8253_v39 = vpack.c.bf16 %v1283_v2, %v1283_v2  ;;  %v1288_v60 = vld [vmem:[#allocation2 + $0xe1] sm:$0xff]  ;;  %v1287_v61 = vld [vmem:[#allocation2 + $0xd9] sm:$0xff]  ;;  %v2186_v12 = vld [vmem:[#allocation2 + $0x10a] sm:$0xff] }
  0xde   : > { %v721_v29 = vpop.permute.xlu1 %720  ;;  %3264 = vmatmul.mubr.bf16.gmra.mxu0 %v7574_v51  ;;  %1611 = vrot.lane.b32.xlu0 %v10133_v54, %s9612_s30  ;;  %v8258_v33 = vpack.c.bf16 %v1288_v60, %v1288_v60  ;;  %v8351_v51 = vpack.c.bf16 %v1926_v52, %v1926_v52  ;;  %v8257_v31 = vpack.c.bf16 %v1287_v61, %v1287_v61  ;;  %v1927_v2 = vld [vmem:[#allocation2 + $0xe1] sm:$0xff] }
  0xdf   : > { %804 = vst.msk [vmem:[#allocation3 + $0x104] sm:$0xf] %vm790_vm3, %v721_v29  ;;  %v1736_v29 = vld [vmem:[#allocation2 + $0xf0] sm:$0xff]  ;;  %v1738_v56 = vld [vmem:[#allocation2 + $0x108] sm:$0xff]  ;;  %v1740_v61 = vld [vmem:[#allocation2 + $0x120] sm:$0xff] }
  0xe0   : > { %2058 = vrot.lane.b32.xlu1 %v10157_v42, %s9612_s30  ;;  %v723_v45 = vpop.permute.xlu0 %722  ;;  %1443 = vst.msk [vmem:[#allocation3 + $0xf8] sm:$0xf] %vm533_vm2, %v8253_v39  ;;  %1448 = vst.msk [vmem:[#allocation3 + $0x15c] sm:$0xf] %vm533_vm2, %v8258_v33  ;;  %v8322_v39 = vpack.c.bf16 %v1737_v53, %v1737_v53  ;;  %v8321_v19 = vpack.c.bf16 %v1736_v29, %v1736_v29  ;;  %v8323_v22 = vpack.c.bf16 %v1738_v56, %v1738_v56  ;;  %v1291_v33 = vld [vmem:[#allocation2 + $0x109] sm:$0xff] }
  0xe1   : > { %805 = vst.msk [vmem:[#allocation3 + $0x118] sm:$0xf] %vm790_vm3, %v723_v45  ;;  %v1928_v45 = vld [vmem:[#allocation2 + $0xf1] sm:$0xff]  ;;  %v8325_v53 = vpack.c.bf16 %v1740_v61, %v1740_v61 }
  0xe2   : > { %v1170_v20 = vpop.permute.xlu1 %1169  ;;  %v2393_v62 = vld [vmem:[#allocation3 + $0xdc] sm:$0xff]  ;;  %2060 = vrot.lane.b32.xlu0 %v10163_v58, %s9612_s30  ;;  %1447 = vst.msk [vmem:[#allocation3 + $0x148] sm:$0xf] %vm533_vm2, %v8257_v31  ;;  %1897 = vst.msk [vmem:[#allocation3 + $0x160] sm:$0xf] %vm533_vm2, %v8322_v39 }
  0xe3   : > { %v9326_v54 = vld [vmem:[#allocation3 + $0xcc] ss:$20 sps:$4 sm:$0xff]   ;;  %1252 = vst.msk [vmem:[#allocation3 + $0x108] sm:$0xf] %vm790_vm3, %v1170_v20  ;;  %v7579_v42 = vcombine.low %v2390_v5, %v2393_v62  ;;  %v8352_v5 = vpack.c.bf16 %v1927_v2, %v1927_v2 }
  0xe4   : > { %1613 = vrot.lane.b32.xlu1 %v10135_v46, %s9612_s30  ;;  %3271 = vmatprep.mubr.bf16.mxu0 %v9326_v54  ;;  %v1172_v41 = vpop.permute.xlu0 %1171  ;;  %v2181_v58 = vld [vmem:[#allocation2 + $0xca] sm:$0xff]  ;;  %v1285_v46 = vld [vmem:[#allocation2 + $0xc1] sm:$0xff]  ;;  %1896 = vst.msk [vmem:[#allocation3 + $0x14c] sm:$0xf] %vm533_vm2, %v8321_v19  ;;  %v1290_v62 = vld [vmem:[#allocation2 + $0xf9] sm:$0xff] }
  0xe5   : > { %1253 = vst.msk [vmem:[#allocation3 + $0x11c] sm:$0xf] %vm790_vm3, %v1172_v41  ;;  %v8382_v15 = vpack.c.bf16 %v2181_v58, %v2181_v58  ;;  %v8255_v6 = vpack.c.bf16 %v1285_v46, %v1285_v46  ;;  %v2396_v23 = vld [vmem:[#allocation3 + $0xf0] sm:$0xff]  ;;  %v2184_v54 = vld [vmem:[#allocation2 + $0xf2] sm:$0xff]  ;;  %v8260_v41 = vpack.c.bf16 %v1290_v62, %v1290_v62 }
  0xe6   : > { %v725_v16 = vpop.permute.xlu1 %724  ;;  %3272 = vmatmul.mubr.bf16.gmra.mxu0 %v7579_v42  ;;  %1615 = vrot.lane.b32.xlu0 %v10149_v47, %s9612_s30  ;;  %v8353_v42 = vpack.c.bf16 %v1928_v45, %v1928_v45  ;;  %v8385_v7 = vpack.c.bf16 %v2184_v54, %v2184_v54  ;;  %v2187_v58 = vld [vmem:[#allocation2 + $0x112] sm:$0xff]  ;;  %2345 = vst.msk [vmem:[#allocation3 + $0x164] sm:$0xf] %vm533_vm2, %v8386_v48  ;;  %1898 = vst.msk [vmem:[#allocation3 + $0x174] sm:$0xf] %vm533_vm2, %v8323_v22  ;;  %v1932_v19 = vld [vmem:[#allocation2 + $0x121] sm:$0xff] }
  0xe7   : > { %806 = vst.msk [vmem:[#allocation3 + $0x12c] sm:$0xf] %vm790_vm3, %v725_v16  ;;  %v8388_v63 = vpack.c.bf16 %v2187_v58, %v2187_v58  ;;  %v1289_v16 = vld [vmem:[#allocation2 + $0xf1] sm:$0xff]  ;;  %v2191_v62 = vld [vmem:[#allocation2 + $0x142] sm:$0xff]  ;;  %v1934_v22 = vld [vmem:[#allocation2 + $0x139] sm:$0xff] }
  0xe8   : > { %2062 = vrot.lane.b32.xlu1 %v10177_v3, %s9612_s30  ;;  %v727_v55 = vpop.permute.xlu0 %726  ;;  %2341 = vst.msk [vmem:[#allocation3 + $0x114] sm:$0xf] %vm533_vm2, %v8382_v15  ;;  %1445 = vst.msk [vmem:[#allocation3 + $0x120] sm:$0xf] %vm533_vm2, %v8255_v6  ;;  %v1739_v15 = vld [vmem:[#allocation2 + $0x110] sm:$0xff]  ;;  %v8259_v46 = vpack.c.bf16 %v1289_v16, %v1289_v16  ;;  %v8392_v17 = vpack.c.bf16 %v2191_v62, %v2191_v62 }
  0xe9   : > { %807 = vst.msk [vmem:[#allocation3 + $0x140] sm:$0xf] %vm790_vm3, %v727_v55  ;;  %v8324_v32 = vpack.c.bf16 %v1739_v15, %v1739_v15  ;;  %v1936_v61 = vld [vmem:[#allocation2 + $0x151] sm:$0xff] }
  0xea   : > { %v1174_v47 = vpop.permute.xlu1 %1173  ;;  %v2399_v50 = vld [vmem:[#allocation3 + $0x104] sm:$0xff]  ;;  %2064 = vrot.lane.b32.xlu0 %v10183_v35, %s9612_s30  ;;  %1450 = vst.msk [vmem:[#allocation3 + $0x184] sm:$0xf] %vm533_vm2, %v8260_v41  ;;  %2344 = vst.msk [vmem:[#allocation3 + $0x150] sm:$0xf] %vm533_vm2, %v8385_v7  ;;  %v1293_v7 = vld [vmem:[#allocation2 + $0x121] sm:$0xff] }
  0xeb   : > { %v9329_v59 = vld [vmem:[#allocation3 + $0xf4] ss:$20 sps:$4 sm:$0xff]   ;;  %1254 = vst.msk [vmem:[#allocation3 + $0x130] sm:$0xf] %vm790_vm3, %v1174_v47  ;;  %v7584_v3 = vcombine.low %v2396_v23, %v2399_v50  ;;  %v1930_v23 = vld [vmem:[#allocation2 + $0x109] sm:$0xff]  ;;  %v8263_v48 = vpack.c.bf16 %v1293_v7, %v1293_v7 }
  0xec   : > { %1617 = vrot.lane.b32.xlu1 %v10159_v36, %s9612_s30  ;;  %3279 = vmatprep.mubr.bf16.mxu0 %v9329_v59  ;;  %v1176_v43 = vpop.permute.xlu0 %1175  ;;  %v2402_v57 = vld [vmem:[#allocation3 + $0x118] sm:$0xff]  ;;  %2347 = vst.msk [vmem:[#allocation3 + $0x18c] sm:$0xf] %vm533_vm2, %v8388_v63  ;;  %1449 = vst.msk [vmem:[#allocation3 + $0x170] sm:$0xf] %vm533_vm2, %v8259_v46  ;;  %v8355_v52 = vpack.c.bf16 %v1930_v23, %v1930_v23  ;;  %v1742_v63 = vld [vmem:[#allocation2 + $0x138] sm:$0xff] }
  0xed   : > { %1255 = vst.msk [vmem:[#allocation3 + $0x144] sm:$0xf] %vm790_vm3, %v1176_v43  ;;  %v1292_v43 = vld [vmem:[#allocation2 + $0x111] sm:$0xff]  ;;  %v8327_v16 = vpack.c.bf16 %v1742_v63, %v1742_v63 }
  0xee   : > { %v729_v35 = vpop.permute.xlu1 %728  ;;  %3280 = vmatmul.mubr.bf16.gmra.mxu0 %v7584_v3  ;;  %1619 = vrot.lane.b32.xlu0 %v10169_v37, %s9612_s30  ;;  %1899 = vst.msk [vmem:[#allocation3 + $0x188] sm:$0xf] %vm533_vm2, %v8324_v32  ;;  %v8262_v60 = vpack.c.bf16 %v1292_v43, %v1292_v43  ;;  %1900 = vst.msk [vmem:[#allocation3 + $0x19c] sm:$0xf] %vm533_vm2, %v8325_v53  ;;  %v1745_v23 = vld [vmem:[#allocation2 + $0x158] sm:$0xff]  ;;  %v1935_v43 = vld [vmem:[#allocation2 + $0x141] sm:$0xff] }
  0xef   : > { %808 = vst.msk [vmem:[#allocation3 + $0x154] sm:$0xf] %vm790_vm3, %v729_v35  ;;  %v2192_v53 = vld [vmem:[#allocation2 + $0x152] sm:$0xff] }
  0xf0   : > { %2066 = vrot.lane.b32.xlu1 %v10198_v0, %s9612_s30  ;;  %v731_v36 = vpop.permute.xlu0 %730  ;;  %1452 = vst.msk [vmem:[#allocation3 + $0x1ac] sm:$0xf] %vm533_vm2, %v8262_v60  ;;  %2351 = vst.msk [vmem:[#allocation3 + $0x1dc] sm:$0xf] %vm533_vm2, %v8392_v17 }
  0xf1   : > { %809 = vst.msk [vmem:[#allocation3 + $0x168] sm:$0xf] %vm790_vm3, %v731_v36  ;;  %v1931_v36 = vld [vmem:[#allocation2 + $0x111] sm:$0xff] }
  0xf2   : > { %v1178_v37 = vpop.permute.xlu1 %1177  ;;  %v2405_v10 = vld [vmem:[#allocation3 + $0x12c] sm:$0xff]  ;;  %2068 = vrot.lane.b32.xlu0 %v8351_v51, %s9612_s30  ;;  %v1741_v51 = vld [vmem:[#allocation2 + $0x128] sm:$0xff]  ;;  %1453 = vst.msk [vmem:[#allocation3 + $0x1c0] sm:$0xf] %vm533_vm2, %v8263_v48  ;;  %1902 = vst.msk [vmem:[#allocation3 + $0x1c4] sm:$0xf] %vm533_vm2, %v8327_v16 }
  0xf3   : > { %v9331_v8 = vld [vmem:[#allocation3 + $0x11c] ss:$20 sps:$4 sm:$0xff]   ;;  %1256 = vst.msk [vmem:[#allocation3 + $0x158] sm:$0xf] %vm790_vm3, %v1178_v37  ;;  %v7589_v0 = vcombine.low %v2402_v57, %v2405_v10  ;;  %v8326_v31 = vpack.c.bf16 %v1741_v51, %v1741_v51  ;;  %v8356_v57 = vpack.c.bf16 %v1931_v36, %v1931_v36  ;;  %v1300_v16 = vld [vmem:[#allocation2 + $0x171] sm:$0xff] }
  0xf4   : > { %1621 = vrot.lane.b32.xlu1 %v10179_v38, %s9612_s30  ;;  %3287 = vmatprep.mubr.bf16.mxu0 %v9331_v8  ;;  %v1180_v20 = vpop.permute.xlu0 %1179  ;;  %v8387_v38 = vpack.c.bf16 %v2186_v12, %v2186_v12  ;;  %v2408_v6 = vld [vmem:[#allocation3 + $0x140] sm:$0xff]  ;;  %v2188_v10 = vld [vmem:[#allocation2 + $0x122] sm:$0xff] }
  0xf5   : > { %1257 = vst.msk [vmem:[#allocation3 + $0x16c] sm:$0xf] %vm790_vm3, %v1180_v20  ;;  %v2189_v8 = vld [vmem:[#allocation2 + $0x12a] sm:$0xff]  ;;  %v1743_v12 = vld [vmem:[#allocation2 + $0x140] sm:$0xff] }
  0xf6   : > { %v733_v21 = vpop.permute.xlu1 %732  ;;  %3288 = vmatmul.mubr.bf16.gmra.mxu0 %v7589_v0  ;;  %1623 = vrot.lane.b32.xlu0 %v10189_v30, %s9612_s30  ;;  %2346 = vst.msk [vmem:[#allocation3 + $0x178] sm:$0xf] %vm533_vm2, %v8387_v38  ;;  %v1929_v30 = vld [vmem:[#allocation2 + $0xf9] sm:$0xff]  ;;  %1901 = vst.msk [vmem:[#allocation3 + $0x1b0] sm:$0xf] %vm533_vm2, %v8326_v31  ;;  %v8389_v0 = vpack.c.bf16 %v2188_v10, %v2188_v10  ;;  %v8390_v20 = vpack.c.bf16 %v2189_v8, %v2189_v8  ;;  %v1297_v8 = vld [vmem:[#allocation2 + $0x151] sm:$0xff] }
  0xf7   : > { %810 = vst.msk [vmem:[#allocation3 + $0x17c] sm:$0xf] %vm790_vm3, %v733_v21  ;;  %v8354_v59 = vpack.c.bf16 %v1929_v30, %v1929_v30  ;;  %v8328_v38 = vpack.c.bf16 %v1743_v12, %v1743_v12  ;;  %v8360_v31 = vpack.c.bf16 %v1935_v43, %v1935_v43  ;;  %v8267_v62 = vpack.c.bf16 %v1297_v8, %v1297_v8 }
  0xf8   : > { %2070 = vrot.lane.b32.xlu1 %v8352_v5, %s9612_s30  ;;  %v735_v1 = vpop.permute.xlu0 %734  ;;  %v2190_v5 = vld [vmem:[#allocation2 + $0x13a] sm:$0xff]  ;;  %2348 = vst.msk [vmem:[#allocation3 + $0x1a0] sm:$0xf] %vm533_vm2, %v8389_v0  ;;  %2349 = vst.msk [vmem:[#allocation3 + $0x1b4] sm:$0xf] %vm533_vm2, %v8390_v20  ;;  %v1747_v0 = vld [vmem:[#allocation2 + $0x170] sm:$0xff] }
  0xf9   : > { %811 = vst.msk [vmem:[#allocation3 + $0x190] sm:$0xf] %vm790_vm3, %v735_v1  ;;  %v8391_v41 = vpack.c.bf16 %v2190_v5, %v2190_v5 }
  0xfa   : > { %v1182_v55 = vpop.permute.xlu1 %1181  ;;  %v2411_v49 = vld [vmem:[#allocation3 + $0x154] sm:$0xff]  ;;  %2072 = vrot.lane.b32.xlu0 %v8353_v42, %s9612_s30  ;;  %v8357_v42 = vpack.c.bf16 %v1932_v19, %v1932_v19  ;;  %1903 = vst.msk [vmem:[#allocation3 + $0x1d8] sm:$0xf] %vm533_vm2, %v8328_v38  ;;  %1457 = vst.msk [vmem:[#allocation3 + $0x210] sm:$0xf] %vm533_vm2, %v8267_v62 }
  0xfb   : > { %v9333_v9 = vld [vmem:[#allocation3 + $0x144] ss:$20 sps:$4 sm:$0xff]   ;;  %1258 = vst.msk [vmem:[#allocation3 + $0x180] sm:$0xf] %vm790_vm3, %v1182_v55  ;;  %v7594_v47 = vcombine.low %v2408_v6, %v2411_v49  ;;  %v8359_v49 = vpack.c.bf16 %v1934_v22, %v1934_v22  ;;  %v1748_v22 = vld [vmem:[#allocation2 + $0x180] sm:$0xff] }
  0xfc   : > { %1625 = vrot.lane.b32.xlu1 %v10200_v44, %s9612_s30  ;;  %3295 = vmatprep.mubr.bf16.mxu0 %v9333_v9  ;;  %v1184_v50 = vpop.permute.xlu0 %1183  ;;  %v8261_v44 = vpack.c.bf16 %v1291_v33, %v1291_v33  ;;  %v2414_v29 = vld [vmem:[#allocation3 + $0x168] sm:$0xff]  ;;  %2350 = vst.msk [vmem:[#allocation3 + $0x1c8] sm:$0xf] %vm533_vm2, %v8391_v41  ;;  %v1296_v9 = vld [vmem:[#allocation2 + $0x141] sm:$0xff]  ;;  %v1494_v62 = vld [vmem:[#allocation2 + $0x18a] sm:$0xff] }
  0xfd   : > { %1259 = vst.msk [vmem:[#allocation3 + $0x194] sm:$0xf] %vm790_vm3, %v1184_v50 }
  0xfe   : > { %v737_v3 = vpop.permute.xlu1 %736  ;;  %3296 = vmatmul.mubr.bf16.gmra.mxu0 %v7594_v47  ;;  %1627 = vrot.lane.b32.xlu0 %v10208_v28, %s9612_s30  ;;  %1451 = vst.msk [vmem:[#allocation3 + $0x198] sm:$0xf] %vm533_vm2, %v8261_v44  ;;  %v1295_v47 = vld [vmem:[#allocation2 + $0x139] sm:$0xff] }
  0xff   : > { %812 = vst.msk [vmem:[#allocation3 + $0x1a4] sm:$0xf] %vm790_vm3, %v737_v3  ;;  %v8330_v3 = vpack.c.bf16 %v1745_v23, %v1745_v23  ;;  %v1940_v23 = vld [vmem:[#allocation2 + $0x181] sm:$0xff] }
 0x100   : > { %2074 = vrot.lane.b32.xlu1 %v8354_v59, %s9612_s30  ;;  %v739_v35 = vpop.permute.xlu0 %738  ;;  %v8265_v59 = vpack.c.bf16 %v1295_v47, %v1295_v47 }
 0x101   : > { %813 = vst.msk [vmem:[#allocation3 + $0x1b8] sm:$0xf] %vm790_vm3, %v739_v35 }
 0x102   : > { %v1186_v28 = vpop.permute.xlu1 %1185  ;;  %v2417_v2 = vld [vmem:[#allocation3 + $0x17c] sm:$0xff]  ;;  %2076 = vrot.lane.b32.xlu0 %v8355_v52, %s9612_s30  ;;  %1455 = vst.msk [vmem:[#allocation3 + $0x1e8] sm:$0xf] %vm533_vm2, %v8265_v59  ;;  %1905 = vst.msk [vmem:[#allocation3 + $0x200] sm:$0xf] %vm533_vm2, %v8330_v3  ;;  %v2196_v59 = vld [vmem:[#allocation2 + $0x182] sm:$0xff] }
 0x103   : > { %v9335_v45 = vld [vmem:[#allocation3 + $0x16c] ss:$20 sps:$4 sm:$0xff]   ;;  %1260 = vst.msk [vmem:[#allocation3 + $0x1a8] sm:$0xf] %vm790_vm3, %v1186_v28  ;;  %v7599_v39 = vcombine.low %v2414_v29, %v2417_v2  ;;  %v8393_v29 = vpack.c.bf16 %v2192_v53, %v2192_v53 }
 0x104   : > { %1629 = vrot.lane.b32.xlu1 %v10216_v27, %s9612_s30  ;;  %3303 = vmatprep.mubr.bf16.mxu0 %v9335_v45  ;;  %v1188_v37 = vpop.permute.xlu0 %1187  ;;  %v1294_v27 = vld [vmem:[#allocation2 + $0x129] sm:$0xff]  ;;  %v2420_v56 = vld [vmem:[#allocation3 + $0x190] sm:$0xff] }
 0x105   : > { %1261 = vst.msk [vmem:[#allocation3 + $0x1bc] sm:$0xf] %vm790_vm3, %v1188_v37  ;;  %v8264_v21 = vpack.c.bf16 %v1294_v27, %v1294_v27  ;;  %v1744_v52 = vld [vmem:[#allocation2 + $0x150] sm:$0xff]  ;;  %v2193_v28 = vld [vmem:[#allocation2 + $0x15a] sm:$0xff]  ;;  %v8361_v37 = vpack.c.bf16 %v1936_v61, %v1936_v61 }
 0x106   : > { %v741_v54 = vpop.permute.xlu1 %740  ;;  %3304 = vmatmul.mubr.bf16.gmra.mxu0 %v7599_v39  ;;  %1631 = vrot.lane.b32.xlu0 %v10222_v18, %s9612_s30  ;;  %v1933_v18 = vld [vmem:[#allocation2 + $0x129] sm:$0xff]  ;;  %v8329_v60 = vpack.c.bf16 %v1744_v52, %v1744_v52  ;;  %v8394_v2 = vpack.c.bf16 %v2193_v28, %v2193_v28  ;;  %v2195_v39 = vld [vmem:[#allocation2 + $0x172] sm:$0xff]  ;;  %2352 = vst.msk [vmem:[#allocation3 + $0x1f0] sm:$0xf] %vm533_vm2, %v8393_v29 }
 0x107   : > { %814 = vst.msk [vmem:[#allocation3 + $0x1cc] sm:$0xf] %vm790_vm3, %v741_v54  ;;  %v8358_v55 = vpack.c.bf16 %v1933_v18, %v1933_v18  ;;  %v2194_v45 = vld [vmem:[#allocation2 + $0x16a] sm:$0xff]  ;;  %v8396_v10 = vpack.c.bf16 %v2195_v39, %v2195_v39  ;;  %v8332_v54 = vpack.c.bf16 %v1747_v0, %v1747_v0  ;;  %v8397_v52 = vpack.c.bf16 %v2196_v59, %v2196_v59  ;;  %v1942_v0 = vld [vmem:[#allocation2 + $0x199] sm:$0xff] }
 0x108   : > { %2078 = vrot.lane.b32.xlu1 %v8356_v57, %s9612_s30  ;;  %v743_v58 = vpop.permute.xlu0 %742  ;;  %1454 = vst.msk [vmem:[#allocation3 + $0x1d4] sm:$0xf] %vm533_vm2, %v8264_v21  ;;  %1904 = vst.msk [vmem:[#allocation3 + $0x1ec] sm:$0xf] %vm533_vm2, %v8329_v60  ;;  %v8395_v57 = vpack.c.bf16 %v2194_v45, %v2194_v45  ;;  %v1938_v21 = vld [vmem:[#allocation2 + $0x169] sm:$0xff]  ;;  %v2198_v60 = vld [vmem:[#allocation2 + $0x19a] sm:$0xff] }
 0x109   : > { %815 = vst.msk [vmem:[#allocation3 + $0x1e0] sm:$0xf] %vm790_vm3, %v743_v58  ;;  %v8363_v18 = vpack.c.bf16 %v1938_v21, %v1938_v21  ;;  %v2197_v3 = vld [vmem:[#allocation2 + $0x18a] sm:$0xff] }
 0x10a   : > { %v1190_v15 = vpop.permute.xlu1 %1189  ;;  %v2423_v1 = vld [vmem:[#allocation3 + $0x1a4] sm:$0xff]  ;;  %2080 = vrot.lane.b32.xlu0 %v8357_v42, %s9612_s30  ;;  %2353 = vst.msk [vmem:[#allocation3 + $0x204] sm:$0xf] %vm533_vm2, %v8394_v2  ;;  %v1746_v42 = vld [vmem:[#allocation2 + $0x168] sm:$0xff]  ;;  %2354 = vst.msk [vmem:[#allocation3 + $0x218] sm:$0xf] %vm533_vm2, %v8395_v57  ;;  %v8398_v43 = vpack.c.bf16 %v2197_v3, %v2197_v3 }
 0x10b   : > { %v9338_v46 = vld [vmem:[#allocation3 + $0x194] ss:$20 sps:$4 sm:$0xff]   ;;  %1262 = vst.msk [vmem:[#allocation3 + $0x1d0] sm:$0xf] %vm790_vm3, %v1190_v15  ;;  %v7604_v32 = vcombine.low %v2420_v56, %v2423_v1  ;;  %v8331_v41 = vpack.c.bf16 %v1746_v42, %v1746_v42  ;;  %v1299_v15 = vld [vmem:[#allocation2 + $0x169] sm:$0xff]  ;;  %v8367_v42 = vpack.c.bf16 %v1942_v0, %v1942_v0 }
 0x10c   : > { %1633 = vrot.lane.b32.xlu1 %v10230_v4, %s9612_s30  ;;  %3311 = vmatprep.mubr.bf16.mxu0 %v9338_v46  ;;  %v1192_v30 = vpop.permute.xlu0 %1191  ;;  %v8266_v4 = vpack.c.bf16 %v1296_v9, %v1296_v9  ;;  %v2426_v35 = vld [vmem:[#allocation3 + $0x1b8] sm:$0xff]  ;;  %2355 = vst.msk [vmem:[#allocation3 + $0x22c] sm:$0xf] %vm533_vm2, %v8396_v10  ;;  %1907 = vst.msk [vmem:[#allocation3 + $0x228] sm:$0xf] %vm533_vm2, %v8332_v54  ;;  %v8269_v46 = vpack.c.bf16 %v1299_v15, %v1299_v15 }
 0x10d   : > { %1263 = vst.msk [vmem:[#allocation3 + $0x1e4] sm:$0xf] %vm790_vm3, %v1192_v30  ;;  %v1749_v56 = vld [vmem:[#allocation2 + $0x188] sm:$0xff]  ;;  %v1939_v30 = vld [vmem:[#allocation2 + $0x171] sm:$0xff] }
 0x10e   : > { %v745_v6 = vpop.permute.xlu1 %744  ;;  %3312 = vmatmul.mubr.bf16.gmra.mxu0 %v7604_v32  ;;  %1635 = vrot.lane.b32.xlu0 %v10236_v26, %s9612_s30  ;;  %1456 = vst.msk [vmem:[#allocation3 + $0x1fc] sm:$0xf] %vm533_vm2, %v8266_v4  ;;  %1906 = vst.msk [vmem:[#allocation3 + $0x214] sm:$0xf] %vm533_vm2, %v8331_v41  ;;  %v8334_v32 = vpack.c.bf16 %v1749_v56, %v1749_v56  ;;  %v8364_v4 = vpack.c.bf16 %v1939_v30, %v1939_v30  ;;  %v1302_v61 = vld [vmem:[#allocation2 + $0x189] sm:$0xff] }
 0x10f   : > { %816 = vst.msk [vmem:[#allocation3 + $0x1f4] sm:$0xf] %vm790_vm3, %v745_v6  ;;  %v8272_v28 = vpack.c.bf16 %v1302_v61, %v1302_v61  ;;  %v1941_v45 = vld [vmem:[#allocation2 + $0x189] sm:$0xff] }
 0x110   : > { %2082 = vrot.lane.b32.xlu1 %v8358_v55, %s9612_s30  ;;  %v747_v50 = vpop.permute.xlu0 %746  ;;  %v8333_v55 = vpack.c.bf16 %v1748_v22, %v1748_v22  ;;  %1459 = vst.msk [vmem:[#allocation3 + $0x238] sm:$0xf] %vm533_vm2, %v8269_v46  ;;  %1909 = vst.msk [vmem:[#allocation3 + $0x250] sm:$0xf] %vm533_vm2, %v8334_v32  ;;  %v9370_v15 = vld [vmem:[#allocation3 + $0x38] ss:$20 sps:$4 sm:$0xff]  }
 0x111   : > { %817 = vst.msk [vmem:[#allocation3 + $0x208] sm:$0xf] %vm790_vm3, %v747_v50  ;;  %v9375_v22 = vld [vmem:[#allocation3 + $0x60] ss:$20 sps:$4 sm:$0xff]  }
 0x112   : > { %v1194_v33 = vpop.permute.xlu1 %1193  ;;  %v2429_v26 = vld [vmem:[#allocation3 + $0x1cc] sm:$0xff]  ;;  %2084 = vrot.lane.b32.xlu0 %v8359_v49, %s9612_s30  ;;  %1908 = vst.msk [vmem:[#allocation3 + $0x23c] sm:$0xf] %vm533_vm2, %v8333_v55  ;;  %2356 = vst.msk [vmem:[#allocation3 + $0x240] sm:$0xf] %vm533_vm2, %v8397_v52 }
 0x113   : > { %v9340_v44 = vld [vmem:[#allocation3 + $0x1bc] ss:$20 sps:$4 sm:$0xff]   ;;  %1264 = vst.msk [vmem:[#allocation3 + $0x1f8] sm:$0xf] %vm790_vm3, %v1194_v33  ;;  %v7609_v51 = vcombine.low %v2426_v35, %v2429_v26  ;;  %v8365_v26 = vpack.c.bf16 %v1940_v23, %v1940_v23 }
 0x114   : > { %1637 = vrot.lane.b32.xlu1 %v10244_v13, %s9612_s30  ;;  %3319 = vmatprep.mubr.bf16.mxu0 %v9340_v44  ;;  %v1196_v36 = vpop.permute.xlu0 %1195  ;;  %v1298_v13 = vld [vmem:[#allocation2 + $0x159] sm:$0xff]  ;;  %v2432_v27 = vld [vmem:[#allocation3 + $0x1e0] sm:$0xff]  ;;  %v2199_v33 = vld [vmem:[#allocation2 + $0x1a2] sm:$0xff]  ;;  %2357 = vst.msk [vmem:[#allocation3 + $0x254] sm:$0xf] %vm533_vm2, %v8398_v43 }
 0x115   : > { %1265 = vst.msk [vmem:[#allocation3 + $0x20c] sm:$0xf] %vm790_vm3, %v1196_v36  ;;  %v8268_v5 = vpack.c.bf16 %v1298_v13, %v1298_v13  ;;  %v1493_v44 = vld [vmem:[#allocation2 + $0x182] sm:$0xff] }
 0x116   : > { %v749_v19 = vpop.permute.xlu1 %748  ;;  %3320 = vmatmul.mubr.bf16.gmra.mxu0 %v7609_v51  ;;  %1639 = vrot.lane.b32.xlu0 %v10250_v24, %s9612_s30  ;;  %v1937_v24 = vld [vmem:[#allocation2 + $0x159] sm:$0xff]  ;;  %v8399_v51 = vpack.c.bf16 %v2198_v60, %v2198_v60  ;;  %v1301_v36 = vld [vmem:[#allocation2 + $0x181] sm:$0xff]  ;;  %v8303_v13 = vpack.c.bf16 %v1493_v44, %v1493_v44  ;;  %1462 = vst.msk [vmem:[#allocation3 + $0x274] sm:$0xf] %vm533_vm2, %v8272_v28 }
 0x117   : > { %818 = vst.msk [vmem:[#allocation3 + $0x21c] sm:$0xf] %vm790_vm3, %v749_v19  ;;  %v8362_v38 = vpack.c.bf16 %v1937_v24, %v1937_v24  ;;  %v8271_v29 = vpack.c.bf16 %v1301_v36, %v1301_v36 }
 0x118   : > { %2086 = vrot.lane.b32.xlu1 %v8360_v31, %s9612_s30  ;;  %v751_v20 = vpop.permute.xlu0 %750  ;;  %1458 = vst.msk [vmem:[#allocation3 + $0x224] sm:$0xf] %vm533_vm2, %v8268_v5  ;;  %v1751_v31 = vld [vmem:[#allocation2 + $0x1a0] sm:$0xff]  ;;  %2358 = vst.msk [vmem:[#allocation3 + $0x268] sm:$0xf] %vm533_vm2, %v8399_v51  ;;  %v8366_v5 = vpack.c.bf16 %v1941_v45, %v1941_v45 }
 0x119   : > { %819 = vst.msk [vmem:[#allocation3 + $0x230] sm:$0xf] %vm790_vm3, %v751_v20  ;;  %v10612_v2 = vpack.c.bf16 %v1751_v31, %v1751_v31 }
 0x11a   : > { %v1198_v17 = vpop.permute.xlu1 %1197  ;;  %v2435_v7 = vld [vmem:[#allocation3 + $0x1f4] sm:$0xff]  ;;  %2088 = vrot.lane.b32.xlu0 %v8361_v37, %s9612_s30  ;;  %1461 = vst.msk [vmem:[#allocation3 + $0x260] sm:$0xf] %vm533_vm2, %v8271_v29 }
 0x11b   : > { %v9342_v12 = vld [vmem:[#allocation3 + $0x1e4] ss:$20 sps:$4 sm:$0xff]   ;;  %1266 = vst.msk [vmem:[#allocation3 + $0x220] sm:$0xf] %vm790_vm3, %v1198_v17  ;;  %v7614_v58 = vcombine.low %v2432_v27, %v2435_v7  ;;  %v8304_v17 = vpack.c.bf16 %v1494_v62, %v1494_v62 }
 0x11c   : > { %1641 = vrot.lane.b32.xlu1 %v10258_v40, %s9612_s30  ;;  %3327 = vmatprep.mubr.bf16.mxu0 %v9342_v12  ;;  %v1200_v48 = vpop.permute.xlu0 %1199  ;;  %v8270_v40 = vpack.c.bf16 %v1300_v16, %v1300_v16  ;;  %v2438_v49 = vld [vmem:[#allocation3 + $0x208] sm:$0xff]  ;;  %1911 = vst.msk [vmem:[#allocation3 + $0x278] sm:$0xf] %vm533_vm2, %v10612_v2 }
 0x11d   : > { %1267 = vst.msk [vmem:[#allocation3 + $0x234] sm:$0xf] %vm790_vm3, %v1200_v48  ;;  %v9369_v48 = vld [vmem:[#allocation3 + $0x10] ss:$20 sps:$4 sm:$0xff]  }
 0x11e   : > { %v753_v63 = vpop.permute.xlu1 %752  ;;  %3328 = vmatmul.mubr.bf16.gmra.mxu0 %v7614_v58  ;;  %1643 = vrot.lane.b32.xlu0 %v10270_v11, %s9612_s30  ;;  %1460 = vst.msk [vmem:[#allocation3 + $0x24c] sm:$0xf] %vm533_vm2, %v8270_v40 }
 0x11f   : > { %820 = vst.msk [vmem:[#allocation3 + $0x244] sm:$0xf] %vm790_vm3, %v753_v63 }
 0x120   : > { %2090 = vrot.lane.b32.xlu1 %v8362_v38, %s9612_s30  ;;  %v755_v1 = vpop.permute.xlu0 %754 }
 0x121   : > { %821 = vst.msk [vmem:[#allocation3 + $0x258] sm:$0xf] %vm790_vm3, %v755_v1 }
 0x122   : > { %v1202_v6 = vpop.permute.xlu1 %1201  ;;  %v2441_v11 = vld [vmem:[#allocation3 + $0x21c] sm:$0xff]  ;;  %2092 = vrot.lane.b32.xlu0 %v8363_v18, %s9612_s30 }
 0x123   : > { %v9348_v9 = vld [vmem:[#allocation3 + $0x20c] ss:$20 sps:$4 sm:$0xff]   ;;  %1268 = vst.msk [vmem:[#allocation3 + $0x248] sm:$0xf] %vm790_vm3, %v1202_v6  ;;  %v7619_v47 = vcombine.low %v2438_v49, %v2441_v11  ;;  %v9376_v49 = vld [vmem:[#allocation3 + $0x88] ss:$20 sps:$4 sm:$0xff]  }
 0x124   : > { %1645 = vrot.lane.b32.xlu1 %v10281_v34, %s9612_s30  ;;  %3335 = vmatprep.mubr.bf16.mxu0 %v9348_v9  ;;  %v1204_v50 = vpop.permute.xlu0 %1203  ;;  %v8400_v34 = vpack.c.bf16 %v2199_v33, %v2199_v33  ;;  %v2444_v37 = vld [vmem:[#allocation3 + $0x230] sm:$0xff] }
 0x125   : > { %1269 = vst.msk [vmem:[#allocation3 + $0x25c] sm:$0xf] %vm790_vm3, %v1204_v50 }
 0x126   : > { %v757_v35 = vpop.permute.xlu1 %756  ;;  %3336 = vmatmul.mubr.bf16.gmra.mxu0 %v7619_v47  ;;  %1647 = vrot.lane.b32.xlu0 %v10296_v14, %s9612_s30  ;;  %v1750_v14 = vld [vmem:[#allocation2 + $0x198] sm:$0xff]  ;;  %2359 = vst.msk [vmem:[#allocation3 + $0x27c] sm:$0xf] %vm533_vm2, %v8400_v34 }
 0x127   : > { %822 = vst.msk [vmem:[#allocation3 + $0x26c] sm:$0xf] %vm790_vm3, %v757_v35  ;;  %v10617_v39 = vpack.c.bf16 %v1750_v14, %v1750_v14  ;;  %v9388_v14 = vld [vmem:[#allocation3 + $0x128] ss:$20 sps:$4 sm:$0xff]  }
 0x128   : > { %2094 = vrot.lane.b32.xlu1 %v8364_v4, %s9612_s30  ;;  %v1592_v53 = vpop.permute.xlu0 %1591  ;;  %v9381_v4 = vld [vmem:[#allocation3 + $0xb0] ss:$20 sps:$4 sm:$0xff]  }
 0x129   : > { %1687 = vst.msk [vmem:[#allocation3 + $0x8] sm:$0xf] %vm790_vm3, %v1592_v53 }
 0x12a   : > { %v1206_v19 = vpop.permute.xlu1 %1205  ;;  %v2447_v57 = vld [vmem:[#allocation3 + $0x244] sm:$0xff]  ;;  %2096 = vrot.lane.b32.xlu0 %v8365_v26, %s9612_s30  ;;  %1910 = vst.msk [vmem:[#allocation3 + $0x264] sm:$0xf] %vm533_vm2, %v10617_v39  ;;  %v9382_v26 = vld [vmem:[#allocation3 + $0xd8] ss:$20 sps:$4 sm:$0xff]  }
 0x12b   : > { %v9355_v10 = vld [vmem:[#allocation3 + $0x234] ss:$20 sps:$4 sm:$0xff]   ;;  %1270 = vst.msk [vmem:[#allocation3 + $0x270] sm:$0xf] %vm790_vm3, %v1206_v19  ;;  %v7624_v8 = vcombine.low %v2444_v37, %v2447_v57  ;;  %v9393_v19 = vld [vmem:[#allocation3 + $0x150] ss:$20 sps:$4 sm:$0xff]  }
 0x12c   : > { %1649 = vrot.lane.b32.xlu1 %v10307_v25, %s9612_s30  ;;  %3343 = vmatprep.mubr.bf16.mxu0 %v9355_v10  ;;  %v2041_v20 = vpop.permute.xlu0 %2040  ;;  %v1943_v25 = vld [vmem:[#allocation2 + $0x1a1] sm:$0xff] }
 0x12d   : > { %2136 = vst.msk [vmem:[#allocation3 + $0xc] sm:$0xf] %vm790_vm3, %v2041_v20  ;;  %v10632_v24 = vld [vmem:[#allocation3 + $0x268] ss:$20 sps:$4 sm:$0xff]   ;;  %v8368_v63 = vpack.c.bf16 %v1943_v25, %v1943_v25 }
 0x12e   : > { %v1594_v54 = vpop.permute.xlu1 %1593  ;;  %3344 = vmatmul.mubr.bf16.gmra.mxu0 %v7624_v8  ;;  %1651 = vrot.lane.b32.xlu0 %v8303_v13, %s9612_s30  ;;  %5794 = vst.msk [vmem:[#allocation3 + $0x268] sm:$0xf] %vm533_vm2, %v8399_v51  ;;  %5795 = vst.msk [vmem:[#allocation3 + $0x27c] sm:$0xf] %vm533_vm2, %v8400_v34  ;;  %v2450_v7 = vld [vmem:[#allocation3 + $0x258] sm:$0xff] }
 0x12f   : > { %1688 = vst.msk [vmem:[#allocation3 + $0x1c] sm:$0xf] %vm790_vm3, %v1594_v54  ;;  %v9387_v51 = vld [vmem:[#allocation3 + $0x100] ss:$20 sps:$4 sm:$0xff]  }
 0x130   : > { %2098 = vrot.lane.b32.xlu1 %v8366_v5, %s9612_s30  ;;  %v1596_v41 = vpop.permute.xlu0 %1595  ;;  %v9394_v5 = vld [vmem:[#allocation3 + $0x178] ss:$20 sps:$4 sm:$0xff]   ;;  %v9399_v54 = vld [vmem:[#allocation3 + $0x1a0] ss:$20 sps:$4 sm:$0xff]  }
 0x131   : > { %1689 = vst.msk [vmem:[#allocation3 + $0x30] sm:$0xf] %vm790_vm3, %v1596_v41 }
 0x132   : > { %v2043_v27 = vpop.permute.xlu1 %2042  ;;  %v2453_v12 = vld [vmem:[#allocation3 + $0x26c] sm:$0xff]  ;;  %2100 = vrot.lane.b32.xlu0 %v8367_v42, %s9612_s30 }
 0x133   : > { %v9361_v58 = vld [vmem:[#allocation3 + $0x25c] ss:$20 sps:$4 sm:$0xff]   ;;  %2137 = vst.msk [vmem:[#allocation3 + $0x20] sm:$0xf] %vm790_vm3, %v2043_v27  ;;  %v7629_v21 = vcombine.low %v2450_v7, %v2453_v12 }
 0x134   : > { %1653 = vrot.lane.b32.xlu1 %v8304_v17, %s9612_s30  ;;  %3351 = vmatprep.mubr.bf16.mxu0 %v9361_v58  ;;  %v2045_v38 = vpop.permute.xlu0 %2044  ;;  %v2361_v1 = vld [vmem:[#allocation3 + $0x8] sm:$0xff] }
 0x135   : > { %2138 = vst.msk [vmem:[#allocation3 + $0x34] sm:$0xf] %vm790_vm3, %v2045_v38  ;;  %v9400_v58 = vld [vmem:[#allocation3 + $0x1c8] ss:$20 sps:$4 sm:$0xff]  }
 0x136   : > { %v1598_v18 = vpop.permute.xlu1 %1597  ;;  %3352 = vmatmul.mubr.bf16.gmra.mxu0 %v7629_v21 }
 0x137   : > { %1690 = vst.msk [vmem:[#allocation3 + $0x44] sm:$0xf] %vm790_vm3, %v1598_v18  ;;  %9186 = vmatprep.mubr.msk.bf16.mxu0 %vm284_vm0, %v9369_v48  ;;  %v9405_v48 = vld [vmem:[#allocation3 + $0x1f0] ss:$20 sps:$4 sm:$0xff]  }
 0x138   : > { %2102 = vrot.lane.b32.xlu1 %v8368_v63, %s9612_s30  ;;  %v1600_v16 = vpop.permute.xlu0 %1599 }
 0x139   : > { %1691 = vst.msk [vmem:[#allocation3 + $0x58] sm:$0xf] %vm790_vm3, %v1600_v16 }
 0x13a   : > { %v2047_v56 = vpop.permute.xlu1 %2046  ;;  %v2364_v40 = vld [vmem:[#allocation3 + $0x1c] sm:$0xff] }
 0x13b   : > { %v9367_v46 = vld [vmem:[#allocation3 + $0xc] ss:$20 sps:$4 sm:$0xff]   ;;  %2139 = vst.msk [vmem:[#allocation3 + $0x48] sm:$0xf] %vm790_vm3, %v2047_v56  ;;  %v7556_v32 = vcombine.low %v2361_v1, %v2364_v40 }
 0x13c   : > { %3392 = vmatprep.mubr.bf16.mxu1 %v9367_v46  ;;  %v2049_v30 = vpop.permute.xlu0 %2048  ;;  %v2367_v9 = vld [vmem:[#allocation3 + $0x30] sm:$0xff]  ;;  %v9406_v40 = vld [vmem:[#allocation3 + $0x218] ss:$20 sps:$4 sm:$0xff]  }
 0x13d   : > { %3393 = vmatmul.mubr.bf16.vlgmr.msra.gmra.mxu1 %v7556_v32  ;;  %2140 = vst.msk [vmem:[#allocation3 + $0x5c] sm:$0xf] %vm790_vm3, %v2049_v30  ;;  %v9412_v32 = vld [vmem:[#allocation3 + $0x240] ss:$20 sps:$4 sm:$0xff]  }
 0x13e   : > { %v1602_v55 = vpop.permute.xlu1 %1601  ;;  %9187 = vmatmul.mubr.msk.bf16.vlgmr.msra.gmra.mxu0 %vm284_vm0, %v9370_v15 }
 0x13f   : > { %1692 = vst.msk [vmem:[#allocation3 + $0x6c] sm:$0xf] %vm790_vm3, %v1602_v55  ;;  %9190 = vmatprep.mubr.msk.bf16.mxu0 %vm284_vm0, %v9375_v22 }
 0x140   : > { %v1604_v6 = vpop.permute.xlu0 %1603 }
 0x141   : > { %1693 = vst.msk [vmem:[#allocation3 + $0x80] sm:$0xf] %vm790_vm3, %v1604_v6 }
 0x142   : > { %v2051_v11 = vpop.permute.xlu1 %2050  ;;  %v2370_v47 = vld [vmem:[#allocation3 + $0x44] sm:$0xff] }
 0x143   : > { %v9371_v23 = vld [vmem:[#allocation3 + $0x34] ss:$20 sps:$4 sm:$0xff]   ;;  %2141 = vst.msk [vmem:[#allocation3 + $0x70] sm:$0xf] %vm790_vm3, %v2051_v11  ;;  %v7561_v50 = vcombine.low %v2367_v9, %v2370_v47 }
 0x144   : > { %3400 = vmatprep.mubr.bf16.mxu1 %v9371_v23  ;;  %v2053_v59 = vpop.permute.xlu0 %2052  ;;  %v2373_v52 = vld [vmem:[#allocation3 + $0x58] sm:$0xff] }
 0x145   : > { %3401 = vmatmul.mubr.bf16.gmra.mxu1 %v7561_v50  ;;  %2142 = vst.msk [vmem:[#allocation3 + $0x84] sm:$0xf] %vm790_vm3, %v2053_v59 }
 0x146   : > { %v1606_v3 = vpop.permute.xlu1 %1605  ;;  %9191 = vmatmul.mubr.msk.bf16.gmra.mxu0 %vm284_vm0, %v9376_v49 }
 0x147   : > { %1694 = vst.msk [vmem:[#allocation3 + $0x94] sm:$0xf] %vm790_vm3, %v1606_v3  ;;  %9194 = vmatprep.mubr.msk.bf16.mxu0 %vm284_vm0, %v9381_v4 }
 0x148   : > { %v1608_v43 = vpop.permute.xlu0 %1607 }
 0x149   : > { %1695 = vst.msk [vmem:[#allocation3 + $0xa8] sm:$0xf] %vm790_vm3, %v1608_v43 }
 0x14a   : > { %v2055_v60 = vpop.permute.xlu1 %2054  ;;  %v2376_v33 = vld [vmem:[#allocation3 + $0x6c] sm:$0xff] }
 0x14b   : > { %v9373_v35 = vld [vmem:[#allocation3 + $0x5c] ss:$20 sps:$4 sm:$0xff]   ;;  %2143 = vst.msk [vmem:[#allocation3 + $0x98] sm:$0xf] %vm790_vm3, %v2055_v60  ;;  %v7566_v44 = vcombine.low %v2373_v52, %v2376_v33 }
 0x14c   : > { %3408 = vmatprep.mubr.bf16.mxu1 %v9373_v35  ;;  %v2057_v34 = vpop.permute.xlu0 %2056  ;;  %v2379_v36 = vld [vmem:[#allocation3 + $0x80] sm:$0xff] }
 0x14d   : > { %3409 = vmatmul.mubr.bf16.gmra.mxu1 %v7566_v44  ;;  %2144 = vst.msk [vmem:[#allocation3 + $0xac] sm:$0xf] %vm790_vm3, %v2057_v34 }
 0x14e   : > { %v1610_v61 = vpop.permute.xlu1 %1609  ;;  %9195 = vmatmul.mubr.msk.bf16.gmra.mxu0 %vm284_vm0, %v9382_v26 }
 0x14f   : > { %1696 = vst.msk [vmem:[#allocation3 + $0xbc] sm:$0xf] %vm790_vm3, %v1610_v61  ;;  %9198 = vmatprep.mubr.msk.bf16.mxu0 %vm284_vm0, %v9387_v51 }
 0x150   : > { %v1612_v31 = vpop.permute.xlu0 %1611 }
 0x151   : > { %1697 = vst.msk [vmem:[#allocation3 + $0xd0] sm:$0xf] %vm790_vm3, %v1612_v31 }
 0x152   : > { %v2059_v53 = vpop.permute.xlu1 %2058  ;;  %v2382_v28 = vld [vmem:[#allocation3 + $0x94] sm:$0xff] }
 0x153   : > { %v9377_v29 = vld [vmem:[#allocation3 + $0x84] ss:$20 sps:$4 sm:$0xff]   ;;  %2145 = vst.msk [vmem:[#allocation3 + $0xc0] sm:$0xf] %vm790_vm3, %v2059_v53  ;;  %v7571_v45 = vcombine.low %v2379_v36, %v2382_v28 }
 0x154   : > { %3416 = vmatprep.mubr.bf16.mxu1 %v9377_v29  ;;  %v2061_v37 = vpop.permute.xlu0 %2060  ;;  %v2385_v10 = vld [vmem:[#allocation3 + $0xa8] sm:$0xff] }
 0x155   : > { %3417 = vmatmul.mubr.bf16.gmra.mxu1 %v7571_v45  ;;  %2146 = vst.msk [vmem:[#allocation3 + $0xd4] sm:$0xf] %vm790_vm3, %v2061_v37 }
 0x156   : > { %v1614_v57 = vpop.permute.xlu1 %1613  ;;  %9199 = vmatmul.mubr.msk.bf16.gmra.mxu0 %vm284_vm0, %v9388_v14 }
 0x157   : > { %1698 = vst.msk [vmem:[#allocation3 + $0xe4] sm:$0xf] %vm790_vm3, %v1614_v57  ;;  %9202 = vmatprep.mubr.msk.bf16.mxu0 %vm284_vm0, %v9393_v19 }
 0x158   : > { %v1616_v13 = vpop.permute.xlu0 %1615 }
 0x159   : > { %1699 = vst.msk [vmem:[#allocation3 + $0xf8] sm:$0xf] %vm790_vm3, %v1616_v13 }
 0x15a   : > { %v2063_v8 = vpop.permute.xlu1 %2062  ;;  %v2388_v0 = vld [vmem:[#allocation3 + $0xbc] sm:$0xff] }
 0x15b   : > { %v9379_v20 = vld [vmem:[#allocation3 + $0xac] ss:$20 sps:$4 sm:$0xff]   ;;  %2147 = vst.msk [vmem:[#allocation3 + $0xe8] sm:$0xf] %vm790_vm3, %v2063_v8  ;;  %v7576_v62 = vcombine.low %v2385_v10, %v2388_v0 }
 0x15c   : > { %3424 = vmatprep.mubr.bf16.mxu1 %v9379_v20  ;;  %v2065_v42 = vpop.permute.xlu0 %2064  ;;  %v2391_v17 = vld [vmem:[#allocation3 + $0xd0] sm:$0xff] }
 0x15d   : > { %3425 = vmatmul.mubr.bf16.gmra.mxu1 %v7576_v62  ;;  %2148 = vst.msk [vmem:[#allocation3 + $0xfc] sm:$0xf] %vm790_vm3, %v2065_v42 }
 0x15e   : > { %v1618_v41 = vpop.permute.xlu1 %1617  ;;  %9203 = vmatmul.mubr.msk.bf16.gmra.mxu0 %vm284_vm0, %v9394_v5 }
 0x15f   : > { %1700 = vst.msk [vmem:[#allocation3 + $0x10c] sm:$0xf] %vm790_vm3, %v1618_v41  ;;  %9206 = vmatprep.mubr.msk.bf16.mxu0 %vm284_vm0, %v9399_v54 }
 0x160   : > { %v1620_v25 = vpop.permute.xlu0 %1619 }
 0x161   : > { %1701 = vst.msk [vmem:[#allocation3 + $0x120] sm:$0xf] %vm790_vm3, %v1620_v25 }
 0x162   : > { %v2067_v27 = vpop.permute.xlu1 %2066  ;;  %v2394_v7 = vld [vmem:[#allocation3 + $0xe4] sm:$0xff] }
 0x163   : > { %v9383_v12 = vld [vmem:[#allocation3 + $0xd4] ss:$20 sps:$4 sm:$0xff]   ;;  %2149 = vst.msk [vmem:[#allocation3 + $0x110] sm:$0xf] %vm790_vm3, %v2067_v27  ;;  %v7581_v21 = vcombine.low %v2391_v17, %v2394_v7 }
 0x164   : > { %3432 = vmatprep.mubr.bf16.mxu1 %v9383_v12  ;;  %v2069_v38 = vpop.permute.xlu0 %2068  ;;  %v2397_v18 = vld [vmem:[#allocation3 + $0xf8] sm:$0xff] }
 0x165   : > { %3433 = vmatmul.mubr.bf16.gmra.mxu1 %v7581_v21  ;;  %2150 = vst.msk [vmem:[#allocation3 + $0x124] sm:$0xf] %vm790_vm3, %v2069_v38 }
 0x166   : > { %v1622_v63 = vpop.permute.xlu1 %1621  ;;  %9207 = vmatmul.mubr.msk.bf16.gmra.mxu0 %vm284_vm0, %v9400_v58 }
 0x167   : > { %1702 = vst.msk [vmem:[#allocation3 + $0x134] sm:$0xf] %vm790_vm3, %v1622_v63  ;;  %9210 = vmatprep.mubr.msk.bf16.mxu0 %vm284_vm0, %v9405_v48 }
 0x168   : > { %v1624_v16 = vpop.permute.xlu0 %1623 }
 0x169   : > { %1703 = vst.msk [vmem:[#allocation3 + $0x148] sm:$0xf] %vm790_vm3, %v1624_v16 }
 0x16a   : > { %v2071_v15 = vpop.permute.xlu1 %2070  ;;  %v2400_v56 = vld [vmem:[#allocation3 + $0x10c] sm:$0xff] }
 0x16b   : > { %v9385_v1 = vld [vmem:[#allocation3 + $0xfc] ss:$20 sps:$4 sm:$0xff]   ;;  %2151 = vst.msk [vmem:[#allocation3 + $0x138] sm:$0xf] %vm790_vm3, %v2071_v15  ;;  %v7586_v46 = vcombine.low %v2397_v18, %v2400_v56 }
 0x16c   : > { %3440 = vmatprep.mubr.bf16.mxu1 %v9385_v1  ;;  %v2073_v22 = vpop.permute.xlu0 %2072  ;;  %v2403_v55 = vld [vmem:[#allocation3 + $0x120] sm:$0xff]  ;;  %v4004_v15 = vld [vmem:[#allocation2 + $0x1] sm:$0xff] }
 0x16d   : > { %3441 = vmatmul.mubr.bf16.gmra.mxu1 %v7586_v46  ;;  %2152 = vst.msk [vmem:[#allocation3 + $0x14c] sm:$0xf] %vm790_vm3, %v2073_v22  ;;  %v8433_v56 = vpack.c.bf16 %v4004_v15, %v4004_v15 }
 0x16e   : > { %v1626_v30 = vpop.permute.xlu1 %1625  ;;  %9211 = vmatmul.mubr.msk.bf16.gmra.mxu0 %vm284_vm0, %v9406_v40 }
 0x16f   : > { %1704 = vst.msk [vmem:[#allocation3 + $0x15c] sm:$0xf] %vm790_vm3, %v1626_v30  ;;  %9214 = vmatprep.mubr.msk.bf16.mxu0 %vm284_vm0, %v9412_v32  ;;  %4132 = vrot.lane.b32.xlu0 %v8433_v56, %s9612_s30  ;;  %v4005_v30 = vld [vmem:[#allocation2 + $0x9] sm:$0xff] }
 0x170   : > { %v1628_v6 = vpop.permute.xlu0 %1627 }
 0x171   : > { %1705 = vst.msk [vmem:[#allocation3 + $0x170] sm:$0xf] %vm790_vm3, %v1628_v6  ;;  %v8434_v6 = vpack.c.bf16 %v4005_v30, %v4005_v30 }
 0x172   : > { %v2075_v49 = vpop.permute.xlu1 %2074  ;;  %v2406_v11 = vld [vmem:[#allocation3 + $0x134] sm:$0xff] }
 0x173   : > { %v9389_v9 = vld [vmem:[#allocation3 + $0x124] ss:$20 sps:$4 sm:$0xff]   ;;  %2153 = vst.msk [vmem:[#allocation3 + $0x160] sm:$0xf] %vm790_vm3, %v2075_v49  ;;  %v7591_v47 = vcombine.low %v2403_v55, %v2406_v11  ;;  %4134 = vrot.lane.b32.xlu1 %v8434_v6, %s9612_s30 }
 0x174   : > { %3448 = vmatprep.mubr.bf16.mxu1 %v9389_v9  ;;  %v2077_v23 = vpop.permute.xlu0 %2076  ;;  %v2409_v4 = vld [vmem:[#allocation3 + $0x148] sm:$0xff] }
 0x175   : > { %3449 = vmatmul.mubr.bf16.gmra.mxu1 %v7591_v47  ;;  %2154 = vst.msk [vmem:[#allocation3 + $0x174] sm:$0xf] %vm790_vm3, %v2077_v23 }
 0x176   : > { %v1630_v50 = vpop.permute.xlu1 %1629  ;;  %9215 = vmatmul.mubr.msk.bf16.gmra.mxu0 %vm284_vm0, %v10632_v24 }
 0x177   : > { %1706 = vst.msk [vmem:[#allocation3 + $0x184] sm:$0xf] %vm790_vm3, %v1630_v50 }
 0x178   : > { %v1632_v59 = vpop.permute.xlu0 %1631 }
 0x179   : > { %1707 = vst.msk [vmem:[#allocation3 + $0x198] sm:$0xf] %vm790_vm3, %v1632_v59 }
 0x17a   : > { %v2079_v3 = vpop.permute.xlu1 %2078  ;;  %v2412_v52 = vld [vmem:[#allocation3 + $0x15c] sm:$0xff] }
 0x17b   : > { %v9391_v43 = vld [vmem:[#allocation3 + $0x14c] ss:$20 sps:$4 sm:$0xff]   ;;  %2155 = vst.msk [vmem:[#allocation3 + $0x188] sm:$0xf] %vm790_vm3, %v2079_v3  ;;  %v7596_v60 = vcombine.low %v2409_v4, %v2412_v52 }
 0x17c   : > { %3456 = vmatprep.mubr.bf16.mxu1 %v9391_v43  ;;  %v2081_v33 = vpop.permute.xlu0 %2080  ;;  %v2415_v44 = vld [vmem:[#allocation3 + $0x170] sm:$0xff] }
 0x17d   : > { %3457 = vmatmul.mubr.bf16.gmra.mxu1 %v7596_v60  ;;  %2156 = vst.msk [vmem:[#allocation3 + $0x19c] sm:$0xf] %vm790_vm3, %v2081_v33 }
 0x17e   : > { %v8706_v35 = vpop.f32.mrf.mxu0  ;;  %v1634_v26 = vpop.permute.xlu1 %1633 }
 0x17f   : > { %1708 = vst.msk [vmem:[#allocation3 + $0x1ac] sm:$0xf] %vm790_vm3, %v1634_v26 }
 0x180   : > { %v8707_v24 = vpop.f32.mrf.mxu0  ;;  %v1636_v51 = vpop.permute.xlu0 %1635 }
 0x181   : > { %v10697_v34 = vadd.f32 %v8707_v24, %v8706_v35  ;;  %1709 = vst.msk [vmem:[#allocation3 + $0x1c0] sm:$0xf] %vm790_vm3, %v1636_v51 }
 0x182   : > { %v10700_v61 = vpop.f32.mrf.mxu0  ;;  %v2083_v36 = vpop.permute.xlu1 %2082  ;;  %v2418_v31 = vld [vmem:[#allocation3 + $0x184] sm:$0xff] }
 0x183   : > { %v9395_v53 = vld [vmem:[#allocation3 + $0x174] ss:$20 sps:$4 sm:$0xff]   ;;  %2157 = vst.msk [vmem:[#allocation3 + $0x1b0] sm:$0xf] %vm790_vm3, %v2083_v36  ;;  %v7601_v28 = vcombine.low %v2415_v44, %v2418_v31 }
 0x184   : > { %v10703_v29 = vpop.f32.mrf.mxu0  ;;  %3464 = vmatprep.mubr.bf16.mxu1 %v9395_v53  ;;  %v2085_v14 = vpop.permute.xlu0 %2084  ;;  %v2421_v57 = vld [vmem:[#allocation3 + $0x198] sm:$0xff] }
 0x185   : > { %3465 = vmatmul.mubr.bf16.gmra.mxu1 %v7601_v28  ;;  %2158 = vst.msk [vmem:[#allocation3 + $0x1c4] sm:$0xf] %vm790_vm3, %v2085_v14 }
 0x186   : > { %v1638_v45 = vpop.permute.xlu1 %1637  ;;  %v8712_v19 = vpop.f32.mrf.mxu0 }
 0x187   : > { %1710 = vst.msk [vmem:[#allocation3 + $0x1d4] sm:$0xf] %vm790_vm3, %v1638_v45 }
 0x188   : > { %v8713_v37 = vpop.f32.mrf.mxu0  ;;  %v1640_v10 = vpop.permute.xlu0 %1639 }
 0x189   : > { %v10707_v13 = vadd.f32 %v8713_v37, %v8712_v19  ;;  %1711 = vst.msk [vmem:[#allocation3 + $0x1e8] sm:$0xf] %vm790_vm3, %v1640_v10 }
 0x18a   : > { %v2087_v8 = vpop.permute.xlu1 %2086  ;;  %v10710_v0 = vpop.f32.mrf.mxu0  ;;  %v2424_v20 = vld [vmem:[#allocation3 + $0x1ac] sm:$0xff] }
 0x18b   : > { %v9397_v5 = vld [vmem:[#allocation3 + $0x19c] ss:$20 sps:$4 sm:$0xff]   ;;  %2159 = vst.msk [vmem:[#allocation3 + $0x1d8] sm:$0xf] %vm790_vm3, %v2087_v8  ;;  %v7606_v62 = vcombine.low %v2421_v57, %v2424_v20 }
 0x18c   : > { %v10713_v54 = vpop.f32.mrf.mxu0  ;;  %3472 = vmatprep.mubr.bf16.mxu1 %v9397_v5  ;;  %v2089_v42 = vpop.permute.xlu0 %2088  ;;  %v2427_v27 = vld [vmem:[#allocation3 + $0x1c0] sm:$0xff] }
 0x18d   : > { %3473 = vmatmul.mubr.bf16.gmra.mxu1 %v7606_v62  ;;  %2160 = vst.msk [vmem:[#allocation3 + $0x1ec] sm:$0xf] %vm790_vm3, %v2089_v42 }
 0x18e   : > { %v1642_v41 = vpop.permute.xlu1 %1641  ;;  %v8718_v17 = vpop.f32.mrf.mxu0 }
 0x18f   : > { %1712 = vst.msk [vmem:[#allocation3 + $0x1fc] sm:$0xf] %vm790_vm3, %v1642_v41 }
 0x190   : > { %v8719_v25 = vpop.f32.mrf.mxu0  ;;  %v1644_v7 = vpop.permute.xlu0 %1643 }
 0x191   : > { %v10717_v12 = vadd.f32 %v8719_v25, %v8718_v17  ;;  %1713 = vst.msk [vmem:[#allocation3 + $0x210] sm:$0xf] %vm790_vm3, %v1644_v7 }
 0x192   : > { %v2091_v58 = vpop.permute.xlu1 %2090  ;;  %v10720_v21 = vpop.f32.mrf.mxu0  ;;  %v2430_v48 = vld [vmem:[#allocation3 + $0x1d4] sm:$0xff] }
 0x193   : > { %v9401_v38 = vld [vmem:[#allocation3 + $0x1c4] ss:$20 sps:$4 sm:$0xff]   ;;  %2161 = vst.msk [vmem:[#allocation3 + $0x200] sm:$0xf] %vm790_vm3, %v2091_v58  ;;  %v7611_v63 = vcombine.low %v2427_v27, %v2430_v48 }
 0x194   : > { %v10723_v18 = vpop.f32.mrf.mxu0  ;;  %3480 = vmatprep.mubr.bf16.mxu1 %v9401_v38  ;;  %v2093_v16 = vpop.permute.xlu0 %2092  ;;  %v2433_v32 = vld [vmem:[#allocation3 + $0x1e8] sm:$0xff] }
 0x195   : > { %3481 = vmatmul.mubr.bf16.gmra.mxu1 %v7611_v63  ;;  %2162 = vst.msk [vmem:[#allocation3 + $0x214] sm:$0xf] %vm790_vm3, %v2093_v16 }
 0x196   : > { %v1646_v1 = vpop.permute.xlu1 %1645  ;;  %v8724_v40 = vpop.f32.mrf.mxu0 }
 0x197   : > { %1714 = vst.msk [vmem:[#allocation3 + $0x224] sm:$0xf] %vm790_vm3, %v1646_v1 }
 0x198   : > { %v8725_v46 = vpop.f32.mrf.mxu0  ;;  %v1648_v22 = vpop.permute.xlu0 %1647 }
 0x199   : > { %v10728_v55 = vadd.f32 %v8725_v46, %v8724_v40  ;;  %1715 = vst.msk [vmem:[#allocation3 + $0x238] sm:$0xf] %vm790_vm3, %v1648_v22 }
 0x19a   : > { %v2095_v49 = vpop.permute.xlu1 %2094  ;;  %v10731_v11 = vpop.f32.mrf.mxu0  ;;  %v2436_v9 = vld [vmem:[#allocation3 + $0x1fc] sm:$0xff] }
 0x19b   : > { %v9403_v47 = vld [vmem:[#allocation3 + $0x1ec] ss:$20 sps:$4 sm:$0xff]   ;;  %2163 = vst.msk [vmem:[#allocation3 + $0x228] sm:$0xf] %vm790_vm3, %v2095_v49  ;;  %v7616_v23 = vcombine.low %v2433_v32, %v2436_v9 }
 0x19c   : > { %v10735_v50 = vpop.f32.mrf.mxu0  ;;  %3488 = vmatprep.mubr.bf16.mxu1 %v9403_v47  ;;  %v2097_v4 = vpop.permute.xlu0 %2096  ;;  %v2439_v43 = vld [vmem:[#allocation3 + $0x210] sm:$0xff] }
 0x19d   : > { %3489 = vmatmul.mubr.bf16.gmra.mxu1 %v7616_v23  ;;  %2164 = vst.msk [vmem:[#allocation3 + $0x23c] sm:$0xf] %vm790_vm3, %v2097_v4 }
 0x19e   : > { %v1650_v59 = vpop.permute.xlu1 %1649  ;;  %v8730_v3 = vpop.f32.mrf.mxu0 }
 0x19f   : > { %1716 = vst.msk [vmem:[#allocation3 + $0x24c] sm:$0xf] %vm790_vm3, %v1650_v59 }
 0x1a0   : > { %v8731_v52 = vpop.f32.mrf.mxu0  ;;  %v1652_v60 = vpop.permute.xlu0 %1651 }
 0x1a1   : > { %v10739_v33 = vadd.f32 %v8731_v52, %v8730_v3  ;;  %1717 = vst.msk [vmem:[#allocation3 + $0x260] sm:$0xf] %vm790_vm3, %v1652_v60 }
 0x1a2   : > { %v2099_v35 = vpop.permute.xlu1 %2098  ;;  %v10742_v26 = vpop.f32.mrf.mxu0  ;;  %v2442_v24 = vld [vmem:[#allocation3 + $0x224] sm:$0xff] }
 0x1a3   : > { %v9407_v44 = vld [vmem:[#allocation3 + $0x214] ss:$20 sps:$4 sm:$0xff]   ;;  %2165 = vst.msk [vmem:[#allocation3 + $0x250] sm:$0xf] %vm790_vm3, %v2099_v35  ;;  %v7621_v51 = vcombine.low %v2439_v43, %v2442_v24 }
 0x1a4   : > { %v10745_v36 = vpop.f32.mrf.mxu0  ;;  %3496 = vmatprep.mubr.bf16.mxu1 %v9407_v44  ;;  %v2101_v31 = vpop.permute.xlu0 %2100 }
 0x1a5   : > { %3497 = vmatmul.mubr.bf16.gmra.mxu1 %v7621_v51  ;;  %2166 = vst.msk [vmem:[#allocation3 + $0x264] sm:$0xf] %vm790_vm3, %v2101_v31 }
 0x1a6   : > { %v1654_v53 = vpop.permute.xlu1 %1653  ;;  %v8736_v28 = vpop.f32.mrf.mxu0  ;;  %v9411_v10 = vld [vmem:[#allocation3 + $0x238] ss:$20 sps:$4 sm:$0xff]  }
 0x1a7   : > { %1718 = vst.msk [vmem:[#allocation3 + $0x274] sm:$0xf] %vm790_vm3, %v1654_v53  ;;  %v9414_v53 = vld [vmem:[%s12125_s3 + $0x78] sm:$0xff]  }
 0x1a8   : > { %v8737_v14 = vpop.f32.mrf.mxu0  ;;  %8934 = vmatprep.subr.bf16.mxu1 %v9414_v53 }
 0x1a9   : > { %v10749_v45 = vadd.f32 %v8737_v14, %v8736_v28  ;;  %v9415_v28 = vld [vmem:[%s12125_s3 + $0x38] sm:$0xff]  }
 0x1aa   : > { %v2103_v19 = vpop.permute.xlu1 %2102  ;;  %v10751_v37 = vpop.f32.mrf.mxu0  ;;  %v9409_v57 = vld [vmem:[#allocation3 + $0x23c] ss:$20 sps:$4 sm:$0xff]   ;;  %8935 = vmatpush3.bf16.msra.mxu1 %v9415_v28  ;;  %v8711_v28 = vadd.f32 %v10703_v29, %v10700_v61 }
 0x1ab   : > { %2167 = vst.msk [vmem:[#allocation3 + $0x278] sm:$0xf] %vm790_vm3, %v2103_v19  ;;  %3504 = vmatprep.mubr.bf16.mxu1 %v9409_v57  ;;  %v9418_v61 = vld [vmem:[%s12125_s3 + $0x68] sm:$0xff]  }
 0x1ac   : > { %v2451_v8 = vld [vmem:[#allocation3 + $0x260] sm:$0xff]  ;;  %v10754_v20 = vpop.f32.mrf.mxu0  ;;  %v9419_v29 = vld [vmem:[%s12125_s3 + $0x28] sm:$0xff]  }
 0x1ad   : > { %5346 = vst.msk [vmem:[#allocation3 + $0x264] sm:$0xf] %vm533_vm2, %v10617_v39  ;;  %3505 = vmatmul.mubr.bf16.gmra.mxu1 %v9411_v10 }
 0x1ae   : > { %v8742_v5 = vpop.f32.mrf.mxu0 }
 0x1b0   : > { %v8743_v62 = vpop.f32.mrf.mxu0 }
 0x1b1   : > { %v10758_v42 = vadd.f32 %v8743_v62, %v8742_v5 }
 0x1b2   : > { %v2454_v41 = vld [vmem:[#allocation3 + $0x274] sm:$0xff]  ;;  %v10760_v17 = vpop.f32.mrf.mxu0 }
 0x1b3   : > { %5347 = vst.msk [vmem:[#allocation3 + $0x278] sm:$0xf] %vm533_vm2, %v10612_v2  ;;  %v7632_v25 = vcombine.high %v2451_v8, %v2454_v41  ;;  %v7631_v27 = vcombine.low %v2451_v8, %v2454_v41 }
 0x1b4   : > { %v10764_v7 = vpop.f32.mrf.mxu0 }
 0x1b5   : > { %3512 = vmatprep.mubr.bf16.mxu1 %v7632_v25 }
 0x1b6   : > { %v8748_v58 = vpop.f32.mrf.mxu0  ;;  %3513 = vmatmul.mubr.bf16.gmra.mxu1 %v7631_v27 }
 0x1b8   : > { %v8749_v48 = vpop.f32.mrf.mxu0 }
 0x1b9   : > { %v10766_v39 = vadd.f32 %v8749_v48, %v8748_v58 }
 0x1ba   : > { %v10768_v38 = vpop.f32.mrf.mxu0 }
 0x1bc   : > { %v10770_v63 = vpop.f32.mrf.mxu0 }
 0x1be   : > { %v8754_v16 = vpop.f32.mrf.mxu0 }
 0x1c0   : > { %v8755_v15 = vpop.f32.mrf.mxu0 }
 0x1c1   : > { %v10772_v56 = vadd.f32 %v8755_v15, %v8754_v16  ;;  %v9416_v16 = vld [vmem:[%s12125_s3 + $0x70] sm:$0xff]  }
 0x1c2   : > { %v10774_v1 = vpop.f32.mrf.mxu0  ;;  %v9417_v15 = vld [vmem:[%s12125_s3 + $0x30] sm:$0xff]   ;;  %8936 = vmatprep.subr.bf16.mxu1 %v9416_v16 }
 0x1c3   : > { %8937 = vmatpush3.bf16.msra.mxu1 %v9417_v15 }
 0x1c4   : > { %v10776_v2 = vpop.f32.mrf.mxu0  ;;  %8938 = vmatprep.subr.bf16.mxu1 %v9418_v61 }
 0x1c6   : > { %v8760_v40 = vpop.f32.mrf.mxu0 }
 0x1c7   : > { %8939 = vmatpush3.bf16.msra.mxu1 %v9419_v29 }
 0x1c8   : > { %v8761_v46 = vpop.f32.mrf.mxu0 }
 0x1c9   : > { %v10778_v32 = vadd.f32 %v8761_v46, %v8760_v40 }
 0x1ca   : > { %v10780_v22 = vpop.f32.mrf.mxu0 }
 0x1cc   : > { %v10782_v30 = vpop.f32.mrf.mxu0 }
 0x1ce   : > { %v8766_v6 = vpop.f32.mrf.mxu0 }
 0x1d0   : > { %v8767_v49 = vpop.f32.mrf.mxu0 }
 0x1d1   : > { %v10784_v9 = vadd.f32 %v8767_v49, %v8766_v6 }
 0x1d2   : > { %v10786_v47 = vpop.f32.mrf.mxu0 }
 0x1d4   : > { %v10788_v23 = vpop.f32.mrf.mxu0 }
 0x1d6   : > { %v8772_v4 = vpop.f32.mrf.mxu0 }
 0x1d8   : > { %v8773_v59 = vpop.f32.mrf.mxu0 }
 0x1d9   : > { %v10790_v3 = vadd.f32 %v8773_v59, %v8772_v4  ;;  %v10825_v59 = vld [vmem:[%s12124_s2] ss:$0 sm:$0xff] }
 0x1da   : > { %v10792_v52 = vpop.f32.mrf.mxu0  ;;  %v3234_v53 = vadd.f32 %v10697_v34, %v10825_v59 }
 0x1dc   : > { %v10794_v43 = vpop.f32.mrf.mxu0 }
 0x1de   : > { %v8778_v60 = vpop.f32.mrf.mxu0 }
 0x1e0   : > { %v8779_v35 = vpop.f32.mrf.mxu0 }
 0x1e1   : > { %v10796_v24 = vadd.f32 %v8779_v35, %v8778_v60 }
 0x1e2   : > { %v8781_v44 = vpop.f32.mrf.mxu0 }
 0x1e4   : > { %v8782_v51 = vpop.f32.mrf.mxu0 }
 0x1e5   : > { %v10798_v31 = vadd.f32 %v8782_v51, %v8781_v44 }
 0x1e6   : > { %v8784_v14 = vpop.f32.mrf.mxu0 }
 0x1e8   : > { %v8785_v19 = vpop.f32.mrf.mxu0 }
 0x1e9   : > { %v10806_v57 = vadd.f32 %v8785_v19, %v8784_v14 }
 0x1ea   : > { %v8787_v10 = vpop.f32.mrf.mxu0 }
 0x1ec   : > { %v8788_v8 = vpop.f32.mrf.mxu0 }
 0x1ed   : > { %v10808_v5 = vadd.f32 %v8788_v8, %v8787_v10 }
 0x1ee   : > { %v8790_v62 = vpop.f32.mrf.mxu0 }
 0x1f0   : > { %v8791_v41 = vpop.f32.mrf.mxu0 }
 0x1f1   : > { %v10810_v25 = vadd.f32 %v8791_v41, %v8790_v62 }
 0x1f2   : > { %v8793_v27 = vpop.f32.mrf.mxu0 }
 0x1f4   : > { %v8794_v58 = vpop.f32.mrf.mxu0 }
 0x1f5   : > { %v10812_v48 = vadd.f32 %v8794_v58, %v8793_v27  ;;  %v10833_v27 = vstv %s3682_s20  ;;  %v3237_v58 = vadd.f32 %v8711_v28, %v10825_v59 }
 0x1f6   : > { %v8796_v40 = vpop.f32.mrf.mxu0 }
 0x1f8   : > { %v8797_v46 = vpop.f32.mrf.mxu0 }
 0x1f9   : > { %v10820_v6 = vadd.f32 %v8797_v46, %v8796_v40 }
 0x1fa   : > { %v8799_v49 = vpop.f32.mrf.mxu0 }
 0x1fc   : > { %v8800_v4 = vpop.f32.mrf.mxu0 }
 0x1fd   : > { %v10827_v60 = vadd.f32 %v8800_v4, %v8799_v49  ;;  %v8818_v35 = vpop.f32.mrf.mxu1  ;;  %v3242_v4 = vadd.f32 %v10707_v13, %v10825_v59 }
 0x1fe   : > { %v9188_v44 = vpop.f32.mrf.mxu0 }
 0x1ff   : > { %v8819_v51 = vpop.f32.mrf.mxu1 }
 0x200   : > { %v8820_v14 = vadd.f32 %v8819_v51, %v8818_v35  ;;  %v3555_v19 = vpop.f32.mrf.mxu0  ;;  %v8717_v35 = vadd.f32 %v10713_v54, %v10710_v0  ;;  %v4133_v0 = vpop.permute.xlu0 %4132 }
 0x201   : > { %v8821_v10 = vpop.f32.mrf.mxu1 }
 0x202   : > { %v3395_v8 = vadd.f32 %v8820_v14, %v3234_v53  ;;  %v9189_v62 = vpop.f32.mrf.mxu0  ;;  %v3812_v53 = vld [vmem:[#allocation2] sm:$0xff]  ;;  %v3245_v54 = vadd.f32 %v8717_v35, %v10825_v59  ;;  %v3250_v35 = vadd.f32 %v10717_v12, %v10825_v59 }
 0x203   : > { %v8822_v41 = vpop.f32.mrf.mxu1 }
 0x204   : > { %v8823_v16 = vadd.f32 %v8822_v41, %v8821_v10  ;;  %v3556_v15 = vadd.f32 %v3555_v19, %v3395_v8  ;;  %v3558_v46 = vpop.f32.mrf.mxu0  ;;  %v8401_v8 = vpack.c.bf16 %v3812_v53, %v3812_v53 }
 0x205   : > { %v8824_v40 = vpop.f32.mrf.mxu1 }
 0x206   : > { %vm3683_vm4 = vcmp.ge.f32.partialorder %v3556_v15, 0.0  ;;  %v3716_v34 = vmul.f32 %v10833_v27, %v3556_v15  ;;  %v3398_v49 = vadd.f32 %v8823_v16, %v3237_v58  ;;  %v10847_v10 = vpop.f32.mrf.mxu0  ;;  %3972 = vst.msk [vmem:[#allocation3] sm:$0xf] %vm533_vm2, %v8401_v8 }
 0x207   : > { %v8825_v51 = vpop.f32.mrf.mxu1  ;;  %4228 = vst.msk [vmem:[#allocation3] sm:$0xf] %vm790_vm3, %v4133_v0 }
 0x208   : > { %v3748_v28 = vsel %vm3683_vm4, %v3556_v15, %v3716_v34  ;;  %v8826_v14 = vadd.f32 %v8825_v51, %v8824_v40  ;;  %v3559_v19 = vadd.f32 %v3558_v46, %v3398_v49  ;;  %v3813_v15 = vld [vmem:[#allocation2 + $0x8] sm:$0xff]  ;;  %v3571_v49 = vpop.f32.mrf.mxu0 }
 0x209   : > { %3780 = vst.msk [vmem:[#allocation2 + $0x19] sm:$0xff] %vm284_vm0, %v3748_v28  ;;  %v8827_v41 = vpop.f32.mrf.mxu1  ;;  %v8402_v61 = vpack.c.bf16 %v3813_v15, %v3813_v15 }
 0x20a   : > { %v3403_v58 = vadd.f32 %v8826_v14, %v3242_v4  ;;  %vm3684_vm5 = vcmp.ge.f32.partialorder %v3559_v19, 0.0  ;;  %v3717_v13 = vmul.f32 %v10833_v27, %v3559_v19  ;;  %v4135_v4 = vpop.permute.xlu1 %4134  ;;  %v9421_v14 = vld [vmem:[%s12125_s3 + $0x20] sm:$0xff]  }
 0x20b   : > { %v8828_v16 = vpop.f32.mrf.mxu1  ;;  %3973 = vst.msk [vmem:[#allocation3 + $0x14] sm:$0xf] %vm533_vm2, %v8402_v61 }
 0x20c   : > { %v3564_v40 = vadd.f32 %v9188_v44, %v3403_v58  ;;  %v3749_v46 = vsel %vm3684_vm5, %v3559_v19, %v3717_v13  ;;  %v8829_v34 = vadd.f32 %v8828_v16, %v8827_v41  ;;  %4229 = vst.msk [vmem:[#allocation3 + $0x14] sm:$0xf] %vm790_vm3, %v4135_v4  ;;  %v9420_v44 = vld [vmem:[%s12125_s3 + $0x60] sm:$0xff]   ;;  %v8723_v19 = vadd.f32 %v10723_v18, %v10720_v21  ;;  %v9422_v18 = vld [vmem:[%s12125_s3 + $0xf8] sm:$0xff]  }
 0x20d   : > { %3781 = vst.msk [vmem:[#allocation2 + $0x21] sm:$0xff] %vm284_vm0, %v3749_v46  ;;  %v8830_v29 = vpop.f32.mrf.mxu1  ;;  %8940 = vmatprep.subr.bf16.mxu1 %v9420_v44  ;;  %9046 = vmatprep.subr.bf16.mxu0 %v9422_v18  ;;  %v9423_v44 = vld [vmem:[%s12125_s3 + $0xb8] sm:$0xff]  }
 0x20e   : > { %vm3685_vm6 = vcmp.ge.f32.partialorder %v3564_v40, 0.0  ;;  %v3718_v51 = vmul.f32 %v10833_v27, %v3564_v40  ;;  %v3406_v53 = vadd.f32 %v8829_v34, %v3245_v54  ;;  %v10869_v54 = vpop.f32.mrf.mxu0  ;;  %8941 = vmatpush3.bf16.msra.mxu1 %v9421_v14  ;;  %9047 = vmatpush3.bf16.msra.mxu0 %v9423_v44 }
 0x20f   : > { %v8831_v28 = vpop.f32.mrf.mxu1 }
 0x210   : > { %v3750_v8 = vsel %vm3685_vm6, %v3564_v40, %v3718_v51  ;;  %v3567_v41 = vadd.f32 %v9189_v62, %v3406_v53  ;;  %v8832_v58 = vadd.f32 %v8831_v28, %v8830_v29  ;;  %v4452_v13 = vld [vmem:[#allocation2 + $0x18] sm:$0xff]  ;;  %v3253_v62 = vadd.f32 %v8723_v19, %v10825_v59  ;;  %v3574_v53 = vpop.f32.mrf.mxu0 }
 0x211   : > { %v4708_v0 = vld [vmem:[#allocation2 + $0x19] sm:$0xff]  ;;  %3782 = vst.msk [vmem:[#allocation2 + $0x31] sm:$0xff] %vm284_vm0, %v3750_v8  ;;  %v8833_v12 = vpop.f32.mrf.mxu1  ;;  %v10871_v16 = vpack.c.bf16 %v4452_v13, %v4452_v13 }
 0x212   : > { %v8529_v15 = vpack.c.bf16 %v4708_v0, %v4708_v0  ;;  %vm3686_vm7 = vcmp.ge.f32.partialorder %v3567_v41, 0.0  ;;  %v3719_v46 = vmul.f32 %v10833_v27, %v3567_v41  ;;  %v3411_v34 = vadd.f32 %v8832_v58, %v3250_v35  ;;  %v9424_v0 = vld [vmem:[%s12125_s3 + $0xf0] sm:$0xff]  }
 0x213   : > { %v8834_v21 = vpop.f32.mrf.mxu1  ;;  %3974 = vst.msk [vmem:[#allocation3 + $0x28] sm:$0xf] %vm533_vm2, %v10871_v16  ;;  %v8729_v58 = vadd.f32 %v10735_v50, %v10731_v11  ;;  %v9425_v11 = vld [vmem:[%s12125_s3 + $0xb0] sm:$0xff]   ;;  %9048 = vmatprep.subr.bf16.mxu0 %v9424_v0 }
 0x214   : > { %4868 = vst.msk [vmem:[#allocation3 + $0x8] sm:$0xf] %vm533_vm2, %v8529_v15  ;;  %v3751_v40 = vsel %vm3686_vm7, %v3567_v41, %v3719_v46  ;;  %v8835_v61 = vadd.f32 %v8834_v21, %v8833_v12  ;;  %v3572_v29 = vadd.f32 %v3571_v49, %v3411_v34  ;;  %v4900_v4 = vld [vmem:[#allocation2 + $0x1a] sm:$0xff]  ;;  %v4901_v28 = vld [vmem:[#allocation2 + $0x22] sm:$0xff]  ;;  %v3258_v46 = vadd.f32 %v10728_v55, %v10825_v59 }
 0x215   : > { %3783 = vst.msk [vmem:[#allocation2 + $0x39] sm:$0xff] %vm284_vm0, %v3751_v40  ;;  %v8836_v51 = vpop.f32.mrf.mxu1  ;;  %v10882_v35 = vpack.c.bf16 %v4900_v4, %v4900_v4  ;;  %v3815_v14 = vld [vmem:[#allocation2 + $0x20] sm:$0xff]  ;;  %v10888_v41 = vpack.c.bf16 %v4901_v28, %v4901_v28  ;;  %v3261_v28 = vadd.f32 %v8729_v58, %v10825_v59  ;;  %9049 = vmatpush3.bf16.msra.mxu0 %v9425_v11 }
 0x216   : > { %vm3687_vm8 = vcmp.ge.f32.partialorder %v3572_v29, 0.0  ;;  %v3720_v19 = vmul.f32 %v10833_v27, %v3572_v29  ;;  %v3414_v8 = vadd.f32 %v8835_v61, %v3253_v62  ;;  %v4709_v49 = vld [vmem:[#allocation2 + $0x21] sm:$0xff]  ;;  %v8404_v12 = vpack.c.bf16 %v3815_v14, %v3815_v14  ;;  %v10905_v61 = vpop.f32.mrf.mxu0  ;;  %v9426_v14 = vld [vmem:[%s12125_s3 + $0x58] sm:$0xff]  }
 0x217   : > { %v8837_v13 = vpop.f32.mrf.mxu1  ;;  %4422 = vst.msk [vmem:[#allocation3 + $0x2c] sm:$0xf] %vm533_vm2, %v10882_v35  ;;  %v8530_v15 = vpack.c.bf16 %v4709_v49, %v4709_v49  ;;  %4423 = vst.msk [vmem:[#allocation3 + $0x40] sm:$0xf] %vm533_vm2, %v10888_v41  ;;  %8942 = vmatprep.subr.bf16.mxu1 %v9426_v14 }
 0x218   : > { %v3752_v34 = vsel %vm3687_vm8, %v3572_v29, %v3720_v19  ;;  %v8838_v21 = vadd.f32 %v8837_v13, %v8836_v51  ;;  %v3575_v18 = vadd.f32 %v3574_v53, %v3414_v8  ;;  %v4454_v62 = vld [vmem:[#allocation2 + $0x30] sm:$0xff]  ;;  %3975 = vst.msk [vmem:[#allocation3 + $0x3c] sm:$0xf] %vm533_vm2, %v8404_v12  ;;  %v9427_v19 = vld [vmem:[%s12125_s3 + $0xe8] sm:$0xff]   ;;  %v3266_v8 = vadd.f32 %v10739_v33, %v10825_v59  ;;  %v9428_v33 = vld [vmem:[%s12125_s3 + $0x18] sm:$0xff]  }
 0x219   : > { %3784 = vst.msk [vmem:[#allocation2 + $0x49] sm:$0xff] %vm284_vm0, %v3752_v34  ;;  %v8839_v50 = vpop.f32.mrf.mxu1  ;;  %v8499_v40 = vpack.c.bf16 %v4454_v62, %v4454_v62  ;;  %v4710_v4 = vld [vmem:[#allocation2 + $0x31] sm:$0xff]  ;;  %9050 = vmatprep.subr.bf16.mxu0 %v9427_v19  ;;  %8943 = vmatpush3.bf16.msra.mxu1 %v9428_v33 }
 0x21a   : > { %4869 = vst.msk [vmem:[#allocation3 + $0x1c] sm:$0xf] %vm533_vm2, %v8530_v15  ;;  %v3419_v55 = vadd.f32 %v8838_v21, %v3258_v46  ;;  %vm3688_vm9 = vcmp.ge.f32.partialorder %v3575_v18, 0.0  ;;  %v3721_v29 = vmul.f32 %v10833_v27, %v3575_v18  ;;  %v4008_v51 = vld [vmem:[#allocation2 + $0x31] sm:$0xff]  ;;  %v8531_v53 = vpack.c.bf16 %v4710_v4, %v4710_v4  ;;  %v3587_v21 = vpop.f32.mrf.mxu0 }
 0x21b   : > { %v8840_v44 = vpop.f32.mrf.mxu1  ;;  %4584 = vrot.lane.b32.xlu0 %v8499_v40, %s9612_s30  ;;  %3976 = vst.msk [vmem:[#allocation3 + $0x50] sm:$0xf] %vm533_vm2, %v8499_v40  ;;  %5316 = vst.msk [vmem:[#allocation3 + $0xc] sm:$0xf] %vm533_vm2, %v8499_v40  ;;  %v8437_v34 = vpack.c.bf16 %v4008_v51, %v4008_v51 }
 0x21c   : > { %v3580_v49 = vadd.f32 %v10847_v10, %v3419_v55  ;;  %v3753_v58 = vsel %vm3688_vm9, %v3575_v18, %v3721_v29  ;;  %v8841_v13 = vadd.f32 %v8840_v44, %v8839_v50  ;;  %v4455_v0 = vld [vmem:[#allocation2 + $0x38] sm:$0xff]  ;;  %4870 = vst.msk [vmem:[#allocation3 + $0x30] sm:$0xf] %vm533_vm2, %v8531_v53  ;;  %v9429_v10 = vld [vmem:[%s12125_s3 + $0xa8] sm:$0xff]   ;;  %v8735_v18 = vadd.f32 %v10745_v36, %v10742_v26  ;;  %v9430_v26 = vld [vmem:[%s12125_s3 + $0x50] sm:$0xff]  }
 0x21d   : > { %v4009_v12 = vld [vmem:[#allocation2 + $0x39] sm:$0xff]  ;;  %3785 = vst.msk [vmem:[#allocation2 + $0x51] sm:$0xff] %vm284_vm0, %v3753_v58  ;;  %v8842_v15 = vpop.f32.mrf.mxu1  ;;  %v8500_v46 = vpack.c.bf16 %v4455_v0, %v4455_v0  ;;  %9051 = vmatpush3.bf16.msra.mxu0 %v9429_v10  ;;  %8944 = vmatprep.subr.bf16.mxu1 %v9430_v26 }
 0x21e   : > { %v10925_v62 = vpack.c.bf16 %v4009_v12, %v4009_v12  ;;  %vm3689_vm10 = vcmp.ge.f32.partialorder %v3580_v49, 0.0  ;;  %v3722_v11 = vmul.f32 %v10833_v27, %v3580_v49  ;;  %v3422_v50 = vadd.f32 %v8841_v13, %v3261_v28  ;;  %v4264_v40 = vld [vmem:[#allocation2 + $0x32] sm:$0xff]  ;;  %v4265_v4 = vld [vmem:[#allocation2 + $0x3a] sm:$0xff]  ;;  %v10954_v12 = vpop.f32.mrf.mxu0 }
 0x21f   : > { %v5604_v55 = vld [vmem:[#allocation2 + $0x32] sm:$0xff]  ;;  %v8843_v29 = vpop.f32.mrf.mxu1  ;;  %4586 = vrot.lane.b32.xlu1 %v8500_v46, %s9612_s30  ;;  %4140 = vrot.lane.b32.xlu0 %v8437_v34, %s9612_s30  ;;  %3977 = vst.msk [vmem:[#allocation3 + $0x64] sm:$0xf] %vm533_vm2, %v8500_v46  ;;  %5317 = vst.msk [vmem:[#allocation3 + $0x20] sm:$0xf] %vm533_vm2, %v8500_v46  ;;  %v9431_v36 = vld [vmem:[%s12125_s3 + $0xe0] sm:$0xff]   ;;  %v8469_v51 = vpack.c.bf16 %v4264_v40, %v4264_v40  ;;  %v8470_v53 = vpack.c.bf16 %v4265_v4, %v4265_v4 }
 0x220   : > { %4871 = vst.msk [vmem:[#allocation3 + $0x44] sm:$0xf] %vm533_vm2, %v10925_v62  ;;  %v5605_v28 = vld [vmem:[#allocation2 + $0x3a] sm:$0xff]  ;;  %v8657_v44 = vpack.c.bf16 %v5604_v55, %v5604_v55  ;;  %v3754_v14 = vsel %vm3689_vm10, %v3580_v49, %v3722_v11  ;;  %v3583_v19 = vadd.f32 %v10869_v54, %v3422_v50  ;;  %v8844_v58 = vadd.f32 %v8843_v29, %v8842_v15  ;;  %v9432_v13 = vld [vmem:[%s12125_s3 + $0x10] sm:$0xff]   ;;  %v3818_v54 = vld [vmem:[#allocation2 + $0x48] sm:$0xff] }
 0x221   : > { %3786 = vst.msk [vmem:[#allocation2 + $0x61] sm:$0xff] %vm284_vm0, %v3754_v14  ;;  %v8845_v0 = vpop.f32.mrf.mxu1  ;;  %9052 = vmatprep.subr.bf16.mxu0 %v9431_v36  ;;  %v9433_v49 = vld [vmem:[%s12125_s3 + $0xa0] sm:$0xff]   ;;  %v4712_v15 = vld [vmem:[#allocation2 + $0x49] sm:$0xff]  ;;  %v8658_v46 = vpack.c.bf16 %v5605_v28, %v5605_v28  ;;  %v8407_v11 = vpack.c.bf16 %v3818_v54, %v3818_v54  ;;  %v3269_v50 = vadd.f32 %v8735_v18, %v10825_v59  ;;  %v9435_v55 = vld [vmem:[%s12125_s3 + $0xd8] sm:$0xff]  }
 0x222   : > { %4424 = vst.msk [vmem:[#allocation3 + $0x54] sm:$0xf] %vm533_vm2, %v8469_v51  ;;  %4425 = vst.msk [vmem:[#allocation3 + $0x68] sm:$0xf] %vm533_vm2, %v8470_v53  ;;  %vm3690_vm11 = vcmp.ge.f32.partialorder %v3583_v19, 0.0  ;;  %v3723_v33 = vmul.f32 %v10833_v27, %v3583_v19  ;;  %v3427_v10 = vadd.f32 %v8844_v58, %v3266_v8  ;;  %v9434_v4 = vld [vmem:[%s12125_s3 + $0x48] sm:$0xff]   ;;  %v8533_v29 = vpack.c.bf16 %v4712_v15, %v4712_v15 }
 0x223   : > { %5764 = vst.msk [vmem:[#allocation3 + $0x10] sm:$0xf] %vm533_vm2, %v8657_v44  ;;  %v8846_v40 = vpop.f32.mrf.mxu1  ;;  %4142 = vrot.lane.b32.xlu1 %v10925_v62, %s9612_s30  ;;  %5476 = vrot.lane.b32.xlu0 %v8437_v34, %s9612_s30  ;;  %5765 = vst.msk [vmem:[#allocation3 + $0x24] sm:$0xf] %vm533_vm2, %v8658_v46  ;;  %v10974_v36 = vld [vmem:[#allocation2 + $0x3a] sm:$0xff]  ;;  %v3274_v34 = vadd.f32 %v10749_v45, %v10825_v59  ;;  %v8741_v28 = vadd.f32 %v10754_v20, %v10751_v37  ;;  %v3590_v44 = vpop.f32.mrf.mxu0  ;;  %v9436_v58 = vld [vmem:[%s12125_s3 + $0x8] sm:$0xff]  }
 0x224   : > { %v3755_v8 = vsel %vm3690_vm11, %v3583_v19, %v3723_v33  ;;  %v8847_v26 = vadd.f32 %v8846_v40, %v8845_v0  ;;  %v3588_v18 = vadd.f32 %v3587_v21, %v3427_v10  ;;  %v10976_v51 = vld [vmem:[#allocation2 + $0x19] sm:$0xff]  ;;  %v4904_v53 = vld [vmem:[#allocation2 + $0x4a] sm:$0xff]  ;;  %8945 = vmatpush3.bf16.msra.mxu1 %v9432_v13  ;;  %9053 = vmatpush3.bf16.msra.mxu0 %v9433_v49 }
 0x225   : > { %3978 = vst.msk [vmem:[#allocation3 + $0x78] sm:$0xf] %vm533_vm2, %v8407_v11  ;;  %5318 = vst.msk [vmem:[#allocation3 + $0x34] sm:$0xf] %vm533_vm2, %v8407_v11  ;;  %v8848_v21 = vpop.f32.mrf.mxu1  ;;  %v10985_v14 = vpack.c.bf16 %v4904_v53, %v4904_v53  ;;  %v4905_v19 = vld [vmem:[#allocation2 + $0x52] sm:$0xff]  ;;  %8946 = vmatprep.subr.bf16.mxu1 %v9434_v4  ;;  %9054 = vmatprep.subr.bf16.mxu0 %v9435_v55  ;;  %v5606_v54 = vld [vmem:[#allocation2 + $0x4a] sm:$0xff]  ;;  %v8435_v53 = vpack.c.bf16 %v10976_v51, %v10976_v51 }
 0x226   : > { %3787 = vst.msk [vmem:[#allocation2 + $0x69] sm:$0xff] %vm284_vm0, %v3755_v8  ;;  %v9437_v45 = vld [vmem:[%s12125_s3 + $0x98] sm:$0xff]   ;;  %vm3691_vm12 = vcmp.ge.f32.partialorder %v3588_v18, 0.0  ;;  %v3724_v37 = vmul.f32 %v10833_v27, %v3588_v18  ;;  %v3430_v20 = vadd.f32 %v8847_v26, %v3269_v50  ;;  %v10995_v13 = vpack.c.bf16 %v4905_v19, %v4905_v19  ;;  %v3819_v0 = vld [vmem:[#allocation2 + $0x50] sm:$0xff]  ;;  %v9438_v46 = vld [vmem:[%s12125_s3 + $0x40] sm:$0xff]  }
 0x227   : > { %4872 = vst.msk [vmem:[#allocation3 + $0x58] sm:$0xf] %vm533_vm2, %v8533_v29  ;;  %v4713_v49 = vld [vmem:[#allocation2 + $0x51] sm:$0xff]  ;;  %v8849_v15 = vpop.f32.mrf.mxu1  ;;  %5478 = vrot.lane.b32.xlu1 %v10925_v62, %s9612_s30  ;;  %4580 = vrot.lane.b32.xlu0 %v10871_v16, %s9612_s30  ;;  %4426 = vst.msk [vmem:[#allocation3 + $0x7c] sm:$0xf] %vm533_vm2, %v10985_v14  ;;  %v8408_v10 = vpack.c.bf16 %v3819_v0, %v3819_v0  ;;  %v8659_v50 = vpack.c.bf16 %v5606_v54, %v5606_v54  ;;  %v4453_v55 = vld [vmem:[#allocation2 + $0x20] sm:$0xff] }
 0x228   : > { %v9439_v33 = vld [vmem:[%s12125_s3 + $0xd0] sm:$0xff]   ;;  %v8534_v11 = vpack.c.bf16 %v4713_v49, %v4713_v49  ;;  %v3756_v40 = vsel %vm3691_vm12, %v3588_v18, %v3724_v37  ;;  %v8850_v62 = vadd.f32 %v8849_v15, %v8848_v21  ;;  %v3591_v4 = vadd.f32 %v3590_v44, %v3430_v20  ;;  %8947 = vmatpush3.bf16.msra.mxu1 %v9436_v58  ;;  %v3820_v16 = vld [vmem:[#allocation2 + $0x60] sm:$0xff]  ;;  %v11017_v18 = vpop.f32.mrf.mxu0 }
 0x229   : > { %9055 = vmatpush3.bf16.msra.mxu0 %v9437_v45  ;;  %4427 = vst.msk [vmem:[#allocation3 + $0x90] sm:$0xf] %vm533_vm2, %v10995_v13  ;;  %v5607_v29 = vld [vmem:[#allocation2 + $0x52] sm:$0xff]  ;;  %v8851_v8 = vpop.f32.mrf.mxu1  ;;  %v8564_v26 = vpack.c.bf16 %v10974_v36, %v10974_v36  ;;  %8948 = vmatprep.subr.bf16.mxu1 %v9438_v46  ;;  %v9440_v21 = vld [vmem:[%s12125_s3] sm:$0xff]   ;;  %v8409_v19 = vpack.c.bf16 %v3820_v16, %v3820_v16  ;;  %3979 = vst.msk [vmem:[#allocation3 + $0x8c] sm:$0xf] %vm533_vm2, %v8408_v10 }
 0x22a   : > { %3788 = vst.msk [vmem:[#allocation2 + $0x79] sm:$0xff] %vm284_vm0, %v3756_v40  ;;  %9056 = vmatprep.subr.bf16.mxu0 %v9439_v33  ;;  %v9441_v44 = vld [vmem:[%s12125_s3 + $0x90] sm:$0xff]   ;;  %v4714_v58 = vld [vmem:[#allocation2 + $0x61] sm:$0xff]  ;;  %v3435_v36 = vadd.f32 %v8850_v62, %v3274_v34  ;;  %vm3692_vm13 = vcmp.ge.f32.partialorder %v3591_v4, 0.0  ;;  %v3725_v51 = vmul.f32 %v10833_v27, %v3591_v4  ;;  %v3277_v20 = vadd.f32 %v8741_v28, %v10825_v59 }
 0x22b   : > { %5319 = vst.msk [vmem:[#allocation3 + $0x48] sm:$0xf] %vm533_vm2, %v8408_v10  ;;  %4873 = vst.msk [vmem:[#allocation3 + $0x6c] sm:$0xf] %vm533_vm2, %v8534_v11  ;;  %v4902_v45 = vld [vmem:[#allocation2 + $0x32] sm:$0xff]  ;;  %v8535_v37 = vpack.c.bf16 %v4714_v58, %v4714_v58  ;;  %v8852_v0 = vpop.f32.mrf.mxu1  ;;  %5034 = vrot.lane.b32.xlu1 %v8564_v26, %s9612_s30  ;;  %4136 = vrot.lane.b32.xlu0 %v8435_v53, %s9612_s30  ;;  %v8660_v49 = vpack.c.bf16 %v5607_v29, %v5607_v29  ;;  %v3603_v11 = vpop.f32.mrf.mxu0  ;;  %v9446_v40 = vld [vmem:[%s12125_s3 + $0x88] sm:$0xff]  }
 0x22c   : > { %5766 = vst.msk [vmem:[#allocation3 + $0x38] sm:$0xf] %vm533_vm2, %v8659_v50  ;;  %3980 = vst.msk [vmem:[#allocation3 + $0xa0] sm:$0xf] %vm533_vm2, %v8409_v19  ;;  %v3596_v54 = vadd.f32 %v10905_v61, %v3435_v36  ;;  %v3757_v34 = vsel %vm3692_vm13, %v3591_v4, %v3725_v51  ;;  %v8853_v15 = vadd.f32 %v8852_v0, %v8851_v8  ;;  %8949 = vmatpush3.bf16.msra.mxu1 %v9440_v21  ;;  %v4007_v50 = vld [vmem:[#allocation2 + $0x21] sm:$0xff] }
 0x22d   : > { %5320 = vst.msk [vmem:[#allocation3 + $0x5c] sm:$0xf] %vm533_vm2, %v8409_v19  ;;  %9057 = vmatpush3.bf16.msra.mxu0 %v9441_v44  ;;  %4874 = vst.msk [vmem:[#allocation3 + $0x80] sm:$0xf] %vm533_vm2, %v8535_v37  ;;  %v3282_v28 = vadd.f32 %v10758_v42, %v10825_v59  ;;  %v8854_v46 = vpop.f32.mrf.mxu1  ;;  %v8498_v33 = vpack.c.bf16 %v4453_v55, %v4453_v55  ;;  %v8563_v10 = vpack.c.bf16 %v4902_v45, %v4902_v45  ;;  %v9445_v61 = vld [vmem:[%s12125_s3 + $0xc8] sm:$0xff]   ;;  %v9449_v51 = vld [vmem:[%s12125_s3 + $0xc0] sm:$0xff]   ;;  %v11057_v0 = vpop.f32.mrf.mxu0 }
 0x22e   : > { %3789 = vst.msk [vmem:[#allocation2 + $0x81] sm:$0xff] %vm284_vm0, %v3757_v34  ;;  %v8747_v42 = vadd.f32 %v10764_v7, %v10760_v17  ;;  %vm3693_vm14 = vcmp.ge.f32.partialorder %v3596_v54, 0.0  ;;  %v3726_v62 = vmul.f32 %v10833_v27, %v3596_v54  ;;  %v3438_v4 = vadd.f32 %v8853_v15, %v3277_v20  ;;  %v3821_v55 = vld [vmem:[#allocation2 + $0x68] sm:$0xff]  ;;  %9058 = vmatprep.subr.bf16.mxu0 %v9445_v61 }
 0x22f   : > { %5767 = vst.msk [vmem:[#allocation3 + $0x4c] sm:$0xf] %vm533_vm2, %v8660_v49  ;;  %v4715_v16 = vld [vmem:[#allocation2 + $0x69] sm:$0xff]  ;;  %v8855_v8 = vpop.f32.mrf.mxu1  ;;  %4582 = vrot.lane.b32.xlu1 %v8498_v33, %s9612_s30  ;;  %5032 = vrot.lane.b32.xlu0 %v8563_v10, %s9612_s30  ;;  %v8410_v26 = vpack.c.bf16 %v3821_v55, %v3821_v55  ;;  %v8436_v20 = vpack.c.bf16 %v4007_v50, %v4007_v50  ;;  %v4458_v10 = vld [vmem:[#allocation2 + $0x60] sm:$0xff] }
 0x230   : > { %v4268_v29 = vld [vmem:[#allocation2 + $0x62] sm:$0xff]  ;;  %v8536_v53 = vpack.c.bf16 %v4715_v16, %v4715_v16  ;;  %v4269_v44 = vld [vmem:[#allocation2 + $0x6a] sm:$0xff]  ;;  %v3758_v36 = vsel %vm3693_vm14, %v3596_v54, %v3726_v62  ;;  %v3599_v17 = vadd.f32 %v10954_v12, %v3438_v4  ;;  %v8856_v7 = vadd.f32 %v8855_v8, %v8854_v46 }
 0x231   : > { %v8473_v21 = vpack.c.bf16 %v4268_v29, %v4268_v29  ;;  %v5608_v19 = vld [vmem:[#allocation2 + $0x62] sm:$0xff]  ;;  %v5609_v58 = vld [vmem:[#allocation2 + $0x6a] sm:$0xff]  ;;  %v8474_v45 = vpack.c.bf16 %v4269_v44, %v4269_v44  ;;  %3790 = vst.msk [vmem:[#allocation2 + $0x91] sm:$0xff] %vm284_vm0, %v3758_v36  ;;  %v8857_v37 = vpop.f32.mrf.mxu1  ;;  %9059 = vmatpush3.bf16.msra.mxu0 %v9446_v40  ;;  %v3822_v49 = vld [vmem:[#allocation2 + $0x78] sm:$0xff]  ;;  %v3285_v62 = vadd.f32 %v8747_v42, %v10825_v59 }
 0x232   : > { %3981 = vst.msk [vmem:[#allocation3 + $0xb4] sm:$0xf] %vm533_vm2, %v8410_v26  ;;  %v9450_v12 = vld [vmem:[%s12125_s3 + $0x80] sm:$0xff]   ;;  %5321 = vst.msk [vmem:[#allocation3 + $0x70] sm:$0xf] %vm533_vm2, %v8410_v26  ;;  %v8661_v34 = vpack.c.bf16 %v5608_v19, %v5608_v19  ;;  %v8662_v15 = vpack.c.bf16 %v5609_v58, %v5609_v58  ;;  %vm3694_vm15 = vcmp.ge.f32.partialorder %v3599_v17, 0.0  ;;  %v3727_v46 = vmul.f32 %v10833_v27, %v3599_v17 }
 0x233   : > { %4875 = vst.msk [vmem:[#allocation3 + $0x94] sm:$0xf] %vm533_vm2, %v8536_v53  ;;  %4428 = vst.msk [vmem:[#allocation3 + $0xa4] sm:$0xf] %vm533_vm2, %v8473_v21  ;;  %v4716_v54 = vld [vmem:[#allocation2 + $0x79] sm:$0xff]  ;;  %v3443_v33 = vadd.f32 %v8856_v7, %v3282_v28  ;;  %9060 = vmatprep.subr.bf16.mxu0 %v9449_v51  ;;  %v8411_v50 = vpack.c.bf16 %v3822_v49, %v3822_v49  ;;  %v8858_v61 = vpop.f32.mrf.mxu1  ;;  %4138 = vrot.lane.b32.xlu1 %v8436_v20, %s9612_s30  ;;  %v4012_v16 = vld [vmem:[#allocation2 + $0x61] sm:$0xff]  ;;  %v3606_v53 = vpop.f32.mrf.mxu0 }
 0x234   : > { %4429 = vst.msk [vmem:[#allocation3 + $0xb8] sm:$0xf] %vm533_vm2, %v8474_v45  ;;  %5028 = vrot.lane.b32.xlu0 %v10882_v35, %s9612_s30  ;;  %v8537_v40 = vpack.c.bf16 %v4716_v54, %v4716_v54  ;;  %5768 = vst.msk [vmem:[#allocation3 + $0x60] sm:$0xf] %vm533_vm2, %v8661_v34  ;;  %v3759_v4 = vsel %vm3694_vm15, %v3599_v17, %v3727_v46  ;;  %v8859_v28 = vadd.f32 %v8858_v61, %v8857_v37  ;;  %v4459_v36 = vld [vmem:[#allocation2 + $0x68] sm:$0xff] }
 0x235   : > { %5769 = vst.msk [vmem:[#allocation3 + $0x74] sm:$0xf] %vm533_vm2, %v8662_v15  ;;  %v3604_v55 = vadd.f32 %v3603_v11, %v3443_v33  ;;  %v4908_v29 = vld [vmem:[#allocation2 + $0x7a] sm:$0xff]  ;;  %3982 = vst.msk [vmem:[#allocation3 + $0xc8] sm:$0xf] %vm533_vm2, %v8411_v50  ;;  %v3290_v8 = vadd.f32 %v10766_v39, %v10825_v59  ;;  %v8753_v35 = vadd.f32 %v10770_v63, %v10768_v38  ;;  %v8860_v26 = vpop.f32.mrf.mxu1  ;;  %v4909_v11 = vld [vmem:[#allocation2 + $0x82] sm:$0xff]  ;;  %9061 = vmatpush3.bf16.msra.mxu0 %v9450_v12  ;;  %v11095_v33 = vpop.f32.mrf.mxu0 }
 0x236   : > { %5322 = vst.msk [vmem:[#allocation3 + $0x84] sm:$0xf] %vm533_vm2, %v8411_v50  ;;  %v8503_v42 = vpack.c.bf16 %v4458_v10, %v4458_v10  ;;  %v11081_v21 = vpack.c.bf16 %v4908_v29, %v4908_v29  ;;  %v3823_v44 = vld [vmem:[#allocation2 + $0x80] sm:$0xff]  ;;  %4876 = vst.msk [vmem:[#allocation3 + $0xa8] sm:$0xf] %vm533_vm2, %v8537_v40  ;;  %v3446_v39 = vadd.f32 %v8859_v28, %v3285_v62  ;;  %v4013_v62 = vld [vmem:[#allocation2 + $0x69] sm:$0xff] }
 0x237   : > { %3791 = vst.msk [vmem:[#allocation2 + $0x99] sm:$0xff] %vm284_vm0, %v3759_v4  ;;  %v4717_v19 = vld [vmem:[#allocation2 + $0x81] sm:$0xff]  ;;  %vm3695_vm1 = vcmp.ge.f32.partialorder %v3604_v55, 0.0  ;;  %v3728_v58 = vmul.f32 %v10833_v27, %v3604_v55  ;;  %v11085_v17 = vpack.c.bf16 %v4909_v11, %v4909_v11  ;;  %v8861_v63 = vpop.f32.mrf.mxu1  ;;  %5030 = vrot.lane.b32.xlu1 %v10888_v41, %s9612_s30  ;;  %v8412_v7 = vpack.c.bf16 %v3823_v44, %v3823_v44  ;;  %v3619_v11 = vpop.f32.mrf.mxu0 }
 0x238   : > { %v5610_v38 = vld [vmem:[#allocation2 + $0x7a] sm:$0xff]  ;;  %4592 = vrot.lane.b32.xlu0 %v8503_v42, %s9612_s30  ;;  %4430 = vst.msk [vmem:[#allocation3 + $0xcc] sm:$0xf] %vm533_vm2, %v11081_v21  ;;  %v8538_v51 = vpack.c.bf16 %v4717_v19, %v4717_v19  ;;  %v5611_v45 = vld [vmem:[#allocation2 + $0x82] sm:$0xff]  ;;  %v8862_v12 = vadd.f32 %v8861_v63, %v8860_v26  ;;  %v3607_v49 = vadd.f32 %v3606_v53, %v3446_v39  ;;  %v3824_v54 = vld [vmem:[#allocation2 + $0x90] sm:$0xff] }
 0x239   : > { %v8663_v37 = vpack.c.bf16 %v5610_v38, %v5610_v38  ;;  %v3760_v20 = vsel %vm3695_vm1, %v3604_v55, %v3728_v58  ;;  %4431 = vst.msk [vmem:[#allocation3 + $0xe0] sm:$0xf] %vm533_vm2, %v11085_v17  ;;  %v8664_v34 = vpack.c.bf16 %v5611_v45, %v5611_v45  ;;  %v8863_v41 = vpop.f32.mrf.mxu1  ;;  %v8504_v15 = vpack.c.bf16 %v4459_v36, %v4459_v36  ;;  %v4718_v50 = vld [vmem:[#allocation2 + $0x91] sm:$0xff]  ;;  %v4456_v39 = vld [vmem:[#allocation2 + $0x48] sm:$0xff] }
 0x23a   : > { %3792 = vst.msk [vmem:[#allocation2 + $0xa9] sm:$0xff] %vm284_vm0, %v3760_v20  ;;  %v8441_v46 = vpack.c.bf16 %v4012_v16, %v4012_v16  ;;  %v8413_v10 = vpack.c.bf16 %v3824_v54, %v3824_v54  ;;  %v3451_v61 = vadd.f32 %v8862_v12, %v3290_v8  ;;  %vm3696_vm4 = vcmp.ge.f32.partialorder %v3607_v49, 0.0  ;;  %v11120_v54 = vpop.f32.mrf.mxu0 }
 0x23b   : > { %3983 = vst.msk [vmem:[#allocation3 + $0xdc] sm:$0xf] %vm533_vm2, %v8412_v7  ;;  %5323 = vst.msk [vmem:[#allocation3 + $0x98] sm:$0xf] %vm533_vm2, %v8412_v7  ;;  %v3729_v40 = vmul.f32 %v10833_v27, %v3607_v49  ;;  %v8539_v4 = vpack.c.bf16 %v4718_v50, %v4718_v50  ;;  %v8864_v28 = vpop.f32.mrf.mxu1  ;;  %4594 = vrot.lane.b32.xlu1 %v8504_v15, %s9612_s30  ;;  %v3293_v55 = vadd.f32 %v8753_v35, %v10825_v59 }
 0x23c   : > { %4877 = vst.msk [vmem:[#allocation3 + $0xbc] sm:$0xf] %vm533_vm2, %v8538_v51  ;;  %5770 = vst.msk [vmem:[#allocation3 + $0x88] sm:$0xf] %vm533_vm2, %v8663_v37  ;;  %4148 = vrot.lane.b32.xlu0 %v8441_v46, %s9612_s30  ;;  %v3612_v16 = vadd.f32 %v11017_v18, %v3451_v61  ;;  %v8865_v8 = vadd.f32 %v8864_v28, %v8863_v41  ;;  %v3298_v26 = vadd.f32 %v10772_v56, %v10825_v59 }
 0x23d   : > { %5771 = vst.msk [vmem:[#allocation3 + $0x9c] sm:$0xf] %vm533_vm2, %v8664_v34  ;;  %3984 = vst.msk [vmem:[#allocation3 + $0xf0] sm:$0xf] %vm533_vm2, %v8413_v10  ;;  %v3761_v29 = vsel %vm3696_vm4, %v3607_v49, %v3729_v40  ;;  %v8866_v53 = vpop.f32.mrf.mxu1  ;;  %v8442_v42 = vpack.c.bf16 %v4013_v62, %v4013_v62  ;;  %v8759_v58 = vadd.f32 %v10776_v2, %v10774_v1 }
 0x23e   : > { %5324 = vst.msk [vmem:[#allocation3 + $0xac] sm:$0xf] %vm533_vm2, %v8413_v10  ;;  %4878 = vst.msk [vmem:[#allocation3 + $0xd0] sm:$0xf] %vm533_vm2, %v8539_v4  ;;  %v3825_v44 = vld [vmem:[#allocation2 + $0x98] sm:$0xff]  ;;  %vm3697_vm5 = vcmp.ge.f32.partialorder %v3612_v16, 0.0  ;;  %v3730_v18 = vmul.f32 %v10833_v27, %v3612_v16  ;;  %v3454_v35 = vadd.f32 %v8865_v8, %v3293_v55  ;;  %v8501_v49 = vpack.c.bf16 %v4456_v39, %v4456_v39 }
 0x23f   : > { %3793 = vst.msk [vmem:[#allocation2 + $0xb1] sm:$0xff] %vm284_vm0, %v3761_v29  ;;  %v4719_v19 = vld [vmem:[#allocation2 + $0x99] sm:$0xff]  ;;  %v8867_v63 = vpop.f32.mrf.mxu1  ;;  %4150 = vrot.lane.b32.xlu1 %v8442_v42, %s9612_s30  ;;  %v8414_v56 = vpack.c.bf16 %v3825_v44, %v3825_v44  ;;  %v4010_v10 = vld [vmem:[#allocation2 + $0x49] sm:$0xff]  ;;  %v3301_v61 = vadd.f32 %v8759_v58, %v10825_v59  ;;  %v3306_v62 = vadd.f32 %v10778_v32, %v10825_v59 }
 0x240   : > { %v4272_v36 = vld [vmem:[#allocation2 + $0x92] sm:$0xff]  ;;  %v4273_v38 = vld [vmem:[#allocation2 + $0x9a] sm:$0xff]  ;;  %5484 = vrot.lane.b32.xlu0 %v8441_v46, %s9612_s30  ;;  %v8540_v7 = vpack.c.bf16 %v4719_v19, %v4719_v19  ;;  %v3762_v45 = vsel %vm3697_vm5, %v3612_v16, %v3730_v18  ;;  %v3615_v37 = vadd.f32 %v11057_v0, %v3454_v35  ;;  %v8868_v20 = vadd.f32 %v8867_v63, %v8866_v53  ;;  %v4907_v46 = vld [vmem:[#allocation2 + $0x6a] sm:$0xff] }
 0x241   : > { %v8477_v51 = vpack.c.bf16 %v4272_v36, %v4272_v36  ;;  %v3826_v1 = vld [vmem:[#allocation2 + $0xa8] sm:$0xff]  ;;  %v8478_v2 = vpack.c.bf16 %v4273_v38, %v4273_v38  ;;  %3794 = vst.msk [vmem:[#allocation2 + $0xc1] sm:$0xff] %vm284_vm0, %v3762_v45  ;;  %v8869_v12 = vpop.f32.mrf.mxu1  ;;  %v8765_v29 = vadd.f32 %v10782_v30, %v10780_v22  ;;  %v8568_v53 = vpack.c.bf16 %v4907_v46, %v4907_v46  ;;  %v4457_v18 = vld [vmem:[#allocation2 + $0x50] sm:$0xff] }
 0x242   : > { %3985 = vst.msk [vmem:[#allocation3 + $0x104] sm:$0xf] %vm533_vm2, %v8414_v56  ;;  %5325 = vst.msk [vmem:[#allocation3 + $0xc0] sm:$0xf] %vm533_vm2, %v8414_v56  ;;  %v8415_v34 = vpack.c.bf16 %v3826_v1, %v3826_v1  ;;  %v4720_v41 = vld [vmem:[#allocation2 + $0xa9] sm:$0xff]  ;;  %vm3698_vm6 = vcmp.ge.f32.partialorder %v3615_v37, 0.0  ;;  %v3731_v0 = vmul.f32 %v10833_v27, %v3615_v37  ;;  %v3459_v15 = vadd.f32 %v8868_v20, %v3298_v26  ;;  %v3622_v26 = vpop.f32.mrf.mxu0 }
 0x243   : > { %4879 = vst.msk [vmem:[#allocation3 + $0xe4] sm:$0xf] %vm533_vm2, %v8540_v7  ;;  %4432 = vst.msk [vmem:[#allocation3 + $0xf4] sm:$0xf] %vm533_vm2, %v8477_v51  ;;  %v8541_v50 = vpack.c.bf16 %v4720_v41, %v4720_v41  ;;  %v8870_v40 = vpop.f32.mrf.mxu1  ;;  %5486 = vrot.lane.b32.xlu1 %v8442_v42, %s9612_s30  ;;  %v8439_v42 = vpack.c.bf16 %v4010_v10, %v4010_v10  ;;  %v8502_v1 = vpack.c.bf16 %v4457_v18, %v4457_v18 }
 0x244   : > { %5772 = vst.msk [vmem:[#allocation3 + $0xb0] sm:$0xf] %vm533_vm2, %v8477_v51  ;;  %4433 = vst.msk [vmem:[#allocation3 + $0x108] sm:$0xf] %vm533_vm2, %v8478_v2  ;;  %4588 = vrot.lane.b32.xlu0 %v8501_v49, %s9612_s30  ;;  %v3763_v4 = vsel %vm3698_vm6, %v3615_v37, %v3731_v0  ;;  %v8871_v28 = vadd.f32 %v8870_v40, %v8869_v12  ;;  %v3620_v55 = vadd.f32 %v3619_v11, %v3459_v15  ;;  %v4011_v0 = vld [vmem:[#allocation2 + $0x51] sm:$0xff]  ;;  %v4906_v15 = vld [vmem:[#allocation2 + $0x62] sm:$0xff] }
 0x245   : > { %5773 = vst.msk [vmem:[#allocation3 + $0xc4] sm:$0xf] %vm533_vm2, %v8478_v2  ;;  %3986 = vst.msk [vmem:[#allocation3 + $0x118] sm:$0xf] %vm533_vm2, %v8415_v34  ;;  %v8872_v8 = vpop.f32.mrf.mxu1  ;;  %v11153_v2 = vpop.f32.mrf.mxu0 }
 0x246   : > { %5326 = vst.msk [vmem:[#allocation3 + $0xd4] sm:$0xf] %vm533_vm2, %v8415_v34  ;;  %v4912_v16 = vld [vmem:[#allocation2 + $0xaa] sm:$0xff]  ;;  %4880 = vst.msk [vmem:[#allocation3 + $0xf8] sm:$0xf] %vm533_vm2, %v8541_v50  ;;  %v4913_v19 = vld [vmem:[#allocation2 + $0xb2] sm:$0xff]  ;;  %v3732_v59 = vmul.f32 %v10833_v27, %v3620_v55  ;;  %v3462_v11 = vadd.f32 %v8871_v28, %v3301_v61 }
 0x247   : > { %3795 = vst.msk [vmem:[#allocation2 + $0xc9] sm:$0xff] %vm284_vm0, %v3763_v4  ;;  %v11141_v44 = vpack.c.bf16 %v4912_v16, %v4912_v16  ;;  %v3827_v58 = vld [vmem:[#allocation2 + $0xb0] sm:$0xff]  ;;  %vm3699_vm7 = vcmp.ge.f32.partialorder %v3620_v55, 0.0  ;;  %v11144_v35 = vpack.c.bf16 %v4913_v19, %v4913_v19  ;;  %v8873_v30 = vpop.f32.mrf.mxu1  ;;  %5042 = vrot.lane.b32.xlu1 %v8568_v53, %s9612_s30  ;;  %v11168_v50 = vld [vmem:[%s12124_s2] ss:$0 sm:$0xff]  ;;  %v8440_v16 = vpack.c.bf16 %v4011_v0, %v4011_v0 }
 0x248   : > { %v4721_v32 = vld [vmem:[#allocation2 + $0xb1] sm:$0xff]  ;;  %4144 = vrot.lane.b32.xlu0 %v8439_v42, %s9612_s30  ;;  %v8416_v36 = vpack.c.bf16 %v3827_v58, %v3827_v58  ;;  %v3764_v56 = vsel %vm3699_vm7, %v3620_v55, %v3732_v59  ;;  %v8874_v7 = vadd.f32 %v8873_v30, %v8872_v8  ;;  %v3623_v51 = vadd.f32 %v3622_v26, %v3462_v11  ;;  %v3828_v45 = vld [vmem:[#allocation2 + $0xc0] sm:$0xff]  ;;  %v3635_v26 = vpop.f32.mrf.mxu0 }
 0x249   : > { %v5614_v39 = vld [vmem:[#allocation2 + $0xaa] sm:$0xff]  ;;  %v5615_v22 = vld [vmem:[#allocation2 + $0xb2] sm:$0xff]  ;;  %4434 = vst.msk [vmem:[#allocation3 + $0x11c] sm:$0xf] %vm533_vm2, %v11141_v44  ;;  %v8542_v38 = vpack.c.bf16 %v4721_v32, %v4721_v32  ;;  %4435 = vst.msk [vmem:[#allocation3 + $0x130] sm:$0xf] %vm533_vm2, %v11144_v35  ;;  %v8875_v20 = vpop.f32.mrf.mxu1  ;;  %v8417_v12 = vpack.c.bf16 %v3828_v45, %v3828_v45  ;;  %v3309_v61 = vadd.f32 %v11168_v50, %v8765_v29 }
 0x24a   : > { %v8667_v63 = vpack.c.bf16 %v5614_v39, %v5614_v39  ;;  %v8668_v37 = vpack.c.bf16 %v5615_v22, %v5615_v22  ;;  %3796 = vst.msk [vmem:[#allocation2 + $0xd9] sm:$0xff] %vm284_vm0, %v3764_v56  ;;  %v4722_v49 = vld [vmem:[#allocation2 + $0xc1] sm:$0xff]  ;;  %v3467_v34 = vadd.f32 %v8874_v7, %v3306_v62  ;;  %vm3700_vm8 = vcmp.ge.f32.partialorder %v3623_v51, 0.0 }
 0x24b   : > { %3987 = vst.msk [vmem:[#allocation3 + $0x12c] sm:$0xf] %vm533_vm2, %v8416_v36  ;;  %5327 = vst.msk [vmem:[#allocation3 + $0xe8] sm:$0xf] %vm533_vm2, %v8416_v36  ;;  %v3733_v41 = vmul.f32 %v10833_v27, %v3623_v51  ;;  %v8543_v46 = vpack.c.bf16 %v4722_v49, %v4722_v49  ;;  %v8876_v10 = vpop.f32.mrf.mxu1  ;;  %4590 = vrot.lane.b32.xlu1 %v8502_v1, %s9612_s30  ;;  %v3314_v28 = vadd.f32 %v11168_v50, %v10784_v9 }
 0x24c   : > { %4881 = vst.msk [vmem:[#allocation3 + $0x10c] sm:$0xf] %vm533_vm2, %v8542_v38  ;;  %5774 = vst.msk [vmem:[#allocation3 + $0xd8] sm:$0xf] %vm533_vm2, %v8667_v63  ;;  %5480 = vrot.lane.b32.xlu0 %v8439_v42, %s9612_s30  ;;  %v3628_v40 = vadd.f32 %v11095_v33, %v3467_v34  ;;  %v8877_v4 = vadd.f32 %v8876_v10, %v8875_v20  ;;  %v8567_v8 = vpack.c.bf16 %v4906_v15, %v4906_v15  ;;  %v11183_v38 = vpop.f32.mrf.mxu0  ;;  %v4016_v34 = vld [vmem:[#allocation2 + $0x91] sm:$0xff] }
 0x24d   : > { %5775 = vst.msk [vmem:[#allocation3 + $0xec] sm:$0xf] %vm533_vm2, %v8668_v37  ;;  %3988 = vst.msk [vmem:[#allocation3 + $0x140] sm:$0xf] %vm533_vm2, %v8417_v12  ;;  %v3765_v62 = vsel %vm3700_vm8, %v3623_v51, %v3733_v41  ;;  %v8878_v55 = vpop.f32.mrf.mxu1  ;;  %v8771_v29 = vadd.f32 %v10788_v23, %v10786_v47  ;;  %v4462_v51 = vld [vmem:[#allocation2 + $0x90] sm:$0xff]  ;;  %v3322_v0 = vadd.f32 %v11168_v50, %v10790_v3 }
 0x24e   : > { %5328 = vst.msk [vmem:[#allocation3 + $0xfc] sm:$0xf] %vm533_vm2, %v8417_v12  ;;  %4882 = vst.msk [vmem:[#allocation3 + $0x120] sm:$0xf] %vm533_vm2, %v8543_v46  ;;  %v3829_v53 = vld [vmem:[#allocation2 + $0xc8] sm:$0xff]  ;;  %vm3701_vm9 = vcmp.ge.f32.partialorder %v3628_v40, 0.0  ;;  %v3734_v33 = vmul.f32 %v10833_v27, %v3628_v40  ;;  %v3470_v19 = vadd.f32 %v8877_v4, %v3309_v61  ;;  %v8777_v15 = vadd.f32 %v10794_v43, %v10792_v52  ;;  %v3638_v46 = vpop.f32.mrf.mxu0 }
 0x24f   : > { %3797 = vst.msk [vmem:[#allocation2 + $0xe1] sm:$0xff] %vm284_vm0, %v3765_v62  ;;  %v4723_v42 = vld [vmem:[#allocation2 + $0xc9] sm:$0xff]  ;;  %v8879_v59 = vpop.f32.mrf.mxu1  ;;  %4146 = vrot.lane.b32.xlu1 %v8440_v16, %s9612_s30  ;;  %v8418_v9 = vpack.c.bf16 %v3829_v53, %v3829_v53  ;;  %v3317_v20 = vadd.f32 %v11168_v50, %v8771_v29  ;;  %v8507_v10 = vpack.c.bf16 %v4462_v51, %v4462_v51 }
 0x250   : > { %v4276_v58 = vld [vmem:[#allocation2 + $0xc2] sm:$0xff]  ;;  %v4277_v32 = vld [vmem:[#allocation2 + $0xca] sm:$0xff]  ;;  %5040 = vrot.lane.b32.xlu0 %v8567_v8, %s9612_s30  ;;  %v8544_v11 = vpack.c.bf16 %v4723_v42, %v4723_v42  ;;  %v3766_v39 = vsel %vm3701_vm9, %v3628_v40, %v3734_v33  ;;  %v3631_v22 = vadd.f32 %v11120_v54, %v3470_v19  ;;  %v8880_v30 = vadd.f32 %v8879_v59, %v8878_v55 }
 0x251   : > { %v8481_v18 = vpack.c.bf16 %v4276_v58, %v4276_v58  ;;  %v8482_v36 = vpack.c.bf16 %v4277_v32, %v4277_v32  ;;  %v3830_v47 = vld [vmem:[#allocation2 + $0xd8] sm:$0xff]  ;;  %3798 = vst.msk [vmem:[#allocation2 + $0xf1] sm:$0xff] %vm284_vm0, %v3766_v39  ;;  %v8881_v23 = vpop.f32.mrf.mxu1 }
 0x252   : > { %3989 = vst.msk [vmem:[#allocation3 + $0x154] sm:$0xf] %vm533_vm2, %v8418_v9  ;;  %5329 = vst.msk [vmem:[#allocation3 + $0x110] sm:$0xf] %vm533_vm2, %v8418_v9  ;;  %v8419_v63 = vpack.c.bf16 %v3830_v47, %v3830_v47  ;;  %v4724_v56 = vld [vmem:[#allocation2 + $0xd9] sm:$0xff]  ;;  %vm3702_vm10 = vcmp.ge.f32.partialorder %v3631_v22, 0.0  ;;  %v3735_v54 = vmul.f32 %v10833_v27, %v3631_v22  ;;  %v3475_v7 = vadd.f32 %v8880_v30, %v3314_v28 }
 0x253   : > { %4883 = vst.msk [vmem:[#allocation3 + $0x134] sm:$0xf] %vm533_vm2, %v8544_v11  ;;  %4436 = vst.msk [vmem:[#allocation3 + $0x144] sm:$0xf] %vm533_vm2, %v8481_v18  ;;  %v8545_v45 = vpack.c.bf16 %v4724_v56, %v4724_v56  ;;  %v8882_v37 = vpop.f32.mrf.mxu1  ;;  %5482 = vrot.lane.b32.xlu1 %v8440_v16, %s9612_s30  ;;  %v4463_v16 = vld [vmem:[#allocation2 + $0x98] sm:$0xff]  ;;  %v8445_v9 = vpack.c.bf16 %v4016_v34, %v4016_v34  ;;  %v11218_v11 = vpop.f32.mrf.mxu0 }
 0x254   : > { %5776 = vst.msk [vmem:[#allocation3 + $0x100] sm:$0xf] %vm533_vm2, %v8481_v18  ;;  %4437 = vst.msk [vmem:[#allocation3 + $0x158] sm:$0xf] %vm533_vm2, %v8482_v36  ;;  %5036 = vrot.lane.b32.xlu0 %v10985_v14, %s9612_s30  ;;  %v3767_v1 = vsel %vm3702_vm10, %v3631_v22, %v3735_v54  ;;  %v8883_v12 = vadd.f32 %v8882_v37, %v8881_v23  ;;  %v3636_v49 = vadd.f32 %v3635_v26, %v3475_v7 }
 0x255   : > { %5777 = vst.msk [vmem:[#allocation3 + $0x114] sm:$0xf] %vm533_vm2, %v8482_v36  ;;  %3990 = vst.msk [vmem:[#allocation3 + $0x168] sm:$0xf] %vm533_vm2, %v8419_v63  ;;  %v8884_v14 = vpop.f32.mrf.mxu1  ;;  %v4017_v36 = vld [vmem:[#allocation2 + $0x99] sm:$0xff] }
 0x256   : > { %5330 = vst.msk [vmem:[#allocation3 + $0x124] sm:$0xf] %vm533_vm2, %v8419_v63  ;;  %v4916_v41 = vld [vmem:[#allocation2 + $0xda] sm:$0xff]  ;;  %4884 = vst.msk [vmem:[#allocation3 + $0x148] sm:$0xf] %vm533_vm2, %v8545_v45  ;;  %v4917_v40 = vld [vmem:[#allocation2 + $0xe2] sm:$0xff]  ;;  %v3736_v28 = vmul.f32 %v10833_v27, %v3636_v49  ;;  %v3478_v55 = vadd.f32 %v8883_v12, %v3317_v20  ;;  %v3325_v63 = vadd.f32 %v11168_v50, %v8777_v15 }
 0x257   : > { %3799 = vst.msk [vmem:[#allocation2 + $0xf9] sm:$0xff] %vm284_vm0, %v3767_v1  ;;  %v11205_v61 = vpack.c.bf16 %v4916_v41, %v4916_v41  ;;  %v3831_v62 = vld [vmem:[#allocation2 + $0xe0] sm:$0xff]  ;;  %vm3703_vm11 = vcmp.ge.f32.partialorder %v3636_v49, 0.0  ;;  %v11208_v8 = vpack.c.bf16 %v4917_v40, %v4917_v40  ;;  %v8885_v52 = vpop.f32.mrf.mxu1  ;;  %5038 = vrot.lane.b32.xlu1 %v10995_v13, %s9612_s30  ;;  %v8508_v13 = vpack.c.bf16 %v4463_v16, %v4463_v16  ;;  %v3651_v1 = vpop.f32.mrf.mxu0  ;;  %v4460_v15 = vld [vmem:[#allocation2 + $0x78] sm:$0xff] }
 0x258   : > { %v4725_v4 = vld [vmem:[#allocation2 + $0xe1] sm:$0xff]  ;;  %4600 = vrot.lane.b32.xlu0 %v8507_v10, %s9612_s30  ;;  %v8420_v43 = vpack.c.bf16 %v3831_v62, %v3831_v62  ;;  %v3768_v29 = vsel %vm3703_vm11, %v3636_v49, %v3736_v28  ;;  %v8886_v33 = vadd.f32 %v8885_v52, %v8884_v14  ;;  %v3639_v19 = vadd.f32 %v3638_v46, %v3478_v55  ;;  %v3832_v58 = vld [vmem:[#allocation2 + $0xf0] sm:$0xff]  ;;  %v11246_v40 = vld [vmem:[%s12125_s3 + $0x118] sm:$0xff]  }
 0x259   : > { %v5618_v3 = vld [vmem:[#allocation2 + $0xda] sm:$0xff]  ;;  %v5619_v26 = vld [vmem:[#allocation2 + $0xe2] sm:$0xff]  ;;  %4438 = vst.msk [vmem:[#allocation3 + $0x16c] sm:$0xf] %vm533_vm2, %v11205_v61  ;;  %v8546_v53 = vpack.c.bf16 %v4725_v4, %v4725_v4  ;;  %4439 = vst.msk [vmem:[#allocation3 + $0x180] sm:$0xf] %vm533_vm2, %v11208_v8  ;;  %v8887_v59 = vpop.f32.mrf.mxu1  ;;  %v8421_v18 = vpack.c.bf16 %v3832_v58, %v3832_v58  ;;  %v3330_v45 = vadd.f32 %v11168_v50, %v10796_v24  ;;  %9218 = vmatprep.subr.bf16.mxu1 %v11246_v40 }
 0x25a   : > { %v8671_v42 = vpack.c.bf16 %v5618_v3, %v5618_v3  ;;  %v8672_v32 = vpack.c.bf16 %v5619_v26, %v5619_v26  ;;  %3800 = vst.msk [vmem:[#allocation2 + $0x109] sm:$0xff] %vm284_vm0, %v3768_v29  ;;  %v4726_v39 = vld [vmem:[#allocation2 + $0xf1] sm:$0xff]  ;;  %v3483_v22 = vadd.f32 %v8886_v33, %v3322_v0  ;;  %vm3704_vm12 = vcmp.ge.f32.partialorder %v3639_v19, 0.0  ;;  %v4911_v58 = vld [vmem:[#allocation2 + $0x9a] sm:$0xff] }
 0x25b   : > { %3991 = vst.msk [vmem:[#allocation3 + $0x17c] sm:$0xf] %vm533_vm2, %v8420_v43  ;;  %5331 = vst.msk [vmem:[#allocation3 + $0x138] sm:$0xf] %vm533_vm2, %v8420_v43  ;;  %v3737_v30 = vmul.f32 %v10833_v27, %v3639_v19  ;;  %v8547_v47 = vpack.c.bf16 %v4726_v39, %v4726_v39  ;;  %v8888_v23 = vpop.f32.mrf.mxu1  ;;  %4602 = vrot.lane.b32.xlu1 %v8508_v13, %s9612_s30  ;;  %v8446_v20 = vpack.c.bf16 %v4017_v36, %v4017_v36 }
 0x25c   : > { %4885 = vst.msk [vmem:[#allocation3 + $0x15c] sm:$0xf] %vm533_vm2, %v8546_v53  ;;  %5778 = vst.msk [vmem:[#allocation3 + $0x128] sm:$0xf] %vm533_vm2, %v8671_v42  ;;  %4156 = vrot.lane.b32.xlu0 %v8445_v9, %s9612_s30  ;;  %v3644_v56 = vadd.f32 %v11153_v2, %v3483_v22  ;;  %v8889_v7 = vadd.f32 %v8888_v23, %v8887_v59  ;;  %v8505_v53 = vpack.c.bf16 %v4460_v15, %v4460_v15  ;;  %v11254_v42 = vpop.f32.mrf.mxu0 }
 0x25d   : > { %5779 = vst.msk [vmem:[#allocation3 + $0x13c] sm:$0xf] %vm533_vm2, %v8672_v32  ;;  %3992 = vst.msk [vmem:[#allocation3 + $0x190] sm:$0xf] %vm533_vm2, %v8421_v18  ;;  %v3769_v54 = vsel %vm3704_vm12, %v3639_v19, %v3737_v30  ;;  %v8890_v37 = vpop.f32.mrf.mxu1  ;;  %v4014_v32 = vld [vmem:[#allocation2 + $0x79] sm:$0xff]  ;;  %v3338_v36 = vadd.f32 %v11168_v50, %v10806_v57 }
 0x25e   : > { %5332 = vst.msk [vmem:[#allocation3 + $0x14c] sm:$0xf] %vm533_vm2, %v8421_v18  ;;  %v4918_v51 = vld [vmem:[#allocation2 + $0xf2] sm:$0xff]  ;;  %4886 = vst.msk [vmem:[#allocation3 + $0x170] sm:$0xf] %vm533_vm2, %v8547_v47  ;;  %v4919_v49 = vld [vmem:[#allocation2 + $0xfa] sm:$0xff]  ;;  %v3738_v2 = vmul.f32 %v10833_v27, %v3644_v56  ;;  %v3486_v0 = vadd.f32 %v8889_v7, %v3325_v63  ;;  %v3654_v23 = vpop.f32.mrf.mxu0  ;;  %v8572_v63 = vpack.c.bf16 %v4911_v58, %v4911_v58 }
 0x25f   : > { %3801 = vst.msk [vmem:[#allocation2 + $0x111] sm:$0xff] %vm284_vm0, %v3769_v54  ;;  %v11236_v12 = vpack.c.bf16 %v4918_v51, %v4918_v51  ;;  %v3833_v34 = vld [vmem:[#allocation2 + $0xf8] sm:$0xff]  ;;  %vm3705_vm13 = vcmp.ge.f32.partialorder %v3644_v56, 0.0  ;;  %v11239_v14 = vpack.c.bf16 %v4919_v49, %v4919_v49  ;;  %v8891_v24 = vpop.f32.mrf.mxu1  ;;  %4158 = vrot.lane.b32.xlu1 %v8446_v20, %s9612_s30 }
 0x260   : > { %v4727_v41 = vld [vmem:[#allocation2 + $0xf9] sm:$0xff]  ;;  %5492 = vrot.lane.b32.xlu0 %v8445_v9, %s9612_s30  ;;  %v8422_v62 = vpack.c.bf16 %v3833_v34, %v3833_v34  ;;  %v3770_v55 = vsel %vm3705_vm13, %v3644_v56, %v3738_v2  ;;  %v3647_v16 = vadd.f32 %v11183_v38, %v3486_v0  ;;  %v8892_v3 = vadd.f32 %v8891_v24, %v8890_v37 }
 0x261   : > { %v5620_v46 = vld [vmem:[#allocation2 + $0xf2] sm:$0xff]  ;;  %v5621_v10 = vld [vmem:[#allocation2 + $0xfa] sm:$0xff]  ;;  %4440 = vst.msk [vmem:[#allocation3 + $0x194] sm:$0xf] %vm533_vm2, %v11236_v12  ;;  %v8548_v4 = vpack.c.bf16 %v4727_v41, %v4727_v41  ;;  %4441 = vst.msk [vmem:[#allocation3 + $0x1a8] sm:$0xf] %vm533_vm2, %v11239_v14  ;;  %v8893_v43 = vpop.f32.mrf.mxu1  ;;  %v3333_v9 = vadd.f32 %v11168_v50, %v10798_v31  ;;  %v8443_v56 = vpack.c.bf16 %v4014_v32, %v4014_v32 }
 0x262   : > { %v8673_v28 = vpack.c.bf16 %v5620_v46, %v5620_v46  ;;  %v3834_v26 = vld [vmem:[#allocation2 + $0x108] sm:$0xff]  ;;  %v8674_v52 = vpack.c.bf16 %v5621_v10, %v5621_v10  ;;  %3802 = vst.msk [vmem:[#allocation2 + $0x121] sm:$0xff] %vm284_vm0, %v3770_v55  ;;  %vm3706_vm14 = vcmp.ge.f32.partialorder %v3647_v16, 0.0  ;;  %v3739_v33 = vmul.f32 %v10833_v27, %v3647_v16  ;;  %v11285_v55 = vpop.f32.mrf.mxu0 }
 0x263   : > { %3993 = vst.msk [vmem:[#allocation3 + $0x1a4] sm:$0xf] %vm533_vm2, %v8422_v62  ;;  %v8423_v29 = vpack.c.bf16 %v3834_v26, %v3834_v26  ;;  %5333 = vst.msk [vmem:[#allocation3 + $0x160] sm:$0xf] %vm533_vm2, %v8422_v62  ;;  %v4728_v38 = vld [vmem:[#allocation2 + $0x109] sm:$0xff]  ;;  %v3491_v19 = vadd.f32 %v8892_v3, %v3330_v45  ;;  %v8894_v13 = vpop.f32.mrf.mxu1  ;;  %5494 = vrot.lane.b32.xlu1 %v8446_v20, %s9612_s30  ;;  %v4461_v20 = vld [vmem:[#allocation2 + $0x80] sm:$0xff] }
 0x264   : > { %4887 = vst.msk [vmem:[#allocation3 + $0x184] sm:$0xf] %vm533_vm2, %v8548_v4  ;;  %5780 = vst.msk [vmem:[#allocation3 + $0x150] sm:$0xf] %vm533_vm2, %v8673_v28  ;;  %v8549_v59 = vpack.c.bf16 %v4728_v38, %v4728_v38  ;;  %4596 = vrot.lane.b32.xlu0 %v8505_v53, %s9612_s30  ;;  %v3771_v18 = vsel %vm3706_vm14, %v3647_v16, %v3739_v33  ;;  %v8895_v39 = vadd.f32 %v8894_v13, %v8893_v43  ;;  %v4015_v43 = vld [vmem:[#allocation2 + $0x81] sm:$0xff]  ;;  %v4910_v53 = vld [vmem:[#allocation2 + $0x92] sm:$0xff] }
 0x265   : > { %5781 = vst.msk [vmem:[#allocation3 + $0x164] sm:$0xf] %vm533_vm2, %v8674_v52  ;;  %3994 = vst.msk [vmem:[#allocation3 + $0x1b8] sm:$0xf] %vm533_vm2, %v8423_v29  ;;  %v3652_v22 = vadd.f32 %v3651_v1, %v3491_v19  ;;  %v8896_v47 = vpop.f32.mrf.mxu1  ;;  %v8506_v28 = vpack.c.bf16 %v4461_v20, %v4461_v20  ;;  %v3341_v33 = vadd.f32 %v11168_v50, %v10808_v5 }
 0x266   : > { %5334 = vst.msk [vmem:[#allocation3 + $0x174] sm:$0xf] %vm533_vm2, %v8423_v29  ;;  %v4920_v30 = vld [vmem:[#allocation2 + $0x10a] sm:$0xff]  ;;  %4888 = vst.msk [vmem:[#allocation3 + $0x198] sm:$0xf] %vm533_vm2, %v8549_v59  ;;  %v4921_v7 = vld [vmem:[#allocation2 + $0x112] sm:$0xff]  ;;  %v3494_v37 = vadd.f32 %v8895_v39, %v3333_v9  ;;  %v3346_v13 = vadd.f32 %v11168_v50, %v10810_v25  ;;  %v8571_v39 = vpack.c.bf16 %v4910_v53, %v4910_v53 }
 0x267   : > { %3803 = vst.msk [vmem:[#allocation2 + $0x129] sm:$0xff] %vm284_vm0, %v3771_v18  ;;  %v11273_v54 = vpack.c.bf16 %v4920_v30, %v4920_v30  ;;  %v3835_v51 = vld [vmem:[#allocation2 + $0x110] sm:$0xff]  ;;  %vm3707_vm15 = vcmp.ge.f32.partialorder %v3652_v22, 0.0  ;;  %v3740_v45 = vmul.f32 %v10833_v27, %v3652_v22  ;;  %v11276_v1 = vpack.c.bf16 %v4921_v7, %v4921_v7  ;;  %v8897_v34 = vpop.f32.mrf.mxu1  ;;  %5050 = vrot.lane.b32.xlu1 %v8572_v63, %s9612_s30 }
 0x268   : > { %v4729_v31 = vld [vmem:[#allocation2 + $0x111] sm:$0xff]  ;;  %4152 = vrot.lane.b32.xlu0 %v8443_v56, %s9612_s30  ;;  %v8424_v41 = vpack.c.bf16 %v3835_v51, %v3835_v51  ;;  %v8898_v46 = vadd.f32 %v8897_v34, %v8896_v47  ;;  %v3655_v10 = vadd.f32 %v3654_v23, %v3494_v37  ;;  %v8444_v18 = vpack.c.bf16 %v4015_v43, %v4015_v43 }
 0x269   : > { %v5622_v49 = vld [vmem:[#allocation2 + $0x10a] sm:$0xff]  ;;  %v5623_v57 = vld [vmem:[#allocation2 + $0x112] sm:$0xff]  ;;  %4442 = vst.msk [vmem:[#allocation3 + $0x1bc] sm:$0xf] %vm533_vm2, %v11273_v54  ;;  %v8550_v2 = vpack.c.bf16 %v4729_v31, %v4729_v31  ;;  %v3772_v15 = vsel %vm3707_vm15, %v3652_v22, %v3740_v45  ;;  %4443 = vst.msk [vmem:[#allocation3 + $0x1d0] sm:$0xf] %vm533_vm2, %v11276_v1  ;;  %v8899_v4 = vpop.f32.mrf.mxu1  ;;  %v3667_v22 = vpop.f32.mrf.mxu0 }
 0x26a   : > { %v8675_v0 = vpack.c.bf16 %v5622_v49, %v5622_v49  ;;  %v3836_v24 = vld [vmem:[#allocation2 + $0x120] sm:$0xff]  ;;  %v8676_v62 = vpack.c.bf16 %v5623_v57, %v5623_v57  ;;  %3804 = vst.msk [vmem:[#allocation2 + $0x139] sm:$0xff] %vm284_vm0, %v3772_v15  ;;  %v3499_v26 = vadd.f32 %v8898_v46, %v3338_v36  ;;  %vm3708_vm1 = vcmp.ge.f32.partialorder %v3655_v10, 0.0 }
 0x26b   : > { %v8425_v16 = vpack.c.bf16 %v3836_v24, %v3836_v24  ;;  %3995 = vst.msk [vmem:[#allocation3 + $0x1cc] sm:$0xf] %vm533_vm2, %v8424_v41  ;;  %5335 = vst.msk [vmem:[#allocation3 + $0x188] sm:$0xf] %vm533_vm2, %v8424_v41  ;;  %v4730_v3 = vld [vmem:[#allocation2 + $0x121] sm:$0xff]  ;;  %v3741_v52 = vmul.f32 %v10833_v27, %v3655_v10  ;;  %v8900_v38 = vpop.f32.mrf.mxu1  ;;  %4598 = vrot.lane.b32.xlu1 %v8506_v28, %s9612_s30 }
 0x26c   : > { %4889 = vst.msk [vmem:[#allocation3 + $0x1ac] sm:$0xf] %vm533_vm2, %v8550_v2  ;;  %5782 = vst.msk [vmem:[#allocation3 + $0x178] sm:$0xf] %vm533_vm2, %v8675_v0  ;;  %v8551_v29 = vpack.c.bf16 %v4730_v3, %v4730_v3  ;;  %5488 = vrot.lane.b32.xlu0 %v8443_v56, %s9612_s30  ;;  %v3660_v19 = vadd.f32 %v11218_v11, %v3499_v26  ;;  %v8901_v32 = vadd.f32 %v8900_v38, %v8899_v4  ;;  %v11317_v2 = vpop.f32.mrf.mxu0  ;;  %v4020_v26 = vld [vmem:[#allocation2 + $0xc1] sm:$0xff] }
 0x26d   : > { %5783 = vst.msk [vmem:[#allocation3 + $0x18c] sm:$0xf] %vm533_vm2, %v8676_v62  ;;  %3996 = vst.msk [vmem:[#allocation3 + $0x1e0] sm:$0xf] %vm533_vm2, %v8425_v16  ;;  %v3773_v58 = vsel %vm3708_vm1, %v3655_v10, %v3741_v52  ;;  %v8902_v9 = vpop.f32.mrf.mxu1  ;;  %v4466_v10 = vld [vmem:[#allocation2 + $0xc0] sm:$0xff]  ;;  %v3349_v4 = vadd.f32 %v11168_v50, %v10812_v48 }
 0x26e   : > { %5336 = vst.msk [vmem:[#allocation3 + $0x19c] sm:$0xf] %vm533_vm2, %v8425_v16  ;;  %v4922_v59 = vld [vmem:[#allocation2 + $0x122] sm:$0xff]  ;;  %4890 = vst.msk [vmem:[#allocation3 + $0x1c0] sm:$0xf] %vm533_vm2, %v8551_v29  ;;  %v4923_v36 = vld [vmem:[#allocation2 + $0x12a] sm:$0xff]  ;;  %v3742_v11 = vmul.f32 %v10833_v27, %v3660_v19  ;;  %v3502_v23 = vadd.f32 %v8901_v32, %v3341_v33  ;;  %v3670_v43 = vpop.f32.mrf.mxu0  ;;  %v8511_v53 = vpack.c.bf16 %v4466_v10, %v4466_v10 }
 0x26f   : > { %3805 = vst.msk [vmem:[#allocation2 + $0x141] sm:$0xff] %vm284_vm0, %v3773_v58  ;;  %v11304_v30 = vpack.c.bf16 %v4922_v59, %v4922_v59  ;;  %v3837_v5 = vld [vmem:[#allocation2 + $0x128] sm:$0xff]  ;;  %vm3709_vm4 = vcmp.ge.f32.partialorder %v3660_v19, 0.0  ;;  %v11307_v63 = vpack.c.bf16 %v4923_v36, %v4923_v36  ;;  %v8903_v25 = vpop.f32.mrf.mxu1  ;;  %4154 = vrot.lane.b32.xlu1 %v8444_v18, %s9612_s30  ;;  %v3354_v36 = vadd.f32 %v11168_v50, %v10820_v6 }
 0x270   : > { %v4731_v47 = vld [vmem:[#allocation2 + $0x129] sm:$0xff]  ;;  %5048 = vrot.lane.b32.xlu0 %v8571_v39, %s9612_s30  ;;  %v8426_v51 = vpack.c.bf16 %v3837_v5, %v3837_v5  ;;  %v3774_v37 = vsel %vm3709_vm4, %v3660_v19, %v3742_v11  ;;  %v3663_v20 = vadd.f32 %v11254_v42, %v3502_v23  ;;  %v8904_v49 = vadd.f32 %v8903_v25, %v8902_v9 }
 0x271   : > { %v5624_v56 = vld [vmem:[#allocation2 + $0x122] sm:$0xff]  ;;  %v5625_v7 = vld [vmem:[#allocation2 + $0x12a] sm:$0xff]  ;;  %4444 = vst.msk [vmem:[#allocation3 + $0x1e4] sm:$0xf] %vm533_vm2, %v11304_v30  ;;  %v8552_v31 = vpack.c.bf16 %v4731_v47, %v4731_v47  ;;  %4445 = vst.msk [vmem:[#allocation3 + $0x1f8] sm:$0xf] %vm533_vm2, %v11307_v63  ;;  %v8905_v41 = vpop.f32.mrf.mxu1  ;;  %v8449_v25 = vpack.c.bf16 %v4020_v26, %v4020_v26 }
 0x272   : > { %v8677_v45 = vpack.c.bf16 %v5624_v56, %v5624_v56  ;;  %v3838_v57 = vld [vmem:[#allocation2 + $0x138] sm:$0xff]  ;;  %v8678_v34 = vpack.c.bf16 %v5625_v7, %v5625_v7  ;;  %3806 = vst.msk [vmem:[#allocation2 + $0x151] sm:$0xff] %vm284_vm0, %v3774_v37  ;;  %vm3710_vm5 = vcmp.ge.f32.partialorder %v3663_v20, 0.0  ;;  %v3743_v42 = vmul.f32 %v10833_v27, %v3663_v20  ;;  %v4467_v32 = vld [vmem:[#allocation2 + $0xc8] sm:$0xff] }
 0x273   : > { %3997 = vst.msk [vmem:[#allocation3 + $0x1f4] sm:$0xf] %vm533_vm2, %v8426_v51  ;;  %v8427_v0 = vpack.c.bf16 %v3838_v57, %v3838_v57  ;;  %5337 = vst.msk [vmem:[#allocation3 + $0x1b0] sm:$0xf] %vm533_vm2, %v8426_v51  ;;  %v4732_v15 = vld [vmem:[#allocation2 + $0x139] sm:$0xff]  ;;  %v3507_v46 = vadd.f32 %v8904_v49, %v3346_v13  ;;  %v8906_v62 = vpop.f32.mrf.mxu1  ;;  %5490 = vrot.lane.b32.xlu1 %v8444_v18, %s9612_s30  ;;  %v8512_v7 = vpack.c.bf16 %v4467_v32, %v4467_v32  ;;  %v4021_v37 = vld [vmem:[#allocation2 + $0xc9] sm:$0xff] }
 0x274   : > { %4891 = vst.msk [vmem:[#allocation3 + $0x1d4] sm:$0xf] %vm533_vm2, %v8552_v31  ;;  %5784 = vst.msk [vmem:[#allocation3 + $0x1a0] sm:$0xf] %vm533_vm2, %v8677_v45  ;;  %v8553_v24 = vpack.c.bf16 %v4732_v15, %v4732_v15  ;;  %5044 = vrot.lane.b32.xlu0 %v11081_v21, %s9612_s30  ;;  %v3775_v28 = vsel %vm3710_vm5, %v3663_v20, %v3743_v42  ;;  %v8907_v16 = vadd.f32 %v8906_v62, %v8905_v41  ;;  %v4018_v32 = vld [vmem:[#allocation2 + $0xa9] sm:$0xff] }
 0x275   : > { %5785 = vst.msk [vmem:[#allocation3 + $0x1b4] sm:$0xf] %vm533_vm2, %v8678_v34  ;;  %3998 = vst.msk [vmem:[#allocation3 + $0x208] sm:$0xf] %vm533_vm2, %v8427_v0  ;;  %v3668_v3 = vadd.f32 %v3667_v22, %v3507_v46  ;;  %v8450_v46 = vpack.c.bf16 %v4021_v37, %v4021_v37  ;;  %v4019_v37 = vld [vmem:[#allocation2 + $0xb1] sm:$0xff] }
 0x276   : > { %5338 = vst.msk [vmem:[#allocation3 + $0x1c4] sm:$0xf] %vm533_vm2, %v8427_v0  ;;  %v4924_v52 = vld [vmem:[#allocation2 + $0x13a] sm:$0xff]  ;;  %4892 = vst.msk [vmem:[#allocation3 + $0x1e8] sm:$0xf] %vm533_vm2, %v8553_v24  ;;  %v4925_v21 = vld [vmem:[#allocation2 + $0x142] sm:$0xff]  ;;  %v8908_v48 = vpop.f32.mrf.mxu1  ;;  %v3510_v58 = vadd.f32 %v8907_v16, %v3349_v4  ;;  %v3357_v0 = vadd.f32 %v11168_v50, %v10827_v60 }
 0x277   : > { %3807 = vst.msk [vmem:[#allocation2 + $0x159] sm:$0xff] %vm284_vm0, %v3775_v28  ;;  %v11334_v29 = vpack.c.bf16 %v4924_v52, %v4924_v52  ;;  %v3839_v38 = vld [vmem:[#allocation2 + $0x140] sm:$0xff]  ;;  %vm3711_vm6 = vcmp.ge.f32.partialorder %v3668_v3, 0.0  ;;  %v3744_v19 = vmul.f32 %v10833_v27, %v3668_v3  ;;  %v11337_v59 = vpack.c.bf16 %v4925_v21, %v4925_v21  ;;  %5046 = vrot.lane.b32.xlu1 %v11085_v17, %s9612_s30  ;;  %v4464_v4 = vld [vmem:[#allocation2 + $0xa8] sm:$0xff] }
 0x278   : > { %v4733_v33 = vld [vmem:[#allocation2 + $0x141] sm:$0xff]  ;;  %4608 = vrot.lane.b32.xlu0 %v8511_v53, %s9612_s30  ;;  %v8428_v18 = vpack.c.bf16 %v3839_v38, %v3839_v38  ;;  %v8909_v47 = vpop.f32.mrf.mxu1  ;;  %v3671_v11 = vadd.f32 %v3670_v43, %v3510_v58  ;;  %v4915_v58 = vld [vmem:[#allocation2 + $0xca] sm:$0xff] }
 0x279   : > { %v5626_v13 = vld [vmem:[#allocation2 + $0x13a] sm:$0xff]  ;;  %v5627_v9 = vld [vmem:[#allocation2 + $0x142] sm:$0xff]  ;;  %4446 = vst.msk [vmem:[#allocation3 + $0x20c] sm:$0xf] %vm533_vm2, %v11334_v29  ;;  %v8554_v39 = vpack.c.bf16 %v4733_v33, %v4733_v33  ;;  %v3776_v5 = vsel %vm3711_vm6, %v3668_v3, %v3744_v19  ;;  %4447 = vst.msk [vmem:[#allocation3 + $0x220] sm:$0xf] %vm533_vm2, %v11337_v59  ;;  %v8910_v17 = vadd.f32 %v8909_v47, %v8908_v48 }
 0x27a   : > { %v8679_v22 = vpack.c.bf16 %v5626_v13, %v5626_v13  ;;  %v3840_v23 = vld [vmem:[#allocation2 + $0x150] sm:$0xff]  ;;  %v8680_v56 = vpack.c.bf16 %v5627_v9, %v5627_v9  ;;  %3808 = vst.msk [vmem:[#allocation2 + $0x169] sm:$0xff] %vm284_vm0, %v3776_v5  ;;  %vm3712_vm7 = vcmp.ge.f32.partialorder %v3671_v11, 0.0  ;;  %v3745_v31 = vmul.f32 %v10833_v27, %v3671_v11  ;;  %v8911_v45 = vpop.f32.mrf.mxu1 }
 0x27b   : > { %v8429_v51 = vpack.c.bf16 %v3840_v23, %v3840_v23  ;;  %3999 = vst.msk [vmem:[#allocation3 + $0x21c] sm:$0xf] %vm533_vm2, %v8428_v18  ;;  %5339 = vst.msk [vmem:[#allocation3 + $0x1d8] sm:$0xf] %vm533_vm2, %v8428_v18  ;;  %v4734_v6 = vld [vmem:[#allocation2 + $0x151] sm:$0xff]  ;;  %v3515_v49 = vadd.f32 %v8910_v17, %v3354_v36  ;;  %4610 = vrot.lane.b32.xlu1 %v8512_v7, %s9612_s30  ;;  %v8509_v19 = vpack.c.bf16 %v4464_v4, %v4464_v4 }
 0x27c   : > { %4893 = vst.msk [vmem:[#allocation3 + $0x1fc] sm:$0xf] %vm533_vm2, %v8554_v39  ;;  %5786 = vst.msk [vmem:[#allocation3 + $0x1c8] sm:$0xf] %vm533_vm2, %v8679_v22  ;;  %v8555_v20 = vpack.c.bf16 %v4734_v6, %v4734_v6  ;;  %4164 = vrot.lane.b32.xlu0 %v8449_v25, %s9612_s30  ;;  %v3777_v57 = vsel %vm3712_vm7, %v3671_v11, %v3745_v31  ;;  %v8912_v34 = vpop.f32.mrf.mxu1  ;;  %v8576_v22 = vpack.c.bf16 %v4915_v58, %v4915_v58 }
 0x27d   : > { %5787 = vst.msk [vmem:[#allocation3 + $0x1dc] sm:$0xf] %vm533_vm2, %v8680_v56  ;;  %4000 = vst.msk [vmem:[#allocation3 + $0x230] sm:$0xf] %vm533_vm2, %v8429_v51  ;;  %v3676_v15 = vadd.f32 %v11285_v55, %v3515_v49  ;;  %v8913_v42 = vadd.f32 %v8912_v34, %v8911_v45  ;;  %v8447_v36 = vpack.c.bf16 %v4018_v32, %v4018_v32  ;;  %v4914_v49 = vld [vmem:[#allocation2 + $0xc2] sm:$0xff] }
 0x27e   : > { %5340 = vst.msk [vmem:[#allocation3 + $0x1ec] sm:$0xf] %vm533_vm2, %v8429_v51  ;;  %v4926_v41 = vld [vmem:[#allocation2 + $0x152] sm:$0xff]  ;;  %4894 = vst.msk [vmem:[#allocation3 + $0x210] sm:$0xf] %vm533_vm2, %v8555_v20  ;;  %v4927_v10 = vld [vmem:[#allocation2 + $0x15a] sm:$0xff] }
 0x27f   : > { %3809 = vst.msk [vmem:[#allocation2 + $0x171] sm:$0xff] %vm284_vm0, %v3777_v57  ;;  %v3841_v24 = vld [vmem:[#allocation2 + $0x158] sm:$0xff]  ;;  %v11364_v28 = vpack.c.bf16 %v4926_v41, %v4926_v41  ;;  %v11366_v16 = vpack.c.bf16 %v4927_v10, %v4927_v10  ;;  %vm3713_vm8 = vcmp.ge.f32.partialorder %v3676_v15, 0.0  ;;  %v3746_v60 = vmul.f32 %v10833_v27, %v3676_v15  ;;  %4166 = vrot.lane.b32.xlu1 %v8450_v46, %s9612_s30 }
 0x280   : > { %v4735_v62 = vld [vmem:[#allocation2 + $0x159] sm:$0xff]  ;;  %v8430_v3 = vpack.c.bf16 %v3841_v24, %v3841_v24  ;;  %v3518_v50 = vadd.f32 %v8913_v42, %v3357_v0  ;;  %5500 = vrot.lane.b32.xlu0 %v8449_v25, %s9612_s30  ;;  %v8575_v42 = vpack.c.bf16 %v4914_v49, %v4914_v49 }
 0x281   : > { %v8556_v26 = vpack.c.bf16 %v4735_v62, %v4735_v62  ;;  %v5628_v52 = vld [vmem:[#allocation2 + $0x152] sm:$0xff]  ;;  %v5629_v43 = vld [vmem:[#allocation2 + $0x15a] sm:$0xff]  ;;  %4448 = vst.msk [vmem:[#allocation3 + $0x234] sm:$0xf] %vm533_vm2, %v11364_v28  ;;  %4449 = vst.msk [vmem:[#allocation3 + $0x248] sm:$0xf] %vm533_vm2, %v11366_v16  ;;  %v3778_v38 = vsel %vm3713_vm8, %v3676_v15, %v3746_v60  ;;  %v8448_v15 = vpack.c.bf16 %v4019_v37, %v4019_v37 }
 0x282   : > { %v8681_v55 = vpack.c.bf16 %v5628_v52, %v5628_v52  ;;  %4001 = vst.msk [vmem:[#allocation3 + $0x244] sm:$0xf] %vm533_vm2, %v8430_v3  ;;  %v3842_v53 = vld [vmem:[#allocation2 + $0x168] sm:$0xff]  ;;  %5341 = vst.msk [vmem:[#allocation3 + $0x200] sm:$0xf] %vm533_vm2, %v8430_v3  ;;  %v8682_v21 = vpack.c.bf16 %v5629_v43, %v5629_v43  ;;  %v3679_v33 = vadd.f32 %v11317_v2, %v3518_v50  ;;  %v4470_v50 = vld [vmem:[#allocation2 + $0xf0] sm:$0xff] }
 0x283   : > { %4895 = vst.msk [vmem:[#allocation3 + $0x224] sm:$0xf] %vm533_vm2, %v8556_v26  ;;  %v4736_v48 = vld [vmem:[#allocation2 + $0x169] sm:$0xff]  ;;  %v8431_v13 = vpack.c.bf16 %v3842_v53, %v3842_v53  ;;  %5502 = vrot.lane.b32.xlu1 %v8450_v46, %s9612_s30 }
 0x284   : > { %5788 = vst.msk [vmem:[#allocation3 + $0x1f0] sm:$0xf] %vm533_vm2, %v8681_v55  ;;  %v8557_v9 = vpack.c.bf16 %v4736_v48, %v4736_v48  ;;  %5789 = vst.msk [vmem:[#allocation3 + $0x204] sm:$0xf] %vm533_vm2, %v8682_v21  ;;  %vm3714_vm9 = vcmp.ge.f32.partialorder %v3679_v33, 0.0  ;;  %v3747_v18 = vmul.f32 %v10833_v27, %v3679_v33  ;;  %4604 = vrot.lane.b32.xlu0 %v8509_v19, %s9612_s30  ;;  %v4465_v27 = vld [vmem:[#allocation2 + $0xb0] sm:$0xff] }
 0x285   : > { %3810 = vst.msk [vmem:[#allocation2 + $0x181] sm:$0xff] %vm284_vm0, %v3778_v38  ;;  %v8510_v45 = vpack.c.bf16 %v4465_v27, %v4465_v27  ;;  %v8515_v21 = vpack.c.bf16 %v4470_v50, %v4470_v50  ;;  %v4471_v38 = vld [vmem:[#allocation2 + $0xf8] sm:$0xff]  ;;  %v4023_v27 = vld [vmem:[#allocation2 + $0xe1] sm:$0xff] }
 0x286   : > { %v4928_v2 = vld [vmem:[#allocation2 + $0x16a] sm:$0xff]  ;;  %4002 = vst.msk [vmem:[#allocation3 + $0x258] sm:$0xf] %vm533_vm2, %v8431_v13  ;;  %5342 = vst.msk [vmem:[#allocation3 + $0x214] sm:$0xf] %vm533_vm2, %v8431_v13  ;;  %v3779_v39 = vsel %vm3714_vm9, %v3679_v33, %v3747_v18  ;;  %v4929_v47 = vld [vmem:[#allocation2 + $0x172] sm:$0xff]  ;;  %v8516_v58 = vpack.c.bf16 %v4471_v38, %v4471_v38 }
 0x287   : > { %4896 = vst.msk [vmem:[#allocation3 + $0x238] sm:$0xf] %vm533_vm2, %v8557_v9  ;;  %v11388_v5 = vpack.c.bf16 %v4928_v2, %v4928_v2  ;;  %v3843_v11 = vld [vmem:[#allocation2 + $0x170] sm:$0xff]  ;;  %v11391_v56 = vpack.c.bf16 %v4929_v47, %v4929_v47  ;;  %5058 = vrot.lane.b32.xlu1 %v8576_v22, %s9612_s30  ;;  %v4468_v13 = vld [vmem:[#allocation2 + $0xd8] sm:$0xff] }
 0x288   : > { %v4737_v23 = vld [vmem:[#allocation2 + $0x171] sm:$0xff]  ;;  %3811 = vst.msk [vmem:[#allocation2 + $0x189] sm:$0xff] %vm284_vm0, %v3779_v39  ;;  %v8432_v17 = vpack.c.bf16 %v3843_v11, %v3843_v11  ;;  %4160 = vrot.lane.b32.xlu0 %v8447_v36, %s9612_s30  ;;  %v8513_v2 = vpack.c.bf16 %v4468_v13, %v4468_v13  ;;  %v4469_v39 = vld [vmem:[#allocation2 + $0xe0] sm:$0xff] }
 0x289   : > { %v8558_v7 = vpack.c.bf16 %v4737_v23, %v4737_v23  ;;  %v5630_v25 = vld [vmem:[#allocation2 + $0x16a] sm:$0xff]  ;;  %v5631_v51 = vld [vmem:[#allocation2 + $0x172] sm:$0xff]  ;;  %4450 = vst.msk [vmem:[#allocation3 + $0x25c] sm:$0xf] %vm533_vm2, %v11388_v5  ;;  %4451 = vst.msk [vmem:[#allocation3 + $0x270] sm:$0xf] %vm533_vm2, %v11391_v56  ;;  %v8514_v11 = vpack.c.bf16 %v4469_v39, %v4469_v39 }
 0x28a   : > { %v8683_v6 = vpack.c.bf16 %v5630_v25, %v5630_v25  ;;  %v8684_v31 = vpack.c.bf16 %v5631_v51, %v5631_v51  ;;  %4003 = vst.msk [vmem:[#allocation3 + $0x26c] sm:$0xf] %vm533_vm2, %v8432_v17  ;;  %5343 = vst.msk [vmem:[#allocation3 + $0x228] sm:$0xf] %vm533_vm2, %v8432_v17  ;;  %v4024_v33 = vld [vmem:[#allocation2 + $0xf1] sm:$0xff]  ;;  %v4022_v22 = vld [vmem:[#allocation2 + $0xd9] sm:$0xff]  ;;  %v11446_v51 = vpack.c.bf16 %v4023_v27, %v4023_v27 }
 0x28b   : > { %4897 = vst.msk [vmem:[#allocation3 + $0x24c] sm:$0xf] %vm533_vm2, %v8558_v7  ;;  %4606 = vrot.lane.b32.xlu1 %v8510_v45, %s9612_s30  ;;  %v11425_v32 = vpack.c.bf16 %v4024_v33, %v4024_v33  ;;  %v11439_v23 = vpack.c.bf16 %v4022_v22, %v4022_v22  ;;  %v4474_v17 = vld [vmem:[#allocation2 + $0x120] sm:$0xff]  ;;  %v4027_v33 = vld [vmem:[#allocation2 + $0x111] sm:$0xff] }
 0x28c   : > { %v5184_v20 = vld [vmem:[#allocation2 + $0x180] sm:$0xff]  ;;  %5790 = vst.msk [vmem:[#allocation3 + $0x218] sm:$0xf] %vm533_vm2, %v8683_v6  ;;  %5791 = vst.msk [vmem:[#allocation3 + $0x22c] sm:$0xf] %vm533_vm2, %v8684_v31  ;;  %5496 = vrot.lane.b32.xlu0 %v8447_v36, %s9612_s30  ;;  %v8519_v6 = vpack.c.bf16 %v4474_v17, %v4474_v17  ;;  %v4475_v31 = vld [vmem:[#allocation2 + $0x128] sm:$0xff]  ;;  %v11481_v13 = vpack.c.bf16 %v4027_v33, %v4027_v33 }
 0x28d   : > { %v8621_v57 = vpack.c.bf16 %v5184_v20, %v5184_v20  ;;  %v4738_v34 = vld [vmem:[#allocation2 + $0x181] sm:$0xff]  ;;  %v4585_v0 = vpop.permute.xlu0 %4584  ;;  %v8520_v49 = vpack.c.bf16 %v4475_v31, %v4475_v31  ;;  %v4476_v27 = vld [vmem:[#allocation2 + $0x138] sm:$0xff] }
 0x28e   : > { %v8559_v41 = vpack.c.bf16 %v4738_v34, %v4738_v34  ;;  %4678 = vst.msk [vmem:[#allocation3 + $0x2c] sm:$0xf] %vm790_vm3, %v4585_v0  ;;  %v4028_v45 = vld [vmem:[#allocation2 + $0x121] sm:$0xff]  ;;  %v4029_v0 = vld [vmem:[#allocation2 + $0x129] sm:$0xff] }
 0x28f   : > { %5344 = vst.msk [vmem:[#allocation3 + $0x23c] sm:$0xf] %vm533_vm2, %v8621_v57  ;;  %v5185_v46 = vld [vmem:[#allocation2 + $0x188] sm:$0xff]  ;;  %4162 = vrot.lane.b32.xlu1 %v8448_v15, %s9612_s30  ;;  %v11453_v57 = vpack.c.bf16 %v4028_v45, %v4028_v45  ;;  %v9442_v34 = vld [vmem:[#allocation3] ss:$20 sps:$4 sm:$0xff]  }
 0x290   : > { %4898 = vst.msk [vmem:[#allocation3 + $0x260] sm:$0xf] %vm533_vm2, %v8559_v41  ;;  %v4739_v10 = vld [vmem:[#allocation2 + $0x189] sm:$0xff]  ;;  %5056 = vrot.lane.b32.xlu0 %v8575_v42, %s9612_s30  ;;  %v8622_v24 = vpack.c.bf16 %v5185_v46, %v5185_v46  ;;  %v4477_v31 = vld [vmem:[#allocation2 + $0x140] sm:$0xff] }
 0x291   : > { %v8560_v62 = vpack.c.bf16 %v4739_v10, %v4739_v10  ;;  %v5632_v4 = vld [vmem:[#allocation2 + $0x182] sm:$0xff]  ;;  %v5633_v3 = vld [vmem:[#allocation2 + $0x18a] sm:$0xff]  ;;  %v4587_v43 = vpop.permute.xlu1 %4586  ;;  %v4141_v60 = vpop.permute.xlu0 %4140 }
 0x292   : > { %v8685_v26 = vpack.c.bf16 %v5632_v4, %v5632_v4  ;;  %v8686_v52 = vpack.c.bf16 %v5633_v3, %v5633_v3  ;;  %5345 = vst.msk [vmem:[#allocation3 + $0x250] sm:$0xf] %vm533_vm2, %v8622_v24  ;;  %v9472_v42 = vld [vmem:[%s12125_s3 + $0x110] sm:$0xff]   ;;  %v11463_v24 = vpack.c.bf16 %v4029_v0, %v4029_v0  ;;  %v9495_v45 = vld [vmem:[%s12125_s3 + $0x100] sm:$0xff]  }
 0x293   : > { %4899 = vst.msk [vmem:[#allocation3 + $0x274] sm:$0xf] %vm533_vm2, %v8560_v62  ;;  %5498 = vrot.lane.b32.xlu1 %v8448_v15, %s9612_s30  ;;  %v4472_v15 = vld [vmem:[#allocation2 + $0x108] sm:$0xff]  ;;  %v4473_v3 = vld [vmem:[#allocation2 + $0x110] sm:$0xff] }
 0x294   : > { %4679 = vst.msk [vmem:[#allocation3 + $0x40] sm:$0xf] %vm790_vm3, %v4587_v43  ;;  %4232 = vst.msk [vmem:[#allocation3 + $0x50] sm:$0xf] %vm790_vm3, %v4141_v60  ;;  %5052 = vrot.lane.b32.xlu0 %v11141_v44, %s9612_s30  ;;  %v4025_v44 = vld [vmem:[#allocation2 + $0xf9] sm:$0xff]  ;;  %v8517_v62 = vpack.c.bf16 %v4472_v15, %v4472_v15  ;;  %v9485_v43 = vld [vmem:[%s12125_s3 + $0x108] sm:$0xff]  }
 0x295   : > { %5792 = vst.msk [vmem:[#allocation3 + $0x240] sm:$0xf] %vm533_vm2, %v8685_v26  ;;  %5793 = vst.msk [vmem:[#allocation3 + $0x254] sm:$0xf] %vm533_vm2, %v8686_v52  ;;  %v4143_v55 = vpop.permute.xlu1 %4142  ;;  %v5477_v53 = vpop.permute.xlu0 %5476  ;;  %v11432_v18 = vpack.c.bf16 %v4025_v44, %v4025_v44  ;;  %v4026_v26 = vld [vmem:[#allocation2 + $0x109] sm:$0xff] }
 0x296   : > { %4233 = vst.msk [vmem:[#allocation3 + $0x64] sm:$0xf] %vm790_vm3, %v4143_v55  ;;  %5572 = vst.msk [vmem:[#allocation3 + $0xc] sm:$0xf] %vm790_vm3, %v5477_v53  ;;  %v8518_v55 = vpack.c.bf16 %v4473_v3, %v4473_v3  ;;  %v11474_v53 = vpack.c.bf16 %v4026_v26, %v4026_v26  ;;  %v4482_v3 = vld [vmem:[#allocation2 + $0x180] sm:$0xff] }
 0x297   : > { %5054 = vrot.lane.b32.xlu1 %v11144_v35, %s9612_s30 }
 0x298   : > { %4616 = vrot.lane.b32.xlu0 %v8515_v21, %s9612_s30 }
 0x299   : > { %v5479_v19 = vpop.permute.xlu1 %5478  ;;  %v4581_v48 = vpop.permute.xlu0 %4580 }
 0x29a   : > { %5573 = vst.msk [vmem:[#allocation3 + $0x20] sm:$0xf] %vm790_vm3, %v5479_v19  ;;  %4676 = vst.msk [vmem:[#allocation3 + $0x4] sm:$0xf] %vm790_vm3, %v4581_v48  ;;  %v4478_v19 = vld [vmem:[#allocation2 + $0x150] sm:$0xff] }
 0x29b   : > { %4618 = vrot.lane.b32.xlu1 %v8516_v58, %s9612_s30  ;;  %v9447_v4 = vld [vmem:[#allocation3 + $0x2c] ss:$20 sps:$4 sm:$0xff]  }
 0x29c   : > { %4172 = vrot.lane.b32.xlu0 %v11425_v32, %s9612_s30 }
 0x29d   : > { %v5035_v9 = vpop.permute.xlu1 %5034  ;;  %v4137_v35 = vpop.permute.xlu0 %4136 }
 0x29e   : > { %5127 = vst.msk [vmem:[#allocation3 + $0x44] sm:$0xf] %vm790_vm3, %v5035_v9  ;;  %4230 = vst.msk [vmem:[#allocation3 + $0x28] sm:$0xf] %vm790_vm3, %v4137_v35  ;;  %v8523_v9 = vpack.c.bf16 %v4478_v19, %v4478_v19  ;;  %v4479_v35 = vld [vmem:[#allocation2 + $0x158] sm:$0xff] }
 0x29f   : > { %4174 = vrot.lane.b32.xlu1 %v11432_v18, %s9612_s30 }
 0x2a0   : > { %4612 = vrot.lane.b32.xlu0 %v8513_v2, %s9612_s30  ;;  %v4032_v2 = vld [vmem:[#allocation2 + $0x151] sm:$0xff] }
 0x2a1   : > { %v4583_v36 = vpop.permute.xlu1 %4582  ;;  %v5033_v47 = vpop.permute.xlu0 %5032  ;;  %v9453_v38 = vld [vmem:[#allocation3 + $0xc] ss:$20 sps:$4 sm:$0xff]  }
 0x2a2   : > { %4677 = vst.msk [vmem:[#allocation3 + $0x18] sm:$0xf] %vm790_vm3, %v4583_v36  ;;  %5126 = vst.msk [vmem:[#allocation3 + $0x30] sm:$0xf] %vm790_vm3, %v5033_v47  ;;  %6828 = vmatprep.mubr.bf16.mxu0 %v9453_v38  ;;  %v8524_v36 = vpack.c.bf16 %v4479_v35, %v4479_v35  ;;  %v11488_v47 = vpack.c.bf16 %v4032_v2, %v4032_v2  ;;  %v4481_v35 = vld [vmem:[#allocation2 + $0x170] sm:$0xff] }
 0x2a3   : > { %4614 = vrot.lane.b32.xlu1 %v8514_v11, %s9612_s30  ;;  %v4033_v11 = vld [vmem:[#allocation2 + $0x159] sm:$0xff] }
 0x2a4   : > { %4168 = vrot.lane.b32.xlu0 %v11439_v23, %s9612_s30 }
 0x2a5   : > { %v4139_v7 = vpop.permute.xlu1 %4138 }
 0x2a6   : > { %v5029_v25 = vpop.permute.xlu0 %5028  ;;  %4231 = vst.msk [vmem:[#allocation3 + $0x3c] sm:$0xf] %vm790_vm3, %v4139_v7 }
 0x2a7   : > { %5124 = vst.msk [vmem:[#allocation3 + $0x8] sm:$0xf] %vm790_vm3, %v5029_v25  ;;  %4170 = vrot.lane.b32.xlu1 %v11446_v51, %s9612_s30  ;;  %v11495_v25 = vpack.c.bf16 %v4033_v11, %v4033_v11 }
 0x2a8   : > { %4624 = vrot.lane.b32.xlu0 %v8519_v6, %s9612_s30  ;;  %v8521_v6 = vpack.c.bf16 %v4476_v27, %v4476_v27  ;;  %v4034_v27 = vld [vmem:[#allocation2 + $0x169] sm:$0xff] }
 0x2a9   : > { %v5031_v37 = vpop.permute.xlu1 %5030  ;;  %v9444_v41 = vld [vmem:[#allocation3 + $0x4] ss:$20 sps:$4 sm:$0xff]  }
 0x2aa   : > { %v4593_v20 = vpop.permute.xlu0 %4592  ;;  %5125 = vst.msk [vmem:[#allocation3 + $0x1c] sm:$0xf] %vm790_vm3, %v5031_v37  ;;  %6667 = vmatprep.mubr.bf16.mxu1 %v9444_v41 }
 0x2ab   : > { %4682 = vst.msk [vmem:[#allocation3 + $0x7c] sm:$0xf] %vm790_vm3, %v4593_v20  ;;  %4626 = vrot.lane.b32.xlu1 %v8520_v49, %s9612_s30  ;;  %6668 = vmatmul.mubr.bf16.vlgmr.msra.gmra.mxu1 %v9442_v34  ;;  %v8522_v49 = vpack.c.bf16 %v4477_v31, %v4477_v31  ;;  %v4030_v34 = vld [vmem:[#allocation2 + $0x139] sm:$0xff]  ;;  %v11534_v31 = vpack.c.bf16 %v4034_v27, %v4034_v27 }
 0x2ac   : > { %4180 = vrot.lane.b32.xlu0 %v11453_v57, %s9612_s30  ;;  %9219 = vmatpush3.bf16.msra.mxu1 %v11246_v40  ;;  %v5802_v40 = vld [vmem:[#allocation3 + $0x28] sm:$0xff]  ;;  %v11510_v15 = vpack.c.bf16 %v4030_v34, %v4030_v34 }
 0x2ad   : > { %v4595_v46 = vpop.permute.xlu1 %4594  ;;  %v5805_v52 = vld [vmem:[#allocation3 + $0x3c] sm:$0xff]  ;;  %6675 = vmatprep.mubr.bf16.mxu1 %v9447_v4  ;;  %9220 = vmatprep.subr.bf16.mxu1 %v9472_v42  ;;  %v4031_v4 = vld [vmem:[#allocation2 + $0x141] sm:$0xff] }
 0x2ae   : > { %v4149_v10 = vpop.permute.xlu0 %4148  ;;  %4683 = vst.msk [vmem:[#allocation3 + $0x90] sm:$0xf] %vm790_vm3, %v4595_v46  ;;  %v7980_v48 = vcombine.low %v5802_v40, %v5805_v52  ;;  %v11518_v52 = vpack.c.bf16 %v4031_v4, %v4031_v4 }
 0x2af   : > { %4236 = vst.msk [vmem:[#allocation3 + $0xa0] sm:$0xf] %vm790_vm3, %v4149_v10  ;;  %4182 = vrot.lane.b32.xlu1 %v11463_v24, %s9612_s30 }
 0x2b0   : > { %4620 = vrot.lane.b32.xlu0 %v8517_v62, %s9612_s30  ;;  %9221 = vmatpush3.bf16.msra.mxu1 %v9472_v42 }
 0x2b1   : > { %v4151_v60 = vpop.permute.xlu1 %4150  ;;  %v9451_v21 = vld [vmem:[#allocation3 + $0x8] ss:$20 sps:$4 sm:$0xff]   ;;  %9222 = vmatprep.subr.bf16.mxu1 %v9485_v43 }
 0x2b2   : > { %v5485_v50 = vpop.permute.xlu0 %5484  ;;  %4237 = vst.msk [vmem:[#allocation3 + $0xb4] sm:$0xf] %vm790_vm3, %v4151_v60  ;;  %6829 = vmatmul.mubr.bf16.vlgmr.msra.gmra.mxu0 %v9451_v21 }
 0x2b3   : > { %5576 = vst.msk [vmem:[#allocation3 + $0x5c] sm:$0xf] %vm790_vm3, %v5485_v50  ;;  %4622 = vrot.lane.b32.xlu1 %v8518_v55, %s9612_s30  ;;  %6676 = vmatmul.mubr.bf16.gmra.mxu1 %v7980_v48  ;;  %v4483_v50 = vld [vmem:[#allocation2 + $0x188] sm:$0xff] }
 0x2b4   : > { %4176 = vrot.lane.b32.xlu0 %v11474_v53, %s9612_s30  ;;  %9223 = vmatpush3.bf16.msra.mxu1 %v9485_v43  ;;  %v8527_v43 = vpack.c.bf16 %v4482_v3, %v4482_v3  ;;  %v4480_v55 = vld [vmem:[#allocation2 + $0x168] sm:$0xff]  ;;  %v8528_v40 = vpack.c.bf16 %v4483_v50, %v4483_v50 }
 0x2b5   : > { %v5487_v58 = vpop.permute.xlu1 %5486  ;;  %9224 = vmatprep.subr.bf16.mxu1 %v9495_v45  ;;  %v9456_v60 = vld [vmem:[#allocation3 + $0x7c] ss:$20 sps:$4 sm:$0xff]   ;;  %v8525_v33 = vpack.c.bf16 %v4480_v55, %v4480_v55 }
 0x2b6   : > { %v4589_v44 = vpop.permute.xlu0 %4588  ;;  %5577 = vst.msk [vmem:[#allocation3 + $0x70] sm:$0xf] %vm790_vm3, %v5487_v58 }
 0x2b7   : > { %4680 = vst.msk [vmem:[#allocation3 + $0x54] sm:$0xf] %vm790_vm3, %v4589_v44  ;;  %4178 = vrot.lane.b32.xlu1 %v11481_v13, %s9612_s30 }
 0x2b8   : > { %4632 = vrot.lane.b32.xlu0 %v8523_v9, %s9612_s30  ;;  %9225 = vmatpush3.bf16.msra.mxu1 %v9495_v45 }
 0x2b9   : > { %v5043_v39 = vpop.permute.xlu1 %5042 }
 0x2ba   : > { %v4145_v22 = vpop.permute.xlu0 %4144  ;;  %5131 = vst.msk [vmem:[#allocation3 + $0x94] sm:$0xf] %vm790_vm3, %v5043_v39 }
 0x2bb   : > { %4234 = vst.msk [vmem:[#allocation3 + $0x78] sm:$0xf] %vm790_vm3, %v4145_v22  ;;  %4634 = vrot.lane.b32.xlu1 %v8524_v36, %s9612_s30  ;;  %v8526_v36 = vpack.c.bf16 %v4481_v35, %v4481_v35 }
 0x2bc   : > { %4188 = vrot.lane.b32.xlu0 %v11488_v47, %s9612_s30 }
 0x2bd   : > { %v4591_v17 = vpop.permute.xlu1 %4590  ;;  %v9460_v11 = vld [vmem:[#allocation3 + $0x5c] ss:$20 sps:$4 sm:$0xff]  }
 0x2be   : > { %v5481_v7 = vpop.permute.xlu0 %5480  ;;  %4681 = vst.msk [vmem:[#allocation3 + $0x68] sm:$0xf] %vm790_vm3, %v4591_v17  ;;  %v5808_v42 = vld [vmem:[#allocation3 + $0x50] sm:$0xff] }
 0x2bf   : > { %5574 = vst.msk [vmem:[#allocation3 + $0x34] sm:$0xf] %vm790_vm3, %v5481_v7  ;;  %4190 = vrot.lane.b32.xlu1 %v11495_v25, %s9612_s30 }
 0x2c0   : > { %4628 = vrot.lane.b32.xlu0 %v8521_v6, %s9612_s30 }
 0x2c1   : > { %v4147_v37 = vpop.permute.xlu1 %4146 }
 0x2c2   : > { %v5041_v20 = vpop.permute.xlu0 %5040  ;;  %4235 = vst.msk [vmem:[#allocation3 + $0x8c] sm:$0xf] %vm790_vm3, %v4147_v37  ;;  %v5814_v44 = vld [vmem:[#allocation3 + $0x78] sm:$0xff]  ;;  %v4035_v37 = vld [vmem:[#allocation2 + $0x171] sm:$0xff] }
 0x2c3   : > { %5130 = vst.msk [vmem:[#allocation3 + $0x80] sm:$0xf] %vm790_vm3, %v5041_v20  ;;  %4630 = vrot.lane.b32.xlu1 %v8522_v49, %s9612_s30  ;;  %v11542_v34 = vpack.c.bf16 %v4035_v37, %v4035_v37 }
 0x2c4   : > { %5504 = vrot.lane.b32.xlu0 %v11439_v23, %s9612_s30 }
 0x2c5   : > { %v5483_v41 = vpop.permute.xlu1 %5482  ;;  %v5811_v46 = vld [vmem:[#allocation3 + $0x64] sm:$0xff] }
 0x2c6   : > { %v5037_v0 = vpop.permute.xlu0 %5036  ;;  %v9454_v10 = vld [vmem:[#allocation3 + $0x54] ss:$20 sps:$4 sm:$0xff]   ;;  %5575 = vst.msk [vmem:[#allocation3 + $0x48] sm:$0xf] %vm790_vm3, %v5483_v41  ;;  %v7985_v62 = vcombine.low %v5808_v42, %v5811_v46 }
 0x2c7   : > { %5128 = vst.msk [vmem:[#allocation3 + $0x58] sm:$0xf] %vm790_vm3, %v5037_v0  ;;  %5506 = vrot.lane.b32.xlu1 %v11446_v51, %s9612_s30  ;;  %6683 = vmatprep.mubr.bf16.mxu1 %v9454_v10  ;;  %v5803_v19 = vld [vmem:[#allocation3 + $0x30] sm:$0xff] }
 0x2c8   : > { %4184 = vrot.lane.b32.xlu0 %v11510_v15, %s9612_s30  ;;  %6684 = vmatmul.mubr.bf16.gmra.mxu1 %v7985_v62 }
 0x2c9   : > { %v5039_v23 = vpop.permute.xlu1 %5038  ;;  %v5817_v51 = vld [vmem:[#allocation3 + $0x8c] sm:$0xff]  ;;  %6691 = vmatprep.mubr.bf16.mxu1 %v9456_v60 }
 0x2ca   : > { %v4601_v26 = vpop.permute.xlu0 %4600  ;;  %5129 = vst.msk [vmem:[#allocation3 + $0x6c] sm:$0xf] %vm790_vm3, %v5039_v23  ;;  %v7990_v2 = vcombine.low %v5814_v44, %v5817_v51  ;;  %v5377_v44 = vld [vmem:[#allocation2 + $0x189] sm:$0xff] }
 0x2cb   : > { %4686 = vst.msk [vmem:[#allocation3 + $0xcc] sm:$0xf] %vm790_vm3, %v4601_v26  ;;  %4186 = vrot.lane.b32.xlu1 %v11518_v52, %s9612_s30  ;;  %v8654_v35 = vpack.c.bf16 %v5377_v44, %v5377_v44 }
 0x2cc   : > { %4640 = vrot.lane.b32.xlu0 %v8527_v43, %s9612_s30 }
 0x2cd   : > { %v4603_v21 = vpop.permute.xlu1 %4602  ;;  %v5806_v48 = vld [vmem:[#allocation3 + $0x44] sm:$0xff] }
 0x2ce   : > { %v4157_v38 = vpop.permute.xlu0 %4156  ;;  %v9458_v58 = vld [vmem:[#allocation3 + $0x34] ss:$20 sps:$4 sm:$0xff]   ;;  %4687 = vst.msk [vmem:[#allocation3 + $0xe0] sm:$0xf] %vm790_vm3, %v4603_v21  ;;  %v7982_v9 = vcombine.low %v5803_v19, %v5806_v48  ;;  %v5809_v45 = vld [vmem:[#allocation3 + $0x58] sm:$0xff] }
 0x2cf   : > { %4240 = vst.msk [vmem:[#allocation3 + $0xf0] sm:$0xf] %vm790_vm3, %v4157_v38  ;;  %4642 = vrot.lane.b32.xlu1 %v8528_v40, %s9612_s30  ;;  %6836 = vmatprep.mubr.bf16.mxu0 %v9458_v58 }
 0x2d0   : > { %4636 = vrot.lane.b32.xlu0 %v8525_v33, %s9612_s30  ;;  %6837 = vmatmul.mubr.bf16.gmra.mxu0 %v7982_v9 }
 0x2d1   : > { %v4159_v39 = vpop.permute.xlu1 %4158  ;;  %6692 = vmatmul.mubr.bf16.gmra.mxu1 %v7990_v2  ;;  %v5812_v17 = vld [vmem:[#allocation3 + $0x6c] sm:$0xff]  ;;  %6844 = vmatprep.mubr.bf16.mxu0 %v9460_v11 }
 0x2d2   : > { %v5493_v22 = vpop.permute.xlu0 %5492  ;;  %4241 = vst.msk [vmem:[#allocation3 + $0x104] sm:$0xf] %vm790_vm3, %v4159_v39  ;;  %v7987_v20 = vcombine.low %v5809_v45, %v5812_v17  ;;  %v4930_v39 = vld [vmem:[#allocation2 + $0x182] sm:$0xff]  ;;  %v4931_v45 = vld [vmem:[#allocation2 + $0x18a] sm:$0xff] }
 0x2d3   : > { %5580 = vst.msk [vmem:[#allocation3 + $0xac] sm:$0xf] %vm790_vm3, %v5493_v22  ;;  %4638 = vrot.lane.b32.xlu1 %v8526_v36, %s9612_s30  ;;  %v5378_v36 = vld [vmem:[#allocation2 + $0x199] sm:$0xff]  ;;  %v8591_v17 = vpack.c.bf16 %v4930_v39, %v4930_v39 }
 0x2d4   : > { %5060 = vrot.lane.b32.xlu0 %v11205_v61, %s9612_s30  ;;  %v8655_v37 = vpack.c.bf16 %v5378_v36, %v5378_v36 }
 0x2d5   : > { %v5495_v7 = vpop.permute.xlu1 %5494 }
 0x2d6   : > { %v4597_v6 = vpop.permute.xlu0 %4596  ;;  %5581 = vst.msk [vmem:[#allocation3 + $0xc0] sm:$0xf] %vm790_vm3, %v5495_v7 }
 0x2d7   : > { %4684 = vst.msk [vmem:[#allocation3 + $0xa4] sm:$0xf] %vm790_vm3, %v4597_v6  ;;  %5062 = vrot.lane.b32.xlu1 %v11208_v8, %s9612_s30 }
 0x2d8   : > { %4192 = vrot.lane.b32.xlu0 %v11534_v31, %s9612_s30  ;;  %6845 = vmatmul.mubr.bf16.gmra.mxu0 %v7987_v20  ;;  %v5379_v20 = vld [vmem:[#allocation2 + $0x1a1] sm:$0xff] }
 0x2d9   : > { %v5051_v61 = vpop.permute.xlu1 %5050 }
 0x2da   : > { %v4153_v49 = vpop.permute.xlu0 %4152  ;;  %5135 = vst.msk [vmem:[#allocation3 + $0xe4] sm:$0xf] %vm790_vm3, %v5051_v61 }
 0x2db   : > { %4238 = vst.msk [vmem:[#allocation3 + $0xc8] sm:$0xf] %vm790_vm3, %v4153_v49  ;;  %4194 = vrot.lane.b32.xlu1 %v11542_v34, %s9612_s30 }
 0x2dc   : > { %5508 = vrot.lane.b32.xlu0 %v11425_v32, %s9612_s30 }
 0x2dd   : > { %v4599_v8 = vpop.permute.xlu1 %4598  ;;  %v9471_v51 = vld [vmem:[#allocation3 + $0xac] ss:$20 sps:$4 sm:$0xff]  }
 0x2de   : > { %v5489_v41 = vpop.permute.xlu0 %5488  ;;  %4685 = vst.msk [vmem:[#allocation3 + $0xb8] sm:$0xf] %vm790_vm3, %v4599_v8  ;;  %v5820_v10 = vld [vmem:[#allocation3 + $0xa0] sm:$0xff] }
 0x2df   : > { %5578 = vst.msk [vmem:[#allocation3 + $0x84] sm:$0xf] %vm790_vm3, %v5489_v41  ;;  %5510 = vrot.lane.b32.xlu1 %v11432_v18, %s9612_s30 }
 0x2e0   : > { %5064 = vrot.lane.b32.xlu0 %v11236_v12, %s9612_s30 }
 0x2e1   : > { %v4155_v0 = vpop.permute.xlu1 %4154 }
 0x2e2   : > { %v5049_v42 = vpop.permute.xlu0 %5048  ;;  %4239 = vst.msk [vmem:[#allocation3 + $0xdc] sm:$0xf] %vm790_vm3, %v4155_v0  ;;  %v5826_v60 = vld [vmem:[#allocation3 + $0xc8] sm:$0xff] }
 0x2e3   : > { %5134 = vst.msk [vmem:[#allocation3 + $0xd0] sm:$0xf] %vm790_vm3, %v5049_v42  ;;  %5066 = vrot.lane.b32.xlu1 %v11239_v14, %s9612_s30 }
 0x2e4   : > { %5512 = vrot.lane.b32.xlu0 %v11474_v53, %s9612_s30  ;;  %v9465_v53 = vld [vmem:[#allocation3 + $0xcc] ss:$20 sps:$4 sm:$0xff]  }
 0x2e5   : > { %v5491_v32 = vpop.permute.xlu1 %5490  ;;  %v5823_v62 = vld [vmem:[#allocation3 + $0xb4] sm:$0xff] }
 0x2e6   : > { %v5045_v46 = vpop.permute.xlu0 %5044  ;;  %v9463_v18 = vld [vmem:[#allocation3 + $0xa4] ss:$20 sps:$4 sm:$0xff]   ;;  %5579 = vst.msk [vmem:[#allocation3 + $0x98] sm:$0xf] %vm790_vm3, %v5491_v32  ;;  %v7995_v12 = vcombine.low %v5820_v10, %v5823_v62 }
 0x2e7   : > { %5132 = vst.msk [vmem:[#allocation3 + $0xa8] sm:$0xf] %vm790_vm3, %v5045_v46  ;;  %5514 = vrot.lane.b32.xlu1 %v11481_v13, %s9612_s30  ;;  %6699 = vmatprep.mubr.bf16.mxu1 %v9463_v18  ;;  %v5815_v13 = vld [vmem:[#allocation3 + $0x80] sm:$0xff] }
 0x2e8   : > { %5068 = vrot.lane.b32.xlu0 %v11273_v54, %s9612_s30  ;;  %6700 = vmatmul.mubr.bf16.gmra.mxu1 %v7995_v12 }
 0x2e9   : > { %v5047_v14 = vpop.permute.xlu1 %5046  ;;  %v5829_v3 = vld [vmem:[#allocation3 + $0xdc] sm:$0xff]  ;;  %6707 = vmatprep.mubr.bf16.mxu1 %v9465_v53 }
 0x2ea   : > { %v4609_v4 = vpop.permute.xlu0 %4608  ;;  %5133 = vst.msk [vmem:[#allocation3 + $0xbc] sm:$0xf] %vm790_vm3, %v5047_v14  ;;  %v9477_v7 = vld [vmem:[#allocation3 + $0xd0] ss:$20 sps:$4 sm:$0xff]  }
 0x2eb   : > { %4690 = vst.msk [vmem:[#allocation3 + $0x11c] sm:$0xf] %vm790_vm3, %v4609_v4  ;;  %5070 = vrot.lane.b32.xlu1 %v11276_v1, %s9612_s30  ;;  %v8000_v1 = vcombine.low %v5826_v60, %v5829_v3 }
 0x2ec   : > { %5516 = vrot.lane.b32.xlu0 %v11453_v57, %s9612_s30 }
 0x2ed   : > { %v4611_v23 = vpop.permute.xlu1 %4610  ;;  %v5818_v26 = vld [vmem:[#allocation3 + $0x94] sm:$0xff] }
 0x2ee   : > { %v4165_v54 = vpop.permute.xlu0 %4164  ;;  %v9467_v43 = vld [vmem:[#allocation3 + $0x84] ss:$20 sps:$4 sm:$0xff]   ;;  %4691 = vst.msk [vmem:[#allocation3 + $0x130] sm:$0xf] %vm790_vm3, %v4611_v23  ;;  %v7992_v50 = vcombine.low %v5815_v13, %v5818_v26 }
 0x2ef   : > { %4244 = vst.msk [vmem:[#allocation3 + $0x140] sm:$0xf] %vm790_vm3, %v4165_v54  ;;  %5518 = vrot.lane.b32.xlu1 %v11463_v24, %s9612_s30  ;;  %6852 = vmatprep.mubr.bf16.mxu0 %v9467_v43 }
 0x2f0   : > { %5072 = vrot.lane.b32.xlu0 %v11304_v30, %s9612_s30  ;;  %6853 = vmatmul.mubr.bf16.gmra.mxu0 %v7992_v50 }
 0x2f1   : > { %v4167_v57 = vpop.permute.xlu1 %4166  ;;  %6708 = vmatmul.mubr.bf16.gmra.mxu1 %v8000_v1  ;;  %6860 = vmatprep.mubr.bf16.mxu0 %v9471_v51  ;;  %v9469_v21 = vld [vmem:[#allocation3 + $0xa8] ss:$20 sps:$4 sm:$0xff]  }
 0x2f2   : > { %v5501_v55 = vpop.permute.xlu0 %5500  ;;  %4245 = vst.msk [vmem:[#allocation3 + $0x154] sm:$0xf] %vm790_vm3, %v4167_v57 }
 0x2f3   : > { %5584 = vst.msk [vmem:[#allocation3 + $0xfc] sm:$0xf] %vm790_vm3, %v5501_v55  ;;  %5074 = vrot.lane.b32.xlu1 %v11307_v63, %s9612_s30 }
 0x2f4   : > { %5520 = vrot.lane.b32.xlu0 %v11510_v15, %s9612_s30 }
 0x2f5   : > { %v5503_v24 = vpop.permute.xlu1 %5502  ;;  %v9475_v2 = vld [vmem:[#allocation3 + $0x11c] ss:$20 sps:$4 sm:$0xff]  }
 0x2f6   : > { %v4605_v30 = vpop.permute.xlu0 %4604  ;;  %5585 = vst.msk [vmem:[#allocation3 + $0x110] sm:$0xf] %vm790_vm3, %v5503_v24 }
 0x2f7   : > { %4688 = vst.msk [vmem:[#allocation3 + $0xf4] sm:$0xf] %vm790_vm3, %v4605_v30  ;;  %5522 = vrot.lane.b32.xlu1 %v11518_v52, %s9612_s30 }
 0x2f8   : > { %5076 = vrot.lane.b32.xlu0 %v11334_v29, %s9612_s30  ;;  %6861 = vmatmul.mubr.bf16.gmra.mxu0 %v9469_v21 }
 0x2f9   : > { %v5059_v38 = vpop.permute.xlu1 %5058 }
 0x2fa   : > { %v4161_v63 = vpop.permute.xlu0 %4160  ;;  %5139 = vst.msk [vmem:[#allocation3 + $0x134] sm:$0xf] %vm790_vm3, %v5059_v38 }
 0x2fb   : > { %4242 = vst.msk [vmem:[#allocation3 + $0x118] sm:$0xf] %vm790_vm3, %v4161_v63  ;;  %5078 = vrot.lane.b32.xlu1 %v11337_v59, %s9612_s30  ;;  %v5376_v59 = vld [vmem:[#allocation2 + $0x181] sm:$0xff] }
 0x2fc   : > { %5524 = vrot.lane.b32.xlu0 %v11488_v47, %s9612_s30 }
 0x2fd   : > { %v4607_v15 = vpop.permute.xlu1 %4606  ;;  %v9482_v8 = vld [vmem:[#allocation3 + $0xfc] ss:$20 sps:$4 sm:$0xff]  }
 0x2fe   : > { %v5497_v40 = vpop.permute.xlu0 %5496  ;;  %4689 = vst.msk [vmem:[#allocation3 + $0x108] sm:$0xf] %vm790_vm3, %v4607_v15  ;;  %v5832_v47 = vld [vmem:[#allocation3 + $0xf0] sm:$0xff] }
 0x2ff   : > { %5582 = vst.msk [vmem:[#allocation3 + $0xd4] sm:$0xf] %vm790_vm3, %v5497_v40  ;;  %5526 = vrot.lane.b32.xlu1 %v11495_v25, %s9612_s30  ;;  %v8653_v25 = vpack.c.bf16 %v5376_v59, %v5376_v59 }
 0x300   : > { %5080 = vrot.lane.b32.xlu0 %v11364_v28, %s9612_s30 }
 0x301   : > { %v4163_v29 = vpop.permute.xlu1 %4162 }
 0x302   : > { %v5057_v52 = vpop.permute.xlu0 %5056  ;;  %4243 = vst.msk [vmem:[#allocation3 + $0x12c] sm:$0xf] %vm790_vm3, %v4163_v29 }
 0x303   : > { %5138 = vst.msk [vmem:[#allocation3 + $0x120] sm:$0xf] %vm790_vm3, %v5057_v52  ;;  %5082 = vrot.lane.b32.xlu1 %v11366_v16, %s9612_s30 }
 0x304   : > { %5528 = vrot.lane.b32.xlu0 %v11534_v31, %s9612_s30  ;;  %v5838_v31 = vld [vmem:[#allocation3 + $0x118] sm:$0xff] }
 0x305   : > { %v5499_v33 = vpop.permute.xlu1 %5498  ;;  %v5835_v48 = vld [vmem:[#allocation3 + $0x104] sm:$0xff] }
 0x306   : > { %v5053_v19 = vpop.permute.xlu0 %5052  ;;  %v9473_v58 = vld [vmem:[#allocation3 + $0xf4] ss:$20 sps:$4 sm:$0xff]   ;;  %5583 = vst.msk [vmem:[#allocation3 + $0xe8] sm:$0xf] %vm790_vm3, %v5499_v33  ;;  %v8005_v28 = vcombine.low %v5832_v47, %v5835_v48 }
 0x307   : > { %5136 = vst.msk [vmem:[#allocation3 + $0xf8] sm:$0xf] %vm790_vm3, %v5053_v19  ;;  %5530 = vrot.lane.b32.xlu1 %v11542_v34, %s9612_s30  ;;  %6715 = vmatprep.mubr.bf16.mxu1 %v9473_v58  ;;  %v8592_v34 = vpack.c.bf16 %v4931_v45, %v4931_v45 }
 0x308   : > { %5532 = vrot.lane.b32.xlu0 %v8653_v25, %s9612_s30  ;;  %6716 = vmatmul.mubr.bf16.gmra.mxu1 %v8005_v28 }
 0x309   : > { %v5055_v16 = vpop.permute.xlu1 %5054  ;;  %v5841_v22 = vld [vmem:[#allocation3 + $0x12c] sm:$0xff]  ;;  %6723 = vmatprep.mubr.bf16.mxu1 %v9475_v2 }
 0x30a   : > { %v4617_v9 = vpop.permute.xlu0 %4616  ;;  %5137 = vst.msk [vmem:[#allocation3 + $0x10c] sm:$0xf] %vm790_vm3, %v5055_v16 }
 0x30b   : > { %4694 = vst.msk [vmem:[#allocation3 + $0x16c] sm:$0xf] %vm790_vm3, %v4617_v9  ;;  %5534 = vrot.lane.b32.xlu1 %v8654_v35, %s9612_s30  ;;  %v9496_v9 = vld [vmem:[#allocation3 + $0x120] ss:$20 sps:$4 sm:$0xff]  }
 0x30c   : > { %5084 = vrot.lane.b32.xlu0 %v11388_v5, %s9612_s30  ;;  %v8010_v5 = vcombine.low %v5838_v31, %v5841_v22 }
 0x30d   : > { %v4619_v11 = vpop.permute.xlu1 %4618  ;;  %v9479_v6 = vld [vmem:[#allocation3 + $0xd4] ss:$20 sps:$4 sm:$0xff]  }
 0x30e   : > { %v4173_v27 = vpop.permute.xlu0 %4172  ;;  %4695 = vst.msk [vmem:[#allocation3 + $0x180] sm:$0xf] %vm790_vm3, %v4619_v11  ;;  %6868 = vmatprep.mubr.bf16.mxu0 %v9479_v6 }
 0x30f   : > { %4248 = vst.msk [vmem:[#allocation3 + $0x190] sm:$0xf] %vm790_vm3, %v4173_v27  ;;  %5086 = vrot.lane.b32.xlu1 %v11391_v56, %s9612_s30  ;;  %6869 = vmatmul.mubr.bf16.gmra.mxu0 %v9477_v7  ;;  %v8656_v56 = vpack.c.bf16 %v5379_v20, %v5379_v20 }
 0x310   : > { %5088 = vrot.lane.b32.xlu0 %v8591_v17, %s9612_s30  ;;  %6724 = vmatmul.mubr.bf16.gmra.mxu1 %v8010_v5 }
 0x311   : > { %v4175_v61 = vpop.permute.xlu1 %4174  ;;  %6876 = vmatprep.mubr.bf16.mxu0 %v9482_v8  ;;  %v9480_v42 = vld [vmem:[#allocation3 + $0xf8] ss:$20 sps:$4 sm:$0xff]  }
 0x312   : > { %v4613_v49 = vpop.permute.xlu0 %4612  ;;  %4249 = vst.msk [vmem:[#allocation3 + $0x1a4] sm:$0xf] %vm790_vm3, %v4175_v61 }
 0x313   : > { %4692 = vst.msk [vmem:[#allocation3 + $0x144] sm:$0xf] %vm790_vm3, %v4613_v49  ;;  %5090 = vrot.lane.b32.xlu1 %v8592_v34, %s9612_s30  ;;  %v9508_v34 = vld [vmem:[#allocation3 + $0x10] ss:$20 sps:$4 sm:$0xff]  }
 0x314   : > { %5536 = vrot.lane.b32.xlu0 %v8655_v37, %s9612_s30 }
 0x315   : > { %v4615_v41 = vpop.permute.xlu1 %4614  ;;  %v9486_v13 = vld [vmem:[#allocation3 + $0x16c] ss:$20 sps:$4 sm:$0xff]  }
 0x316   : > { %v4169_v0 = vpop.permute.xlu0 %4168  ;;  %4693 = vst.msk [vmem:[#allocation3 + $0x158] sm:$0xf] %vm790_vm3, %v4615_v41 }
 0x317   : > { %4246 = vst.msk [vmem:[#allocation3 + $0x168] sm:$0xf] %vm790_vm3, %v4169_v0  ;;  %5538 = vrot.lane.b32.xlu1 %v8656_v56, %s9612_s30  ;;  %6877 = vmatmul.mubr.bf16.gmra.mxu0 %v9480_v42 }
 0x319   : > { %v4171_v32 = vpop.permute.xlu1 %4170 }
 0x31a   : > { %v4625_v46 = vpop.permute.xlu0 %4624  ;;  %4247 = vst.msk [vmem:[#allocation3 + $0x17c] sm:$0xf] %vm790_vm3, %v4171_v32  ;;  %v5844_v18 = vld [vmem:[#allocation3 + $0x140] sm:$0xff] }
 0x31b   : > { %4698 = vst.msk [vmem:[#allocation3 + $0x1bc] sm:$0xf] %vm790_vm3, %v4625_v46  ;;  %v9512_v46 = vld [vmem:[#allocation3 + $0x38] ss:$20 sps:$4 sm:$0xff]  }
 0x31d   : > { %v4627_v10 = vpop.permute.xlu1 %4626  ;;  %v5847_v12 = vld [vmem:[#allocation3 + $0x154] sm:$0xff] }
 0x31e   : > { %v4181_v62 = vpop.permute.xlu0 %4180  ;;  %v9483_v14 = vld [vmem:[#allocation3 + $0x144] ss:$20 sps:$4 sm:$0xff]   ;;  %4699 = vst.msk [vmem:[#allocation3 + $0x1d0] sm:$0xf] %vm790_vm3, %v4627_v10  ;;  %v8015_v4 = vcombine.low %v5844_v18, %v5847_v12  ;;  %v5850_v54 = vld [vmem:[#allocation3 + $0x168] sm:$0xff] }
 0x31f   : > { %4252 = vst.msk [vmem:[#allocation3 + $0x1e0] sm:$0xf] %vm790_vm3, %v4181_v62  ;;  %6731 = vmatprep.mubr.bf16.mxu1 %v9483_v14  ;;  %v9513_v10 = vld [vmem:[#allocation3 + $0x60] ss:$20 sps:$4 sm:$0xff]  }
 0x320   : > { %6732 = vmatmul.mubr.bf16.gmra.mxu1 %v8015_v4 }
 0x321   : > { %v4183_v53 = vpop.permute.xlu1 %4182  ;;  %v5853_v23 = vld [vmem:[#allocation3 + $0x17c] sm:$0xff]  ;;  %6739 = vmatprep.mubr.bf16.mxu1 %v9486_v13  ;;  %v9518_v13 = vld [vmem:[#allocation3 + $0xb0] ss:$20 sps:$4 sm:$0xff]  }
 0x322   : > { %v4621_v3 = vpop.permute.xlu0 %4620  ;;  %4253 = vst.msk [vmem:[#allocation3 + $0x1f4] sm:$0xf] %vm790_vm3, %v4183_v53  ;;  %v8020_v60 = vcombine.low %v5850_v54, %v5853_v23 }
 0x323   : > { %4696 = vst.msk [vmem:[#allocation3 + $0x194] sm:$0xf] %vm790_vm3, %v4621_v3  ;;  %v9517_v3 = vld [vmem:[#allocation3 + $0x88] ss:$20 sps:$4 sm:$0xff]  }
 0x325   : > { %v4623_v26 = vpop.permute.xlu1 %4622  ;;  %v9490_v15 = vld [vmem:[#allocation3 + $0x1bc] ss:$20 sps:$4 sm:$0xff]  }
 0x326   : > { %v4177_v43 = vpop.permute.xlu0 %4176  ;;  %4697 = vst.msk [vmem:[#allocation3 + $0x1a8] sm:$0xf] %vm790_vm3, %v4623_v26 }
 0x327   : > { %4250 = vst.msk [vmem:[#allocation3 + $0x1b8] sm:$0xf] %vm790_vm3, %v4177_v43 }
 0x328   : > { %6740 = vmatmul.mubr.bf16.gmra.mxu1 %v8020_v60 }
 0x329   : > { %v4179_v50 = vpop.permute.xlu1 %4178  ;;  %v9492_v58 = vld [vmem:[#allocation3 + $0x1e0] ss:$20 sps:$4 sm:$0xff]  }
 0x32a   : > { %v4633_v1 = vpop.permute.xlu0 %4632  ;;  %4251 = vst.msk [vmem:[#allocation3 + $0x1cc] sm:$0xf] %vm790_vm3, %v4179_v50  ;;  %v5856_v51 = vld [vmem:[#allocation3 + $0x190] sm:$0xff] }
 0x32b   : > { %4702 = vst.msk [vmem:[#allocation3 + $0x20c] sm:$0xf] %vm790_vm3, %v4633_v1 }
 0x32d   : > { %v4635_v57 = vpop.permute.xlu1 %4634  ;;  %v5859_v24 = vld [vmem:[#allocation3 + $0x1a4] sm:$0xff] }
 0x32e   : > { %v4189_v55 = vpop.permute.xlu0 %4188  ;;  %v9488_v30 = vld [vmem:[#allocation3 + $0x194] ss:$20 sps:$4 sm:$0xff]   ;;  %4703 = vst.msk [vmem:[#allocation3 + $0x220] sm:$0xf] %vm790_vm3, %v4635_v57  ;;  %v8025_v21 = vcombine.low %v5856_v51, %v5859_v24  ;;  %v5862_v29 = vld [vmem:[#allocation3 + $0x1b8] sm:$0xff] }
 0x32f   : > { %4256 = vst.msk [vmem:[#allocation3 + $0x230] sm:$0xf] %vm790_vm3, %v4189_v55  ;;  %6747 = vmatprep.mubr.bf16.mxu1 %v9488_v30  ;;  %v9522_v57 = vld [vmem:[#allocation3 + $0xd8] ss:$20 sps:$4 sm:$0xff]   ;;  %v9523_v51 = vld [vmem:[#allocation3 + $0x100] ss:$20 sps:$4 sm:$0xff]  }
 0x330   : > { %6748 = vmatmul.mubr.bf16.gmra.mxu1 %v8025_v21 }
 0x331   : > { %v4191_v38 = vpop.permute.xlu1 %4190  ;;  %v5865_v40 = vld [vmem:[#allocation3 + $0x1cc] sm:$0xff]  ;;  %6755 = vmatprep.mubr.bf16.mxu1 %v9490_v15 }
 0x332   : > { %v4629_v63 = vpop.permute.xlu0 %4628  ;;  %4257 = vst.msk [vmem:[#allocation3 + $0x244] sm:$0xf] %vm790_vm3, %v4191_v38  ;;  %v8030_v47 = vcombine.low %v5862_v29, %v5865_v40 }
 0x333   : > { %4700 = vst.msk [vmem:[#allocation3 + $0x1e4] sm:$0xf] %vm790_vm3, %v4629_v63 }
 0x335   : > { %v4631_v52 = vpop.permute.xlu1 %4630  ;;  %v9501_v36 = vld [vmem:[#allocation3 + $0x20c] ss:$20 sps:$4 sm:$0xff]  }
 0x336   : > { %v5505_v59 = vpop.permute.xlu0 %5504  ;;  %4701 = vst.msk [vmem:[#allocation3 + $0x1f8] sm:$0xf] %vm790_vm3, %v4631_v52 }
 0x337   : > { %5586 = vst.msk [vmem:[#allocation3 + $0x124] sm:$0xf] %vm790_vm3, %v5505_v59 }
 0x338   : > { %6756 = vmatmul.mubr.bf16.gmra.mxu1 %v8030_v47  ;;  %v11688_v47 = vld [vmem:[%s12126_s4] ss:$0 sm:$0xff] }
 0x339   : > { %v5507_v33 = vpop.permute.xlu1 %5506  ;;  %v9502_v6 = vld [vmem:[#allocation3 + $0x230] ss:$20 sps:$4 sm:$0xff]  }
 0x33a   : > { %v4185_v19 = vpop.permute.xlu0 %4184  ;;  %5587 = vst.msk [vmem:[#allocation3 + $0x138] sm:$0xf] %vm790_vm3, %v5507_v33 }
 0x33b   : > { %4254 = vst.msk [vmem:[#allocation3 + $0x208] sm:$0xf] %vm790_vm3, %v4185_v19 }
 0x33d   : > { %v4187_v25 = vpop.permute.xlu1 %4186  ;;  %v9494_v28 = vld [vmem:[#allocation3 + $0x1e4] ss:$20 sps:$4 sm:$0xff]  }
 0x33e   : > { %v4641_v48 = vpop.permute.xlu0 %4640  ;;  %4255 = vst.msk [vmem:[#allocation3 + $0x21c] sm:$0xf] %vm790_vm3, %v4187_v25  ;;  %6763 = vmatprep.mubr.bf16.mxu1 %v9494_v28  ;;  %v9527_v25 = vld [vmem:[#allocation3 + $0x128] ss:$20 sps:$4 sm:$0xff]  }
 0x33f   : > { %4706 = vst.msk [vmem:[#allocation3 + $0x25c] sm:$0xf] %vm790_vm3, %v4641_v48 }
 0x340   : > { %6764 = vmatmul.mubr.bf16.gmra.mxu1 %v9492_v58  ;;  %v9528_v58 = vld [vmem:[#allocation3 + $0x150] ss:$20 sps:$4 sm:$0xff]  }
 0x341   : > { %v4643_v44 = vpop.permute.xlu1 %4642  ;;  %v9498_v35 = vld [vmem:[#allocation3 + $0x124] ss:$20 sps:$4 sm:$0xff]   ;;  %6771 = vmatprep.mubr.bf16.mxu1 %v9501_v36 }
 0x342   : > { %v4637_v16 = vpop.permute.xlu0 %4636  ;;  %4707 = vst.msk [vmem:[#allocation3 + $0x270] sm:$0xf] %vm790_vm3, %v4643_v44  ;;  %6884 = vmatprep.mubr.bf16.mxu0 %v9498_v35 }
 0x343   : > { %4704 = vst.msk [vmem:[#allocation3 + $0x234] sm:$0xf] %vm790_vm3, %v4637_v16  ;;  %6885 = vmatmul.mubr.bf16.gmra.mxu0 %v9496_v9 }
 0x345   : > { %v4639_v2 = vpop.permute.xlu1 %4638  ;;  %v9499_v22 = vld [vmem:[#allocation3 + $0x208] ss:$20 sps:$4 sm:$0xff]  }
 0x346   : > { %v5061_v39 = vpop.permute.xlu0 %5060  ;;  %4705 = vst.msk [vmem:[#allocation3 + $0x248] sm:$0xf] %vm790_vm3, %v4639_v2 }
 0x347   : > { %5140 = vst.msk [vmem:[#allocation3 + $0x148] sm:$0xf] %vm790_vm3, %v5061_v39 }
 0x348   : > { %6772 = vmatmul.mubr.bf16.gmra.mxu1 %v9499_v22 }
 0x349   : > { %v5063_v11 = vpop.permute.xlu1 %5062  ;;  %v9507_v49 = vld [vmem:[#allocation3 + $0x25c] ss:$20 sps:$4 sm:$0xff]  }
 0x34a   : > { %v4193_v27 = vpop.permute.xlu0 %4192  ;;  %5141 = vst.msk [vmem:[#allocation3 + $0x15c] sm:$0xf] %vm790_vm3, %v5063_v11 }
 0x34b   : > { %4258 = vst.msk [vmem:[#allocation3 + $0x258] sm:$0xf] %vm790_vm3, %v4193_v27 }
 0x34d   : > { %v4195_v17 = vpop.permute.xlu1 %4194  ;;  %v9504_v31 = vld [vmem:[#allocation3 + $0x234] ss:$20 sps:$4 sm:$0xff]  }
 0x34e   : > { %v5509_v7 = vpop.permute.xlu0 %5508  ;;  %4259 = vst.msk [vmem:[#allocation3 + $0x26c] sm:$0xf] %vm790_vm3, %v4195_v17  ;;  %6779 = vmatprep.mubr.bf16.mxu1 %v9504_v31 }
 0x34f   : > { %5588 = vst.msk [vmem:[#allocation3 + $0x14c] sm:$0xf] %vm790_vm3, %v5509_v7 }
 0x350   : > { %6780 = vmatmul.mubr.bf16.gmra.mxu1 %v9502_v6 }
 0x351   : > { %v5511_v45 = vpop.permute.xlu1 %5510  ;;  %6787 = vmatprep.mubr.bf16.mxu1 %v9507_v49  ;;  %v9509_v41 = vld [vmem:[#allocation3 + $0x148] ss:$20 sps:$4 sm:$0xff]  }
 0x352   : > { %v5065_v5 = vpop.permute.xlu0 %5064  ;;  %5589 = vst.msk [vmem:[#allocation3 + $0x160] sm:$0xf] %vm790_vm3, %v5511_v45 }
 0x353   : > { %5142 = vst.msk [vmem:[#allocation3 + $0x170] sm:$0xf] %vm790_vm3, %v5065_v5 }
 0x355   : > { %v5067_v37 = vpop.permute.xlu1 %5066  ;;  %v9505_v61 = vld [vmem:[#allocation3 + $0x258] ss:$20 sps:$4 sm:$0xff]  }
 0x356   : > { %v5513_v20 = vpop.permute.xlu0 %5512  ;;  %5143 = vst.msk [vmem:[#allocation3 + $0x184] sm:$0xf] %vm790_vm3, %v5067_v37 }
 0x357   : > { %5590 = vst.msk [vmem:[#allocation3 + $0x174] sm:$0xf] %vm790_vm3, %v5513_v20  ;;  %v9532_v20 = vld [vmem:[#allocation3 + $0x178] ss:$20 sps:$4 sm:$0xff]  }
 0x358   : > { %6788 = vmatmul.mubr.bf16.gmra.mxu1 %v9505_v61  ;;  %v9533_v61 = vld [vmem:[#allocation3 + $0x1a0] ss:$20 sps:$4 sm:$0xff]  }
 0x359   : > { %v5515_v8 = vpop.permute.xlu1 %5514  ;;  %9226 = vmatprep.mubr.msk.bf16.mxu1 %vm284_vm0, %v9508_v34  ;;  %v9511_v0 = vld [vmem:[#allocation3 + $0x14c] ss:$20 sps:$4 sm:$0xff]  }
 0x35a   : > { %v5069_v56 = vpop.permute.xlu0 %5068  ;;  %5591 = vst.msk [vmem:[#allocation3 + $0x188] sm:$0xf] %vm790_vm3, %v5515_v8  ;;  %6892 = vmatprep.mubr.bf16.mxu0 %v9511_v0 }
 0x35b   : > { %5144 = vst.msk [vmem:[#allocation3 + $0x198] sm:$0xf] %vm790_vm3, %v5069_v56  ;;  %6893 = vmatmul.mubr.bf16.gmra.mxu0 %v9509_v41 }
 0x35d   : > { %v5071_v42 = vpop.permute.xlu1 %5070  ;;  %v9514_v12 = vld [vmem:[#allocation3 + $0x170] ss:$20 sps:$4 sm:$0xff]  }
 0x35e   : > { %v5517_v32 = vpop.permute.xlu0 %5516  ;;  %5145 = vst.msk [vmem:[#allocation3 + $0x1ac] sm:$0xf] %vm790_vm3, %v5071_v42 }
 0x35f   : > { %5592 = vst.msk [vmem:[#allocation3 + $0x19c] sm:$0xf] %vm790_vm3, %v5517_v32  ;;  %v9537_v32 = vld [vmem:[#allocation3 + $0x1c8] ss:$20 sps:$4 sm:$0xff]  }
 0x360   : > { %9227 = vmatmul.mubr.msk.bf16.vlgmr.msra.gmra.mxu1 %vm284_vm0, %v9512_v46  ;;  %v9538_v46 = vld [vmem:[#allocation3 + $0x1f0] ss:$20 sps:$4 sm:$0xff]  }
 0x361   : > { %v5519_v62 = vpop.permute.xlu1 %5518  ;;  %9230 = vmatprep.mubr.msk.bf16.mxu1 %vm284_vm0, %v9513_v10  ;;  %v9516_v14 = vld [vmem:[#allocation3 + $0x174] ss:$20 sps:$4 sm:$0xff]  }
 0x362   : > { %v5073_v18 = vpop.permute.xlu0 %5072  ;;  %5593 = vst.msk [vmem:[#allocation3 + $0x1b0] sm:$0xf] %vm790_vm3, %v5519_v62  ;;  %6900 = vmatprep.mubr.bf16.mxu0 %v9516_v14 }
 0x363   : > { %5146 = vst.msk [vmem:[#allocation3 + $0x1c0] sm:$0xf] %vm790_vm3, %v5073_v18  ;;  %6901 = vmatmul.mubr.bf16.gmra.mxu0 %v9514_v12 }
 0x365   : > { %v5075_v4 = vpop.permute.xlu1 %5074  ;;  %v9519_v26 = vld [vmem:[#allocation3 + $0x198] ss:$20 sps:$4 sm:$0xff]  }
 0x366   : > { %v5521_v53 = vpop.permute.xlu0 %5520  ;;  %5147 = vst.msk [vmem:[#allocation3 + $0x1d4] sm:$0xf] %vm790_vm3, %v5075_v4 }
 0x367   : > { %5594 = vst.msk [vmem:[#allocation3 + $0x1c4] sm:$0xf] %vm790_vm3, %v5521_v53 }
 0x368   : > { %9231 = vmatmul.mubr.msk.bf16.gmra.mxu1 %vm284_vm0, %v9517_v3  ;;  %v9542_v3 = vld [vmem:[#allocation3 + $0x218] ss:$20 sps:$4 sm:$0xff]  }
 0x369   : > { %v5523_v23 = vpop.permute.xlu1 %5522  ;;  %9234 = vmatprep.mubr.msk.bf16.mxu1 %vm284_vm0, %v9518_v13  ;;  %v9521_v43 = vld [vmem:[#allocation3 + $0x19c] ss:$20 sps:$4 sm:$0xff]  }
 0x36a   : > { %v5077_v54 = vpop.permute.xlu0 %5076  ;;  %5595 = vst.msk [vmem:[#allocation3 + $0x1d8] sm:$0xf] %vm790_vm3, %v5523_v23  ;;  %6908 = vmatprep.mubr.bf16.mxu0 %v9521_v43  ;;  %v9543_v23 = vld [vmem:[#allocation3 + $0x240] ss:$20 sps:$4 sm:$0xff]  }
 0x36b   : > { %5148 = vst.msk [vmem:[#allocation3 + $0x1e8] sm:$0xf] %vm790_vm3, %v5077_v54  ;;  %6909 = vmatmul.mubr.bf16.gmra.mxu0 %v9519_v26  ;;  %v8950_v50 = vpop.f32.mrf.mxu1 }
 0x36d   : > { %v5079_v60 = vpop.permute.xlu1 %5078  ;;  %v8951_v55 = vpop.f32.mrf.mxu1  ;;  %v9524_v38 = vld [vmem:[#allocation3 + $0x1c0] ss:$20 sps:$4 sm:$0xff]  }
 0x36e   : > { %5149 = vst.msk [vmem:[#allocation3 + $0x1fc] sm:$0xf] %vm790_vm3, %v5079_v60  ;;  %v5525_v1 = vpop.permute.xlu0 %5524  ;;  %v8952_v24 = vadd.f32 %v8951_v55, %v8950_v50 }
 0x36f   : > { %5596 = vst.msk [vmem:[#allocation3 + $0x1ec] sm:$0xf] %vm790_vm3, %v5525_v1  ;;  %v8953_v21 = vpop.f32.mrf.mxu1 }
 0x370   : > { %9235 = vmatmul.mubr.msk.bf16.gmra.mxu1 %vm284_vm0, %v9522_v57  ;;  %v6670_v16 = vadd.f32 %v8952_v24, %v11688_v47  ;;  %v9547_v57 = vld [vmem:[#allocation3 + $0x268] ss:$20 sps:$4 sm:$0xff]  }
 0x371   : > { %v5527_v30 = vpop.permute.xlu1 %5526  ;;  %9238 = vmatprep.mubr.msk.bf16.mxu1 %vm284_vm0, %v9523_v51  ;;  %v9526_v63 = vld [vmem:[#allocation3 + $0x1c4] ss:$20 sps:$4 sm:$0xff]   ;;  %v8954_v40 = vpop.f32.mrf.mxu1 }
 0x372   : > { %5597 = vst.msk [vmem:[#allocation3 + $0x200] sm:$0xf] %vm790_vm3, %v5527_v30  ;;  %v5081_v15 = vpop.permute.xlu0 %5080  ;;  %6916 = vmatprep.mubr.bf16.mxu0 %v9526_v63  ;;  %v8955_v29 = vadd.f32 %v8954_v40, %v8953_v21  ;;  %v9062_v33 = vpop.f32.mrf.mxu0 }
 0x373   : > { %5150 = vst.msk [vmem:[#allocation3 + $0x210] sm:$0xf] %vm790_vm3, %v5081_v15  ;;  %6917 = vmatmul.mubr.bf16.gmra.mxu0 %v9524_v38  ;;  %v8956_v59 = vpop.f32.mrf.mxu1 }
 0x374   : > { %v9063_v44 = vpop.f32.mrf.mxu0  ;;  %v6673_v31 = vadd.f32 %v8955_v29, %v11688_v47 }
 0x375   : > { %v5083_v52 = vpop.permute.xlu1 %5082  ;;  %v8957_v48 = vpop.f32.mrf.mxu1  ;;  %v9064_v9 = vadd.f32 %v9063_v44, %v9062_v33  ;;  %v9529_v39 = vld [vmem:[#allocation3 + $0x1e8] ss:$20 sps:$4 sm:$0xff]  }
 0x376   : > { %5151 = vst.msk [vmem:[#allocation3 + $0x224] sm:$0xf] %vm790_vm3, %v5083_v52  ;;  %v5529_v19 = vpop.permute.xlu0 %5528  ;;  %v11692_v28 = vadd.f32 %v8957_v48, %v8956_v59  ;;  %v9065_v36 = vpop.f32.mrf.mxu0 }
 0x377   : > { %5598 = vst.msk [vmem:[#allocation3 + $0x214] sm:$0xf] %vm790_vm3, %v5529_v19  ;;  %v8959_v2 = vpop.f32.mrf.mxu1  ;;  %v11699_v17 = vadd.f32 %v9064_v9, %v6670_v16 }
 0x378   : > { %9239 = vmatmul.mubr.msk.bf16.gmra.mxu1 %vm284_vm0, %v9527_v25  ;;  %v9066_v6 = vpop.f32.mrf.mxu0 }
 0x379   : > { %v5531_v35 = vpop.permute.xlu1 %5530  ;;  %9242 = vmatprep.mubr.msk.bf16.mxu1 %vm284_vm0, %v9528_v58  ;;  %v9531_v22 = vld [vmem:[#allocation3 + $0x1ec] ss:$20 sps:$4 sm:$0xff]   ;;  %v8960_v27 = vpop.f32.mrf.mxu1  ;;  %v9067_v45 = vadd.f32 %v9066_v6, %v9065_v36 }
 0x37a   : > { %5599 = vst.msk [vmem:[#allocation3 + $0x228] sm:$0xf] %vm790_vm3, %v5531_v35  ;;  %v5533_v11 = vpop.permute.xlu0 %5532  ;;  %6924 = vmatprep.mubr.bf16.mxu0 %v9531_v22  ;;  %v11701_v7 = vadd.f32 %v8960_v27, %v8959_v2 }
 0x37b   : > { %5600 = vst.msk [vmem:[#allocation3 + $0x23c] sm:$0xf] %vm790_vm3, %v5533_v11  ;;  %6925 = vmatmul.mubr.bf16.gmra.mxu0 %v9529_v39  ;;  %v11706_v49 = vadd.f32 %v9067_v45, %v6673_v31 }
 0x37d   : > { %v5535_v5 = vpop.permute.xlu1 %5534  ;;  %v9534_v8 = vld [vmem:[#allocation3 + $0x210] ss:$20 sps:$4 sm:$0xff]  }
 0x37e   : > { %5601 = vst.msk [vmem:[#allocation3 + $0x250] sm:$0xf] %vm790_vm3, %v5535_v5  ;;  %v5085_v37 = vpop.permute.xlu0 %5084 }
 0x37f   : > { %5152 = vst.msk [vmem:[#allocation3 + $0x238] sm:$0xf] %vm790_vm3, %v5085_v37 }
 0x380   : > { %9243 = vmatmul.mubr.msk.bf16.gmra.mxu1 %vm284_vm0, %v9532_v20 }
 0x381   : > { %v5087_v34 = vpop.permute.xlu1 %5086  ;;  %9246 = vmatprep.mubr.msk.bf16.mxu1 %vm284_vm0, %v9533_v61  ;;  %v9536_v56 = vld [vmem:[#allocation3 + $0x214] ss:$20 sps:$4 sm:$0xff]  }
 0x382   : > { %5153 = vst.msk [vmem:[#allocation3 + $0x24c] sm:$0xf] %vm790_vm3, %v5087_v34  ;;  %v5089_v41 = vpop.permute.xlu0 %5088  ;;  %6932 = vmatprep.mubr.bf16.mxu0 %v9536_v56 }
 0x383   : > { %5154 = vst.msk [vmem:[#allocation3 + $0x260] sm:$0xf] %vm790_vm3, %v5089_v41  ;;  %6933 = vmatmul.mubr.bf16.gmra.mxu0 %v9534_v8 }
 0x385   : > { %v5091_v0 = vpop.permute.xlu1 %5090  ;;  %v9541_v12 = vld [vmem:[#allocation3 + $0x23c] ss:$20 sps:$4 sm:$0xff]  }
 0x386   : > { %5155 = vst.msk [vmem:[#allocation3 + $0x274] sm:$0xf] %vm790_vm3, %v5091_v0  ;;  %v5537_v42 = vpop.permute.xlu0 %5536  ;;  %6940 = vmatprep.mubr.bf16.mxu0 %v9541_v12 }
 0x387   : > { %5602 = vst.msk [vmem:[#allocation3 + $0x264] sm:$0xf] %vm790_vm3, %v5537_v42 }
 0x388   : > { %9247 = vmatmul.mubr.msk.bf16.gmra.mxu1 %vm284_vm0, %v9537_v32  ;;  %v8962_v62 = vpop.f32.mrf.mxu1 }
 0x389   : > { %v5539_v10 = vpop.permute.xlu1 %5538  ;;  %9250 = vmatprep.mubr.msk.bf16.mxu1 %vm284_vm0, %v9538_v46  ;;  %v9539_v18 = vld [vmem:[#allocation3 + $0x238] ss:$20 sps:$4 sm:$0xff]  }
 0x38a   : > { %5603 = vst.msk [vmem:[#allocation3 + $0x278] sm:$0xf] %vm790_vm3, %v5539_v10  ;;  %v8963_v14 = vpop.f32.mrf.mxu1 }
 0x38b   : > { %v11717_v4 = vadd.f32 %v8963_v14, %v8962_v62  ;;  %6941 = vmatmul.mubr.bf16.gmra.mxu0 %v9539_v18 }
 0x38c   : > { %v8965_v53 = vpop.f32.mrf.mxu1 }
 0x38d   : > { %v9544_v43 = vld [vmem:[#allocation3 + $0x260] ss:$20 sps:$4 sm:$0xff]  }
 0x38e   : > { %v8966_v13 = vpop.f32.mrf.mxu1 }
 0x38f   : > { %v11719_v54 = vadd.f32 %v8966_v13, %v8965_v53 }
 0x390   : > { %9251 = vmatmul.mubr.msk.bf16.gmra.mxu1 %vm284_vm0, %v9542_v3  ;;  %v11732_v59 = vpop.f32.mrf.mxu0 }
 0x391   : > { %v8968_v26 = vpop.f32.mrf.mxu1  ;;  %9254 = vmatprep.mubr.msk.bf16.mxu1 %vm284_vm0, %v9543_v23  ;;  %v9546_v60 = vld [vmem:[#allocation3 + $0x264] ss:$20 sps:$4 sm:$0xff]  }
 0x392   : > { %6948 = vmatprep.mubr.bf16.mxu0 %v9546_v60  ;;  %v11736_v48 = vpop.f32.mrf.mxu0 }
 0x393   : > { %v8969_v50 = vpop.f32.mrf.mxu1  ;;  %6949 = vmatmul.mubr.bf16.gmra.mxu0 %v9544_v43 }
 0x394   : > { %v11723_v1 = vadd.f32 %v8969_v50, %v8968_v26  ;;  %v11740_v44 = vpop.f32.mrf.mxu0 }
 0x395   : > { %v8971_v55 = vpop.f32.mrf.mxu1 }
 0x396   : > { %v11742_v16 = vpop.f32.mrf.mxu0 }
 0x397   : > { %v8972_v51 = vpop.f32.mrf.mxu1 }
 0x398   : > { %v11725_v24 = vadd.f32 %v8972_v51, %v8971_v55  ;;  %9255 = vmatmul.mubr.msk.bf16.gmra.mxu1 %vm284_vm0, %v9547_v57  ;;  %v11744_v9 = vpop.f32.mrf.mxu0 }
 0x39a   : > { %v11746_v35 = vpop.f32.mrf.mxu0 }
 0x39c   : > { %v11748_v22 = vpop.f32.mrf.mxu0 }
 0x39e   : > { %v11752_v6 = vpop.f32.mrf.mxu0 }
 0x3a8   : > { %v8974_v30 = vpop.f32.mrf.mxu1 }
 0x3aa   : > { %v8975_v21 = vpop.f32.mrf.mxu1 }
 0x3ab   : > { %v11728_v38 = vadd.f32 %v8975_v21, %v8974_v30 }
 0x3ac   : > { %v8977_v63 = vpop.f32.mrf.mxu1 }
 0x3ae   : > { %v8978_v15 = vpop.f32.mrf.mxu1 }
 0x3af   : > { %v11730_v40 = vadd.f32 %v8978_v15, %v8977_v63 }
 0x3b0   : > { %v11756_v5 = vpop.f32.mrf.mxu0 }
 0x3b1   : > { %v8980_v29 = vpop.f32.mrf.mxu1 }
 0x3b2   : > { %v11760_v34 = vpop.f32.mrf.mxu0 }
 0x3b3   : > { %v8981_v52 = vpop.f32.mrf.mxu1 }
 0x3b4   : > { %v11734_v33 = vadd.f32 %v8981_v52, %v8980_v29  ;;  %v11764_v41 = vpop.f32.mrf.mxu0 }
 0x3b5   : > { %v8983_v19 = vpop.f32.mrf.mxu1 }
 0x3b6   : > { %v11766_v0 = vpop.f32.mrf.mxu0 }
 0x3b7   : > { %v8984_v25 = vpop.f32.mrf.mxu1 }
 0x3b8   : > { %v11738_v58 = vadd.f32 %v8984_v25, %v8983_v19  ;;  %v11768_v32 = vpop.f32.mrf.mxu0 }
 0x3ba   : > { %v11772_v18 = vpop.f32.mrf.mxu0 }
 0x3bc   : > { %v11776_v3 = vpop.f32.mrf.mxu0 }
 0x3be   : > { %v11780_v43 = vpop.f32.mrf.mxu0 }
 0x3c8   : > { %v8986_v2 = vpop.f32.mrf.mxu1 }
 0x3ca   : > { %v8987_v39 = vpop.f32.mrf.mxu1 }
 0x3cb   : > { %v11750_v36 = vadd.f32 %v8987_v39, %v8986_v2 }
 0x3cc   : > { %v8989_v11 = vpop.f32.mrf.mxu1 }
 0x3ce   : > { %v8990_v27 = vpop.f32.mrf.mxu1 }
 0x3cf   : > { %v11754_v31 = vadd.f32 %v8990_v27, %v8989_v11  ;;  %v11784_v57 = vpop.f32.mrf.mxu0 }
 0x3d0   : > { %v8992_v45 = vpop.f32.mrf.mxu1 }
 0x3d1   : > { %v11788_v21 = vpop.f32.mrf.mxu0 }
 0x3d2   : > { %v8993_v37 = vpop.f32.mrf.mxu1 }
 0x3d3   : > { %v11758_v20 = vadd.f32 %v8993_v37, %v8992_v45  ;;  %v11792_v52 = vpop.f32.mrf.mxu0 }
 0x3d4   : > { %v8995_v61 = vpop.f32.mrf.mxu1 }
 0x3d5   : > { %v11796_v39 = vpop.f32.mrf.mxu0 }
 0x3d6   : > { %v8996_v8 = vpop.f32.mrf.mxu1 }
 0x3d7   : > { %v11762_v56 = vadd.f32 %v8996_v8, %v8995_v61  ;;  %v11800_v37 = vpop.f32.mrf.mxu0 }
 0x3e0   : > { %v8998_v42 = vpop.f32.mrf.mxu1 }
 0x3e2   : > { %v8999_v46 = vpop.f32.mrf.mxu1 }
 0x3e3   : > { %v11770_v10 = vadd.f32 %v8999_v46, %v8998_v42  ;;  %v11804_v46 = vpop.f32.mrf.mxu0 }
 0x3e4   : > { %v9001_v62 = vpop.f32.mrf.mxu1 }
 0x3e6   : > { %v9002_v12 = vpop.f32.mrf.mxu1 }
 0x3e7   : > { %v11774_v14 = vadd.f32 %v9002_v12, %v9001_v62 }
 0x3e8   : > { %v9004_v53 = vpop.f32.mrf.mxu1 }
 0x3ea   : > { %v9005_v13 = vpop.f32.mrf.mxu1 }
 0x3eb   : > { %v11778_v23 = vadd.f32 %v9005_v13, %v9004_v53  ;;  %v11808_v13 = vpop.f32.mrf.mxu0 }
 0x3ec   : > { %v9007_v26 = vpop.f32.mrf.mxu1 }
 0x3ee   : > { %v9008_v60 = vpop.f32.mrf.mxu1 }
 0x3ef   : > { %v11782_v50 = vadd.f32 %v9008_v60, %v9007_v26 }
 0x3f0   : > { %v9010_v55 = vpop.f32.mrf.mxu1 }
 0x3f2   : > { %v9011_v51 = vpop.f32.mrf.mxu1 }
 0x3f3   : > { %v11786_v30 = vadd.f32 %v9011_v51, %v9010_v55  ;;  %v11812_v51 = vpop.f32.mrf.mxu0 }
 0x3f4   : > { %v9013_v63 = vpop.f32.mrf.mxu1 }
 0x3f6   : > { %v9014_v15 = vpop.f32.mrf.mxu1 }
 0x3f7   : > { %v11790_v29 = vadd.f32 %v9014_v15, %v9013_v63 }
 0x3f8   : > { %v9016_v19 = vpop.f32.mrf.mxu1 }
 0x3f9   : > { %12195 = vst [vmem:[#allocation40_spill] sm:$0xff] %v11790_v29 }
 0x3fa   : > { %v9017_v25 = vpop.f32.mrf.mxu1 }
 0x3fb   : > { %v11794_v2 = vadd.f32 %v9017_v25, %v9016_v19 }
 0x3fc   : > { %v9019_v11 = vpop.f32.mrf.mxu1 }
 0x3fe   : > { %v9020_v27 = vpop.f32.mrf.mxu1 }
 0x3ff   : > { %v11798_v45 = vadd.f32 %v9020_v27, %v9019_v11 }
 0x400   : > { %v9022_v61 = vpop.f32.mrf.mxu1 }
 0x401   : > { %12196 = vst [vmem:[#allocation41_spill] sm:$0xff] %v11798_v45 }
 0x402   : > { %v9023_v8 = vpop.f32.mrf.mxu1 }
 0x403   : > { %v11802_v42 = vadd.f32 %v9023_v8, %v9022_v61  ;;  %v11814_v15 = vpop.f32.mrf.mxu0 }
 0x404   : > { %v9025_v62 = vpop.f32.mrf.mxu1 }
 0x405   : > { %12197 = vst [vmem:[#allocation42_spill] sm:$0xff] %v11802_v42  ;;  %v11818_v27 = vpop.f32.mrf.mxu0 }
 0x406   : > { %v9026_v12 = vpop.f32.mrf.mxu1 }
 0x407   : > { %v11806_v53 = vadd.f32 %v9026_v12, %v9025_v62  ;;  %v11822_v12 = vpop.f32.mrf.mxu0 }
 0x408   : > { %v9028_v26 = vpop.f32.mrf.mxu1 }
 0x409   : > { %12198 = vst [vmem:[#allocation43_spill] sm:$0xff] %v11806_v53  ;;  %v11828_v42 = vpop.f32.mrf.mxu0 }
 0x40a   : > { %v9029_v60 = vpop.f32.mrf.mxu1 }
 0x40b   : > { %v11810_v55 = vadd.f32 %v9029_v60, %v9028_v26 }
 0x40c   : > { %v9031_v63 = vpop.f32.mrf.mxu1 }
 0x40d   : > { %12199 = vst [vmem:[#allocation44_spill] sm:$0xff] %v11810_v55 }
 0x40e   : > { %v9032_v19 = vpop.f32.mrf.mxu1 }
 0x40f   : > { %v11816_v25 = vadd.f32 %v9032_v19, %v9031_v63  ;;  %v9070_v63 = vadd.f32 %v11736_v48, %v11732_v59  ;;  %v6681_v48 = vadd.f32 %v11701_v7, %v11688_v47  ;;  %v9076_v7 = vadd.f32 %v11746_v35, %v11744_v9  ;;  %v12209_v9 = vld [vmem:[#allocation11_spill] sm:$0xff] }
 0x410   : > { %v9034_v11 = vpop.f32.mrf.mxu1 }
 0x411   : > { %12200 = vst [vmem:[#allocation45_spill] sm:$0xff] %v11816_v25  ;;  %v12207_v25 = vld [vmem:[#allocation10_spill] sm:$0xff] }
 0x412   : > { %v9035_v61 = vpop.f32.mrf.mxu1 }
 0x413   : > { %v11820_v8 = vadd.f32 %v9035_v61, %v9034_v11  ;;  %v6678_v61 = vadd.f32 %v11692_v28, %v11688_v47 }
 0x414   : > { %v9037_v62 = vpop.f32.mrf.mxu1 }
 0x415   : > { %12201 = vst [vmem:[#allocation46_spill] sm:$0xff] %v11820_v8 }
 0x416   : > { %v9038_v26 = vpop.f32.mrf.mxu1 }
 0x417   : > { %v11824_v60 = vadd.f32 %v9038_v26, %v9037_v62  ;;  %v9073_v26 = vadd.f32 %v11742_v16, %v11740_v44 }
 0x418   : > { %v11826_v53 = vpop.f32.mrf.mxu1 }
 0x419   : > { %12202 = vst [vmem:[#allocation47_spill] sm:$0xff] %v11824_v60  ;;  %12203 = vst [vmem:[#allocation48_spill] sm:$0xff] %v11826_v53  ;;  %v6839_v60 = vadd.f32 %v9070_v63, %v6678_v61  ;;  %v6842_v16 = vadd.f32 %v9073_v26, %v6681_v48  ;;  %v6694_v61 = vadd.f32 %v11723_v1, %v11688_v47 }
 0x41a   : > { %v11830_v55 = vpop.f32.mrf.mxu1  ;;  %v9085_v1 = vadd.f32 %v11766_v0, %v11764_v41  ;;  %v12210_v41 = vld [vmem:[#allocation9_spill] sm:$0xff] }
 0x41b   : > { %12204 = vst [vmem:[#allocation49_spill] sm:$0xff] %v11830_v55  ;;  %v11836_v11 = vpop.f32.mrf.mxu0 }
 0x41c   : > { %v11834_v19 = vpop.f32.mrf.mxu1 }
 0x41d   : > { %12205 = vst [vmem:[#allocation50_spill] sm:$0xff] %v11834_v19  ;;  %v11843_v62 = vpop.f32.mrf.mxu0 }
 0x41e   : > { %v11841_v8 = vpop.f32.mrf.mxu1 }
 0x41f   : > { %12206 = vst [vmem:[#allocation51_spill] sm:$0xff] %v11841_v8  ;;  %v11849_v55 = vpop.f32.mrf.mxu0  ;;  %v9082_v8 = vadd.f32 %v11760_v34, %v11756_v5  ;;  %v12208_v5 = vld [vmem:[#allocation8_spill] sm:$0xff] }
 0x420   : > { %v9228_v59 = vpop.f32.mrf.mxu1 }
 0x421   : > { %v7000_v19 = vadd.f32 %v9228_v59, %v6839_v60  ;;  %v11853_v53 = vpop.f32.mrf.mxu0  ;;  %v9079_v59 = vadd.f32 %v11752_v6, %v11748_v22  ;;  %v9094_v22 = vadd.f32 %v11788_v21, %v11784_v57  ;;  %v12211_v6 = vld [vmem:[#allocation14_spill] sm:$0xff]  ;;  %v12212_v57 = vld [vmem:[#allocation12_spill] sm:$0xff] }
 0x422   : > { %v6991_v28 = vpop.f32.mrf.mxu1 }
 0x423   : > { %v7120_v29 = vadd.f32 %v7000_v19, %v12207_v25  ;;  %v6992_v44 = vadd.f32 %v6991_v28, %v11699_v17  ;;  %v11859_v45 = vpop.f32.mrf.mxu0  ;;  %v6686_v25 = vadd.f32 %v11717_v4, %v11688_v47  ;;  %v6697_v28 = vadd.f32 %v11725_v24, %v11688_v47 }
 0x424   : > { %v9229_v63 = vpop.f32.mrf.mxu1 }
 0x425   : > { %7152 = vst.msk [vmem:[%s11865_s17 + $0x10] sm:$0xff] %vm284_vm0, %v7120_v29  ;;  %v7118_v34 = vadd.f32 %v6992_v44, %v12208_v5  ;;  %v7003_v17 = vadd.f32 %v9229_v63, %v6842_v16  ;;  %v11872_v60 = vpop.f32.mrf.mxu0  ;;  %v6855_v29 = vadd.f32 %v9082_v8, %v6694_v61  ;;  %v6847_v16 = vadd.f32 %v9076_v7, %v6686_v25 }
 0x426   : > { %v6994_v19 = vpop.f32.mrf.mxu1  ;;  %v6858_v5 = vadd.f32 %v9085_v1, %v6697_v28  ;;  %v9088_v25 = vadd.f32 %v11772_v18, %v11768_v32 }
 0x427   : > { %7150 = vst.msk [vmem:[%s11865_s17] sm:$0xff] %vm284_vm0, %v7118_v34  ;;  %v7121_v35 = vadd.f32 %v7003_v17, %v12209_v9  ;;  %v6995_v26 = vadd.f32 %v6994_v19, %v11706_v49  ;;  %v11882_v48 = vpop.f32.mrf.mxu0  ;;  %v6689_v49 = vadd.f32 %v11719_v54, %v11688_v47  ;;  %v6710_v54 = vadd.f32 %v11734_v33, %v11688_v47  ;;  %v12213_v33 = vld [vmem:[#allocation15_spill] sm:$0xff] }
 0x428   : > { %v9232_v4 = vpop.f32.mrf.mxu1  ;;  %v6702_v9 = vadd.f32 %v11728_v38, %v11688_v47  ;;  %v6713_v38 = vadd.f32 %v11738_v58, %v11688_v47 }
 0x429   : > { %7153 = vst.msk [vmem:[%s11865_s17 + $0x18] sm:$0xff] %vm284_vm0, %v7121_v35  ;;  %v7119_v0 = vadd.f32 %v6995_v26, %v12210_v41  ;;  %v7016_v44 = vadd.f32 %v9232_v4, %v6855_v29  ;;  %v11891_v8 = vpop.f32.mrf.mxu0  ;;  %v6850_v7 = vadd.f32 %v9079_v59, %v6689_v49  ;;  %v9097_v26 = vadd.f32 %v11796_v39, %v11792_v52  ;;  %v12214_v41 = vld [vmem:[#allocation13_spill] sm:$0xff] }
 0x42a   : > { %v7007_v63 = vpop.f32.mrf.mxu1  ;;  %v6871_v29 = vadd.f32 %v9094_v22, %v6710_v54  ;;  %v9091_v59 = vadd.f32 %v11780_v43, %v11776_v3  ;;  %v9106_v3 = vadd.f32 %v11818_v27, %v11814_v15  ;;  %v12215_v43 = vld [vmem:[#allocation18_spill] sm:$0xff]  ;;  %v12216_v15 = vld [vmem:[#allocation16_spill] sm:$0xff] }
 0x42b   : > { %7151 = vst.msk [vmem:[%s11865_s17 + $0x8] sm:$0xff] %vm284_vm0, %v7119_v0  ;;  %v7124_v24 = vadd.f32 %v7016_v44, %v12211_v6  ;;  %v7008_v61 = vadd.f32 %v7007_v63, %v6847_v16  ;;  %v11898_v34 = vpop.f32.mrf.mxu0  ;;  %v6863_v0 = vadd.f32 %v9088_v25, %v6702_v9  ;;  %v6705_v44 = vadd.f32 %v11730_v40, %v11688_v47 }
 0x42c   : > { %v9233_v17 = vpop.f32.mrf.mxu1  ;;  %v6874_v22 = vadd.f32 %v9097_v26, %v6713_v38  ;;  %v9100_v40 = vadd.f32 %v11804_v46, %v11800_v37  ;;  %v12218_v26 = vld [vmem:[#allocation17_spill] sm:$0xff] }
 0x42d   : > { %7156 = vst.msk [vmem:[%s11865_s17 + $0x30] sm:$0xff] %vm284_vm0, %v7124_v24  ;;  %v7122_v21 = vadd.f32 %v7008_v61, %v12212_v57  ;;  %v7019_v19 = vadd.f32 %v9233_v17, %v6858_v5  ;;  %v11909_v1 = vpop.f32.mrf.mxu0  ;;  %v6866_v61 = vadd.f32 %v9091_v59, %v6705_v44  ;;  %v6726_v5 = vadd.f32 %v11758_v20, %v11688_v47  ;;  %v12217_v20 = vld [vmem:[#allocation19_spill] sm:$0xff] }
 0x42e   : > { %v7010_v35 = vpop.f32.mrf.mxu1  ;;  %v9109_v57 = vadd.f32 %v11828_v42, %v11822_v12  ;;  %v6734_v44 = vadd.f32 %v11770_v10, %v11688_v47  ;;  %v9115_v10 = vadd.f32 %v11853_v53, %v11849_v55  ;;  %v6758_v55 = vadd.f32 %v11794_v2, %v11688_v47  ;;  %v12225_v2 = vld [vmem:[#allocation27_spill] sm:$0xff] }
 0x42f   : > { %7154 = vst.msk [vmem:[%s11865_s17 + $0x20] sm:$0xff] %vm284_vm0, %v7122_v21  ;;  %v7125_v32 = vadd.f32 %v7019_v19, %v12213_v33  ;;  %v7011_v18 = vadd.f32 %v7010_v35, %v6850_v7  ;;  %v11918_v4 = vpop.f32.mrf.mxu0  ;;  %v6718_v7 = vadd.f32 %v11750_v36, %v11688_v47  ;;  %v6887_v46 = vadd.f32 %v9106_v3, %v6726_v5 }
 0x430   : > { %v9236_v28 = vpop.f32.mrf.mxu1  ;;  %v9103_v19 = vadd.f32 %v11812_v51, %v11808_v13  ;;  %v6729_v36 = vadd.f32 %v11762_v56, %v11688_v47  ;;  %v9118_v13 = vadd.f32 %v11872_v60, %v11859_v45  ;;  %v12219_v51 = vld [vmem:[#allocation22_spill] sm:$0xff]  ;;  %v12220_v45 = vld [vmem:[#allocation20_spill] sm:$0xff] }
 0x431   : > { %7157 = vst.msk [vmem:[%s11865_s17 + $0x38] sm:$0xff] %vm284_vm0, %v7125_v32  ;;  %v7123_v52 = vadd.f32 %v7011_v18, %v12214_v41  ;;  %v7032_v39 = vadd.f32 %v9236_v28, %v6871_v29  ;;  %v11927_v16 = vpop.f32.mrf.mxu0  ;;  %v6879_v12 = vadd.f32 %v9100_v40, %v6718_v7  ;;  %v6721_v32 = vadd.f32 %v11754_v31, %v11688_v47 }
 0x432   : > { %v7023_v49 = vpop.f32.mrf.mxu1  ;;  %v6890_v28 = vadd.f32 %v9109_v57, %v6729_v36  ;;  %v9112_v31 = vadd.f32 %v11843_v62, %v11836_v11  ;;  %v6737_v40 = vadd.f32 %v11774_v14, %v11688_v47  ;;  %v12224_v14 = vld [vmem:[#allocation24_spill] sm:$0xff] }
 0x433   : > { %7155 = vst.msk [vmem:[%s11865_s17 + $0x28] sm:$0xff] %vm284_vm0, %v7123_v52  ;;  %v7128_v58 = vadd.f32 %v7032_v39, %v12215_v43  ;;  %v7024_v63 = vadd.f32 %v7023_v49, %v6863_v0  ;;  %v9128_v6 = vpop.f32.mrf.mxu0  ;;  %v6882_v52 = vadd.f32 %v9103_v19, %v6721_v32  ;;  %v6742_v39 = vadd.f32 %v11778_v23, %v11688_v47  ;;  %v12221_v23 = vld [vmem:[#allocation23_spill] sm:$0xff] }
 0x434   : > { %v9237_v24 = vpop.f32.mrf.mxu1  ;;  %v9121_v43 = vadd.f32 %v11891_v8, %v11882_v48  ;;  %v6895_v5 = vadd.f32 %v9112_v31, %v6734_v44 }
 0x435   : > { %7160 = vst.msk [vmem:[%s11865_s17 + $0x50] sm:$0xff] %vm284_vm0, %v7128_v58  ;;  %v7126_v27 = vadd.f32 %v7024_v63, %v12216_v15  ;;  %v7035_v17 = vadd.f32 %v9237_v24, %v6874_v22  ;;  %v9129_v54 = vpop.f32.mrf.mxu0  ;;  %v6903_v62 = vadd.f32 %v9118_v13, %v6742_v39  ;;  %v6745_v63 = vadd.f32 %v11782_v50, %v11688_v47  ;;  %v12223_v50 = vld [vmem:[#allocation26_spill] sm:$0xff] }
 0x436   : > { %v7026_v25 = vpop.f32.mrf.mxu1 }
 0x437   : > { %7158 = vst.msk [vmem:[%s11865_s17 + $0x40] sm:$0xff] %vm284_vm0, %v7126_v27  ;;  %v7129_v21 = vadd.f32 %v7035_v17, %v12217_v20  ;;  %v7027_v37 = vadd.f32 %v7026_v25, %v6866_v61  ;;  %v9131_v9 = vpop.f32.mrf.mxu0  ;;  %v12222_v61 = vld [vmem:[#allocation21_spill] sm:$0xff]  ;;  %v9130_v17 = vadd.f32 %v9129_v54, %v9128_v6  ;;  %v6906_v53 = vadd.f32 %v9121_v43, %v6745_v63 }
 0x438   : > { %v9240_v35 = vpop.f32.mrf.mxu1 }
 0x439   : > { %7161 = vst.msk [vmem:[%s11865_s17 + $0x58] sm:$0xff] %vm284_vm0, %v7129_v21  ;;  %v7127_v33 = vadd.f32 %v7027_v37, %v12218_v26  ;;  %v7048_v42 = vadd.f32 %v9240_v35, %v6887_v46  ;;  %v9132_v18 = vpop.f32.mrf.mxu0  ;;  %v9124_v21 = vadd.f32 %v11909_v1, %v11898_v34  ;;  %v6898_v37 = vadd.f32 %v9115_v10, %v6737_v40  ;;  %v12226_v1 = vld [vmem:[#allocation41_spill] sm:$0xff] }
 0x43a   : > { %v7039_v29 = vpop.f32.mrf.mxu1  ;;  %v6750_v46 = vadd.f32 %v11786_v30, %v11688_v47  ;;  %v9133_v36 = vadd.f32 %v9132_v18, %v9131_v9  ;;  %v6919_v34 = vadd.f32 %v9130_v17, %v6758_v55  ;;  %v12227_v30 = vld [vmem:[#allocation25_spill] sm:$0xff]  ;;  %v12236_v55 = vld [vmem:[#allocation48_spill] sm:$0xff] }
 0x43b   : > { %7159 = vst.msk [vmem:[%s11865_s17 + $0x48] sm:$0xff] %vm284_vm0, %v7127_v33  ;;  %v7132_v56 = vadd.f32 %v7048_v42, %v12219_v51  ;;  %v7040_v59 = vadd.f32 %v7039_v29, %v6879_v12  ;;  %v11962_v38 = vpop.f32.mrf.mxu0  ;;  %v6761_v42 = vadd.f32 %v12226_v1, %v11688_v47  ;;  %v9127_v29 = vadd.f32 %v11927_v16, %v11918_v4  ;;  %v12228_v51 = vld [vmem:[#allocation40_spill] sm:$0xff]  ;;  %v12241_v1 = vld [vmem:[#allocation46_spill] sm:$0xff] }
 0x43c   : > { %v9241_v41 = vpop.f32.mrf.mxu1  ;;  %v6911_v13 = vadd.f32 %v9124_v21, %v6750_v46  ;;  %v12230_v16 = vld [vmem:[#allocation44_spill] sm:$0xff] }
 0x43d   : > { %7164 = vst.msk [vmem:[%s11865_s17 + $0x70] sm:$0xff] %vm284_vm0, %v7132_v56  ;;  %v7130_v60 = vadd.f32 %v7040_v59, %v12220_v45  ;;  %v7051_v0 = vadd.f32 %v9241_v41, %v6890_v28  ;;  %v9135_v49 = vpop.f32.mrf.mxu0  ;;  %v6753_v56 = vadd.f32 %v12228_v51, %v11688_v47  ;;  %v6922_v4 = vadd.f32 %v9133_v36, %v6761_v42 }
 0x43e   : > { %v7042_v3 = vpop.f32.mrf.mxu1  ;;  %v6774_v45 = vadd.f32 %v12230_v16, %v11688_v47  ;;  %v9136_v44 = vadd.f32 %v9135_v49, %v11962_v38  ;;  %v12234_v49 = vld [vmem:[#allocation45_spill] sm:$0xff]  ;;  %v6782_v42 = vadd.f32 %v12241_v1, %v11688_v47 }
 0x43f   : > { %7162 = vst.msk [vmem:[%s11865_s17 + $0x60] sm:$0xff] %vm284_vm0, %v7130_v60  ;;  %v7133_v58 = vadd.f32 %v7051_v0, %v12221_v23  ;;  %v7043_v11 = vadd.f32 %v7042_v3, %v6882_v52  ;;  %v11980_v22 = vpop.f32.mrf.mxu0  ;;  %v12229_v52 = vld [vmem:[#allocation30_spill] sm:$0xff]  ;;  %v12231_v3 = vld [vmem:[#allocation28_spill] sm:$0xff] }
 0x440   : > { %v9244_v24 = vpop.f32.mrf.mxu1 }
 0x441   : > { %7165 = vst.msk [vmem:[%s11865_s17 + $0x78] sm:$0xff] %vm284_vm0, %v7133_v58  ;;  %v7131_v48 = vadd.f32 %v7043_v11, %v12222_v61  ;;  %v7064_v8 = vadd.f32 %v9244_v24, %v6903_v62  ;;  %v9138_v15 = vpop.f32.mrf.mxu0  ;;  %v6914_v58 = vadd.f32 %v9127_v29, %v6753_v56  ;;  %v12232_v11 = vld [vmem:[#allocation42_spill] sm:$0xff]  ;;  %v12233_v61 = vld [vmem:[#allocation31_spill] sm:$0xff] }
 0x442   : > { %v7055_v27 = vpop.f32.mrf.mxu1  ;;  %v6766_v62 = vadd.f32 %v12232_v11, %v11688_v47  ;;  %v9139_v17 = vadd.f32 %v9138_v15, %v11980_v22 }
 0x443   : > { %7163 = vst.msk [vmem:[%s11865_s17 + $0x68] sm:$0xff] %vm284_vm0, %v7131_v48  ;;  %v7136_v7 = vadd.f32 %v7064_v8, %v12223_v50  ;;  %v7056_v25 = vadd.f32 %v7055_v27, %v6895_v5  ;;  %v9140_v57 = vpop.f32.mrf.mxu0  ;;  %v6777_v5 = vadd.f32 %v12234_v49, %v11688_v47  ;;  %v12235_v50 = vld [vmem:[#allocation29_spill] sm:$0xff]  ;;  %v12249_v49 = vld [vmem:[#allocation39_spill] sm:$0xff] }
 0x444   : > { %v9245_v20 = vpop.f32.mrf.mxu1 }
 0x445   : > { %7168 = vst.msk [vmem:[%s11865_s17 + $0x90] sm:$0xff] %vm284_vm0, %v7136_v7  ;;  %v7134_v6 = vadd.f32 %v7056_v25, %v12224_v14  ;;  %v7067_v54 = vadd.f32 %v9245_v20, %v6906_v53  ;;  %v9141_v19 = vpop.f32.mrf.mxu0  ;;  %v6927_v53 = vadd.f32 %v9136_v44, %v6766_v62  ;;  %v12247_v62 = vld [vmem:[#allocation38_spill] sm:$0xff] }
 0x446   : > { %v7058_v35 = vpop.f32.mrf.mxu1  ;;  %v9142_v41 = vadd.f32 %v9141_v19, %v9140_v57  ;;  %v12237_v57 = vld [vmem:[#allocation49_spill] sm:$0xff] }
 0x447   : > { %7166 = vst.msk [vmem:[%s11865_s17 + $0x80] sm:$0xff] %vm284_vm0, %v7134_v6  ;;  %v7137_v26 = vadd.f32 %v7067_v54, %v12225_v2  ;;  %v7059_v33 = vadd.f32 %v7058_v35, %v6898_v37  ;;  %v9143_v12 = vpop.f32.mrf.mxu0  ;;  %v9042_v20 = vadd.f32 %v12237_v57, %v12236_v55  ;;  %v12238_v6 = vld [vmem:[#allocation43_spill] sm:$0xff]  ;;  %v12239_v37 = vld [vmem:[#allocation34_spill] sm:$0xff]  ;;  %v12240_v2 = vld [vmem:[#allocation32_spill] sm:$0xff] }
 0x448   : > { %v9248_v32 = vpop.f32.mrf.mxu1  ;;  %v6935_v38 = vadd.f32 %v9142_v41, %v6774_v45  ;;  %v6769_v54 = vadd.f32 %v12238_v6, %v11688_v47  ;;  %v12246_v45 = vld [vmem:[#allocation47_spill] sm:$0xff] }
 0x449   : > { %7169 = vst.msk [vmem:[%s11865_s17 + $0x98] sm:$0xff] %vm284_vm0, %v7137_v26  ;;  %v7135_v9 = vadd.f32 %v7059_v33, %v12227_v30  ;;  %v7080_v18 = vadd.f32 %v9248_v32, %v6919_v34  ;;  %v9144_v59 = vpop.f32.mrf.mxu0  ;;  %v12242_v30 = vld [vmem:[#allocation50_spill] sm:$0xff] }
 0x44a   : > { %v7071_v28 = vpop.f32.mrf.mxu1  ;;  %v9145_v10 = vadd.f32 %v9144_v59, %v9143_v12  ;;  %v6930_v34 = vadd.f32 %v9139_v17, %v6769_v54  ;;  %v6790_v12 = vadd.f32 %v9042_v20, %v11688_v47 }
 0x44b   : > { %7167 = vst.msk [vmem:[%s11865_s17 + $0x88] sm:$0xff] %vm284_vm0, %v7135_v9  ;;  %v7140_v39 = vadd.f32 %v7080_v18, %v12229_v52  ;;  %v7072_v31 = vadd.f32 %v7071_v28, %v6911_v13  ;;  %v9146_v60 = vpop.f32.mrf.mxu0  ;;  %v12243_v9 = vld [vmem:[#allocation51_spill] sm:$0xff] }
 0x44c   : > { %v9249_v0 = vpop.f32.mrf.mxu1  ;;  %v6938_v46 = vadd.f32 %v9145_v10, %v6777_v5  ;;  %v9045_v18 = vadd.f32 %v12243_v9, %v12242_v30  ;;  %v12244_v13 = vld [vmem:[#allocation35_spill] sm:$0xff] }
 0x44d   : > { %7172 = vst.msk [vmem:[%s11865_s17 + $0xb0] sm:$0xff] %vm284_vm0, %v7140_v39  ;;  %v7138_v43 = vadd.f32 %v7072_v31, %v12231_v3  ;;  %v7083_v23 = vadd.f32 %v9249_v0, %v6922_v4  ;;  %v9147_v63 = vpop.f32.mrf.mxu0  ;;  %v12245_v39 = vld [vmem:[#allocation33_spill] sm:$0xff] }
 0x44e   : > { %v7074_v24 = vpop.f32.mrf.mxu1  ;;  %v9148_v36 = vadd.f32 %v9147_v63, %v9146_v60  ;;  %v6785_v60 = vadd.f32 %v12246_v45, %v11688_v47  ;;  %v6793_v3 = vadd.f32 %v9045_v18, %v11688_v47 }
 0x44f   : > { %7170 = vst.msk [vmem:[%s11865_s17 + $0xa0] sm:$0xff] %vm284_vm0, %v7138_v43  ;;  %v7141_v48 = vadd.f32 %v7083_v23, %v12233_v61  ;;  %v7075_v8 = vadd.f32 %v7074_v24, %v6914_v58  ;;  %v9149_v40 = vpop.f32.mrf.mxu0  ;;  %v12248_v24 = vld [vmem:[#allocation36_spill] sm:$0xff] }
 0x450   : > { %v9252_v27 = vpop.f32.mrf.mxu1  ;;  %v6943_v16 = vadd.f32 %v9148_v36, %v6782_v42 }
 0x451   : > { %7173 = vst.msk [vmem:[%s11865_s17 + $0xb8] sm:$0xff] %vm284_vm0, %v7141_v48  ;;  %v7139_v7 = vadd.f32 %v7075_v8, %v12235_v50  ;;  %v7096_v25 = vadd.f32 %v9252_v27, %v6935_v38  ;;  %v9150_v21 = vpop.f32.mrf.mxu0 }
 0x452   : > { %v7087_v14 = vpop.f32.mrf.mxu1  ;;  %v9151_v52 = vadd.f32 %v9150_v21, %v9149_v40  ;;  %v12250_v40 = vld [vmem:[#allocation37_spill] sm:$0xff] }
 0x453   : > { %7171 = vst.msk [vmem:[%s11865_s17 + $0xa8] sm:$0xff] %vm284_vm0, %v7139_v7  ;;  %v7144_v22 = vadd.f32 %v7096_v25, %v12239_v37  ;;  %v7088_v15 = vadd.f32 %v7087_v14, %v6927_v53  ;;  %v9152_v19 = vpop.f32.mrf.mxu0 }
 0x454   : > { %v9253_v35 = vpop.f32.mrf.mxu1  ;;  %v6946_v48 = vadd.f32 %v9151_v52, %v6785_v60 }
 0x455   : > { %7176 = vst.msk [vmem:[%s11865_s17 + $0xd0] sm:$0xff] %vm284_vm0, %v7144_v22  ;;  %v7142_v26 = vadd.f32 %v7088_v15, %v12240_v2  ;;  %v7099_v33 = vadd.f32 %v9253_v35, %v6938_v46  ;;  %v9153_v32 = vpop.f32.mrf.mxu0 }
 0x456   : > { %v7090_v29 = vpop.f32.mrf.mxu1  ;;  %v9154_v56 = vadd.f32 %v9153_v32, %v9152_v19 }
 0x457   : > { %7174 = vst.msk [vmem:[%s11865_s17 + $0xc0] sm:$0xff] %vm284_vm0, %v7142_v26  ;;  %v7145_v51 = vadd.f32 %v7099_v33, %v12244_v13  ;;  %v7091_v59 = vadd.f32 %v7090_v29, %v6930_v34  ;;  %v9155_v28 = vpop.f32.mrf.mxu0 }
 0x458   : > { %v9256_v41 = vpop.f32.mrf.mxu1  ;;  %v6951_v4 = vadd.f32 %v9154_v56, %v6790_v12 }
 0x459   : > { %7177 = vst.msk [vmem:[%s11865_s17 + $0xd8] sm:$0xff] %vm284_vm0, %v7145_v51  ;;  %v7143_v31 = vadd.f32 %v7091_v59, %v12245_v39  ;;  %v9156_v0 = vpop.f32.mrf.mxu0 }
 0x45a   : > { %v7103_v44 = vpop.f32.mrf.mxu1  ;;  %v7112_v43 = vadd.f32 %v9256_v41, %v6951_v4  ;;  %v9157_v23 = vadd.f32 %v9156_v0, %v9155_v28 }
 0x45b   : > { %7175 = vst.msk [vmem:[%s11865_s17 + $0xc8] sm:$0xff] %vm284_vm0, %v7143_v31  ;;  %v7104_v58 = vadd.f32 %v7103_v44, %v6943_v16 }
 0x45c   : > { %v9257_v11 = vpop.f32.mrf.mxu1  ;;  %v7148_v63 = vadd.f32 %v7112_v43, %v12247_v62  ;;  %v6954_v61 = vadd.f32 %v9157_v23, %v6793_v3 }
 0x45d   : > { %v7146_v10 = vadd.f32 %v7104_v58, %v12248_v24 }
 0x45e   : > { %v7106_v8 = vpop.f32.mrf.mxu1  ;;  %7180 = vst.msk [vmem:[%s11865_s17 + $0xf0] sm:$0xff] %vm284_vm0, %v7148_v63  ;;  %v7115_v47 = vadd.f32 %v9257_v11, %v6954_v61 }
 0x45f   : > { %7178 = vst.msk [vmem:[%s11865_s17 + $0xe0] sm:$0xff] %vm284_vm0, %v7146_v10  ;;  %v7107_v38 = vadd.f32 %v7106_v8, %v6946_v48 }
 0x460   : > { %v7149_v5 = vadd.f32 %v7115_v47, %v12249_v49 }
 0x461   : > { %v7147_v27 = vadd.f32 %v7107_v38, %v12250_v40 }
 0x462   : > { %7181 = vst.msk [vmem:[%s11865_s17 + $0xf8] sm:$0xff] %vm284_vm0, %v7149_v5 }
 0x463   : > { %7179 = vst.msk [vmem:[%s11865_s17 + $0xe8] sm:$0xff] %vm284_vm0, %v7147_v27 }
 0x464   : > { %9562 = shalt.err (!%p9559_p3)
}
 0x465   : > { %s9563_s13 = scalar_lea.hbm %s12070_s27, 4096  ;;  %s9567_s15 = scalar_lea.hbm %s12128_s6, 8192 }
 0x466   : > { %p9564_p4 = scmp.ne.s32.totalorder %s12070_s27, %s9563_s13  ;;  %p9568_p9 = scmp.lt.s32.totalorder %s12070_s27, %s12128_s6 }
 0x467   : > { %p9569_p10 = scmp.lt.s32.totalorder %s9567_s15, %s9563_s13 }
 0x468   : > { %p9565_p7 = pnand %p9564_p4, %p9692_p5 }
 0x469   : > { %p9570_p11 = por %p9569_p10, %p9568_p9 }
 0x46a   : > { %p9566_p8 = pneg %p9565_p7 }
 0x46c   : > { %p9571_p12 = pnand %p9570_p11, %p9566_p8 }
 0x46e   : > { %9574 = shalt.err (!%p9571_p12)
}
 0x46f   : > { %s9614_s17 = smov 128   ;;  %s9615_s18 = smov 8  }
 0x470   : > { %9258 = dma.vmem_to_hbm [thread:$0]  (%p9692_p5), %s12072_s19, 4096, %s12070_s27, %s12082_s5, %s9614_s17, %s9614_s17, %s9615_s18  }
 0x471 PF: > { %p9264_p13 = scmp.ge.s32.totalorder %s9609_s26, 2  ;;  %s7211_s20 = sand.u32 1, %s9597_s23  }
 0x472   : > { %s7212_s21 = scalar_lea.sflag [#allocation6], %s7211_s20 }
 0x473   : > { %p9261_p0 = pnand %p9264_p13, %p9696_p6 }
 0x475   : > { %p9262_p1 = pneg %p9261_p0 }
 0x477   : > { %9592 = dma.done.wait (%p9262_p1), %s7212_s21, 4096  }
 0x478   : > { %9594 = vsyncadd (%p9262_p1), %s7212_s21, 4294963200  ;;  %p17_p2 = scmp.ge.s32.totalorder %s9679_s28, 4   ;;  %s12251_s23 = smov %s9601_s24 }
 0x479   : > { %s12252_s24 = smov %s9605_s25  ;;  %s12253_s25 = smov %s9690_s7 }
 0x47a   : > { %s12254_s26 = smov %s9679_s28  ;;  %19 = sbr.rel (!%p17_p2) target bundleno = 5 (0x5), region = 81 }
 0x47f   :  { %7217 = vsyncpa [#allocation6], 1 }
 0x480   :  { %7219 = vsyncpa [#allocation6 + $0x1], 1 }

</bundles_post_ra>
